<compile_context>
chip_gen: v7x
topology: tpu7x:2x2x1
jax: 0.10.0
libtpu: 0.0.40
codegen_flags: <defaults>
</compile_context>

<pallas_src>
import numpy as np
import jax
import jax.numpy as jnp
from jax.experimental import pallas as pl
from jax.experimental.pallas import tpu as pltpu


N_CLS_PAD = 16  # pad the class axis to a sublane/bf16-tile friendly count


# ---------------------------------------------------------------------------
# Kernel 1: fused image branch (adapter -> residual mix -> normalize -> logits)
# ---------------------------------------------------------------------------

def _image_logits_kernel(x_ref, w1t_ref, w2t_ref, txt_ref, o_ref):
    # x_ref block: (1, C, T) f32 -- channels on sublanes, spatial positions on lanes.
    x = x_ref[0]                                                   # (C, T) f32
    xb = x.astype(jnp.bfloat16)
    h = jnp.dot(w1t_ref[...], xb, preferred_element_type=jnp.float32)   # (C//4, T)
    h = jnp.maximum(h, 0.0).astype(jnp.bfloat16)                          # ReLU
    h2 = jnp.dot(w2t_ref[...], h, preferred_element_type=jnp.float32)    # (C, T)
    h2 = jnp.maximum(h2, 0.0)                                             # ReLU
    mix = 0.5 * h2 + 0.5 * x                                              # ratio = 0.5
    ssq = jnp.sum(mix * mix, axis=0, keepdims=True)                       # (1, T)
    inv = jax.lax.rsqrt(ssq + 1e-24)                                      # eps guard
    # txt_ref already holds exp(logit_scale) * normalized text features (padded rows = 0)
    logits = jnp.dot(txt_ref[...], mix.astype(jnp.bfloat16),
                     preferred_element_type=jnp.float32)                  # (PAD, T)
    o_ref[0] = (logits * inv).astype(o_ref.dtype)


def _pick_spatial_tile(hw, cap=512):
    if hw <= cap:
        return hw
    for t in (512, 384, 256, 128):
        if hw % t == 0:
            return t
    return hw  # fallback for odd spatial sizes: single tile


def image_logits_fused(x_bc_hw, w1t, w2t, txt_scaled):
    # x_bc_hw: (B, C, H*W) f32; w1t: (C//4, C) bf16; w2t: (C, C//4) bf16;
    # txt_scaled: (N_CLS_PAD, C) bf16 (pre-normalized, pre-scaled text features)
    B, C, HW = x_bc_hw.shape
    tile = _pick_spatial_tile(HW)
    grid = (B, HW // tile)
    return pl.pallas_call(
        _image_logits_kernel,
        grid=grid,
        in_specs=[
            pl.BlockSpec((1, C, tile), lambda b, s: (b, 0, s)),
            pl.BlockSpec(w1t.shape, lambda b, s: (0, 0)),          # weights stay resident
            pl.BlockSpec(w2t.shape, lambda b, s: (0, 0)),
            pl.BlockSpec(txt_scaled.shape, lambda b, s: (0, 0)),
        ],
        out_specs=pl.BlockSpec((1, N_CLS_PAD, tile), lambda b, s: (b, 0, s)),
        out_shape=jax.ShapeDtypeStruct((B, N_CLS_PAD, HW), jnp.float32),
        compiler_params=pltpu.CompilerParams(
            dimension_semantics=("parallel", "parallel"),
            vmem_limit_bytes=32 * 1024 * 1024),
    )(x_bc_hw, w1t, w2t, txt_scaled)


# ---------------------------------------------------------------------------
# Kernel 2: fused text encoder (2-layer CLIP transformer + LN + proj + norm)
# ---------------------------------------------------------------------------

def _text_encoder_kernel(x0_ref, mask_ref,
                         ln1_g_ref, ln1_b_ref,
                         wq_ref, wk_ref, wv_ref, bq_ref, bk_ref, bv_ref,
                         wo_ref, bo_ref,
                         ln2_g_ref, ln2_b_ref,
                         fc_w_ref, fc_b_ref, pj_w_ref, pj_b_ref,
                         lnf_g_ref, lnf_b_ref,
                         proj_ref, sel_ref, scale_ref, o_ref):
    n_layers, n_heads, D, hd = wq_ref.shape
    L = mask_ref.shape[0]
    n_cls = x0_ref.shape[0] // L
    qk_scale = float(hd) ** -0.5

    def ln(v, g, b):
        mu = jnp.mean(v, axis=-1, keepdims=True)
        vc = v - mu
        var = jnp.mean(vc * vc, axis=-1, keepdims=True)
        return vc * jax.lax.rsqrt(var + 1e-5) * g + b

    x = x0_ref[...]                      # (n_cls*L, D) f32, class-major rows
    mask = mask_ref[...]                 # (L, L) additive causal mask

    for l in range(n_layers):            # static unroll (n_layers = 2)
        h = ln(x, ln1_g_ref[l], ln1_b_ref[l])
        attn_rows = []
        for c in range(n_cls):
            hc = h[c * L:(c + 1) * L, :]                              # (L, D)
            acc = jnp.zeros((L, D), jnp.float32)
            for hh in range(n_heads):
                q = jnp.dot(hc, wq_ref[l, hh],
                            preferred_element_type=jnp.float32) + bq_ref[l, hh]
                k = jnp.dot(hc, wk_ref[l, hh],
                            preferred_element_type=jnp.float32) + bk_ref[l, hh]
                v = jnp.dot(hc, wv_ref[l, hh],
                            preferred_element_type=jnp.float32) + bv_ref[l, hh]
                s = jax.lax.dot_general(q, k, (((1,), (1,)), ((), ())),
                                        preferred_element_type=jnp.float32)
                s = s * qk_scale + mask
                s = s - jnp.max(s, axis=-1, keepdims=True)
                p = jnp.exp(s)
                p = p * pl.reciprocal(jnp.sum(p, axis=-1, keepdims=True), approx=True)
                o = jnp.dot(p, v, preferred_element_type=jnp.float32)  # (L, hd)
                acc = acc + jnp.dot(o, wo_ref[l, hh],
                                    preferred_element_type=jnp.float32)
            attn_rows.append(acc)
        attn = jnp.concatenate(attn_rows, axis=0) + bo_ref[l]          # (n_cls*L, D)
        x = x + attn
        h2 = ln(x, ln2_g_ref[l], ln2_b_ref[l])
        m = jnp.dot(h2, fc_w_ref[l], preferred_element_type=jnp.float32) + fc_b_ref[l]
        m = m * jax.nn.sigmoid(1.702 * m)                               # QuickGELU
        x = x + jnp.dot(m, pj_w_ref[l], preferred_element_type=jnp.float32) + pj_b_ref[l]

    xf = ln(x, lnf_g_ref[...], lnf_b_ref[...])                          # (n_cls*L, D)
    txt = jnp.dot(sel_ref[...], xf, preferred_element_type=jnp.float32)   # EOT rows, (PAD, D)
    txt = jnp.dot(txt, proj_ref[...], preferred_element_type=jnp.float32) # (PAD, 1024)
    ssq = jnp.sum(txt * txt, axis=-1, keepdims=True)
    txt = txt * jax.lax.rsqrt(ssq + 1e-24)                               # padded rows stay 0
    o_ref[...] = (txt * scale_ref[...]).astype(o_ref.dtype)              # fold exp(logit_scale)


def text_encoder_fused(x0, mask, tx, lnf_g, lnf_b, text_proj, sel, scale):
    # Everything is tiny; the whole text path (all layers, final LN, projection,
    # normalization, logit scale) runs as a single VMEM-resident pallas_call.
    return pl.pallas_call(
        _text_encoder_kernel,
        out_shape=jax.ShapeDtypeStruct((N_CLS_PAD, text_proj.shape[1]), jnp.bfloat16),
    )(x0, mask, tx['ln1_g'], tx['ln1_b'],
      tx['wq'], tx['wk'], tx['wv'], tx['bq'], tx['bk'], tx['bv'],
      tx['wo'], tx['bo'], tx['ln2_g'], tx['ln2_b'],
      tx['fc_w'], tx['fc_b'], tx['pj_w'], tx['pj_b'],
      lnf_g, lnf_b, text_proj, sel, scale)


# ---------------------------------------------------------------------------
# Plain-JAX glue: PromptEncoder LSTM2 (tiny recurrence)
# ---------------------------------------------------------------------------

def prompt_encoder_lstm2(ctx, lstm_params):
    """PromptEncoder(module_type='LSTM2'): 2-layer bidirectional LSTM + residual.
    Matches torch.nn.LSTM eval-mode semantics on an unbatched (seq, D) input."""
    # TODO(synk): the LSTM recurrence (seq=8, hidden=32) stays in plain JAX lax.scan;
    # no clean/efficient Pallas mapping at this size. Inter-layer dropout(0.05)
    # omitted (eval-mode semantics).
    def run_dir(x, p, reverse):
        hid = p['w_hh'].shape[1]

        def cell(carry, xt):
            h, c = carry
            gates = xt @ p['w_ih'].T + p['b_ih'] + h @ p['w_hh'].T + p['b_hh']
            i, f, g, o = jnp.split(gates, 4)
            i = jax.nn.sigmoid(i)
            f = jax.nn.sigmoid(f)
            g = jnp.tanh(g)
            o = jax.nn.sigmoid(o)
            c = f * c + i * g
            h = o * jnp.tanh(c)
            return (h, c), h

        xs = x[::-1] if reverse else x
        init = (jnp.zeros((hid,), x.dtype), jnp.zeros((hid,), x.dtype))
        _, hs = jax.lax.scan(cell, init, xs)
        return hs[::-1] if reverse else hs

    x = ctx
    for layer in lstm_params:
        fwd = run_dir(x, layer[0], reverse=False)
        bwd = run_dir(x, layer[1], reverse=True)
        x = jnp.concatenate([fwd, bwd], axis=-1)
    return x + ctx  # residual connection in PromptEncoder


# ---------------------------------------------------------------------------
# Forward pass of CustomCLIP_np (eval semantics)
# ---------------------------------------------------------------------------

def custom_clip_np_forward(image_features, params):
    B, C, H, W = image_features.shape
    HW = H * W
    # Keep NCHW: view as (B, C, H*W) (free reshape) -- the fused kernel contracts C
    # directly, so the module's permute(0,2,3,1) is never materialized.
    x = image_features.reshape(B, C, HW)

    # --- PromptLearner: ctx -> LSTM2 encoder -> prefix|ctx|suffix -------------
    ctx = prompt_encoder_lstm2(params['ctx'], params['lstm'])           # (n_ctx, D)
    n_cls = params['token_prefix'].shape[0]
    ctx_b = jnp.broadcast_to(ctx[None], (n_cls,) + ctx.shape)
    prompts = jnp.concatenate(
        [params['token_prefix'], ctx_b, params['token_suffix']], axis=1)  # (n_cls, L, D)
    L, D = prompts.shape[1], prompts.shape[2]
    x0 = (prompts + params['pos_emb'][None]).reshape(n_cls * L, D)

    # EOT selection as a (padded) one-hot matmul; logit scale folded into txt feats
    eot = jnp.argmax(params['tokenized_prompts'], axis=-1)              # (n_cls,)
    rows = jnp.arange(n_cls) * L + eot
    sel = jax.nn.one_hot(rows, n_cls * L, dtype=jnp.float32)
    sel = jnp.pad(sel, ((0, N_CLS_PAD - n_cls), (0, 0)))                # (PAD, n_cls*L)
    scale = jnp.exp(params['logit_scale']).reshape(1, 1).astype(jnp.float32)

    txt = text_encoder_fused(x0, params['attn_mask'], params['tx'],
                             params['lnf_g'], params['lnf_b'],
                             params['text_proj'], sel, scale)           # (PAD, 1024) bf16

    # --- fused image branch: adapter + mix + normalize + cosine logits -------
    out_pad = image_logits_fused(x, params['adapter_w1_t'],
                                 params['adapter_w2_t'], txt)           # (B, PAD, HW) f32
    return out_pad[:, :n_cls, :].reshape(B, n_cls, H, W)


# ---------------------------------------------------------------------------
# Deterministic synthetic parameters
# ---------------------------------------------------------------------------

def init_params(key, *, n_cls=3, n_ctx=8, seq_len=16, width=64, n_heads=2,
                n_layers=2, embed_dim=1024, adapter_dim=1024):
    keys = iter(jax.random.split(key, 128))

    def nrm(shape, std=0.02):
        return (std * jax.random.normal(next(keys), shape)).astype(jnp.float32)

    hd = width // n_heads
    params = {}

    # Adapter_np(1024, reduction=4) -- PyTorch Linear weight layout (out, in), bf16 for MXU
    params['adapter_w1_t'] = nrm((adapter_dim // 4, adapter_dim), 0.05).astype(jnp.bfloat16)
    params['adapter_w2_t'] = nrm((adapter_dim, adapter_dim // 4), 0.05).astype(jnp.bfloat16)

    # PromptLearner generic context (nn.init.normal_(std=0.02))
    params['ctx'] = nrm((n_ctx, width), 0.02)

    # LSTM2 bidirectional: 2 layers x 2 directions
    hid = width // 2
    lstm = []
    for layer in range(2):
        in_dim = width if layer == 0 else 2 * hid
        dirs = []
        for _ in range(2):
            dirs.append(dict(w_ih=nrm((4 * hid, in_dim), 0.1),
                             w_hh=nrm((4 * hid, hid), 0.1),
                             b_ih=nrm((4 * hid,), 0.1),
                             b_hh=nrm((4 * hid,), 0.1)))
        lstm.append(dirs)
    params['lstm'] = lstm

    # token_prefix / token_suffix buffers (synthetic stand-ins for token_embedding)
    params['token_prefix'] = nrm((n_cls, 1, width), 0.02)
    params['token_suffix'] = nrm((n_cls, seq_len - 1 - n_ctx, width), 0.02)

    # synthetic tokenized prompts; argmax picks the (per-class) EOT position
    tok = np.zeros((n_cls, seq_len), dtype=np.int32)
    for i in range(n_cls):
        eot_pos = 1 + n_ctx + 2 + i
        tok[i, :eot_pos] = np.arange(1, eot_pos + 1)
        tok[i, eot_pos] = 49407
    params['tokenized_prompts'] = jnp.asarray(tok)

    params['pos_emb'] = nrm((seq_len, width), 0.01)

    # text transformer (CLIP-style, pre-LN, causal mask, QuickGELU), stacked per layer
    # with q/k/v/out weights pre-split per head (avoids lane slicing inside the kernel).
    tx = {k: [] for k in ('ln1_g', 'ln1_b', 'wq', 'wk', 'wv', 'bq', 'bk', 'bv',
                          'wo', 'bo', 'ln2_g', 'ln2_b', 'fc_w', 'fc_b', 'pj_w', 'pj_b')}
    for _ in range(n_layers):
        in_w = nrm((width, 3 * width), 0.02)                 # x @ in_w -> [q|k|v]
        in_b = jnp.zeros((3 * width,), jnp.float32)
        out_w = nrm((width, width), 0.02)                    # (in, out) orientation

        def split_heads(w_cols, b_cols):
            w = w_cols.reshape(width, n_heads, hd).transpose(1, 0, 2)    # (H, D, hd)
            b = b_cols.reshape(n_heads, 1, hd)
            return w, b

        wq, bq = split_heads(in_w[:, :width], in_b[:width])
        wk, bk = split_heads(in_w[:, width:2 * width], in_b[width:2 * width])
        wv, bv = split_heads(in_w[:, 2 * width:], in_b[2 * width:])

        tx['ln1_g'].append(jnp.ones((1, width), jnp.float32))
        tx['ln1_b'].append(jnp.zeros((1, width), jnp.float32))
        tx['wq'].append(wq); tx['wk'].append(wk); tx['wv'].append(wv)
        tx['bq'].append(bq); tx['bk'].append(bk); tx['bv'].append(bv)
        tx['wo'].append(out_w.reshape(n_heads, hd, width))               # (H, hd, D)
        tx['bo'].append(jnp.zeros((1, width), jnp.float32))
        tx['ln2_g'].append(jnp.ones((1, width), jnp.float32))
        tx['ln2_b'].append(jnp.zeros((1, width), jnp.float32))
        tx['fc_w'].append(nrm((width, 4 * width), 0.02))
        tx['fc_b'].append(jnp.zeros((1, 4 * width), jnp.float32))
        tx['pj_w'].append(nrm((4 * width, width), 0.02))
        tx['pj_b'].append(jnp.zeros((1, width), jnp.float32))
    params['tx'] = {k: jnp.stack(v) for k, v in tx.items()}

    params['lnf_g'] = jnp.ones((1, width), jnp.float32)
    params['lnf_b'] = jnp.zeros((1, width), jnp.float32)
    params['text_proj'] = nrm((width, embed_dim), 0.02)
    params['logit_scale'] = jnp.asarray(np.log(1.0 / 0.07), jnp.float32)
    params['attn_mask'] = jnp.triu(
        jnp.full((seq_len, seq_len), -1e30, jnp.float32), k=1)
    return params


if __name__ == "__main__":
    key = jax.random.PRNGKey(0)
    kparam, kimg = jax.random.split(key)
    params = init_params(kparam)

    # NCHW input like the PyTorch module (channels = 1024 is hardcoded there)
    B, C, H, W = 2, 1024, 4, 4
    image_features = jax.random.normal(kimg, (B, C, H, W), jnp.float32)

    fwd = jax.jit(custom_clip_np_forward)
    out = fwd(image_features, params)
    out = jax.block_until_ready(out)
    assert out.shape == (B, 3, H, W), out.shape
    assert out.dtype == jnp.float32
    assert bool(jnp.all(jnp.isfinite(out)))
    print("KERNEL_OK")
</pallas_src>

<mosaic_0001>
module attributes {stable_mosaic.version = 11 : i64} {
  func.func @_image_logits_kernel(%arg0: i32, %arg1: i32, %arg2: memref<1x1024x16xf32, #tpu.memory_space<vmem>>, %arg3: memref<256x1024xbf16, #tpu.memory_space<vmem>>, %arg4: memref<1024x256xbf16, #tpu.memory_space<vmem>>, %arg5: memref<16x1024xbf16, #tpu.memory_space<vmem>>, %arg6: memref<1x16x16xf32, #tpu.memory_space<vmem>>) attributes {dimension_semantics = [#tpu.dimension_semantics<parallel>, #tpu.dimension_semantics<parallel>], iteration_bounds = array<i64: 2, 1>, scalar_prefetch = 0 : i64, scratch_operands = 0 : i64, tpu.core_type = #tpu.core_type<tc>, window_params = [{transform_indices = @transform_0, window_bounds = array<i64: 1, 1024, 16>}, {pipeline_mode = #tpu.pipeline_mode<synchronous>, transform_indices = @transform_1, window_bounds = array<i64: 256, 1024>}, {pipeline_mode = #tpu.pipeline_mode<synchronous>, transform_indices = @transform_2, window_bounds = array<i64: 1024, 256>}, {pipeline_mode = #tpu.pipeline_mode<synchronous>, transform_indices = @transform_3, window_bounds = array<i64: 16, 1024>}, {transform_indices = @transform_4, window_bounds = array<i64: 1, 16, 16>}]} {
    %c0 = arith.constant 0 : index
    %c0_0 = arith.constant 0 : index
    %c0_1 = arith.constant 0 : index
    %0 = vector.load %arg2[%c0, %c0_0, %c0_1] : memref<1x1024x16xf32, #tpu.memory_space<vmem>>, vector<1x1024x16xf32>
    %1 = vector.shape_cast %0 : vector<1x1024x16xf32> to vector<1024x16xf32>
    %2 = arith.truncf %1 : vector<1024x16xf32> to vector<1024x16xbf16>
    %c0_2 = arith.constant 0 : index
    %c0_3 = arith.constant 0 : index
    %3 = vector.load %arg3[%c0_2, %c0_3] : memref<256x1024xbf16, #tpu.memory_space<vmem>>, vector<256x1024xbf16>
    %cst = arith.constant dense<0.000000e+00> : vector<256x16xf32>
    %4 = tpu.matmul %3, %2, %cst {dimension_numbers = #tpu.dot_dimension_numbers<[1], [0], [0], [1], [0, 0, 1, 1], [], []>} : vector<256x1024xbf16>, vector<1024x16xbf16>, vector<256x16xf32> -> vector<256x16xf32>
    %cst_4 = arith.constant 0.000000e+00 : f32
    %5 = vector.broadcast %cst_4 : f32 to vector<256x16xf32>
    %6 = arith.maximumf %4, %5 : vector<256x16xf32>
    %7 = arith.truncf %6 : vector<256x16xf32> to vector<256x16xbf16>
    %c0_5 = arith.constant 0 : index
    %c0_6 = arith.constant 0 : index
    %8 = vector.load %arg4[%c0_5, %c0_6] : memref<1024x256xbf16, #tpu.memory_space<vmem>>, vector<1024x256xbf16>
    %cst_7 = arith.constant dense<0.000000e+00> : vector<1024x16xf32>
    %9 = tpu.matmul %8, %7, %cst_7 {dimension_numbers = #tpu.dot_dimension_numbers<[1], [0], [0], [1], [0, 0, 1, 1], [], []>} : vector<1024x256xbf16>, vector<256x16xbf16>, vector<1024x16xf32> -> vector<1024x16xf32>
    %cst_8 = arith.constant 0.000000e+00 : f32
    %10 = vector.broadcast %cst_8 : f32 to vector<1024x16xf32>
    %11 = arith.maximumf %9, %10 : vector<1024x16xf32>
    %cst_9 = arith.constant 5.000000e-01 : f32
    %12 = vector.broadcast %cst_9 : f32 to vector<1024x16xf32>
    %13 = arith.mulf %12, %11 : vector<1024x16xf32>
    %cst_10 = arith.constant 5.000000e-01 : f32
    %14 = vector.broadcast %cst_10 : f32 to vector<1024x16xf32>
    %15 = arith.mulf %14, %1 : vector<1024x16xf32>
    %16 = arith.addf %13, %15 : vector<1024x16xf32>
    %17 = arith.mulf %16, %16 : vector<1024x16xf32>
    %cst_11 = arith.constant dense<0.000000e+00> : vector<16xf32>
    %18 = vector.multi_reduction <add>, %17, %cst_11 [0] : vector<1024x16xf32> to vector<16xf32>
    %19 = vector.shape_cast %18 : vector<16xf32> to vector<1x16xf32>
    %cst_12 = arith.constant 1.000000e-24 : f32
    %20 = vector.broadcast %cst_12 : f32 to vector<1x16xf32>
    %21 = arith.addf %19, %20 : vector<1x16xf32>
    %22 = math.rsqrt %21 : vector<1x16xf32>
    %c0_13 = arith.constant 0 : index
    %c0_14 = arith.constant 0 : index
    %23 = vector.load %arg5[%c0_13, %c0_14] : memref<16x1024xbf16, #tpu.memory_space<vmem>>, vector<16x1024xbf16>
    %24 = arith.truncf %16 : vector<1024x16xf32> to vector<1024x16xbf16>
    %cst_15 = arith.constant dense<0.000000e+00> : vector<16x16xf32>
    %25 = tpu.matmul %23, %24, %cst_15 {dimension_numbers = #tpu.dot_dimension_numbers<[1], [0], [0], [1], [0, 0, 1, 1], [], []>} : vector<16x1024xbf16>, vector<1024x16xbf16>, vector<16x16xf32> -> vector<16x16xf32>
    %26 = vector.broadcast %22 : vector<1x16xf32> to vector<16x16xf32>
    %27 = arith.mulf %25, %26 : vector<16x16xf32>
    %c0_16 = arith.constant 0 : index
    %c0_17 = arith.constant 0 : index
    %c0_18 = arith.constant 0 : index
    %28 = vector.load %arg6[%c0_16, %c0_17, %c0_18] : memref<1x16x16xf32, #tpu.memory_space<vmem>>, vector<1x16x16xf32>
    %29 = vector.shape_cast %28 : vector<1x16x16xf32> to vector<16x16xf32>
    %30 = vector.shape_cast %27 : vector<16x16xf32> to vector<1x16x16xf32>
    tpu.vector_store %arg6[%c0_16, %c0_17, %c0_18], %30 {strides = array<i32>} : memref<1x16x16xf32, #tpu.memory_space<vmem>>, vector<1x16x16xf32>,
    return
  }
  func.func @transform_0(%arg0: i32, %arg1: i32) -> (i32, i32, i32) {
    %c0_i32 = arith.constant 0 : i32
    %c0_i32_0 = arith.constant 0 : i32
    return %arg0, %c0_i32, %arg1 : i32, i32, i32
  }
  func.func @transform_1(%arg0: i32, %arg1: i32) -> (i32, i32) {
    %c0_i32 = arith.constant 0 : i32
    %c0_i32_0 = arith.constant 0 : i32
    %c0_i32_1 = arith.constant 0 : i32
    return %c0_i32, %c0_i32_0 : i32, i32
  }
  func.func @transform_2(%arg0: i32, %arg1: i32) -> (i32, i32) {
    %c0_i32 = arith.constant 0 : i32
    %c0_i32_0 = arith.constant 0 : i32
    %c0_i32_1 = arith.constant 0 : i32
    return %c0_i32, %c0_i32_0 : i32, i32
  }
  func.func @transform_3(%arg0: i32, %arg1: i32) -> (i32, i32) {
    %c0_i32 = arith.constant 0 : i32
    %c0_i32_0 = arith.constant 0 : i32
    %c0_i32_1 = arith.constant 0 : i32
    return %c0_i32, %c0_i32_0 : i32, i32
  }
  func.func @transform_4(%arg0: i32, %arg1: i32) -> (i32, i32, i32) {
    %c0_i32 = arith.constant 0 : i32
    %c0_i32_0 = arith.constant 0 : i32
    return %arg0, %c0_i32, %arg1 : i32, i32, i32
  }
}

module attributes {stable_mosaic.version = 11 : i64} {
  func.func @_text_encoder_kernel(%arg0: memref<48x64xf32, #tpu.memory_space<vmem>>, %arg1: memref<16x16xf32, #tpu.memory_space<vmem>>, %arg2: memref<2x1x64xf32, #tpu.memory_space<vmem>>, %arg3: memref<2x1x64xf32, #tpu.memory_space<vmem>>, %arg4: memref<2x2x64x32xf32, #tpu.memory_space<vmem>>, %arg5: memref<2x2x64x32xf32, #tpu.memory_space<vmem>>, %arg6: memref<2x2x64x32xf32, #tpu.memory_space<vmem>>, %arg7: memref<2x2x1x32xf32, #tpu.memory_space<vmem>>, %arg8: memref<2x2x1x32xf32, #tpu.memory_space<vmem>>, %arg9: memref<2x2x1x32xf32, #tpu.memory_space<vmem>>, %arg10: memref<2x2x32x64xf32, #tpu.memory_space<vmem>>, %arg11: memref<2x1x64xf32, #tpu.memory_space<vmem>>, %arg12: memref<2x1x64xf32, #tpu.memory_space<vmem>>, %arg13: memref<2x1x64xf32, #tpu.memory_space<vmem>>, %arg14: memref<2x64x256xf32, #tpu.memory_space<vmem>>, %arg15: memref<2x1x256xf32, #tpu.memory_space<vmem>>, %arg16: memref<2x256x64xf32, #tpu.memory_space<vmem>>, %arg17: memref<2x1x64xf32, #tpu.memory_space<vmem>>, %arg18: memref<1x64xf32, #tpu.memory_space<vmem>>, %arg19: memref<1x64xf32, #tpu.memory_space<vmem>>, %arg20: memref<64x1024xf32, #tpu.memory_space<vmem>>, %arg21: memref<16x48xf32, #tpu.memory_space<vmem>>, %arg22: memref<1x1xf32, #tpu.memory_space<vmem>>, %arg23: memref<16x1024xbf16, #tpu.memory_space<vmem>>) attributes {dimension_semantics = [], scalar_prefetch = 0 : i64, scratch_operands = 0 : i64, tpu.core_type = #tpu.core_type<tc>} {
    %c0 = arith.constant 0 : index
    %c0_0 = arith.constant 0 : index
    %0 = vector.load %arg0[%c0, %c0_0] : memref<48x64xf32, #tpu.memory_space<vmem>>, vector<48x64xf32>
    %c0_1 = arith.constant 0 : index
    %c0_2 = arith.constant 0 : index
    %1 = vector.load %arg1[%c0_1, %c0_2] : memref<16x16xf32, #tpu.memory_space<vmem>>, vector<16x16xf32>
    %c0_3 = arith.constant 0 : index
    %c0_4 = arith.constant 0 : index
    %c0_5 = arith.constant 0 : index
    %2 = vector.load %arg2[%c0_3, %c0_4, %c0_5] : memref<2x1x64xf32, #tpu.memory_space<vmem>>, vector<1x1x64xf32>
    %3 = vector.shape_cast %2 : vector<1x1x64xf32> to vector<1x64xf32>
    %c0_6 = arith.constant 0 : index
    %c0_7 = arith.constant 0 : index
    %c0_8 = arith.constant 0 : index
    %4 = vector.load %arg3[%c0_6, %c0_7, %c0_8] : memref<2x1x64xf32, #tpu.memory_space<vmem>>, vector<1x1x64xf32>
    %5 = vector.shape_cast %4 : vector<1x1x64xf32> to vector<1x64xf32>
    %cst = arith.constant dense<0.000000e+00> : vector<48xf32>
    %6 = vector.multi_reduction <add>, %0, %cst [1] : vector<48x64xf32> to vector<48xf32>
    %7 = vector.shape_cast %6 : vector<48xf32> to vector<48x1xf32>
    %cst_9 = arith.constant 6.400000e+01 : f32
    %8 = vector.broadcast %cst_9 : f32 to vector<48x1xf32>
    %9 = arith.divf %7, %8 : vector<48x1xf32>
    %10 = vector.broadcast %9 : vector<48x1xf32> to vector<48x64xf32>
    %11 = arith.subf %0, %10 : vector<48x64xf32>
    %12 = arith.mulf %11, %11 : vector<48x64xf32>
    %cst_10 = arith.constant dense<0.000000e+00> : vector<48xf32>
    %13 = vector.multi_reduction <add>, %12, %cst_10 [1] : vector<48x64xf32> to vector<48xf32>
    %14 = vector.shape_cast %13 : vector<48xf32> to vector<48x1xf32>
    %cst_11 = arith.constant 6.400000e+01 : f32
    %15 = vector.broadcast %cst_11 : f32 to vector<48x1xf32>
    %16 = arith.divf %14, %15 : vector<48x1xf32>
    %cst_12 = arith.constant 9.99999974E-6 : f32
    %17 = vector.broadcast %cst_12 : f32 to vector<48x1xf32>
    %18 = arith.addf %16, %17 : vector<48x1xf32>
    %19 = math.rsqrt %18 : vector<48x1xf32>
    %20 = vector.broadcast %19 : vector<48x1xf32> to vector<48x64xf32>
    %21 = arith.mulf %11, %20 : vector<48x64xf32>
    %22 = vector.broadcast %3 : vector<1x64xf32> to vector<48x64xf32>
    %23 = arith.mulf %21, %22 : vector<48x64xf32>
    %24 = vector.broadcast %5 : vector<1x64xf32> to vector<48x64xf32>
    %25 = arith.addf %23, %24 : vector<48x64xf32>
    %26 = vector.extract_strided_slice %25 {offsets = [0, 0], sizes = [16, 64], strides = [1, 1]} : vector<48x64xf32> to vector<16x64xf32>
    %cst_13 = arith.constant 0.000000e+00 : f32
    %27 = vector.broadcast %cst_13 : f32 to vector<16x64xf32>
    %c0_14 = arith.constant 0 : index
    %c0_15 = arith.constant 0 : index
    %c0_16 = arith.constant 0 : index
    %c0_17 = arith.constant 0 : index
    %28 = vector.load %arg4[%c0_14, %c0_15, %c0_16, %c0_17] : memref<2x2x64x32xf32, #tpu.memory_space<vmem>>, vector<1x1x64x32xf32>
    %29 = vector.shape_cast %28 : vector<1x1x64x32xf32> to vector<64x32xf32>
    %cst_18 = arith.constant dense<0.000000e+00> : vector<16x32xf32>
    %30 = tpu.matmul %26, %29, %cst_18 {dimension_numbers = #tpu.dot_dimension_numbers<[1], [0], [0], [1], [0, 0, 1, 1], [], []>} : vector<16x64xf32>, vector<64x32xf32>, vector<16x32xf32> -> vector<16x32xf32>
    %c0_19 = arith.constant 0 : index
    %c0_20 = arith.constant 0 : index
    %c0_21 = arith.constant 0 : index
    %c0_22 = arith.constant 0 : index
    %31 = vector.load %arg7[%c0_19, %c0_20, %c0_21, %c0_22] : memref<2x2x1x32xf32, #tpu.memory_space<vmem>>, vector<1x1x1x32xf32>
    %32 = vector.shape_cast %31 : vector<1x1x1x32xf32> to vector<1x32xf32>
    %33 = vector.broadcast %32 : vector<1x32xf32> to vector<16x32xf32>
    %34 = arith.addf %30, %33 : vector<16x32xf32>
    %c0_23 = arith.constant 0 : index
    %c0_24 = arith.constant 0 : index
    %c0_25 = arith.constant 0 : index
    %c0_26 = arith.constant 0 : index
    %35 = vector.load %arg5[%c0_23, %c0_24, %c0_25, %c0_26] : memref<2x2x64x32xf32, #tpu.memory_space<vmem>>, vector<1x1x64x32xf32>
    %36 = vector.shape_cast %35 : vector<1x1x64x32xf32> to vector<64x32xf32>
    %cst_27 = arith.constant dense<0.000000e+00> : vector<16x32xf32>
    %37 = tpu.matmul %26, %36, %cst_27 {dimension_numbers = #tpu.dot_dimension_numbers<[1], [0], [0], [1], [0, 0, 1, 1], [], []>} : vector<16x64xf32>, vector<64x32xf32>, vector<16x32xf32> -> vector<16x32xf32>
    %c0_28 = arith.constant 0 : index
    %c0_29 = arith.constant 0 : index
    %c0_30 = arith.constant 0 : index
    %c0_31 = arith.constant 0 : index
    %38 = vector.load %arg8[%c0_28, %c0_29, %c0_30, %c0_31] : memref<2x2x1x32xf32, #tpu.memory_space<vmem>>, vector<1x1x1x32xf32>
    %39 = vector.shape_cast %38 : vector<1x1x1x32xf32> to vector<1x32xf32>
    %40 = vector.broadcast %39 : vector<1x32xf32> to vector<16x32xf32>
    %41 = arith.addf %37, %40 : vector<16x32xf32>
    %c0_32 = arith.constant 0 : index
    %c0_33 = arith.constant 0 : index
    %c0_34 = arith.constant 0 : index
    %c0_35 = arith.constant 0 : index
    %42 = vector.load %arg6[%c0_32, %c0_33, %c0_34, %c0_35] : memref<2x2x64x32xf32, #tpu.memory_space<vmem>>, vector<1x1x64x32xf32>
    %43 = vector.shape_cast %42 : vector<1x1x64x32xf32> to vector<64x32xf32>
    %cst_36 = arith.constant dense<0.000000e+00> : vector<16x32xf32>
    %44 = tpu.matmul %26, %43, %cst_36 {dimension_numbers = #tpu.dot_dimension_numbers<[1], [0], [0], [1], [0, 0, 1, 1], [], []>} : vector<16x64xf32>, vector<64x32xf32>, vector<16x32xf32> -> vector<16x32xf32>
    %c0_37 = arith.constant 0 : index
    %c0_38 = arith.constant 0 : index
    %c0_39 = arith.constant 0 : index
    %c0_40 = arith.constant 0 : index
    %45 = vector.load %arg9[%c0_37, %c0_38, %c0_39, %c0_40] : memref<2x2x1x32xf32, #tpu.memory_space<vmem>>, vector<1x1x1x32xf32>
    %46 = vector.shape_cast %45 : vector<1x1x1x32xf32> to vector<1x32xf32>
    %47 = vector.broadcast %46 : vector<1x32xf32> to vector<16x32xf32>
    %48 = arith.addf %44, %47 : vector<16x32xf32>
    %cst_41 = arith.constant dense<0.000000e+00> : vector<16x16xf32>
    %49 = tpu.matmul %34, %41, %cst_41 {dimension_numbers = #tpu.dot_dimension_numbers<[1], [1], [0], [0], [0, 0, 1, 0], [], []>} : vector<16x32xf32>, vector<16x32xf32>, vector<16x16xf32> -> vector<16x16xf32>
    %cst_42 = arith.constant 0.176776692 : f32
    %50 = vector.broadcast %cst_42 : f32 to vector<16x16xf32>
    %51 = arith.mulf %49, %50 : vector<16x16xf32>
    %52 = arith.addf %51, %1 : vector<16x16xf32>
    %cst_43 = arith.constant dense<0xFF800000> : vector<16xf32>
    %53 = vector.multi_reduction <maximumf>, %52, %cst_43 [1] : vector<16x16xf32> to vector<16xf32>
    %54 = vector.shape_cast %53 : vector<16xf32> to vector<16x1xf32>
    %55 = vector.broadcast %54 : vector<16x1xf32> to vector<16x16xf32>
    %56 = arith.subf %52, %55 : vector<16x16xf32>
    %57 = math.exp %56 : vector<16x16xf32>
    %cst_44 = arith.constant dense<0.000000e+00> : vector<16xf32>
    %58 = vector.multi_reduction <add>, %57, %cst_44 [1] : vector<16x16xf32> to vector<16xf32>
    %59 = vector.shape_cast %58 : vector<16xf32> to vector<16x1xf32>
    %60 = tpu.reciprocal %59 {approx = true} : vector<16x1xf32> -> vector<16x1xf32>
    %61 = vector.broadcast %60 : vector<16x1xf32> to vector<16x16xf32>
    %62 = arith.mulf %57, %61 : vector<16x16xf32>
    %cst_45 = arith.constant dense<0.000000e+00> : vector<16x32xf32>
    %63 = tpu.matmul %62, %48, %cst_45 {dimension_numbers = #tpu.dot_dimension_numbers<[1], [0], [0], [1], [0, 0, 1, 1], [], []>} : vector<16x16xf32>, vector<16x32xf32>, vector<16x32xf32> -> vector<16x32xf32>
    %c0_46 = arith.constant 0 : index
    %c0_47 = arith.constant 0 : index
    %c0_48 = arith.constant 0 : index
    %c0_49 = arith.constant 0 : index
    %64 = vector.load %arg10[%c0_46, %c0_47, %c0_48, %c0_49] : memref<2x2x32x64xf32, #tpu.memory_space<vmem>>, vector<1x1x32x64xf32>
    %65 = vector.shape_cast %64 : vector<1x1x32x64xf32> to vector<32x64xf32>
    %cst_50 = arith.constant dense<0.000000e+00> : vector<16x64xf32>
    %66 = tpu.matmul %63, %65, %cst_50 {dimension_numbers = #tpu.dot_dimension_numbers<[1], [0], [0], [1], [0, 0, 1, 1], [], []>} : vector<16x32xf32>, vector<32x64xf32>, vector<16x64xf32> -> vector<16x64xf32>
    %67 = arith.addf %27, %66 : vector<16x64xf32>
    %c0_51 = arith.constant 0 : index
    %c1 = arith.constant 1 : index
    %c0_52 = arith.constant 0 : index
    %c0_53 = arith.constant 0 : index
    %68 = vector.load %arg4[%c0_51, %c1, %c0_52, %c0_53] : memref<2x2x64x32xf32, #tpu.memory_space<vmem>>, vector<1x1x64x32xf32>
    %69 = vector.shape_cast %68 : vector<1x1x64x32xf32> to vector<64x32xf32>
    %cst_54 = arith.constant dense<0.000000e+00> : vector<16x32xf32>
    %70 = tpu.matmul %26, %69, %cst_54 {dimension_numbers = #tpu.dot_dimension_numbers<[1], [0], [0], [1], [0, 0, 1, 1], [], []>} : vector<16x64xf32>, vector<64x32xf32>, vector<16x32xf32> -> vector<16x32xf32>
    %c0_55 = arith.constant 0 : index
    %c1_56 = arith.constant 1 : index
    %c0_57 = arith.constant 0 : index
    %c0_58 = arith.constant 0 : index
    %71 = vector.load %arg7[%c0_55, %c1_56, %c0_57, %c0_58] : memref<2x2x1x32xf32, #tpu.memory_space<vmem>>, vector<1x1x1x32xf32>
    %72 = vector.shape_cast %71 : vector<1x1x1x32xf32> to vector<1x32xf32>
    %73 = vector.broadcast %72 : vector<1x32xf32> to vector<16x32xf32>
    %74 = arith.addf %70, %73 : vector<16x32xf32>
    %c0_59 = arith.constant 0 : index
    %c1_60 = arith.constant 1 : index
    %c0_61 = arith.constant 0 : index
    %c0_62 = arith.constant 0 : index
    %75 = vector.load %arg5[%c0_59, %c1_60, %c0_61, %c0_62] : memref<2x2x64x32xf32, #tpu.memory_space<vmem>>, vector<1x1x64x32xf32>
    %76 = vector.shape_cast %75 : vector<1x1x64x32xf32> to vector<64x32xf32>
    %cst_63 = arith.constant dense<0.000000e+00> : vector<16x32xf32>
    %77 = tpu.matmul %26, %76, %cst_63 {dimension_numbers = #tpu.dot_dimension_numbers<[1], [0], [0], [1], [0, 0, 1, 1], [], []>} : vector<16x64xf32>, vector<64x32xf32>, vector<16x32xf32> -> vector<16x32xf32>
    %c0_64 = arith.constant 0 : index
    %c1_65 = arith.constant 1 : index
    %c0_66 = arith.constant 0 : index
    %c0_67 = arith.constant 0 : index
    %78 = vector.load %arg8[%c0_64, %c1_65, %c0_66, %c0_67] : memref<2x2x1x32xf32, #tpu.memory_space<vmem>>, vector<1x1x1x32xf32>
    %79 = vector.shape_cast %78 : vector<1x1x1x32xf32> to vector<1x32xf32>
    %80 = vector.broadcast %79 : vector<1x32xf32> to vector<16x32xf32>
    %81 = arith.addf %77, %80 : vector<16x32xf32>
    %c0_68 = arith.constant 0 : index
    %c1_69 = arith.constant 1 : index
    %c0_70 = arith.constant 0 : index
    %c0_71 = arith.constant 0 : index
    %82 = vector.load %arg6[%c0_68, %c1_69, %c0_70, %c0_71] : memref<2x2x64x32xf32, #tpu.memory_space<vmem>>, vector<1x1x64x32xf32>
    %83 = vector.shape_cast %82 : vector<1x1x64x32xf32> to vector<64x32xf32>
    %cst_72 = arith.constant dense<0.000000e+00> : vector<16x32xf32>
    %84 = tpu.matmul %26, %83, %cst_72 {dimension_numbers = #tpu.dot_dimension_numbers<[1], [0], [0], [1], [0, 0, 1, 1], [], []>} : vector<16x64xf32>, vector<64x32xf32>, vector<16x32xf32> -> vector<16x32xf32>
    %c0_73 = arith.constant 0 : index
    %c1_74 = arith.constant 1 : index
    %c0_75 = arith.constant 0 : index
    %c0_76 = arith.constant 0 : index
    %85 = vector.load %arg9[%c0_73, %c1_74, %c0_75, %c0_76] : memref<2x2x1x32xf32, #tpu.memory_space<vmem>>, vector<1x1x1x32xf32>
    %86 = vector.shape_cast %85 : vector<1x1x1x32xf32> to vector<1x32xf32>
    %87 = vector.broadcast %86 : vector<1x32xf32> to vector<16x32xf32>
    %88 = arith.addf %84, %87 : vector<16x32xf32>
    %cst_77 = arith.constant dense<0.000000e+00> : vector<16x16xf32>
    %89 = tpu.matmul %74, %81, %cst_77 {dimension_numbers = #tpu.dot_dimension_numbers<[1], [1], [0], [0], [0, 0, 1, 0], [], []>} : vector<16x32xf32>, vector<16x32xf32>, vector<16x16xf32> -> vector<16x16xf32>
    %cst_78 = arith.constant 0.176776692 : f32
    %90 = vector.broadcast %cst_78 : f32 to vector<16x16xf32>
    %91 = arith.mulf %89, %90 : vector<16x16xf32>
    %92 = arith.addf %91, %1 : vector<16x16xf32>
    %cst_79 = arith.constant dense<0xFF800000> : vector<16xf32>
    %93 = vector.multi_reduction <maximumf>, %92, %cst_79 [1] : vector<16x16xf32> to vector<16xf32>
    %94 = vector.shape_cast %93 : vector<16xf32> to vector<16x1xf32>
    %95 = vector.broadcast %94 : vector<16x1xf32> to vector<16x16xf32>
    %96 = arith.subf %92, %95 : vector<16x16xf32>
    %97 = math.exp %96 : vector<16x16xf32>
    %cst_80 = arith.constant dense<0.000000e+00> : vector<16xf32>
    %98 = vector.multi_reduction <add>, %97, %cst_80 [1] : vector<16x16xf32> to vector<16xf32>
    %99 = vector.shape_cast %98 : vector<16xf32> to vector<16x1xf32>
    %100 = tpu.reciprocal %99 {approx = true} : vector<16x1xf32> -> vector<16x1xf32>
    %101 = vector.broadcast %100 : vector<16x1xf32> to vector<16x16xf32>
    %102 = arith.mulf %97, %101 : vector<16x16xf32>
    %cst_81 = arith.constant dense<0.000000e+00> : vector<16x32xf32>
    %103 = tpu.matmul %102, %88, %cst_81 {dimension_numbers = #tpu.dot_dimension_numbers<[1], [0], [0], [1], [0, 0, 1, 1], [], []>} : vector<16x16xf32>, vector<16x32xf32>, vector<16x32xf32> -> vector<16x32xf32>
    %c0_82 = arith.constant 0 : index
    %c1_83 = arith.constant 1 : index
    %c0_84 = arith.constant 0 : index
    %c0_85 = arith.constant 0 : index
    %104 = vector.load %arg10[%c0_82, %c1_83, %c0_84, %c0_85] : memref<2x2x32x64xf32, #tpu.memory_space<vmem>>, vector<1x1x32x64xf32>
    %105 = vector.shape_cast %104 : vector<1x1x32x64xf32> to vector<32x64xf32>
    %cst_86 = arith.constant dense<0.000000e+00> : vector<16x64xf32>
    %106 = tpu.matmul %103, %105, %cst_86 {dimension_numbers = #tpu.dot_dimension_numbers<[1], [0], [0], [1], [0, 0, 1, 1], [], []>} : vector<16x32xf32>, vector<32x64xf32>, vector<16x64xf32> -> vector<16x64xf32>
    %107 = arith.addf %67, %106 : vector<16x64xf32>
    %108 = vector.extract_strided_slice %25 {offsets = [16, 0], sizes = [16, 64], strides = [1, 1]} : vector<48x64xf32> to vector<16x64xf32>
    %cst_87 = arith.constant 0.000000e+00 : f32
    %109 = vector.broadcast %cst_87 : f32 to vector<16x64xf32>
    %c0_88 = arith.constant 0 : index
    %c0_89 = arith.constant 0 : index
    %c0_90 = arith.constant 0 : index
    %c0_91 = arith.constant 0 : index
    %110 = vector.load %arg4[%c0_88, %c0_89, %c0_90, %c0_91] : memref<2x2x64x32xf32, #tpu.memory_space<vmem>>, vector<1x1x64x32xf32>
    %111 = vector.shape_cast %110 : vector<1x1x64x32xf32> to vector<64x32xf32>
    %cst_92 = arith.constant dense<0.000000e+00> : vector<16x32xf32>
    %112 = tpu.matmul %108, %111, %cst_92 {dimension_numbers = #tpu.dot_dimension_numbers<[1], [0], [0], [1], [0, 0, 1, 1], [], []>} : vector<16x64xf32>, vector<64x32xf32>, vector<16x32xf32> -> vector<16x32xf32>
    %c0_93 = arith.constant 0 : index
    %c0_94 = arith.constant 0 : index
    %c0_95 = arith.constant 0 : index
    %c0_96 = arith.constant 0 : index
    %113 = vector.load %arg7[%c0_93, %c0_94, %c0_95, %c0_96] : memref<2x2x1x32xf32, #tpu.memory_space<vmem>>, vector<1x1x1x32xf32>
    %114 = vector.shape_cast %113 : vector<1x1x1x32xf32> to vector<1x32xf32>
    %115 = vector.broadcast %114 : vector<1x32xf32> to vector<16x32xf32>
    %116 = arith.addf %112, %115 : vector<16x32xf32>
    %c0_97 = arith.constant 0 : index
    %c0_98 = arith.constant 0 : index
    %c0_99 = arith.constant 0 : index
    %c0_100 = arith.constant 0 : index
    %117 = vector.load %arg5[%c0_97, %c0_98, %c0_99, %c0_100] : memref<2x2x64x32xf32, #tpu.memory_space<vmem>>, vector<1x1x64x32xf32>
    %118 = vector.shape_cast %117 : vector<1x1x64x32xf32> to vector<64x32xf32>
    %cst_101 = arith.constant dense<0.000000e+00> : vector<16x32xf32>
    %119 = tpu.matmul %108, %118, %cst_101 {dimension_numbers = #tpu.dot_dimension_numbers<[1], [0], [0], [1], [0, 0, 1, 1], [], []>} : vector<16x64xf32>, vector<64x32xf32>, vector<16x32xf32> -> vector<16x32xf32>
    %c0_102 = arith.constant 0 : index
    %c0_103 = arith.constant 0 : index
    %c0_104 = arith.constant 0 : index
    %c0_105 = arith.constant 0 : index
    %120 = vector.load %arg8[%c0_102, %c0_103, %c0_104, %c0_105] : memref<2x2x1x32xf32, #tpu.memory_space<vmem>>, vector<1x1x1x32xf32>
    %121 = vector.shape_cast %120 : vector<1x1x1x32xf32> to vector<1x32xf32>
    %122 = vector.broadcast %121 : vector<1x32xf32> to vector<16x32xf32>
    %123 = arith.addf %119, %122 : vector<16x32xf32>
    %c0_106 = arith.constant 0 : index
    %c0_107 = arith.constant 0 : index
    %c0_108 = arith.constant 0 : index
    %c0_109 = arith.constant 0 : index
    %124 = vector.load %arg6[%c0_106, %c0_107, %c0_108, %c0_109] : memref<2x2x64x32xf32, #tpu.memory_space<vmem>>, vector<1x1x64x32xf32>
    %125 = vector.shape_cast %124 : vector<1x1x64x32xf32> to vector<64x32xf32>
    %cst_110 = arith.constant dense<0.000000e+00> : vector<16x32xf32>
    %126 = tpu.matmul %108, %125, %cst_110 {dimension_numbers = #tpu.dot_dimension_numbers<[1], [0], [0], [1], [0, 0, 1, 1], [], []>} : vector<16x64xf32>, vector<64x32xf32>, vector<16x32xf32> -> vector<16x32xf32>
    %c0_111 = arith.constant 0 : index
    %c0_112 = arith.constant 0 : index
    %c0_113 = arith.constant 0 : index
    %c0_114 = arith.constant 0 : index
    %127 = vector.load %arg9[%c0_111, %c0_112, %c0_113, %c0_114] : memref<2x2x1x32xf32, #tpu.memory_space<vmem>>, vector<1x1x1x32xf32>
    %128 = vector.shape_cast %127 : vector<1x1x1x32xf32> to vector<1x32xf32>
    %129 = vector.broadcast %128 : vector<1x32xf32> to vector<16x32xf32>
    %130 = arith.addf %126, %129 : vector<16x32xf32>
    %cst_115 = arith.constant dense<0.000000e+00> : vector<16x16xf32>
    %131 = tpu.matmul %116, %123, %cst_115 {dimension_numbers = #tpu.dot_dimension_numbers<[1], [1], [0], [0], [0, 0, 1, 0], [], []>} : vector<16x32xf32>, vector<16x32xf32>, vector<16x16xf32> -> vector<16x16xf32>
    %cst_116 = arith.constant 0.176776692 : f32
    %132 = vector.broadcast %cst_116 : f32 to vector<16x16xf32>
    %133 = arith.mulf %131, %132 : vector<16x16xf32>
    %134 = arith.addf %133, %1 : vector<16x16xf32>
    %cst_117 = arith.constant dense<0xFF800000> : vector<16xf32>
    %135 = vector.multi_reduction <maximumf>, %134, %cst_117 [1] : vector<16x16xf32> to vector<16xf32>
    %136 = vector.shape_cast %135 : vector<16xf32> to vector<16x1xf32>
    %137 = vector.broadcast %136 : vector<16x1xf32> to vector<16x16xf32>
    %138 = arith.subf %134, %137 : vector<16x16xf32>
    %139 = math.exp %138 : vector<16x16xf32>
    %cst_118 = arith.constant dense<0.000000e+00> : vector<16xf32>
    %140 = vector.multi_reduction <add>, %139, %cst_118 [1] : vector<16x16xf32> to vector<16xf32>
    %141 = vector.shape_cast %140 : vector<16xf32> to vector<16x1xf32>
    %142 = tpu.reciprocal %141 {approx = true} : vector<16x1xf32> -> vector<16x1xf32>
    %143 = vector.broadcast %142 : vector<16x1xf32> to vector<16x16xf32>
    %144 = arith.mulf %139, %143 : vector<16x16xf32>
    %cst_119 = arith.constant dense<0.000000e+00> : vector<16x32xf32>
    %145 = tpu.matmul %144, %130, %cst_119 {dimension_numbers = #tpu.dot_dimension_numbers<[1], [0], [0], [1], [0, 0, 1, 1], [], []>} : vector<16x16xf32>, vector<16x32xf32>, vector<16x32xf32> -> vector<16x32xf32>
    %c0_120 = arith.constant 0 : index
    %c0_121 = arith.constant 0 : index
    %c0_122 = arith.constant 0 : index
    %c0_123 = arith.constant 0 : index
    %146 = vector.load %arg10[%c0_120, %c0_121, %c0_122, %c0_123] : memref<2x2x32x64xf32, #tpu.memory_space<vmem>>, vector<1x1x32x64xf32>
    %147 = vector.shape_cast %146 : vector<1x1x32x64xf32> to vector<32x64xf32>
    %cst_124 = arith.constant dense<0.000000e+00> : vector<16x64xf32>
    %148 = tpu.matmul %145, %147, %cst_124 {dimension_numbers = #tpu.dot_dimension_numbers<[1], [0], [0], [1], [0, 0, 1, 1], [], []>} : vector<16x32xf32>, vector<32x64xf32>, vector<16x64xf32> -> vector<16x64xf32>
    %149 = arith.addf %109, %148 : vector<16x64xf32>
    %c0_125 = arith.constant 0 : index
    %c1_126 = arith.constant 1 : index
    %c0_127 = arith.constant 0 : index
    %c0_128 = arith.constant 0 : index
    %150 = vector.load %arg4[%c0_125, %c1_126, %c0_127, %c0_128] : memref<2x2x64x32xf32, #tpu.memory_space<vmem>>, vector<1x1x64x32xf32>
    %151 = vector.shape_cast %150 : vector<1x1x64x32xf32> to vector<64x32xf32>
    %cst_129 = arith.constant dense<0.000000e+00> : vector<16x32xf32>
    %152 = tpu.matmul %108, %151, %cst_129 {dimension_numbers = #tpu.dot_dimension_numbers<[1], [0], [0], [1], [0, 0, 1, 1], [], []>} : vector<16x64xf32>, vector<64x32xf32>, vector<16x32xf32> -> vector<16x32xf32>
    %c0_130 = arith.constant 0 : index
    %c1_131 = arith.constant 1 : index
    %c0_132 = arith.constant 0 : index
    %c0_133 = arith.constant 0 : index
    %153 = vector.load %arg7[%c0_130, %c1_131, %c0_132, %c0_133] : memref<2x2x1x32xf32, #tpu.memory_space<vmem>>, vector<1x1x1x32xf32>
    %154 = vector.shape_cast %153 : vector<1x1x1x32xf32> to vector<1x32xf32>
    %155 = vector.broadcast %154 : vector<1x32xf32> to vector<16x32xf32>
    %156 = arith.addf %152, %155 : vector<16x32xf32>
    %c0_134 = arith.constant 0 : index
    %c1_135 = arith.constant 1 : index
    %c0_136 = arith.constant 0 : index
    %c0_137 = arith.constant 0 : index
    %157 = vector.load %arg5[%c0_134, %c1_135, %c0_136, %c0_137] : memref<2x2x64x32xf32, #tpu.memory_space<vmem>>, vector<1x1x64x32xf32>
    %158 = vector.shape_cast %157 : vector<1x1x64x32xf32> to vector<64x32xf32>
    %cst_138 = arith.constant dense<0.000000e+00> : vector<16x32xf32>
    %159 = tpu.matmul %108, %158, %cst_138 {dimension_numbers = #tpu.dot_dimension_numbers<[1], [0], [0], [1], [0, 0, 1, 1], [], []>} : vector<16x64xf32>, vector<64x32xf32>, vector<16x32xf32> -> vector<16x32xf32>
    %c0_139 = arith.constant 0 : index
    %c1_140 = arith.constant 1 : index
    %c0_141 = arith.constant 0 : index
    %c0_142 = arith.constant 0 : index
    %160 = vector.load %arg8[%c0_139, %c1_140, %c0_141, %c0_142] : memref<2x2x1x32xf32, #tpu.memory_space<vmem>>, vector<1x1x1x32xf32>
    %161 = vector.shape_cast %160 : vector<1x1x1x32xf32> to vector<1x32xf32>
    %162 = vector.broadcast %161 : vector<1x32xf32> to vector<16x32xf32>
    %163 = arith.addf %159, %162 : vector<16x32xf32>
    %c0_143 = arith.constant 0 : index
    %c1_144 = arith.constant 1 : index
    %c0_145 = arith.constant 0 : index
    %c0_146 = arith.constant 0 : index
    %164 = vector.load %arg6[%c0_143, %c1_144, %c0_145, %c0_146] : memref<2x2x64x32xf32, #tpu.memory_space<vmem>>, vector<1x1x64x32xf32>
    %165 = vector.shape_cast %164 : vector<1x1x64x32xf32> to vector<64x32xf32>
    %cst_147 = arith.constant dense<0.000000e+00> : vector<16x32xf32>
    %166 = tpu.matmul %108, %165, %cst_147 {dimension_numbers = #tpu.dot_dimension_numbers<[1], [0], [0], [1], [0, 0, 1, 1], [], []>} : vector<16x64xf32>, vector<64x32xf32>, vector<16x32xf32> -> vector<16x32xf32>
    %c0_148 = arith.constant 0 : index
    %c1_149 = arith.constant 1 : index
    %c0_150 = arith.constant 0 : index
    %c0_151 = arith.constant 0 : index
    %167 = vector.load %arg9[%c0_148, %c1_149, %c0_150, %c0_151] : memref<2x2x1x32xf32, #tpu.memory_space<vmem>>, vector<1x1x1x32xf32>
    %168 = vector.shape_cast %167 : vector<1x1x1x32xf32> to vector<1x32xf32>
    %169 = vector.broadcast %168 : vector<1x32xf32> to vector<16x32xf32>
    %170 = arith.addf %166, %169 : vector<16x32xf32>
    %cst_152 = arith.constant dense<0.000000e+00> : vector<16x16xf32>
    %171 = tpu.matmul %156, %163, %cst_152 {dimension_numbers = #tpu.dot_dimension_numbers<[1], [1], [0], [0], [0, 0, 1, 0], [], []>} : vector<16x32xf32>, vector<16x32xf32>, vector<16x16xf32> -> vector<16x16xf32>
    %cst_153 = arith.constant 0.176776692 : f32
    %172 = vector.broadcast %cst_153 : f32 to vector<16x16xf32>
    %173 = arith.mulf %171, %172 : vector<16x16xf32>
    %174 = arith.addf %173, %1 : vector<16x16xf32>
    %cst_154 = arith.constant dense<0xFF800000> : vector<16xf32>
    %175 = vector.multi_reduction <maximumf>, %174, %cst_154 [1] : vector<16x16xf32> to vector<16xf32>
    %176 = vector.shape_cast %175 : vector<16xf32> to vector<16x1xf32>
    %177 = vector.broadcast %176 : vector<16x1xf32> to vector<16x16xf32>
    %178 = arith.subf %174, %177 : vector<16x16xf32>
    %179 = math.exp %178 : vector<16x16xf32>
    %cst_155 = arith.constant dense<0.000000e+00> : vector<16xf32>
    %180 = vector.multi_reduction <add>, %179, %cst_155 [1] : vector<16x16xf32> to vector<16xf32>
    %181 = vector.shape_cast %180 : vector<16xf32> to vector<16x1xf32>
    %182 = tpu.reciprocal %181 {approx = true} : vector<16x1xf32> -> vector<16x1xf32>
    %183 = vector.broadcast %182 : vector<16x1xf32> to vector<16x16xf32>
    %184 = arith.mulf %179, %183 : vector<16x16xf32>
    %cst_156 = arith.constant dense<0.000000e+00> : vector<16x32xf32>
    %185 = tpu.matmul %184, %170, %cst_156 {dimension_numbers = #tpu.dot_dimension_numbers<[1], [0], [0], [1], [0, 0, 1, 1], [], []>} : vector<16x16xf32>, vector<16x32xf32>, vector<16x32xf32> -> vector<16x32xf32>
    %c0_157 = arith.constant 0 : index
    %c1_158 = arith.constant 1 : index
    %c0_159 = arith.constant 0 : index
    %c0_160 = arith.constant 0 : index
    %186 = vector.load %arg10[%c0_157, %c1_158, %c0_159, %c0_160] : memref<2x2x32x64xf32, #tpu.memory_space<vmem>>, vector<1x1x32x64xf32>
    %187 = vector.shape_cast %186 : vector<1x1x32x64xf32> to vector<32x64xf32>
    %cst_161 = arith.constant dense<0.000000e+00> : vector<16x64xf32>
    %188 = tpu.matmul %185, %187, %cst_161 {dimension_numbers = #tpu.dot_dimension_numbers<[1], [0], [0], [1], [0, 0, 1, 1], [], []>} : vector<16x32xf32>, vector<32x64xf32>, vector<16x64xf32> -> vector<16x64xf32>
    %189 = arith.addf %149, %188 : vector<16x64xf32>
    %190 = vector.extract_strided_slice %25 {offsets = [32, 0], sizes = [16, 64], strides = [1, 1]} : vector<48x64xf32> to vector<16x64xf32>
    %cst_162 = arith.constant 0.000000e+00 : f32
    %191 = vector.broadcast %cst_162 : f32 to vector<16x64xf32>
    %c0_163 = arith.constant 0 : index
    %c0_164 = arith.constant 0 : index
    %c0_165 = arith.constant 0 : index
    %c0_166 = arith.constant 0 : index
    %192 = vector.load %arg4[%c0_163, %c0_164, %c0_165, %c0_166] : memref<2x2x64x32xf32, #tpu.memory_space<vmem>>, vector<1x1x64x32xf32>
    %193 = vector.shape_cast %192 : vector<1x1x64x32xf32> to vector<64x32xf32>
    %cst_167 = arith.constant dense<0.000000e+00> : vector<16x32xf32>
    %194 = tpu.matmul %190, %193, %cst_167 {dimension_numbers = #tpu.dot_dimension_numbers<[1], [0], [0], [1], [0, 0, 1, 1], [], []>} : vector<16x64xf32>, vector<64x32xf32>, vector<16x32xf32> -> vector<16x32xf32>
    %c0_168 = arith.constant 0 : index
    %c0_169 = arith.constant 0 : index
    %c0_170 = arith.constant 0 : index
    %c0_171 = arith.constant 0 : index
    %195 = vector.load %arg7[%c0_168, %c0_169, %c0_170, %c0_171] : memref<2x2x1x32xf32, #tpu.memory_space<vmem>>, vector<1x1x1x32xf32>
    %196 = vector.shape_cast %195 : vector<1x1x1x32xf32> to vector<1x32xf32>
    %197 = vector.broadcast %196 : vector<1x32xf32> to vector<16x32xf32>
    %198 = arith.addf %194, %197 : vector<16x32xf32>
    %c0_172 = arith.constant 0 : index
    %c0_173 = arith.constant 0 : index
    %c0_174 = arith.constant 0 : index
    %c0_175 = arith.constant 0 : index
    %199 = vector.load %arg5[%c0_172, %c0_173, %c0_174, %c0_175] : memref<2x2x64x32xf32, #tpu.memory_space<vmem>>, vector<1x1x64x32xf32>
    %200 = vector.shape_cast %199 : vector<1x1x64x32xf32> to vector<64x32xf32>
    %cst_176 = arith.constant dense<0.000000e+00> : vector<16x32xf32>
    %201 = tpu.matmul %190, %200, %cst_176 {dimension_numbers = #tpu.dot_dimension_numbers<[1], [0], [0], [1], [0, 0, 1, 1], [], []>} : vector<16x64xf32>, vector<64x32xf32>, vector<16x32xf32> -> vector<16x32xf32>
    %c0_177 = arith.constant 0 : index
    %c0_178 = arith.constant 0 : index
    %c0_179 = arith.constant 0 : index
    %c0_180 = arith.constant 0 : index
    %202 = vector.load %arg8[%c0_177, %c0_178, %c0_179, %c0_180] : memref<2x2x1x32xf32, #tpu.memory_space<vmem>>, vector<1x1x1x32xf32>
    %203 = vector.shape_cast %202 : vector<1x1x1x32xf32> to vector<1x32xf32>
    %204 = vector.broadcast %203 : vector<1x32xf32> to vector<16x32xf32>
    %205 = arith.addf %201, %204 : vector<16x32xf32>
    %c0_181 = arith.constant 0 : index
    %c0_182 = arith.constant 0 : index
    %c0_183 = arith.constant 0 : index
    %c0_184 = arith.constant 0 : index
    %206 = vector.load %arg6[%c0_181, %c0_182, %c0_183, %c0_184] : memref<2x2x64x32xf32, #tpu.memory_space<vmem>>, vector<1x1x64x32xf32>
    %207 = vector.shape_cast %206 : vector<1x1x64x32xf32> to vector<64x32xf32>
    %cst_185 = arith.constant dense<0.000000e+00> : vector<16x32xf32>
    %208 = tpu.matmul %190, %207, %cst_185 {dimension_numbers = #tpu.dot_dimension_numbers<[1], [0], [0], [1], [0, 0, 1, 1], [], []>} : vector<16x64xf32>, vector<64x32xf32>, vector<16x32xf32> -> vector<16x32xf32>
    %c0_186 = arith.constant 0 : index
    %c0_187 = arith.constant 0 : index
    %c0_188 = arith.constant 0 : index
    %c0_189 = arith.constant 0 : index
    %209 = vector.load %arg9[%c0_186, %c0_187, %c0_188, %c0_189] : memref<2x2x1x32xf32, #tpu.memory_space<vmem>>, vector<1x1x1x32xf32>
    %210 = vector.shape_cast %209 : vector<1x1x1x32xf32> to vector<1x32xf32>
    %211 = vector.broadcast %210 : vector<1x32xf32> to vector<16x32xf32>
    %212 = arith.addf %208, %211 : vector<16x32xf32>
    %cst_190 = arith.constant dense<0.000000e+00> : vector<16x16xf32>
    %213 = tpu.matmul %198, %205, %cst_190 {dimension_numbers = #tpu.dot_dimension_numbers<[1], [1], [0], [0], [0, 0, 1, 0], [], []>} : vector<16x32xf32>, vector<16x32xf32>, vector<16x16xf32> -> vector<16x16xf32>
    %cst_191 = arith.constant 0.176776692 : f32
    %214 = vector.broadcast %cst_191 : f32 to vector<16x16xf32>
    %215 = arith.mulf %213, %214 : vector<16x16xf32>
    %216 = arith.addf %215, %1 : vector<16x16xf32>
    %cst_192 = arith.constant dense<0xFF800000> : vector<16xf32>
    %217 = vector.multi_reduction <maximumf>, %216, %cst_192 [1] : vector<16x16xf32> to vector<16xf32>
    %218 = vector.shape_cast %217 : vector<16xf32> to vector<16x1xf32>
    %219 = vector.broadcast %218 : vector<16x1xf32> to vector<16x16xf32>
    %220 = arith.subf %216, %219 : vector<16x16xf32>
    %221 = math.exp %220 : vector<16x16xf32>
    %cst_193 = arith.constant dense<0.000000e+00> : vector<16xf32>
    %222 = vector.multi_reduction <add>, %221, %cst_193 [1] : vector<16x16xf32> to vector<16xf32>
    %223 = vector.shape_cast %222 : vector<16xf32> to vector<16x1xf32>
    %224 = tpu.reciprocal %223 {approx = true} : vector<16x1xf32> -> vector<16x1xf32>
    %225 = vector.broadcast %224 : vector<16x1xf32> to vector<16x16xf32>
    %226 = arith.mulf %221, %225 : vector<16x16xf32>
    %cst_194 = arith.constant dense<0.000000e+00> : vector<16x32xf32>
    %227 = tpu.matmul %226, %212, %cst_194 {dimension_numbers = #tpu.dot_dimension_numbers<[1], [0], [0], [1], [0, 0, 1, 1], [], []>} : vector<16x16xf32>, vector<16x32xf32>, vector<16x32xf32> -> vector<16x32xf32>
    %c0_195 = arith.constant 0 : index
    %c0_196 = arith.constant 0 : index
    %c0_197 = arith.constant 0 : index
    %c0_198 = arith.constant 0 : index
    %228 = vector.load %arg10[%c0_195, %c0_196, %c0_197, %c0_198] : memref<2x2x32x64xf32, #tpu.memory_space<vmem>>, vector<1x1x32x64xf32>
    %229 = vector.shape_cast %228 : vector<1x1x32x64xf32> to vector<32x64xf32>
    %cst_199 = arith.constant dense<0.000000e+00> : vector<16x64xf32>
    %230 = tpu.matmul %227, %229, %cst_199 {dimension_numbers = #tpu.dot_dimension_numbers<[1], [0], [0], [1], [0, 0, 1, 1], [], []>} : vector<16x32xf32>, vector<32x64xf32>, vector<16x64xf32> -> vector<16x64xf32>
    %231 = arith.addf %191, %230 : vector<16x64xf32>
    %c0_200 = arith.constant 0 : index
    %c1_201 = arith.constant 1 : index
    %c0_202 = arith.constant 0 : index
    %c0_203 = arith.constant 0 : index
    %232 = vector.load %arg4[%c0_200, %c1_201, %c0_202, %c0_203] : memref<2x2x64x32xf32, #tpu.memory_space<vmem>>, vector<1x1x64x32xf32>
    %233 = vector.shape_cast %232 : vector<1x1x64x32xf32> to vector<64x32xf32>
    %cst_204 = arith.constant dense<0.000000e+00> : vector<16x32xf32>
    %234 = tpu.matmul %190, %233, %cst_204 {dimension_numbers = #tpu.dot_dimension_numbers<[1], [0], [0], [1], [0, 0, 1, 1], [], []>} : vector<16x64xf32>, vector<64x32xf32>, vector<16x32xf32> -> vector<16x32xf32>
    %c0_205 = arith.constant 0 : index
    %c1_206 = arith.constant 1 : index
    %c0_207 = arith.constant 0 : index
    %c0_208 = arith.constant 0 : index
    %235 = vector.load %arg7[%c0_205, %c1_206, %c0_207, %c0_208] : memref<2x2x1x32xf32, #tpu.memory_space<vmem>>, vector<1x1x1x32xf32>
    %236 = vector.shape_cast %235 : vector<1x1x1x32xf32> to vector<1x32xf32>
    %237 = vector.broadcast %236 : vector<1x32xf32> to vector<16x32xf32>
    %238 = arith.addf %234, %237 : vector<16x32xf32>
    %c0_209 = arith.constant 0 : index
    %c1_210 = arith.constant 1 : index
    %c0_211 = arith.constant 0 : index
    %c0_212 = arith.constant 0 : index
    %239 = vector.load %arg5[%c0_209, %c1_210, %c0_211, %c0_212] : memref<2x2x64x32xf32, #tpu.memory_space<vmem>>, vector<1x1x64x32xf32>
    %240 = vector.shape_cast %239 : vector<1x1x64x32xf32> to vector<64x32xf32>
    %cst_213 = arith.constant dense<0.000000e+00> : vector<16x32xf32>
    %241 = tpu.matmul %190, %240, %cst_213 {dimension_numbers = #tpu.dot_dimension_numbers<[1], [0], [0], [1], [0, 0, 1, 1], [], []>} : vector<16x64xf32>, vector<64x32xf32>, vector<16x32xf32> -> vector<16x32xf32>
    %c0_214 = arith.constant 0 : index
    %c1_215 = arith.constant 1 : index
    %c0_216 = arith.constant 0 : index
    %c0_217 = arith.constant 0 : index
    %242 = vector.load %arg8[%c0_214, %c1_215, %c0_216, %c0_217] : memref<2x2x1x32xf32, #tpu.memory_space<vmem>>, vector<1x1x1x32xf32>
    %243 = vector.shape_cast %242 : vector<1x1x1x32xf32> to vector<1x32xf32>
    %244 = vector.broadcast %243 : vector<1x32xf32> to vector<16x32xf32>
    %245 = arith.addf %241, %244 : vector<16x32xf32>
    %c0_218 = arith.constant 0 : index
    %c1_219 = arith.constant 1 : index
    %c0_220 = arith.constant 0 : index
    %c0_221 = arith.constant 0 : index
    %246 = vector.load %arg6[%c0_218, %c1_219, %c0_220, %c0_221] : memref<2x2x64x32xf32, #tpu.memory_space<vmem>>, vector<1x1x64x32xf32>
    %247 = vector.shape_cast %246 : vector<1x1x64x32xf32> to vector<64x32xf32>
    %cst_222 = arith.constant dense<0.000000e+00> : vector<16x32xf32>
    %248 = tpu.matmul %190, %247, %cst_222 {dimension_numbers = #tpu.dot_dimension_numbers<[1], [0], [0], [1], [0, 0, 1, 1], [], []>} : vector<16x64xf32>, vector<64x32xf32>, vector<16x32xf32> -> vector<16x32xf32>
    %c0_223 = arith.constant 0 : index
    %c1_224 = arith.constant 1 : index
    %c0_225 = arith.constant 0 : index
    %c0_226 = arith.constant 0 : index
    %249 = vector.load %arg9[%c0_223, %c1_224, %c0_225, %c0_226] : memref<2x2x1x32xf32, #tpu.memory_space<vmem>>, vector<1x1x1x32xf32>
    %250 = vector.shape_cast %249 : vector<1x1x1x32xf32> to vector<1x32xf32>
    %251 = vector.broadcast %250 : vector<1x32xf32> to vector<16x32xf32>
    %252 = arith.addf %248, %251 : vector<16x32xf32>
    %cst_227 = arith.constant dense<0.000000e+00> : vector<16x16xf32>
    %253 = tpu.matmul %238, %245, %cst_227 {dimension_numbers = #tpu.dot_dimension_numbers<[1], [1], [0], [0], [0, 0, 1, 0], [], []>} : vector<16x32xf32>, vector<16x32xf32>, vector<16x16xf32> -> vector<16x16xf32>
    %cst_228 = arith.constant 0.176776692 : f32
    %254 = vector.broadcast %cst_228 : f32 to vector<16x16xf32>
    %255 = arith.mulf %253, %254 : vector<16x16xf32>
    %256 = arith.addf %255, %1 : vector<16x16xf32>
    %cst_229 = arith.constant dense<0xFF800000> : vector<16xf32>
    %257 = vector.multi_reduction <maximumf>, %256, %cst_229 [1] : vector<16x16xf32> to vector<16xf32>
    %258 = vector.shape_cast %257 : vector<16xf32> to vector<16x1xf32>
    %259 = vector.broadcast %258 : vector<16x1xf32> to vector<16x16xf32>
    %260 = arith.subf %256, %259 : vector<16x16xf32>
    %261 = math.exp %260 : vector<16x16xf32>
    %cst_230 = arith.constant dense<0.000000e+00> : vector<16xf32>
    %262 = vector.multi_reduction <add>, %261, %cst_230 [1] : vector<16x16xf32> to vector<16xf32>
    %263 = vector.shape_cast %262 : vector<16xf32> to vector<16x1xf32>
    %264 = tpu.reciprocal %263 {approx = true} : vector<16x1xf32> -> vector<16x1xf32>
    %265 = vector.broadcast %264 : vector<16x1xf32> to vector<16x16xf32>
    %266 = arith.mulf %261, %265 : vector<16x16xf32>
    %cst_231 = arith.constant dense<0.000000e+00> : vector<16x32xf32>
    %267 = tpu.matmul %266, %252, %cst_231 {dimension_numbers = #tpu.dot_dimension_numbers<[1], [0], [0], [1], [0, 0, 1, 1], [], []>} : vector<16x16xf32>, vector<16x32xf32>, vector<16x32xf32> -> vector<16x32xf32>
    %c0_232 = arith.constant 0 : index
    %c1_233 = arith.constant 1 : index
    %c0_234 = arith.constant 0 : index
    %c0_235 = arith.constant 0 : index
    %268 = vector.load %arg10[%c0_232, %c1_233, %c0_234, %c0_235] : memref<2x2x32x64xf32, #tpu.memory_space<vmem>>, vector<1x1x32x64xf32>
    %269 = vector.shape_cast %268 : vector<1x1x32x64xf32> to vector<32x64xf32>
    %cst_236 = arith.constant dense<0.000000e+00> : vector<16x64xf32>
    %270 = tpu.matmul %267, %269, %cst_236 {dimension_numbers = #tpu.dot_dimension_numbers<[1], [0], [0], [1], [0, 0, 1, 1], [], []>} : vector<16x32xf32>, vector<32x64xf32>, vector<16x64xf32> -> vector<16x64xf32>
    %271 = arith.addf %231, %270 : vector<16x64xf32>
    %272 = tpu.concatenate %107, %189, %271 in 0 : vector<16x64xf32>, vector<16x64xf32>, vector<16x64xf32> -> vector<48x64xf32>
    %c0_237 = arith.constant 0 : index
    %c0_238 = arith.constant 0 : index
    %c0_239 = arith.constant 0 : index
    %273 = vector.load %arg11[%c0_237, %c0_238, %c0_239] : memref<2x1x64xf32, #tpu.memory_space<vmem>>, vector<1x1x64xf32>
    %274 = vector.shape_cast %273 : vector<1x1x64xf32> to vector<1x64xf32>
    %275 = vector.broadcast %274 : vector<1x64xf32> to vector<48x64xf32>
    %276 = arith.addf %272, %275 : vector<48x64xf32>
    %277 = arith.addf %0, %276 : vector<48x64xf32>
    %c0_240 = arith.constant 0 : index
    %c0_241 = arith.constant 0 : index
    %c0_242 = arith.constant 0 : index
    %278 = vector.load %arg12[%c0_240, %c0_241, %c0_242] : memref<2x1x64xf32, #tpu.memory_space<vmem>>, vector<1x1x64xf32>
    %279 = vector.shape_cast %278 : vector<1x1x64xf32> to vector<1x64xf32>
    %c0_243 = arith.constant 0 : index
    %c0_244 = arith.constant 0 : index
    %c0_245 = arith.constant 0 : index
    %280 = vector.load %arg13[%c0_243, %c0_244, %c0_245] : memref<2x1x64xf32, #tpu.memory_space<vmem>>, vector<1x1x64xf32>
    %281 = vector.shape_cast %280 : vector<1x1x64xf32> to vector<1x64xf32>
    %cst_246 = arith.constant dense<0.000000e+00> : vector<48xf32>
    %282 = vector.multi_reduction <add>, %277, %cst_246 [1] : vector<48x64xf32> to vector<48xf32>
    %283 = vector.shape_cast %282 : vector<48xf32> to vector<48x1xf32>
    %cst_247 = arith.constant 6.400000e+01 : f32
    %284 = vector.broadcast %cst_247 : f32 to vector<48x1xf32>
    %285 = arith.divf %283, %284 : vector<48x1xf32>
    %286 = vector.broadcast %285 : vector<48x1xf32> to vector<48x64xf32>
    %287 = arith.subf %277, %286 : vector<48x64xf32>
    %288 = arith.mulf %287, %287 : vector<48x64xf32>
    %cst_248 = arith.constant dense<0.000000e+00> : vector<48xf32>
    %289 = vector.multi_reduction <add>, %288, %cst_248 [1] : vector<48x64xf32> to vector<48xf32>
    %290 = vector.shape_cast %289 : vector<48xf32> to vector<48x1xf32>
    %cst_249 = arith.constant 6.400000e+01 : f32
    %291 = vector.broadcast %cst_249 : f32 to vector<48x1xf32>
    %292 = arith.divf %290, %291 : vector<48x1xf32>
    %cst_250 = arith.constant 9.99999974E-6 : f32
    %293 = vector.broadcast %cst_250 : f32 to vector<48x1xf32>
    %294 = arith.addf %292, %293 : vector<48x1xf32>
    %295 = math.rsqrt %294 : vector<48x1xf32>
    %296 = vector.broadcast %295 : vector<48x1xf32> to vector<48x64xf32>
    %297 = arith.mulf %287, %296 : vector<48x64xf32>
    %298 = vector.broadcast %279 : vector<1x64xf32> to vector<48x64xf32>
    %299 = arith.mulf %297, %298 : vector<48x64xf32>
    %300 = vector.broadcast %281 : vector<1x64xf32> to vector<48x64xf32>
    %301 = arith.addf %299, %300 : vector<48x64xf32>
    %c0_251 = arith.constant 0 : index
    %c0_252 = arith.constant 0 : index
    %c0_253 = arith.constant 0 : index
    %302 = vector.load %arg14[%c0_251, %c0_252, %c0_253] : memref<2x64x256xf32, #tpu.memory_space<vmem>>, vector<1x64x256xf32>
    %303 = vector.shape_cast %302 : vector<1x64x256xf32> to vector<64x256xf32>
    %cst_254 = arith.constant dense<0.000000e+00> : vector<48x256xf32>
    %304 = tpu.matmul %301, %303, %cst_254 {dimension_numbers = #tpu.dot_dimension_numbers<[1], [0], [0], [1], [0, 0, 1, 1], [], []>} : vector<48x64xf32>, vector<64x256xf32>, vector<48x256xf32> -> vector<48x256xf32>
    %c0_255 = arith.constant 0 : index
    %c0_256 = arith.constant 0 : index
    %c0_257 = arith.constant 0 : index
    %305 = vector.load %arg15[%c0_255, %c0_256, %c0_257] : memref<2x1x256xf32, #tpu.memory_space<vmem>>, vector<1x1x256xf32>
    %306 = vector.shape_cast %305 : vector<1x1x256xf32> to vector<1x256xf32>
    %307 = vector.broadcast %306 : vector<1x256xf32> to vector<48x256xf32>
    %308 = arith.addf %304, %307 : vector<48x256xf32>
    %cst_258 = arith.constant 1.702000e+00 : f32
    %309 = vector.broadcast %cst_258 : f32 to vector<48x256xf32>
    %310 = arith.mulf %309, %308 : vector<48x256xf32>
    %311 = arith.negf %310 : vector<48x256xf32>
    %312 = math.exp %311 : vector<48x256xf32>
    %cst_259 = arith.constant 1.000000e+00 : f32
    %313 = vector.broadcast %cst_259 : f32 to vector<48x256xf32>
    %314 = arith.addf %313, %312 : vector<48x256xf32>
    %315 = arith.divf %313, %314 : vector<48x256xf32>
    %316 = arith.mulf %308, %315 : vector<48x256xf32>
    %c0_260 = arith.constant 0 : index
    %c0_261 = arith.constant 0 : index
    %c0_262 = arith.constant 0 : index
    %317 = vector.load %arg16[%c0_260, %c0_261, %c0_262] : memref<2x256x64xf32, #tpu.memory_space<vmem>>, vector<1x256x64xf32>
    %318 = vector.shape_cast %317 : vector<1x256x64xf32> to vector<256x64xf32>
    %cst_263 = arith.constant dense<0.000000e+00> : vector<48x64xf32>
    %319 = tpu.matmul %316, %318, %cst_263 {dimension_numbers = #tpu.dot_dimension_numbers<[1], [0], [0], [1], [0, 0, 1, 1], [], []>} : vector<48x256xf32>, vector<256x64xf32>, vector<48x64xf32> -> vector<48x64xf32>
    %320 = arith.addf %277, %319 : vector<48x64xf32>
    %c0_264 = arith.constant 0 : index
    %c0_265 = arith.constant 0 : index
    %c0_266 = arith.constant 0 : index
    %321 = vector.load %arg17[%c0_264, %c0_265, %c0_266] : memref<2x1x64xf32, #tpu.memory_space<vmem>>, vector<1x1x64xf32>
    %322 = vector.shape_cast %321 : vector<1x1x64xf32> to vector<1x64xf32>
    %323 = vector.broadcast %322 : vector<1x64xf32> to vector<48x64xf32>
    %324 = arith.addf %320, %323 : vector<48x64xf32>
    %c1_267 = arith.constant 1 : index
    %c0_268 = arith.constant 0 : index
    %c0_269 = arith.constant 0 : index
    %325 = vector.load %arg2[%c1_267, %c0_268, %c0_269] : memref<2x1x64xf32, #tpu.memory_space<vmem>>, vector<1x1x64xf32>
    %326 = vector.shape_cast %325 : vector<1x1x64xf32> to vector<1x64xf32>
    %c1_270 = arith.constant 1 : index
    %c0_271 = arith.constant 0 : index
    %c0_272 = arith.constant 0 : index
    %327 = vector.load %arg3[%c1_270, %c0_271, %c0_272] : memref<2x1x64xf32, #tpu.memory_space<vmem>>, vector<1x1x64xf32>
    %328 = vector.shape_cast %327 : vector<1x1x64xf32> to vector<1x64xf32>
    %cst_273 = arith.constant dense<0.000000e+00> : vector<48xf32>
    %329 = vector.multi_reduction <add>, %324, %cst_273 [1] : vector<48x64xf32> to vector<48xf32>
    %330 = vector.shape_cast %329 : vector<48xf32> to vector<48x1xf32>
    %cst_274 = arith.constant 6.400000e+01 : f32
    %331 = vector.broadcast %cst_274 : f32 to vector<48x1xf32>
    %332 = arith.divf %330, %331 : vector<48x1xf32>
    %333 = vector.broadcast %332 : vector<48x1xf32> to vector<48x64xf32>
    %334 = arith.subf %324, %333 : vector<48x64xf32>
    %335 = arith.mulf %334, %334 : vector<48x64xf32>
    %cst_275 = arith.constant dense<0.000000e+00> : vector<48xf32>
    %336 = vector.multi_reduction <add>, %335, %cst_275 [1] : vector<48x64xf32> to vector<48xf32>
    %337 = vector.shape_cast %336 : vector<48xf32> to vector<48x1xf32>
    %cst_276 = arith.constant 6.400000e+01 : f32
    %338 = vector.broadcast %cst_276 : f32 to vector<48x1xf32>
    %339 = arith.divf %337, %338 : vector<48x1xf32>
    %cst_277 = arith.constant 9.99999974E-6 : f32
    %340 = vector.broadcast %cst_277 : f32 to vector<48x1xf32>
    %341 = arith.addf %339, %340 : vector<48x1xf32>
    %342 = math.rsqrt %341 : vector<48x1xf32>
    %343 = vector.broadcast %342 : vector<48x1xf32> to vector<48x64xf32>
    %344 = arith.mulf %334, %343 : vector<48x64xf32>
    %345 = vector.broadcast %326 : vector<1x64xf32> to vector<48x64xf32>
    %346 = arith.mulf %344, %345 : vector<48x64xf32>
    %347 = vector.broadcast %328 : vector<1x64xf32> to vector<48x64xf32>
    %348 = arith.addf %346, %347 : vector<48x64xf32>
    %349 = vector.extract_strided_slice %348 {offsets = [0, 0], sizes = [16, 64], strides = [1, 1]} : vector<48x64xf32> to vector<16x64xf32>
    %cst_278 = arith.constant 0.000000e+00 : f32
    %350 = vector.broadcast %cst_278 : f32 to vector<16x64xf32>
    %c1_279 = arith.constant 1 : index
    %c0_280 = arith.constant 0 : index
    %c0_281 = arith.constant 0 : index
    %c0_282 = arith.constant 0 : index
    %351 = vector.load %arg4[%c1_279, %c0_280, %c0_281, %c0_282] : memref<2x2x64x32xf32, #tpu.memory_space<vmem>>, vector<1x1x64x32xf32>
    %352 = vector.shape_cast %351 : vector<1x1x64x32xf32> to vector<64x32xf32>
    %cst_283 = arith.constant dense<0.000000e+00> : vector<16x32xf32>
    %353 = tpu.matmul %349, %352, %cst_283 {dimension_numbers = #tpu.dot_dimension_numbers<[1], [0], [0], [1], [0, 0, 1, 1], [], []>} : vector<16x64xf32>, vector<64x32xf32>, vector<16x32xf32> -> vector<16x32xf32>
    %c1_284 = arith.constant 1 : index
    %c0_285 = arith.constant 0 : index
    %c0_286 = arith.constant 0 : index
    %c0_287 = arith.constant 0 : index
    %354 = vector.load %arg7[%c1_284, %c0_285, %c0_286, %c0_287] : memref<2x2x1x32xf32, #tpu.memory_space<vmem>>, vector<1x1x1x32xf32>
    %355 = vector.shape_cast %354 : vector<1x1x1x32xf32> to vector<1x32xf32>
    %356 = vector.broadcast %355 : vector<1x32xf32> to vector<16x32xf32>
    %357 = arith.addf %353, %356 : vector<16x32xf32>
    %c1_288 = arith.constant 1 : index
    %c0_289 = arith.constant 0 : index
    %c0_290 = arith.constant 0 : index
    %c0_291 = arith.constant 0 : index
    %358 = vector.load %arg5[%c1_288, %c0_289, %c0_290, %c0_291] : memref<2x2x64x32xf32, #tpu.memory_space<vmem>>, vector<1x1x64x32xf32>
    %359 = vector.shape_cast %358 : vector<1x1x64x32xf32> to vector<64x32xf32>
    %cst_292 = arith.constant dense<0.000000e+00> : vector<16x32xf32>
    %360 = tpu.matmul %349, %359, %cst_292 {dimension_numbers = #tpu.dot_dimension_numbers<[1], [0], [0], [1], [0, 0, 1, 1], [], []>} : vector<16x64xf32>, vector<64x32xf32>, vector<16x32xf32> -> vector<16x32xf32>
    %c1_293 = arith.constant 1 : index
    %c0_294 = arith.constant 0 : index
    %c0_295 = arith.constant 0 : index
    %c0_296 = arith.constant 0 : index
    %361 = vector.load %arg8[%c1_293, %c0_294, %c0_295, %c0_296] : memref<2x2x1x32xf32, #tpu.memory_space<vmem>>, vector<1x1x1x32xf32>
    %362 = vector.shape_cast %361 : vector<1x1x1x32xf32> to vector<1x32xf32>
    %363 = vector.broadcast %362 : vector<1x32xf32> to vector<16x32xf32>
    %364 = arith.addf %360, %363 : vector<16x32xf32>
    %c1_297 = arith.constant 1 : index
    %c0_298 = arith.constant 0 : index
    %c0_299 = arith.constant 0 : index
    %c0_300 = arith.constant 0 : index
    %365 = vector.load %arg6[%c1_297, %c0_298, %c0_299, %c0_300] : memref<2x2x64x32xf32, #tpu.memory_space<vmem>>, vector<1x1x64x32xf32>
    %366 = vector.shape_cast %365 : vector<1x1x64x32xf32> to vector<64x32xf32>
    %cst_301 = arith.constant dense<0.000000e+00> : vector<16x32xf32>
    %367 = tpu.matmul %349, %366, %cst_301 {dimension_numbers = #tpu.dot_dimension_numbers<[1], [0], [0], [1], [0, 0, 1, 1], [], []>} : vector<16x64xf32>, vector<64x32xf32>, vector<16x32xf32> -> vector<16x32xf32>
    %c1_302 = arith.constant 1 : index
    %c0_303 = arith.constant 0 : index
    %c0_304 = arith.constant 0 : index
    %c0_305 = arith.constant 0 : index
    %368 = vector.load %arg9[%c1_302, %c0_303, %c0_304, %c0_305] : memref<2x2x1x32xf32, #tpu.memory_space<vmem>>, vector<1x1x1x32xf32>
    %369 = vector.shape_cast %368 : vector<1x1x1x32xf32> to vector<1x32xf32>
    %370 = vector.broadcast %369 : vector<1x32xf32> to vector<16x32xf32>
    %371 = arith.addf %367, %370 : vector<16x32xf32>
    %cst_306 = arith.constant dense<0.000000e+00> : vector<16x16xf32>
    %372 = tpu.matmul %357, %364, %cst_306 {dimension_numbers = #tpu.dot_dimension_numbers<[1], [1], [0], [0], [0, 0, 1, 0], [], []>} : vector<16x32xf32>, vector<16x32xf32>, vector<16x16xf32> -> vector<16x16xf32>
    %cst_307 = arith.constant 0.176776692 : f32
    %373 = vector.broadcast %cst_307 : f32 to vector<16x16xf32>
    %374 = arith.mulf %372, %373 : vector<16x16xf32>
    %375 = arith.addf %374, %1 : vector<16x16xf32>
    %cst_308 = arith.constant dense<0xFF800000> : vector<16xf32>
    %376 = vector.multi_reduction <maximumf>, %375, %cst_308 [1] : vector<16x16xf32> to vector<16xf32>
    %377 = vector.shape_cast %376 : vector<16xf32> to vector<16x1xf32>
    %378 = vector.broadcast %377 : vector<16x1xf32> to vector<16x16xf32>
    %379 = arith.subf %375, %378 : vector<16x16xf32>
    %380 = math.exp %379 : vector<16x16xf32>
    %cst_309 = arith.constant dense<0.000000e+00> : vector<16xf32>
    %381 = vector.multi_reduction <add>, %380, %cst_309 [1] : vector<16x16xf32> to vector<16xf32>
    %382 = vector.shape_cast %381 : vector<16xf32> to vector<16x1xf32>
    %383 = tpu.reciprocal %382 {approx = true} : vector<16x1xf32> -> vector<16x1xf32>
    %384 = vector.broadcast %383 : vector<16x1xf32> to vector<16x16xf32>
    %385 = arith.mulf %380, %384 : vector<16x16xf32>
    %cst_310 = arith.constant dense<0.000000e+00> : vector<16x32xf32>
    %386 = tpu.matmul %385, %371, %cst_310 {dimension_numbers = #tpu.dot_dimension_numbers<[1], [0], [0], [1], [0, 0, 1, 1], [], []>} : vector<16x16xf32>, vector<16x32xf32>, vector<16x32xf32> -> vector<16x32xf32>
    %c1_311 = arith.constant 1 : index
    %c0_312 = arith.constant 0 : index
    %c0_313 = arith.constant 0 : index
    %c0_314 = arith.constant 0 : index
    %387 = vector.load %arg10[%c1_311, %c0_312, %c0_313, %c0_314] : memref<2x2x32x64xf32, #tpu.memory_space<vmem>>, vector<1x1x32x64xf32>
    %388 = vector.shape_cast %387 : vector<1x1x32x64xf32> to vector<32x64xf32>
    %cst_315 = arith.constant dense<0.000000e+00> : vector<16x64xf32>
    %389 = tpu.matmul %386, %388, %cst_315 {dimension_numbers = #tpu.dot_dimension_numbers<[1], [0], [0], [1], [0, 0, 1, 1], [], []>} : vector<16x32xf32>, vector<32x64xf32>, vector<16x64xf32> -> vector<16x64xf32>
    %390 = arith.addf %350, %389 : vector<16x64xf32>
    %c1_316 = arith.constant 1 : index
    %c1_317 = arith.constant 1 : index
    %c0_318 = arith.constant 0 : index
    %c0_319 = arith.constant 0 : index
    %391 = vector.load %arg4[%c1_316, %c1_317, %c0_318, %c0_319] : memref<2x2x64x32xf32, #tpu.memory_space<vmem>>, vector<1x1x64x32xf32>
    %392 = vector.shape_cast %391 : vector<1x1x64x32xf32> to vector<64x32xf32>
    %cst_320 = arith.constant dense<0.000000e+00> : vector<16x32xf32>
    %393 = tpu.matmul %349, %392, %cst_320 {dimension_numbers = #tpu.dot_dimension_numbers<[1], [0], [0], [1], [0, 0, 1, 1], [], []>} : vector<16x64xf32>, vector<64x32xf32>, vector<16x32xf32> -> vector<16x32xf32>
    %c1_321 = arith.constant 1 : index
    %c1_322 = arith.constant 1 : index
    %c0_323 = arith.constant 0 : index
    %c0_324 = arith.constant 0 : index
    %394 = vector.load %arg7[%c1_321, %c1_322, %c0_323, %c0_324] : memref<2x2x1x32xf32, #tpu.memory_space<vmem>>, vector<1x1x1x32xf32>
    %395 = vector.shape_cast %394 : vector<1x1x1x32xf32> to vector<1x32xf32>
    %396 = vector.broadcast %395 : vector<1x32xf32> to vector<16x32xf32>
    %397 = arith.addf %393, %396 : vector<16x32xf32>
    %c1_325 = arith.constant 1 : index
    %c1_326 = arith.constant 1 : index
    %c0_327 = arith.constant 0 : index
    %c0_328 = arith.constant 0 : index
    %398 = vector.load %arg5[%c1_325, %c1_326, %c0_327, %c0_328] : memref<2x2x64x32xf32, #tpu.memory_space<vmem>>, vector<1x1x64x32xf32>
    %399 = vector.shape_cast %398 : vector<1x1x64x32xf32> to vector<64x32xf32>
    %cst_329 = arith.constant dense<0.000000e+00> : vector<16x32xf32>
    %400 = tpu.matmul %349, %399, %cst_329 {dimension_numbers = #tpu.dot_dimension_numbers<[1], [0], [0], [1], [0, 0, 1, 1], [], []>} : vector<16x64xf32>, vector<64x32xf32>, vector<16x32xf32> -> vector<16x32xf32>
    %c1_330 = arith.constant 1 : index
    %c1_331 = arith.constant 1 : index
    %c0_332 = arith.constant 0 : index
    %c0_333 = arith.constant 0 : index
    %401 = vector.load %arg8[%c1_330, %c1_331, %c0_332, %c0_333] : memref<2x2x1x32xf32, #tpu.memory_space<vmem>>, vector<1x1x1x32xf32>
    %402 = vector.shape_cast %401 : vector<1x1x1x32xf32> to vector<1x32xf32>
    %403 = vector.broadcast %402 : vector<1x32xf32> to vector<16x32xf32>
    %404 = arith.addf %400, %403 : vector<16x32xf32>
    %c1_334 = arith.constant 1 : index
    %c1_335 = arith.constant 1 : index
    %c0_336 = arith.constant 0 : index
    %c0_337 = arith.constant 0 : index
    %405 = vector.load %arg6[%c1_334, %c1_335, %c0_336, %c0_337] : memref<2x2x64x32xf32, #tpu.memory_space<vmem>>, vector<1x1x64x32xf32>
    %406 = vector.shape_cast %405 : vector<1x1x64x32xf32> to vector<64x32xf32>
    %cst_338 = arith.constant dense<0.000000e+00> : vector<16x32xf32>
    %407 = tpu.matmul %349, %406, %cst_338 {dimension_numbers = #tpu.dot_dimension_numbers<[1], [0], [0], [1], [0, 0, 1, 1], [], []>} : vector<16x64xf32>, vector<64x32xf32>, vector<16x32xf32> -> vector<16x32xf32>
    %c1_339 = arith.constant 1 : index
    %c1_340 = arith.constant 1 : index
    %c0_341 = arith.constant 0 : index
    %c0_342 = arith.constant 0 : index
    %408 = vector.load %arg9[%c1_339, %c1_340, %c0_341, %c0_342] : memref<2x2x1x32xf32, #tpu.memory_space<vmem>>, vector<1x1x1x32xf32>
    %409 = vector.shape_cast %408 : vector<1x1x1x32xf32> to vector<1x32xf32>
    %410 = vector.broadcast %409 : vector<1x32xf32> to vector<16x32xf32>
    %411 = arith.addf %407, %410 : vector<16x32xf32>
    %cst_343 = arith.constant dense<0.000000e+00> : vector<16x16xf32>
    %412 = tpu.matmul %397, %404, %cst_343 {dimension_numbers = #tpu.dot_dimension_numbers<[1], [1], [0], [0], [0, 0, 1, 0], [], []>} : vector<16x32xf32>, vector<16x32xf32>, vector<16x16xf32> -> vector<16x16xf32>
    %cst_344 = arith.constant 0.176776692 : f32
    %413 = vector.broadcast %cst_344 : f32 to vector<16x16xf32>
    %414 = arith.mulf %412, %413 : vector<16x16xf32>
    %415 = arith.addf %414, %1 : vector<16x16xf32>
    %cst_345 = arith.constant dense<0xFF800000> : vector<16xf32>
    %416 = vector.multi_reduction <maximumf>, %415, %cst_345 [1] : vector<16x16xf32> to vector<16xf32>
    %417 = vector.shape_cast %416 : vector<16xf32> to vector<16x1xf32>
    %418 = vector.broadcast %417 : vector<16x1xf32> to vector<16x16xf32>
    %419 = arith.subf %415, %418 : vector<16x16xf32>
    %420 = math.exp %419 : vector<16x16xf32>
    %cst_346 = arith.constant dense<0.000000e+00> : vector<16xf32>
    %421 = vector.multi_reduction <add>, %420, %cst_346 [1] : vector<16x16xf32> to vector<16xf32>
    %422 = vector.shape_cast %421 : vector<16xf32> to vector<16x1xf32>
    %423 = tpu.reciprocal %422 {approx = true} : vector<16x1xf32> -> vector<16x1xf32>
    %424 = vector.broadcast %423 : vector<16x1xf32> to vector<16x16xf32>
    %425 = arith.mulf %420, %424 : vector<16x16xf32>
    %cst_347 = arith.constant dense<0.000000e+00> : vector<16x32xf32>
    %426 = tpu.matmul %425, %411, %cst_347 {dimension_numbers = #tpu.dot_dimension_numbers<[1], [0], [0], [1], [0, 0, 1, 1], [], []>} : vector<16x16xf32>, vector<16x32xf32>, vector<16x32xf32> -> vector<16x32xf32>
    %c1_348 = arith.constant 1 : index
    %c1_349 = arith.constant 1 : index
    %c0_350 = arith.constant 0 : index
    %c0_351 = arith.constant 0 : index
    %427 = vector.load %arg10[%c1_348, %c1_349, %c0_350, %c0_351] : memref<2x2x32x64xf32, #tpu.memory_space<vmem>>, vector<1x1x32x64xf32>
    %428 = vector.shape_cast %427 : vector<1x1x32x64xf32> to vector<32x64xf32>
    %cst_352 = arith.constant dense<0.000000e+00> : vector<16x64xf32>
    %429 = tpu.matmul %426, %428, %cst_352 {dimension_numbers = #tpu.dot_dimension_numbers<[1], [0], [0], [1], [0, 0, 1, 1], [], []>} : vector<16x32xf32>, vector<32x64xf32>, vector<16x64xf32> -> vector<16x64xf32>
    %430 = arith.addf %390, %429 : vector<16x64xf32>
    %431 = vector.extract_strided_slice %348 {offsets = [16, 0], sizes = [16, 64], strides = [1, 1]} : vector<48x64xf32> to vector<16x64xf32>
    %cst_353 = arith.constant 0.000000e+00 : f32
    %432 = vector.broadcast %cst_353 : f32 to vector<16x64xf32>
    %c1_354 = arith.constant 1 : index
    %c0_355 = arith.constant 0 : index
    %c0_356 = arith.constant 0 : index
    %c0_357 = arith.constant 0 : index
    %433 = vector.load %arg4[%c1_354, %c0_355, %c0_356, %c0_357] : memref<2x2x64x32xf32, #tpu.memory_space<vmem>>, vector<1x1x64x32xf32>
    %434 = vector.shape_cast %433 : vector<1x1x64x32xf32> to vector<64x32xf32>
    %cst_358 = arith.constant dense<0.000000e+00> : vector<16x32xf32>
    %435 = tpu.matmul %431, %434, %cst_358 {dimension_numbers = #tpu.dot_dimension_numbers<[1], [0], [0], [1], [0, 0, 1, 1], [], []>} : vector<16x64xf32>, vector<64x32xf32>, vector<16x32xf32> -> vector<16x32xf32>
    %c1_359 = arith.constant 1 : index
    %c0_360 = arith.constant 0 : index
    %c0_361 = arith.constant 0 : index
    %c0_362 = arith.constant 0 : index
    %436 = vector.load %arg7[%c1_359, %c0_360, %c0_361, %c0_362] : memref<2x2x1x32xf32, #tpu.memory_space<vmem>>, vector<1x1x1x32xf32>
    %437 = vector.shape_cast %436 : vector<1x1x1x32xf32> to vector<1x32xf32>
    %438 = vector.broadcast %437 : vector<1x32xf32> to vector<16x32xf32>
    %439 = arith.addf %435, %438 : vector<16x32xf32>
    %c1_363 = arith.constant 1 : index
    %c0_364 = arith.constant 0 : index
    %c0_365 = arith.constant 0 : index
    %c0_366 = arith.constant 0 : index
    %440 = vector.load %arg5[%c1_363, %c0_364, %c0_365, %c0_366] : memref<2x2x64x32xf32, #tpu.memory_space<vmem>>, vector<1x1x64x32xf32>
    %441 = vector.shape_cast %440 : vector<1x1x64x32xf32> to vector<64x32xf32>
    %cst_367 = arith.constant dense<0.000000e+00> : vector<16x32xf32>
    %442 = tpu.matmul %431, %441, %cst_367 {dimension_numbers = #tpu.dot_dimension_numbers<[1], [0], [0], [1], [0, 0, 1, 1], [], []>} : vector<16x64xf32>, vector<64x32xf32>, vector<16x32xf32> -> vector<16x32xf32>
    %c1_368 = arith.constant 1 : index
    %c0_369 = arith.constant 0 : index
    %c0_370 = arith.constant 0 : index
    %c0_371 = arith.constant 0 : index
    %443 = vector.load %arg8[%c1_368, %c0_369, %c0_370, %c0_371] : memref<2x2x1x32xf32, #tpu.memory_space<vmem>>, vector<1x1x1x32xf32>
    %444 = vector.shape_cast %443 : vector<1x1x1x32xf32> to vector<1x32xf32>
    %445 = vector.broadcast %444 : vector<1x32xf32> to vector<16x32xf32>
    %446 = arith.addf %442, %445 : vector<16x32xf32>
    %c1_372 = arith.constant 1 : index
    %c0_373 = arith.constant 0 : index
    %c0_374 = arith.constant 0 : index
    %c0_375 = arith.constant 0 : index
    %447 = vector.load %arg6[%c1_372, %c0_373, %c0_374, %c0_375] : memref<2x2x64x32xf32, #tpu.memory_space<vmem>>, vector<1x1x64x32xf32>
    %448 = vector.shape_cast %447 : vector<1x1x64x32xf32> to vector<64x32xf32>
    %cst_376 = arith.constant dense<0.000000e+00> : vector<16x32xf32>
    %449 = tpu.matmul %431, %448, %cst_376 {dimension_numbers = #tpu.dot_dimension_numbers<[1], [0], [0], [1], [0, 0, 1, 1], [], []>} : vector<16x64xf32>, vector<64x32xf32>, vector<16x32xf32> -> vector<16x32xf32>
    %c1_377 = arith.constant 1 : index
    %c0_378 = arith.constant 0 : index
    %c0_379 = arith.constant 0 : index
    %c0_380 = arith.constant 0 : index
    %450 = vector.load %arg9[%c1_377, %c0_378, %c0_379, %c0_380] : memref<2x2x1x32xf32, #tpu.memory_space<vmem>>, vector<1x1x1x32xf32>
    %451 = vector.shape_cast %450 : vector<1x1x1x32xf32> to vector<1x32xf32>
    %452 = vector.broadcast %451 : vector<1x32xf32> to vector<16x32xf32>
    %453 = arith.addf %449, %452 : vector<16x32xf32>
    %cst_381 = arith.constant dense<0.000000e+00> : vector<16x16xf32>
    %454 = tpu.matmul %439, %446, %cst_381 {dimension_numbers = #tpu.dot_dimension_numbers<[1], [1], [0], [0], [0, 0, 1, 0], [], []>} : vector<16x32xf32>, vector<16x32xf32>, vector<16x16xf32> -> vector<16x16xf32>
    %cst_382 = arith.constant 0.176776692 : f32
    %455 = vector.broadcast %cst_382 : f32 to vector<16x16xf32>
    %456 = arith.mulf %454, %455 : vector<16x16xf32>
    %457 = arith.addf %456, %1 : vector<16x16xf32>
    %cst_383 = arith.constant dense<0xFF800000> : vector<16xf32>
    %458 = vector.multi_reduction <maximumf>, %457, %cst_383 [1] : vector<16x16xf32> to vector<16xf32>
    %459 = vector.shape_cast %458 : vector<16xf32> to vector<16x1xf32>
    %460 = vector.broadcast %459 : vector<16x1xf32> to vector<16x16xf32>
    %461 = arith.subf %457, %460 : vector<16x16xf32>
    %462 = math.exp %461 : vector<16x16xf32>
    %cst_384 = arith.constant dense<0.000000e+00> : vector<16xf32>
    %463 = vector.multi_reduction <add>, %462, %cst_384 [1] : vector<16x16xf32> to vector<16xf32>
    %464 = vector.shape_cast %463 : vector<16xf32> to vector<16x1xf32>
    %465 = tpu.reciprocal %464 {approx = true} : vector<16x1xf32> -> vector<16x1xf32>
    %466 = vector.broadcast %465 : vector<16x1xf32> to vector<16x16xf32>
    %467 = arith.mulf %462, %466 : vector<16x16xf32>
    %cst_385 = arith.constant dense<0.000000e+00> : vector<16x32xf32>
    %468 = tpu.matmul %467, %453, %cst_385 {dimension_numbers = #tpu.dot_dimension_numbers<[1], [0], [0], [1], [0, 0, 1, 1], [], []>} : vector<16x16xf32>, vector<16x32xf32>, vector<16x32xf32> -> vector<16x32xf32>
    %c1_386 = arith.constant 1 : index
    %c0_387 = arith.constant 0 : index
    %c0_388 = arith.constant 0 : index
    %c0_389 = arith.constant 0 : index
    %469 = vector.load %arg10[%c1_386, %c0_387, %c0_388, %c0_389] : memref<2x2x32x64xf32, #tpu.memory_space<vmem>>, vector<1x1x32x64xf32>
    %470 = vector.shape_cast %469 : vector<1x1x32x64xf32> to vector<32x64xf32>
    %cst_390 = arith.constant dense<0.000000e+00> : vector<16x64xf32>
    %471 = tpu.matmul %468, %470, %cst_390 {dimension_numbers = #tpu.dot_dimension_numbers<[1], [0], [0], [1], [0, 0, 1, 1], [], []>} : vector<16x32xf32>, vector<32x64xf32>, vector<16x64xf32> -> vector<16x64xf32>
    %472 = arith.addf %432, %471 : vector<16x64xf32>
    %c1_391 = arith.constant 1 : index
    %c1_392 = arith.constant 1 : index
    %c0_393 = arith.constant 0 : index
    %c0_394 = arith.constant 0 : index
    %473 = vector.load %arg4[%c1_391, %c1_392, %c0_393, %c0_394] : memref<2x2x64x32xf32, #tpu.memory_space<vmem>>, vector<1x1x64x32xf32>
    %474 = vector.shape_cast %473 : vector<1x1x64x32xf32> to vector<64x32xf32>
    %cst_395 = arith.constant dense<0.000000e+00> : vector<16x32xf32>
    %475 = tpu.matmul %431, %474, %cst_395 {dimension_numbers = #tpu.dot_dimension_numbers<[1], [0], [0], [1], [0, 0, 1, 1], [], []>} : vector<16x64xf32>, vector<64x32xf32>, vector<16x32xf32> -> vector<16x32xf32>
    %c1_396 = arith.constant 1 : index
    %c1_397 = arith.constant 1 : index
    %c0_398 = arith.constant 0 : index
    %c0_399 = arith.constant 0 : index
    %476 = vector.load %arg7[%c1_396, %c1_397, %c0_398, %c0_399] : memref<2x2x1x32xf32, #tpu.memory_space<vmem>>, vector<1x1x1x32xf32>
    %477 = vector.shape_cast %476 : vector<1x1x1x32xf32> to vector<1x32xf32>
    %478 = vector.broadcast %477 : vector<1x32xf32> to vector<16x32xf32>
    %479 = arith.addf %475, %478 : vector<16x32xf32>
    %c1_400 = arith.constant 1 : index
    %c1_401 = arith.constant 1 : index
    %c0_402 = arith.constant 0 : index
    %c0_403 = arith.constant 0 : index
    %480 = vector.load %arg5[%c1_400, %c1_401, %c0_402, %c0_403] : memref<2x2x64x32xf32, #tpu.memory_space<vmem>>, vector<1x1x64x32xf32>
    %481 = vector.shape_cast %480 : vector<1x1x64x32xf32> to vector<64x32xf32>
    %cst_404 = arith.constant dense<0.000000e+00> : vector<16x32xf32>
    %482 = tpu.matmul %431, %481, %cst_404 {dimension_numbers = #tpu.dot_dimension_numbers<[1], [0], [0], [1], [0, 0, 1, 1], [], []>} : vector<16x64xf32>, vector<64x32xf32>, vector<16x32xf32> -> vector<16x32xf32>
    %c1_405 = arith.constant 1 : index
    %c1_406 = arith.constant 1 : index
    %c0_407 = arith.constant 0 : index
    %c0_408 = arith.constant 0 : index
    %483 = vector.load %arg8[%c1_405, %c1_406, %c0_407, %c0_408] : memref<2x2x1x32xf32, #tpu.memory_space<vmem>>, vector<1x1x1x32xf32>
    %484 = vector.shape_cast %483 : vector<1x1x1x32xf32> to vector<1x32xf32>
    %485 = vector.broadcast %484 : vector<1x32xf32> to vector<16x32xf32>
    %486 = arith.addf %482, %485 : vector<16x32xf32>
    %c1_409 = arith.constant 1 : index
    %c1_410 = arith.constant 1 : index
    %c0_411 = arith.constant 0 : index
    %c0_412 = arith.constant 0 : index
    %487 = vector.load %arg6[%c1_409, %c1_410, %c0_411, %c0_412] : memref<2x2x64x32xf32, #tpu.memory_space<vmem>>, vector<1x1x64x32xf32>
    %488 = vector.shape_cast %487 : vector<1x1x64x32xf32> to vector<64x32xf32>
    %cst_413 = arith.constant dense<0.000000e+00> : vector<16x32xf32>
    %489 = tpu.matmul %431, %488, %cst_413 {dimension_numbers = #tpu.dot_dimension_numbers<[1], [0], [0], [1], [0, 0, 1, 1], [], []>} : vector<16x64xf32>, vector<64x32xf32>, vector<16x32xf32> -> vector<16x32xf32>
    %c1_414 = arith.constant 1 : index
    %c1_415 = arith.constant 1 : index
    %c0_416 = arith.constant 0 : index
    %c0_417 = arith.constant 0 : index
    %490 = vector.load %arg9[%c1_414, %c1_415, %c0_416, %c0_417] : memref<2x2x1x32xf32, #tpu.memory_space<vmem>>, vector<1x1x1x32xf32>
    %491 = vector.shape_cast %490 : vector<1x1x1x32xf32> to vector<1x32xf32>
    %492 = vector.broadcast %491 : vector<1x32xf32> to vector<16x32xf32>
    %493 = arith.addf %489, %492 : vector<16x32xf32>
    %cst_418 = arith.constant dense<0.000000e+00> : vector<16x16xf32>
    %494 = tpu.matmul %479, %486, %cst_418 {dimension_numbers = #tpu.dot_dimension_numbers<[1], [1], [0], [0], [0, 0, 1, 0], [], []>} : vector<16x32xf32>, vector<16x32xf32>, vector<16x16xf32> -> vector<16x16xf32>
    %cst_419 = arith.constant 0.176776692 : f32
    %495 = vector.broadcast %cst_419 : f32 to vector<16x16xf32>
    %496 = arith.mulf %494, %495 : vector<16x16xf32>
    %497 = arith.addf %496, %1 : vector<16x16xf32>
    %cst_420 = arith.constant dense<0xFF800000> : vector<16xf32>
    %498 = vector.multi_reduction <maximumf>, %497, %cst_420 [1] : vector<16x16xf32> to vector<16xf32>
    %499 = vector.shape_cast %498 : vector<16xf32> to vector<16x1xf32>
    %500 = vector.broadcast %499 : vector<16x1xf32> to vector<16x16xf32>
    %501 = arith.subf %497, %500 : vector<16x16xf32>
    %502 = math.exp %501 : vector<16x16xf32>
    %cst_421 = arith.constant dense<0.000000e+00> : vector<16xf32>
    %503 = vector.multi_reduction <add>, %502, %cst_421 [1] : vector<16x16xf32> to vector<16xf32>
    %504 = vector.shape_cast %503 : vector<16xf32> to vector<16x1xf32>
    %505 = tpu.reciprocal %504 {approx = true} : vector<16x1xf32> -> vector<16x1xf32>
    %506 = vector.broadcast %505 : vector<16x1xf32> to vector<16x16xf32>
    %507 = arith.mulf %502, %506 : vector<16x16xf32>
    %cst_422 = arith.constant dense<0.000000e+00> : vector<16x32xf32>
    %508 = tpu.matmul %507, %493, %cst_422 {dimension_numbers = #tpu.dot_dimension_numbers<[1], [0], [0], [1], [0, 0, 1, 1], [], []>} : vector<16x16xf32>, vector<16x32xf32>, vector<16x32xf32> -> vector<16x32xf32>
    %c1_423 = arith.constant 1 : index
    %c1_424 = arith.constant 1 : index
    %c0_425 = arith.constant 0 : index
    %c0_426 = arith.constant 0 : index
    %509 = vector.load %arg10[%c1_423, %c1_424, %c0_425, %c0_426] : memref<2x2x32x64xf32, #tpu.memory_space<vmem>>, vector<1x1x32x64xf32>
    %510 = vector.shape_cast %509 : vector<1x1x32x64xf32> to vector<32x64xf32>
    %cst_427 = arith.constant dense<0.000000e+00> : vector<16x64xf32>
    %511 = tpu.matmul %508, %510, %cst_427 {dimension_numbers = #tpu.dot_dimension_numbers<[1], [0], [0], [1], [0, 0, 1, 1], [], []>} : vector<16x32xf32>, vector<32x64xf32>, vector<16x64xf32> -> vector<16x64xf32>
    %512 = arith.addf %472, %511 : vector<16x64xf32>
    %513 = vector.extract_strided_slice %348 {offsets = [32, 0], sizes = [16, 64], strides = [1, 1]} : vector<48x64xf32> to vector<16x64xf32>
    %cst_428 = arith.constant 0.000000e+00 : f32
    %514 = vector.broadcast %cst_428 : f32 to vector<16x64xf32>
    %c1_429 = arith.constant 1 : index
    %c0_430 = arith.constant 0 : index
    %c0_431 = arith.constant 0 : index
    %c0_432 = arith.constant 0 : index
    %515 = vector.load %arg4[%c1_429, %c0_430, %c0_431, %c0_432] : memref<2x2x64x32xf32, #tpu.memory_space<vmem>>, vector<1x1x64x32xf32>
    %516 = vector.shape_cast %515 : vector<1x1x64x32xf32> to vector<64x32xf32>
    %cst_433 = arith.constant dense<0.000000e+00> : vector<16x32xf32>
    %517 = tpu.matmul %513, %516, %cst_433 {dimension_numbers = #tpu.dot_dimension_numbers<[1], [0], [0], [1], [0, 0, 1, 1], [], []>} : vector<16x64xf32>, vector<64x32xf32>, vector<16x32xf32> -> vector<16x32xf32>
    %c1_434 = arith.constant 1 : index
    %c0_435 = arith.constant 0 : index
    %c0_436 = arith.constant 0 : index
    %c0_437 = arith.constant 0 : index
    %518 = vector.load %arg7[%c1_434, %c0_435, %c0_436, %c0_437] : memref<2x2x1x32xf32, #tpu.memory_space<vmem>>, vector<1x1x1x32xf32>
    %519 = vector.shape_cast %518 : vector<1x1x1x32xf32> to vector<1x32xf32>
    %520 = vector.broadcast %519 : vector<1x32xf32> to vector<16x32xf32>
    %521 = arith.addf %517, %520 : vector<16x32xf32>
    %c1_438 = arith.constant 1 : index
    %c0_439 = arith.constant 0 : index
    %c0_440 = arith.constant 0 : index
    %c0_441 = arith.constant 0 : index
    %522 = vector.load %arg5[%c1_438, %c0_439, %c0_440, %c0_441] : memref<2x2x64x32xf32, #tpu.memory_space<vmem>>, vector<1x1x64x32xf32>
    %523 = vector.shape_cast %522 : vector<1x1x64x32xf32> to vector<64x32xf32>
    %cst_442 = arith.constant dense<0.000000e+00> : vector<16x32xf32>
    %524 = tpu.matmul %513, %523, %cst_442 {dimension_numbers = #tpu.dot_dimension_numbers<[1], [0], [0], [1], [0, 0, 1, 1], [], []>} : vector<16x64xf32>, vector<64x32xf32>, vector<16x32xf32> -> vector<16x32xf32>
    %c1_443 = arith.constant 1 : index
    %c0_444 = arith.constant 0 : index
    %c0_445 = arith.constant 0 : index
    %c0_446 = arith.constant 0 : index
    %525 = vector.load %arg8[%c1_443, %c0_444, %c0_445, %c0_446] : memref<2x2x1x32xf32, #tpu.memory_space<vmem>>, vector<1x1x1x32xf32>
    %526 = vector.shape_cast %525 : vector<1x1x1x32xf32> to vector<1x32xf32>
    %527 = vector.broadcast %526 : vector<1x32xf32> to vector<16x32xf32>
    %528 = arith.addf %524, %527 : vector<16x32xf32>
    %c1_447 = arith.constant 1 : index
    %c0_448 = arith.constant 0 : index
    %c0_449 = arith.constant 0 : index
    %c0_450 = arith.constant 0 : index
    %529 = vector.load %arg6[%c1_447, %c0_448, %c0_449, %c0_450] : memref<2x2x64x32xf32, #tpu.memory_space<vmem>>, vector<1x1x64x32xf32>
    %530 = vector.shape_cast %529 : vector<1x1x64x32xf32> to vector<64x32xf32>
    %cst_451 = arith.constant dense<0.000000e+00> : vector<16x32xf32>
    %531 = tpu.matmul %513, %530, %cst_451 {dimension_numbers = #tpu.dot_dimension_numbers<[1], [0], [0], [1], [0, 0, 1, 1], [], []>} : vector<16x64xf32>, vector<64x32xf32>, vector<16x32xf32> -> vector<16x32xf32>
    %c1_452 = arith.constant 1 : index
    %c0_453 = arith.constant 0 : index
    %c0_454 = arith.constant 0 : index
    %c0_455 = arith.constant 0 : index
    %532 = vector.load %arg9[%c1_452, %c0_453, %c0_454, %c0_455] : memref<2x2x1x32xf32, #tpu.memory_space<vmem>>, vector<1x1x1x32xf32>
    %533 = vector.shape_cast %532 : vector<1x1x1x32xf32> to vector<1x32xf32>
    %534 = vector.broadcast %533 : vector<1x32xf32> to vector<16x32xf32>
    %535 = arith.addf %531, %534 : vector<16x32xf32>
    %cst_456 = arith.constant dense<0.000000e+00> : vector<16x16xf32>
    %536 = tpu.matmul %521, %528, %cst_456 {dimension_numbers = #tpu.dot_dimension_numbers<[1], [1], [0], [0], [0, 0, 1, 0], [], []>} : vector<16x32xf32>, vector<16x32xf32>, vector<16x16xf32> -> vector<16x16xf32>
    %cst_457 = arith.constant 0.176776692 : f32
    %537 = vector.broadcast %cst_457 : f32 to vector<16x16xf32>
    %538 = arith.mulf %536, %537 : vector<16x16xf32>
    %539 = arith.addf %538, %1 : vector<16x16xf32>
    %cst_458 = arith.constant dense<0xFF800000> : vector<16xf32>
    %540 = vector.multi_reduction <maximumf>, %539, %cst_458 [1] : vector<16x16xf32> to vector<16xf32>
    %541 = vector.shape_cast %540 : vector<16xf32> to vector<16x1xf32>
    %542 = vector.broadcast %541 : vector<16x1xf32> to vector<16x16xf32>
    %543 = arith.subf %539, %542 : vector<16x16xf32>
    %544 = math.exp %543 : vector<16x16xf32>
    %cst_459 = arith.constant dense<0.000000e+00> : vector<16xf32>
    %545 = vector.multi_reduction <add>, %544, %cst_459 [1] : vector<16x16xf32> to vector<16xf32>
    %546 = vector.shape_cast %545 : vector<16xf32> to vector<16x1xf32>
    %547 = tpu.reciprocal %546 {approx = true} : vector<16x1xf32> -> vector<16x1xf32>
    %548 = vector.broadcast %547 : vector<16x1xf32> to vector<16x16xf32>
    %549 = arith.mulf %544, %548 : vector<16x16xf32>
    %cst_460 = arith.constant dense<0.000000e+00> : vector<16x32xf32>
    %550 = tpu.matmul %549, %535, %cst_460 {dimension_numbers = #tpu.dot_dimension_numbers<[1], [0], [0], [1], [0, 0, 1, 1], [], []>} : vector<16x16xf32>, vector<16x32xf32>, vector<16x32xf32> -> vector<16x32xf32>
    %c1_461 = arith.constant 1 : index
    %c0_462 = arith.constant 0 : index
    %c0_463 = arith.constant 0 : index
    %c0_464 = arith.constant 0 : index
    %551 = vector.load %arg10[%c1_461, %c0_462, %c0_463, %c0_464] : memref<2x2x32x64xf32, #tpu.memory_space<vmem>>, vector<1x1x32x64xf32>
    %552 = vector.shape_cast %551 : vector<1x1x32x64xf32> to vector<32x64xf32>
    %cst_465 = arith.constant dense<0.000000e+00> : vector<16x64xf32>
    %553 = tpu.matmul %550, %552, %cst_465 {dimension_numbers = #tpu.dot_dimension_numbers<[1], [0], [0], [1], [0, 0, 1, 1], [], []>} : vector<16x32xf32>, vector<32x64xf32>, vector<16x64xf32> -> vector<16x64xf32>
    %554 = arith.addf %514, %553 : vector<16x64xf32>
    %c1_466 = arith.constant 1 : index
    %c1_467 = arith.constant 1 : index
    %c0_468 = arith.constant 0 : index
    %c0_469 = arith.constant 0 : index
    %555 = vector.load %arg4[%c1_466, %c1_467, %c0_468, %c0_469] : memref<2x2x64x32xf32, #tpu.memory_space<vmem>>, vector<1x1x64x32xf32>
    %556 = vector.shape_cast %555 : vector<1x1x64x32xf32> to vector<64x32xf32>
    %cst_470 = arith.constant dense<0.000000e+00> : vector<16x32xf32>
    %557 = tpu.matmul %513, %556, %cst_470 {dimension_numbers = #tpu.dot_dimension_numbers<[1], [0], [0], [1], [0, 0, 1, 1], [], []>} : vector<16x64xf32>, vector<64x32xf32>, vector<16x32xf32> -> vector<16x32xf32>
    %c1_471 = arith.constant 1 : index
    %c1_472 = arith.constant 1 : index
    %c0_473 = arith.constant 0 : index
    %c0_474 = arith.constant 0 : index
    %558 = vector.load %arg7[%c1_471, %c1_472, %c0_473, %c0_474] : memref<2x2x1x32xf32, #tpu.memory_space<vmem>>, vector<1x1x1x32xf32>
    %559 = vector.shape_cast %558 : vector<1x1x1x32xf32> to vector<1x32xf32>
    %560 = vector.broadcast %559 : vector<1x32xf32> to vector<16x32xf32>
    %561 = arith.addf %557, %560 : vector<16x32xf32>
    %c1_475 = arith.constant 1 : index
    %c1_476 = arith.constant 1 : index
    %c0_477 = arith.constant 0 : index
    %c0_478 = arith.constant 0 : index
    %562 = vector.load %arg5[%c1_475, %c1_476, %c0_477, %c0_478] : memref<2x2x64x32xf32, #tpu.memory_space<vmem>>, vector<1x1x64x32xf32>
    %563 = vector.shape_cast %562 : vector<1x1x64x32xf32> to vector<64x32xf32>
    %cst_479 = arith.constant dense<0.000000e+00> : vector<16x32xf32>
    %564 = tpu.matmul %513, %563, %cst_479 {dimension_numbers = #tpu.dot_dimension_numbers<[1], [0], [0], [1], [0, 0, 1, 1], [], []>} : vector<16x64xf32>, vector<64x32xf32>, vector<16x32xf32> -> vector<16x32xf32>
    %c1_480 = arith.constant 1 : index
    %c1_481 = arith.constant 1 : index
    %c0_482 = arith.constant 0 : index
    %c0_483 = arith.constant 0 : index
    %565 = vector.load %arg8[%c1_480, %c1_481, %c0_482, %c0_483] : memref<2x2x1x32xf32, #tpu.memory_space<vmem>>, vector<1x1x1x32xf32>
    %566 = vector.shape_cast %565 : vector<1x1x1x32xf32> to vector<1x32xf32>
    %567 = vector.broadcast %566 : vector<1x32xf32> to vector<16x32xf32>
    %568 = arith.addf %564, %567 : vector<16x32xf32>
    %c1_484 = arith.constant 1 : index
    %c1_485 = arith.constant 1 : index
    %c0_486 = arith.constant 0 : index
    %c0_487 = arith.constant 0 : index
    %569 = vector.load %arg6[%c1_484, %c1_485, %c0_486, %c0_487] : memref<2x2x64x32xf32, #tpu.memory_space<vmem>>, vector<1x1x64x32xf32>
    %570 = vector.shape_cast %569 : vector<1x1x64x32xf32> to vector<64x32xf32>
    %cst_488 = arith.constant dense<0.000000e+00> : vector<16x32xf32>
    %571 = tpu.matmul %513, %570, %cst_488 {dimension_numbers = #tpu.dot_dimension_numbers<[1], [0], [0], [1], [0, 0, 1, 1], [], []>} : vector<16x64xf32>, vector<64x32xf32>, vector<16x32xf32> -> vector<16x32xf32>
    %c1_489 = arith.constant 1 : index
    %c1_490 = arith.constant 1 : index
    %c0_491 = arith.constant 0 : index
    %c0_492 = arith.constant 0 : index
    %572 = vector.load %arg9[%c1_489, %c1_490, %c0_491, %c0_492] : memref<2x2x1x32xf32, #tpu.memory_space<vmem>>, vector<1x1x1x32xf32>
    %573 = vector.shape_cast %572 : vector<1x1x1x32xf32> to vector<1x32xf32>
    %574 = vector.broadcast %573 : vector<1x32xf32> to vector<16x32xf32>
    %575 = arith.addf %571, %574 : vector<16x32xf32>
    %cst_493 = arith.constant dense<0.000000e+00> : vector<16x16xf32>
    %576 = tpu.matmul %561, %568, %cst_493 {dimension_numbers = #tpu.dot_dimension_numbers<[1], [1], [0], [0], [0, 0, 1, 0], [], []>} : vector<16x32xf32>, vector<16x32xf32>, vector<16x16xf32> -> vector<16x16xf32>
    %cst_494 = arith.constant 0.176776692 : f32
    %577 = vector.broadcast %cst_494 : f32 to vector<16x16xf32>
    %578 = arith.mulf %576, %577 : vector<16x16xf32>
    %579 = arith.addf %578, %1 : vector<16x16xf32>
    %cst_495 = arith.constant dense<0xFF800000> : vector<16xf32>
    %580 = vector.multi_reduction <maximumf>, %579, %cst_495 [1] : vector<16x16xf32> to vector<16xf32>
    %581 = vector.shape_cast %580 : vector<16xf32> to vector<16x1xf32>
    %582 = vector.broadcast %581 : vector<16x1xf32> to vector<16x16xf32>
    %583 = arith.subf %579, %582 : vector<16x16xf32>
    %584 = math.exp %583 : vector<16x16xf32>
    %cst_496 = arith.constant dense<0.000000e+00> : vector<16xf32>
    %585 = vector.multi_reduction <add>, %584, %cst_496 [1] : vector<16x16xf32> to vector<16xf32>
    %586 = vector.shape_cast %585 : vector<16xf32> to vector<16x1xf32>
    %587 = tpu.reciprocal %586 {approx = true} : vector<16x1xf32> -> vector<16x1xf32>
    %588 = vector.broadcast %587 : vector<16x1xf32> to vector<16x16xf32>
    %589 = arith.mulf %584, %588 : vector<16x16xf32>
    %cst_497 = arith.constant dense<0.000000e+00> : vector<16x32xf32>
    %590 = tpu.matmul %589, %575, %cst_497 {dimension_numbers = #tpu.dot_dimension_numbers<[1], [0], [0], [1], [0, 0, 1, 1], [], []>} : vector<16x16xf32>, vector<16x32xf32>, vector<16x32xf32> -> vector<16x32xf32>
    %c1_498 = arith.constant 1 : index
    %c1_499 = arith.constant 1 : index
    %c0_500 = arith.constant 0 : index
    %c0_501 = arith.constant 0 : index
    %591 = vector.load %arg10[%c1_498, %c1_499, %c0_500, %c0_501] : memref<2x2x32x64xf32, #tpu.memory_space<vmem>>, vector<1x1x32x64xf32>
    %592 = vector.shape_cast %591 : vector<1x1x32x64xf32> to vector<32x64xf32>
    %cst_502 = arith.constant dense<0.000000e+00> : vector<16x64xf32>
    %593 = tpu.matmul %590, %592, %cst_502 {dimension_numbers = #tpu.dot_dimension_numbers<[1], [0], [0], [1], [0, 0, 1, 1], [], []>} : vector<16x32xf32>, vector<32x64xf32>, vector<16x64xf32> -> vector<16x64xf32>
    %594 = arith.addf %554, %593 : vector<16x64xf32>
    %595 = tpu.concatenate %430, %512, %594 in 0 : vector<16x64xf32>, vector<16x64xf32>, vector<16x64xf32> -> vector<48x64xf32>
    %c1_503 = arith.constant 1 : index
    %c0_504 = arith.constant 0 : index
    %c0_505 = arith.constant 0 : index
    %596 = vector.load %arg11[%c1_503, %c0_504, %c0_505] : memref<2x1x64xf32, #tpu.memory_space<vmem>>, vector<1x1x64xf32>
    %597 = vector.shape_cast %596 : vector<1x1x64xf32> to vector<1x64xf32>
    %598 = vector.broadcast %597 : vector<1x64xf32> to vector<48x64xf32>
    %599 = arith.addf %595, %598 : vector<48x64xf32>
    %600 = arith.addf %324, %599 : vector<48x64xf32>
    %c1_506 = arith.constant 1 : index
    %c0_507 = arith.constant 0 : index
    %c0_508 = arith.constant 0 : index
    %601 = vector.load %arg12[%c1_506, %c0_507, %c0_508] : memref<2x1x64xf32, #tpu.memory_space<vmem>>, vector<1x1x64xf32>
    %602 = vector.shape_cast %601 : vector<1x1x64xf32> to vector<1x64xf32>
    %c1_509 = arith.constant 1 : index
    %c0_510 = arith.constant 0 : index
    %c0_511 = arith.constant 0 : index
    %603 = vector.load %arg13[%c1_509, %c0_510, %c0_511] : memref<2x1x64xf32, #tpu.memory_space<vmem>>, vector<1x1x64xf32>
    %604 = vector.shape_cast %603 : vector<1x1x64xf32> to vector<1x64xf32>
    %cst_512 = arith.constant dense<0.000000e+00> : vector<48xf32>
    %605 = vector.multi_reduction <add>, %600, %cst_512 [1] : vector<48x64xf32> to vector<48xf32>
    %606 = vector.shape_cast %605 : vector<48xf32> to vector<48x1xf32>
    %cst_513 = arith.constant 6.400000e+01 : f32
    %607 = vector.broadcast %cst_513 : f32 to vector<48x1xf32>
    %608 = arith.divf %606, %607 : vector<48x1xf32>
    %609 = vector.broadcast %608 : vector<48x1xf32> to vector<48x64xf32>
    %610 = arith.subf %600, %609 : vector<48x64xf32>
    %611 = arith.mulf %610, %610 : vector<48x64xf32>
    %cst_514 = arith.constant dense<0.000000e+00> : vector<48xf32>
    %612 = vector.multi_reduction <add>, %611, %cst_514 [1] : vector<48x64xf32> to vector<48xf32>
    %613 = vector.shape_cast %612 : vector<48xf32> to vector<48x1xf32>
    %cst_515 = arith.constant 6.400000e+01 : f32
    %614 = vector.broadcast %cst_515 : f32 to vector<48x1xf32>
    %615 = arith.divf %613, %614 : vector<48x1xf32>
    %cst_516 = arith.constant 9.99999974E-6 : f32
    %616 = vector.broadcast %cst_516 : f32 to vector<48x1xf32>
    %617 = arith.addf %615, %616 : vector<48x1xf32>
    %618 = math.rsqrt %617 : vector<48x1xf32>
    %619 = vector.broadcast %618 : vector<48x1xf32> to vector<48x64xf32>
    %620 = arith.mulf %610, %619 : vector<48x64xf32>
    %621 = vector.broadcast %602 : vector<1x64xf32> to vector<48x64xf32>
    %622 = arith.mulf %620, %621 : vector<48x64xf32>
    %623 = vector.broadcast %604 : vector<1x64xf32> to vector<48x64xf32>
    %624 = arith.addf %622, %623 : vector<48x64xf32>
    %c1_517 = arith.constant 1 : index
    %c0_518 = arith.constant 0 : index
    %c0_519 = arith.constant 0 : index
    %625 = vector.load %arg14[%c1_517, %c0_518, %c0_519] : memref<2x64x256xf32, #tpu.memory_space<vmem>>, vector<1x64x256xf32>
    %626 = vector.shape_cast %625 : vector<1x64x256xf32> to vector<64x256xf32>
    %cst_520 = arith.constant dense<0.000000e+00> : vector<48x256xf32>
    %627 = tpu.matmul %624, %626, %cst_520 {dimension_numbers = #tpu.dot_dimension_numbers<[1], [0], [0], [1], [0, 0, 1, 1], [], []>} : vector<48x64xf32>, vector<64x256xf32>, vector<48x256xf32> -> vector<48x256xf32>
    %c1_521 = arith.constant 1 : index
    %c0_522 = arith.constant 0 : index
    %c0_523 = arith.constant 0 : index
    %628 = vector.load %arg15[%c1_521, %c0_522, %c0_523] : memref<2x1x256xf32, #tpu.memory_space<vmem>>, vector<1x1x256xf32>
    %629 = vector.shape_cast %628 : vector<1x1x256xf32> to vector<1x256xf32>
    %630 = vector.broadcast %629 : vector<1x256xf32> to vector<48x256xf32>
    %631 = arith.addf %627, %630 : vector<48x256xf32>
    %cst_524 = arith.constant 1.702000e+00 : f32
    %632 = vector.broadcast %cst_524 : f32 to vector<48x256xf32>
    %633 = arith.mulf %632, %631 : vector<48x256xf32>
    %634 = arith.negf %633 : vector<48x256xf32>
    %635 = math.exp %634 : vector<48x256xf32>
    %cst_525 = arith.constant 1.000000e+00 : f32
    %636 = vector.broadcast %cst_525 : f32 to vector<48x256xf32>
    %637 = arith.addf %636, %635 : vector<48x256xf32>
    %638 = arith.divf %636, %637 : vector<48x256xf32>
    %639 = arith.mulf %631, %638 : vector<48x256xf32>
    %c1_526 = arith.constant 1 : index
    %c0_527 = arith.constant 0 : index
    %c0_528 = arith.constant 0 : index
    %640 = vector.load %arg16[%c1_526, %c0_527, %c0_528] : memref<2x256x64xf32, #tpu.memory_space<vmem>>, vector<1x256x64xf32>
    %641 = vector.shape_cast %640 : vector<1x256x64xf32> to vector<256x64xf32>
    %cst_529 = arith.constant dense<0.000000e+00> : vector<48x64xf32>
    %642 = tpu.matmul %639, %641, %cst_529 {dimension_numbers = #tpu.dot_dimension_numbers<[1], [0], [0], [1], [0, 0, 1, 1], [], []>} : vector<48x256xf32>, vector<256x64xf32>, vector<48x64xf32> -> vector<48x64xf32>
    %643 = arith.addf %600, %642 : vector<48x64xf32>
    %c1_530 = arith.constant 1 : index
    %c0_531 = arith.constant 0 : index
    %c0_532 = arith.constant 0 : index
    %644 = vector.load %arg17[%c1_530, %c0_531, %c0_532] : memref<2x1x64xf32, #tpu.memory_space<vmem>>, vector<1x1x64xf32>
    %645 = vector.shape_cast %644 : vector<1x1x64xf32> to vector<1x64xf32>
    %646 = vector.broadcast %645 : vector<1x64xf32> to vector<48x64xf32>
    %647 = arith.addf %643, %646 : vector<48x64xf32>
    %c0_533 = arith.constant 0 : index
    %c0_534 = arith.constant 0 : index
    %648 = vector.load %arg18[%c0_533, %c0_534] : memref<1x64xf32, #tpu.memory_space<vmem>>, vector<1x64xf32>
    %c0_535 = arith.constant 0 : index
    %c0_536 = arith.constant 0 : index
    %649 = vector.load %arg19[%c0_535, %c0_536] : memref<1x64xf32, #tpu.memory_space<vmem>>, vector<1x64xf32>
    %cst_537 = arith.constant dense<0.000000e+00> : vector<48xf32>
    %650 = vector.multi_reduction <add>, %647, %cst_537 [1] : vector<48x64xf32> to vector<48xf32>
    %651 = vector.shape_cast %650 : vector<48xf32> to vector<48x1xf32>
    %cst_538 = arith.constant 6.400000e+01 : f32
    %652 = vector.broadcast %cst_538 : f32 to vector<48x1xf32>
    %653 = arith.divf %651, %652 : vector<48x1xf32>
    %654 = vector.broadcast %653 : vector<48x1xf32> to vector<48x64xf32>
    %655 = arith.subf %647, %654 : vector<48x64xf32>
    %656 = arith.mulf %655, %655 : vector<48x64xf32>
    %cst_539 = arith.constant dense<0.000000e+00> : vector<48xf32>
    %657 = vector.multi_reduction <add>, %656, %cst_539 [1] : vector<48x64xf32> to vector<48xf32>
    %658 = vector.shape_cast %657 : vector<48xf32> to vector<48x1xf32>
    %cst_540 = arith.constant 6.400000e+01 : f32
    %659 = vector.broadcast %cst_540 : f32 to vector<48x1xf32>
    %660 = arith.divf %658, %659 : vector<48x1xf32>
    %cst_541 = arith.constant 9.99999974E-6 : f32
    %661 = vector.broadcast %cst_541 : f32 to vector<48x1xf32>
    %662 = arith.addf %660, %661 : vector<48x1xf32>
    %663 = math.rsqrt %662 : vector<48x1xf32>
    %664 = vector.broadcast %663 : vector<48x1xf32> to vector<48x64xf32>
    %665 = arith.mulf %655, %664 : vector<48x64xf32>
    %666 = vector.broadcast %648 : vector<1x64xf32> to vector<48x64xf32>
    %667 = arith.mulf %665, %666 : vector<48x64xf32>
    %668 = vector.broadcast %649 : vector<1x64xf32> to vector<48x64xf32>
    %669 = arith.addf %667, %668 : vector<48x64xf32>
    %c0_542 = arith.constant 0 : index
    %c0_543 = arith.constant 0 : index
    %670 = vector.load %arg21[%c0_542, %c0_543] : memref<16x48xf32, #tpu.memory_space<vmem>>, vector<16x48xf32>
    %cst_544 = arith.constant dense<0.000000e+00> : vector<16x64xf32>
    %671 = tpu.matmul %670, %669, %cst_544 {dimension_numbers = #tpu.dot_dimension_numbers<[1], [0], [0], [1], [0, 0, 1, 1], [], []>} : vector<16x48xf32>, vector<48x64xf32>, vector<16x64xf32> -> vector<16x64xf32>
    %c0_545 = arith.constant 0 : index
    %c0_546 = arith.constant 0 : index
    %672 = vector.load %arg20[%c0_545, %c0_546] : memref<64x1024xf32, #tpu.memory_space<vmem>>, vector<64x1024xf32>
    %cst_547 = arith.constant dense<0.000000e+00> : vector<16x1024xf32>
    %673 = tpu.matmul %671, %672, %cst_547 {dimension_numbers = #tpu.dot_dimension_numbers<[1], [0], [0], [1], [0, 0, 1, 1], [], []>} : vector<16x64xf32>, vector<64x1024xf32>, vector<16x1024xf32> -> vector<16x1024xf32>
    %674 = arith.mulf %673, %673 : vector<16x1024xf32>
    %cst_548 = arith.constant dense<0.000000e+00> : vector<16xf32>
    %675 = vector.multi_reduction <add>, %674, %cst_548 [1] : vector<16x1024xf32> to vector<16xf32>
    %676 = vector.shape_cast %675 : vector<16xf32> to vector<16x1xf32>
    %cst_549 = arith.constant 1.000000e-24 : f32
    %677 = vector.broadcast %cst_549 : f32 to vector<16x1xf32>
    %678 = arith.addf %676, %677 : vector<16x1xf32>
    %679 = math.rsqrt %678 : vector<16x1xf32>
    %680 = vector.broadcast %679 : vector<16x1xf32> to vector<16x1024xf32>
    %681 = arith.mulf %673, %680 : vector<16x1024xf32>
    %c0_550 = arith.constant 0 : index
    %c0_551 = arith.constant 0 : index
    %682 = vector.load %arg22[%c0_550, %c0_551] : memref<1x1xf32, #tpu.memory_space<vmem>>, vector<1x1xf32>
    %683 = vector.broadcast %682 : vector<1x1xf32> to vector<16x1024xf32>
    %684 = arith.mulf %681, %683 : vector<16x1024xf32>
    %685 = arith.truncf %684 : vector<16x1024xf32> to vector<16x1024xbf16>
    %c0_552 = arith.constant 0 : index
    %c0_553 = arith.constant 0 : index
    %686 = vector.load %arg23[%c0_552, %c0_553] : memref<16x1024xbf16, #tpu.memory_space<vmem>>, vector<16x1024xbf16>
    tpu.vector_store %arg23[%c0_552, %c0_553], %685 {strides = array<i32>} : memref<16x1024xbf16, #tpu.memory_space<vmem>>, vector<16x1024xbf16>,
    return
  }
}

</mosaic_0001>

<bundles_post_ra>
// kernel: custom-call.7
= control target key start
LH: loop header
LB: loop body
LE: loop exit
PB: predicated region body
PF: predicated region fallthrough
CT: control target
= control target key end

     0   :  { %s6_s0 = inlined_call_operand.vmem [shape: f32[32], index: 0, kind: output, shape index: {}]  }

// kernel: custom_clip_np_forward.3
= control target key start
LH: loop header
LB: loop body
LE: loop exit
PB: predicated region body
PF: predicated region fallthrough
CT: control target
= control target key end

     0   :  { %s5704_s15 = smov 0   ;;  %s5706_s16 = smov 0   ;;  %s7687_s0 = inlined_call_operand.vmem [shape: f32[2,1024,16], index: 0, kind: input, shape index: {}]   ;;  %s7688_s1 = inlined_call_operand.vmem [shape: bf16[256,1024], index: 1, kind: input, shape index: {}]   ;;  %s7689_s2 = inlined_call_operand.vmem [shape: bf16[1024,256], index: 2, kind: input, shape index: {}]   ;;  %s7690_s3 = inlined_call_operand.vmem [shape: bf16[16,1024], index: 3, kind: input, shape index: {}]   ;;  %s7691_s4 = inlined_call_operand.vmem [shape: f32[2,16,16], index: 4, kind: output, shape index: {}]  }
   0x1   :  { %s5708_s17 = smov 0  }
   0x2 LB: > { %s26_s18 = sadd.s32 1, %s5672_s16  ;;  %p4466_p0 = scmp.ge.s32.totalorder %s5676_s17, 1  ;;  %s5676_s17 = sphi %s5708_s17, %s14_s17   ;;  %s5672_s16 = sphi %s5706_s16, %s7821_s16   ;;  %s5668_s15 = sphi %s5704_s15, %s7820_s15  }
   0x3   : > { %p28_p1 = scmp.ge.s32.totalorder %s26_s18, 2  ;;  %p181_p2 = scmp.lt.s32.totalorder %s5676_s17, 3 }
   0x5   : > { %s7823_s18 = smov (%p28_p1, %s26_s18), 0  ;;  %p182_p3 = pnand %p4466_p0, %p181_p2 }
   0x7   : > { %185 = sbr.rel (%p182_p3) target bundleno = 1318 (0x526), region = 36 }
   0xe   : > { %p213_p4 = scmp.lt.s32.totalorder %s5668_s15, 1  ;;  %v5725_v0 = vld [vmem:[%s7688_s1] sm:$0xff]  ;;  %v5735_v2 = vld [vmem:[%s7688_s1 + $0x8] sm:$0xff]  ;;  %vm3835_vm0 = vcmask 130048  }
   0xf   : > { %v5730_v1 = vld [vmem:[%s7688_s1 + $0x20] sm:$0xff]  ;;  %v5742_v4 = vld [vmem:[%s7688_s1 + $0x28] sm:$0xff] }
  0x10   : > { %v4472_v3 = vcombine.high %v5725_v0, %v5730_v1  ;;  %s7825_s15 = smov (!%p213_p4, %s5668_s15), 1  ;;  %v4474_v5 = vcombine.high %v5735_v2, %v5742_v4 }
  0x11   : > { %s4737_s27 = sshll.u32 %s7825_s15, 10  ;;  %s4738_s24 = sshll.u32 %s7825_s15, 4 }
  0x12   : > { %1222 = vmatprep.mubr.bf16.mxu0 %v4472_v3  ;;  %1383 = vmatprep.mubr.bf16.mxu1 %v4474_v5  ;;  %s5752_s30 = scalar_lea.vmem %s7687_s0, %s4737_s27  ;;  %s228_s27 = scalar_lea.vmem %s7691_s4, %s4738_s24 }
  0x13   : > { %v246_v6 = vld [vmem:[%s5752_s30 + $0x80] sm:$0xff]  ;;  %v247_v7 = vld [vmem:[%s5752_s30 + $0x88] sm:$0xff]  ;;  %v248_v17 = vld [vmem:[%s5752_s30 + $0x90] sm:$0xff] }
  0x14   : > { %v278_v8 = vld [vmem:[%s5752_s30 + $0x180] sm:$0xff]  ;;  %v366_v9 = vpack.c.bf16 %v247_v7, %v246_v6  ;;  %v279_v10 = vld [vmem:[%s5752_s30 + $0x188] sm:$0xff]  ;;  %v249_v19 = vld [vmem:[%s5752_s30 + $0x98] sm:$0xff] }
  0x15   : > { %v230_v11 = vld [vmem:[%s5752_s30] sm:$0xff]  ;;  %v231_v12 = vld [vmem:[%s5752_s30 + $0x8] sm:$0xff]  ;;  %v382_v13 = vpack.c.bf16 %v279_v10, %v278_v8  ;;  %v280_v20 = vld [vmem:[%s5752_s30 + $0x190] sm:$0xff]  ;;  %v367_v22 = vpack.c.bf16 %v249_v19, %v248_v17 }
  0x16   : > { %v358_v14 = vpack.c.bf16 %v231_v12, %v230_v11  ;;  %v262_v15 = vld [vmem:[%s5752_s30 + $0x100] sm:$0xff]  ;;  %v263_v16 = vld [vmem:[%s5752_s30 + $0x108] sm:$0xff]  ;;  %4739 = vmatprep.subr.bf16.mxu0 %v366_v9  ;;  %v281_v21 = vld [vmem:[%s5752_s30 + $0x198] sm:$0xff] }
  0x17   : > { %v374_v18 = vpack.c.bf16 %v263_v16, %v262_v15  ;;  %4851 = vmatprep.subr.bf16.mxu1 %v382_v13  ;;  %v383_v23 = vpack.c.bf16 %v281_v21, %v280_v20  ;;  %v232_v24 = vld [vmem:[%s5752_s30 + $0x10] sm:$0xff]  ;;  %v233_v25 = vld [vmem:[%s5752_s30 + $0x18] sm:$0xff]  ;;  %v250_v29 = vld [vmem:[%s5752_s30 + $0xa0] sm:$0xff] }
  0x18   : > { %4740 = vmatpush3.bf16.msra.mxu0 %v358_v14  ;;  %v264_v26 = vld [vmem:[%s5752_s30 + $0x110] sm:$0xff]  ;;  %v359_v27 = vpack.c.bf16 %v233_v25, %v232_v24  ;;  %v265_v28 = vld [vmem:[%s5752_s30 + $0x118] sm:$0xff]  ;;  %v251_v30 = vld [vmem:[%s5752_s30 + $0xa8] sm:$0xff] }
  0x19   : > { %4852 = vmatpush3.bf16.msra.mxu1 %v374_v18  ;;  %4741 = vmatprep.subr.bf16.mxu0 %v367_v22  ;;  %v375_v31 = vpack.c.bf16 %v265_v28, %v264_v26  ;;  %v368_v32 = vpack.c.bf16 %v251_v30, %v250_v29  ;;  %v282_v33 = vld [vmem:[%s5752_s30 + $0x1a0] sm:$0xff]  ;;  %v283_v34 = vld [vmem:[%s5752_s30 + $0x1a8] sm:$0xff]  ;;  %v252_v41 = vld [vmem:[%s5752_s30 + $0xb0] sm:$0xff] }
  0x1a   : > { %4853 = vmatprep.subr.bf16.mxu1 %v383_v23  ;;  %v234_v35 = vld [vmem:[%s5752_s30 + $0x20] sm:$0xff]  ;;  %v384_v36 = vpack.c.bf16 %v283_v34, %v282_v33  ;;  %v235_v37 = vld [vmem:[%s5752_s30 + $0x28] sm:$0xff]  ;;  %v253_v42 = vld [vmem:[%s5752_s30 + $0xb8] sm:$0xff] }
  0x1b   : > { %v266_v38 = vld [vmem:[%s5752_s30 + $0x120] sm:$0xff]  ;;  %v267_v39 = vld [vmem:[%s5752_s30 + $0x128] sm:$0xff]  ;;  %v360_v40 = vpack.c.bf16 %v235_v37, %v234_v35  ;;  %v284_v43 = vld [vmem:[%s5752_s30 + $0x1b0] sm:$0xff]  ;;  %v369_v45 = vpack.c.bf16 %v253_v42, %v252_v41 }
  0x1c   : > { %4742 = vmatpush3.bf16.msra.mxu0 %v359_v27  ;;  %v376_v44 = vpack.c.bf16 %v267_v39, %v266_v38  ;;  %v285_v46 = vld [vmem:[%s5752_s30 + $0x1b8] sm:$0xff]  ;;  %v236_v47 = vld [vmem:[%s5752_s30 + $0x30] sm:$0xff]  ;;  %v254_v52 = vld [vmem:[%s5752_s30 + $0xc0] sm:$0xff] }
  0x1d   : > { %4854 = vmatpush3.bf16.msra.mxu1 %v375_v31  ;;  %4743 = vmatprep.subr.bf16.mxu0 %v368_v32  ;;  %v237_v48 = vld [vmem:[%s5752_s30 + $0x38] sm:$0xff]  ;;  %v385_v49 = vpack.c.bf16 %v285_v46, %v284_v43  ;;  %v268_v50 = vld [vmem:[%s5752_s30 + $0x130] sm:$0xff]  ;;  %v255_v53 = vld [vmem:[%s5752_s30 + $0xc8] sm:$0xff] }
  0x1e   : > { %4855 = vmatprep.subr.bf16.mxu1 %v384_v36  ;;  %v269_v51 = vld [vmem:[%s5752_s30 + $0x138] sm:$0xff]  ;;  %v286_v54 = vld [vmem:[%s5752_s30 + $0x1c0] sm:$0xff]  ;;  %v287_v55 = vld [vmem:[%s5752_s30 + $0x1c8] sm:$0xff]  ;;  %v361_v56 = vpack.c.bf16 %v237_v48, %v236_v47  ;;  %v370_v58 = vpack.c.bf16 %v255_v53, %v254_v52 }
  0x1f   : > { %v377_v57 = vpack.c.bf16 %v269_v51, %v268_v50  ;;  %v238_v59 = vld [vmem:[%s5752_s30 + $0x40] sm:$0xff]  ;;  %v239_v60 = vld [vmem:[%s5752_s30 + $0x48] sm:$0xff]  ;;  %v386_v62 = vpack.c.bf16 %v287_v55, %v286_v54  ;;  %v256_v3 = vld [vmem:[%s5752_s30 + $0xd0] sm:$0xff]  ;;  %v4471_v55 = vcombine.low %v5725_v0, %v5730_v1 }
  0x20   : > { %4744 = vmatpush3.bf16.msra.mxu0 %v360_v40  ;;  %v270_v61 = vld [vmem:[%s5752_s30 + $0x140] sm:$0xff]  ;;  %v271_v63 = vld [vmem:[%s5752_s30 + $0x148] sm:$0xff]  ;;  %v257_v5 = vld [vmem:[%s5752_s30 + $0xd8] sm:$0xff]  ;;  %v362_v8 = vpack.c.bf16 %v239_v60, %v238_v59  ;;  %v4473_v59 = vcombine.low %v5735_v2, %v5742_v4 }
  0x21   : > { %4856 = vmatpush3.bf16.msra.mxu1 %v376_v44  ;;  %4745 = vmatprep.subr.bf16.mxu0 %v369_v45  ;;  %v288_v6 = vld [vmem:[%s5752_s30 + $0x1d0] sm:$0xff]  ;;  %v289_v7 = vld [vmem:[%s5752_s30 + $0x1d8] sm:$0xff]  ;;  %v378_v9 = vpack.c.bf16 %v271_v63, %v270_v61  ;;  %v371_v10 = vpack.c.bf16 %v257_v5, %v256_v3  ;;  %v258_v16 = vld [vmem:[%s5752_s30 + $0xe0] sm:$0xff] }
  0x22   : > { %4857 = vmatprep.subr.bf16.mxu1 %v385_v49  ;;  %v240_v11 = vld [vmem:[%s5752_s30 + $0x50] sm:$0xff]  ;;  %v241_v12 = vld [vmem:[%s5752_s30 + $0x58] sm:$0xff]  ;;  %v387_v14 = vpack.c.bf16 %v289_v7, %v288_v6  ;;  %v259_v17 = vld [vmem:[%s5752_s30 + $0xe8] sm:$0xff] }
  0x23   : > { %v272_v13 = vld [vmem:[%s5752_s30 + $0x150] sm:$0xff]  ;;  %v273_v15 = vld [vmem:[%s5752_s30 + $0x158] sm:$0xff]  ;;  %v290_v18 = vld [vmem:[%s5752_s30 + $0x1e0] sm:$0xff]  ;;  %v363_v20 = vpack.c.bf16 %v241_v12, %v240_v11  ;;  %v372_v22 = vpack.c.bf16 %v259_v17, %v258_v16 }
  0x24   : > { %4746 = vmatpush3.bf16.msra.mxu0 %v361_v56  ;;  %v291_v19 = vld [vmem:[%s5752_s30 + $0x1e8] sm:$0xff]  ;;  %v379_v21 = vpack.c.bf16 %v273_v15, %v272_v13  ;;  %v242_v23 = vld [vmem:[%s5752_s30 + $0x60] sm:$0xff]  ;;  %v260_v28 = vld [vmem:[%s5752_s30 + $0xf0] sm:$0xff] }
  0x25   : > { %4858 = vmatpush3.bf16.msra.mxu1 %v377_v57  ;;  %4747 = vmatprep.subr.bf16.mxu0 %v370_v58  ;;  %v243_v24 = vld [vmem:[%s5752_s30 + $0x68] sm:$0xff]  ;;  %v274_v25 = vld [vmem:[%s5752_s30 + $0x160] sm:$0xff]  ;;  %v388_v26 = vpack.c.bf16 %v291_v19, %v290_v18  ;;  %v261_v29 = vld [vmem:[%s5752_s30 + $0xf8] sm:$0xff] }
  0x26   : > { %4859 = vmatprep.subr.bf16.mxu1 %v386_v62  ;;  %v275_v27 = vld [vmem:[%s5752_s30 + $0x168] sm:$0xff]  ;;  %v292_v30 = vld [vmem:[%s5752_s30 + $0x1f0] sm:$0xff]  ;;  %v293_v31 = vld [vmem:[%s5752_s30 + $0x1f8] sm:$0xff]  ;;  %v364_v32 = vpack.c.bf16 %v243_v24, %v242_v23  ;;  %v373_v34 = vpack.c.bf16 %v261_v29, %v260_v28 }
  0x27   : > { %v380_v33 = vpack.c.bf16 %v275_v27, %v274_v25  ;;  %v244_v35 = vld [vmem:[%s5752_s30 + $0x70] sm:$0xff]  ;;  %v245_v36 = vld [vmem:[%s5752_s30 + $0x78] sm:$0xff]  ;;  %v389_v38 = vpack.c.bf16 %v293_v31, %v292_v30  ;;  %v310_v40 = vld [vmem:[%s5752_s30 + $0x280] sm:$0xff] }
  0x28   : > { %4748 = vmatpush3.bf16.msra.mxu0 %v362_v8  ;;  %v276_v37 = vld [vmem:[%s5752_s30 + $0x170] sm:$0xff]  ;;  %v277_v39 = vld [vmem:[%s5752_s30 + $0x178] sm:$0xff]  ;;  %v311_v41 = vld [vmem:[%s5752_s30 + $0x288] sm:$0xff]  ;;  %v365_v44 = vpack.c.bf16 %v245_v36, %v244_v35 }
  0x29   : > { %4860 = vmatpush3.bf16.msra.mxu1 %v378_v9  ;;  %4749 = vmatprep.subr.bf16.mxu0 %v371_v10  ;;  %v342_v42 = vld [vmem:[%s5752_s30 + $0x380] sm:$0xff]  ;;  %v343_v43 = vld [vmem:[%s5752_s30 + $0x388] sm:$0xff]  ;;  %v381_v46 = vpack.c.bf16 %v277_v39, %v276_v37  ;;  %v398_v50 = vpack.c.bf16 %v311_v41, %v310_v40  ;;  %v312_v57 = vld [vmem:[%s5752_s30 + $0x290] sm:$0xff] }
  0x2a   : > { %4861 = vmatprep.subr.bf16.mxu1 %v387_v14  ;;  %v5825_v45 = vld [vmem:[%s7688_s1 + $0x40] sm:$0xff]  ;;  %v5835_v48 = vld [vmem:[%s7688_s1 + $0x48] sm:$0xff]  ;;  %v414_v53 = vpack.c.bf16 %v343_v43, %v342_v42  ;;  %v313_v58 = vld [vmem:[%s5752_s30 + $0x298] sm:$0xff] }
  0x2b   : > { %v5830_v47 = vld [vmem:[%s7688_s1 + $0x60] sm:$0xff]  ;;  %v5840_v49 = vld [vmem:[%s7688_s1 + $0x68] sm:$0xff]  ;;  %v344_v61 = vld [vmem:[%s5752_s30 + $0x390] sm:$0xff]  ;;  %v399_v3 = vpack.c.bf16 %v313_v58, %v312_v57 }
  0x2c   : > { %4750 = vmatpush3.bf16.msra.mxu0 %v363_v20  ;;  %v294_v51 = vld [vmem:[%s5752_s30 + $0x200] sm:$0xff]  ;;  %v295_v52 = vld [vmem:[%s5752_s30 + $0x208] sm:$0xff]  ;;  %v4480_v60 = vcombine.high %v5825_v45, %v5830_v47  ;;  %v345_v62 = vld [vmem:[%s5752_s30 + $0x398] sm:$0xff]  ;;  %v4482_v0 = vcombine.high %v5835_v48, %v5840_v49  ;;  %v4481_v27 = vcombine.low %v5835_v48, %v5840_v49 }
  0x2d   : > { %4862 = vmatpush3.bf16.msra.mxu1 %v379_v21  ;;  %4751 = vmatprep.subr.bf16.mxu0 %v372_v22  ;;  %v326_v54 = vld [vmem:[%s5752_s30 + $0x300] sm:$0xff]  ;;  %v327_v56 = vld [vmem:[%s5752_s30 + $0x308] sm:$0xff]  ;;  %v390_v1 = vpack.c.bf16 %v295_v52, %v294_v51  ;;  %v296_v2 = vld [vmem:[%s5752_s30 + $0x210] sm:$0xff]  ;;  %v415_v6 = vpack.c.bf16 %v345_v62, %v344_v61  ;;  %v4479_v22 = vcombine.low %v5825_v45, %v5830_v47 }
  0x2e   : > { %4863 = vmatprep.subr.bf16.mxu1 %v388_v26  ;;  %v406_v63 = vpack.c.bf16 %v327_v56, %v326_v54  ;;  %v297_v4 = vld [vmem:[%s5752_s30 + $0x218] sm:$0xff]  ;;  %v328_v5 = vld [vmem:[%s5752_s30 + $0x310] sm:$0xff]  ;;  %v314_v8 = vld [vmem:[%s5752_s30 + $0x2a0] sm:$0xff] }
  0x2f   : > { %v329_v7 = vld [vmem:[%s5752_s30 + $0x318] sm:$0xff]  ;;  %v315_v9 = vld [vmem:[%s5752_s30 + $0x2a8] sm:$0xff]  ;;  %v5867_v10 = vld [vmem:[%s7688_s1 + $0x80] sm:$0xff]  ;;  %v391_v16 = vpack.c.bf16 %v297_v4, %v296_v2 }
  0x30   : > { %4752 = vmatpush3.bf16.msra.mxu0 %v364_v32  ;;  %v346_v11 = vld [vmem:[%s5752_s30 + $0x3a0] sm:$0xff]  ;;  %v347_v12 = vld [vmem:[%s5752_s30 + $0x3a8] sm:$0xff]  ;;  %v407_v17 = vpack.c.bf16 %v329_v7, %v328_v5  ;;  %v400_v18 = vpack.c.bf16 %v315_v9, %v314_v8  ;;  %v316_v25 = vld [vmem:[%s5752_s30 + $0x2b0] sm:$0xff] }
  0x31   : > { %4864 = vmatpush3.bf16.msra.mxu1 %v380_v33  ;;  %4753 = vmatprep.subr.bf16.mxu0 %v373_v34  ;;  %v5874_v13 = vld [vmem:[%s7688_s1 + $0xa0] sm:$0xff]  ;;  %v5879_v14 = vld [vmem:[%s7688_s1 + $0x88] sm:$0xff]  ;;  %v416_v23 = vpack.c.bf16 %v347_v12, %v346_v11  ;;  %v317_v26 = vld [vmem:[%s5752_s30 + $0x2b8] sm:$0xff] }
  0x32   : > { %4865 = vmatprep.subr.bf16.mxu1 %v389_v38  ;;  %v5884_v15 = vld [vmem:[%s7688_s1 + $0xa8] sm:$0xff]  ;;  %v298_v19 = vld [vmem:[%s5752_s30 + $0x220] sm:$0xff]  ;;  %v4488_v28 = vcombine.high %v5867_v10, %v5874_v13  ;;  %v348_v29 = vld [vmem:[%s5752_s30 + $0x3b0] sm:$0xff]  ;;  %v401_v34 = vpack.c.bf16 %v317_v26, %v316_v25  ;;  %v4487_v54 = vcombine.low %v5867_v10, %v5874_v13 }
  0x33   : > { %v299_v20 = vld [vmem:[%s5752_s30 + $0x228] sm:$0xff]  ;;  %v330_v21 = vld [vmem:[%s5752_s30 + $0x320] sm:$0xff]  ;;  %v349_v30 = vld [vmem:[%s5752_s30 + $0x3b8] sm:$0xff]  ;;  %v4490_v31 = vcombine.high %v5879_v14, %v5884_v15 }
  0x34   : > { %4754 = vmatpush3.bf16.msra.mxu0 %v365_v44  ;;  %v331_v24 = vld [vmem:[%s5752_s30 + $0x328] sm:$0xff]  ;;  %v392_v32 = vpack.c.bf16 %v299_v20, %v298_v19  ;;  %v300_v35 = vld [vmem:[%s5752_s30 + $0x230] sm:$0xff]  ;;  %v301_v36 = vld [vmem:[%s5752_s30 + $0x238] sm:$0xff]  ;;  %v417_v38 = vpack.c.bf16 %v349_v30, %v348_v29 }
  0x35   : > { %4866 = vmatpush3.bf16.msra.mxu1 %v381_v46  ;;  %4963 = vmatprep.subr.bf16.mxu0 %v398_v50  ;;  %v408_v33 = vpack.c.bf16 %v331_v24, %v330_v21  ;;  %v332_v37 = vld [vmem:[%s5752_s30 + $0x330] sm:$0xff]  ;;  %v333_v39 = vld [vmem:[%s5752_s30 + $0x338] sm:$0xff]  ;;  %v318_v40 = vld [vmem:[%s5752_s30 + $0x2c0] sm:$0xff]  ;;  %v393_v48 = vpack.c.bf16 %v301_v36, %v300_v35 }
  0x36   : > { %5075 = vmatprep.subr.bf16.mxu1 %v414_v53  ;;  %v319_v41 = vld [vmem:[%s5752_s30 + $0x2c8] sm:$0xff]  ;;  %v5911_v42 = vld [vmem:[%s7688_s1 + $0xc0] sm:$0xff]  ;;  %v409_v49 = vpack.c.bf16 %v333_v39, %v332_v37  ;;  %v320_v57 = vld [vmem:[%s5752_s30 + $0x2d0] sm:$0xff] }
  0x37   : > { %1223 = vmatmul.mubr.bf16.vlgmr.msra.gmra.mrb[0].mxu0 %v4471_v55  ;;  %v350_v43 = vld [vmem:[%s5752_s30 + $0x3c0] sm:$0xff]  ;;  %v351_v44 = vld [vmem:[%s5752_s30 + $0x3c8] sm:$0xff]  ;;  %v402_v50 = vpack.c.bf16 %v319_v41, %v318_v40  ;;  %v321_v58 = vld [vmem:[%s5752_s30 + $0x2d8] sm:$0xff] }
  0x38   : > { %1384 = vmatmul.mubr.bf16.vlgmr.msra.gmra.mrb[0].mxu1 %v4473_v59  ;;  %1230 = vmatprep.mubr.bf16.mxu0 %v4480_v60  ;;  %v5918_v45 = vld [vmem:[%s7688_s1 + $0xe0] sm:$0xff]  ;;  %v5923_v46 = vld [vmem:[%s7688_s1 + $0xc8] sm:$0xff]  ;;  %v418_v55 = vpack.c.bf16 %v351_v44, %v350_v43  ;;  %v4489_v59 = vcombine.low %v5879_v14, %v5884_v15  ;;  %v352_v61 = vld [vmem:[%s5752_s30 + $0x3d0] sm:$0xff] }
  0x39   : > { %1391 = vmatprep.mubr.bf16.mxu1 %v4482_v0  ;;  %4964 = vmatpush3.bf16.msra.mxu0 %v390_v1  ;;  %v5928_v47 = vld [vmem:[%s7688_s1 + $0xe8] sm:$0xff]  ;;  %v302_v51 = vld [vmem:[%s5752_s30 + $0x240] sm:$0xff]  ;;  %v4496_v60 = vcombine.high %v5911_v42, %v5918_v45  ;;  %v353_v62 = vld [vmem:[%s5752_s30 + $0x3d8] sm:$0xff] }
  0x3a   : > { %5076 = vmatpush3.bf16.msra.mxu1 %v406_v63  ;;  %4965 = vmatprep.subr.bf16.mxu0 %v399_v3  ;;  %v303_v52 = vld [vmem:[%s5752_s30 + $0x248] sm:$0xff]  ;;  %v334_v53 = vld [vmem:[%s5752_s30 + $0x340] sm:$0xff]  ;;  %v4498_v0 = vcombine.high %v5923_v46, %v5928_v47  ;;  %v403_v3 = vpack.c.bf16 %v321_v58, %v320_v57  ;;  %v304_v2 = vld [vmem:[%s5752_s30 + $0x250] sm:$0xff] }
  0x3b   : > { %5077 = vmatprep.subr.bf16.mxu1 %v415_v6  ;;  %v335_v56 = vld [vmem:[%s5752_s30 + $0x348] sm:$0xff]  ;;  %v394_v1 = vpack.c.bf16 %v303_v52, %v302_v51  ;;  %v305_v4 = vld [vmem:[%s5752_s30 + $0x258] sm:$0xff]  ;;  %v336_v5 = vld [vmem:[%s5752_s30 + $0x350] sm:$0xff]  ;;  %v419_v6 = vpack.c.bf16 %v353_v62, %v352_v61 }
  0x3c   : > { %v410_v63 = vpack.c.bf16 %v335_v56, %v334_v53  ;;  %v337_v7 = vld [vmem:[%s5752_s30 + $0x358] sm:$0xff]  ;;  %v322_v8 = vld [vmem:[%s5752_s30 + $0x2e0] sm:$0xff]  ;;  %v323_v9 = vld [vmem:[%s5752_s30 + $0x2e8] sm:$0xff]  ;;  %v395_v15 = vpack.c.bf16 %v305_v4, %v304_v2 }
  0x3d   : > { %4966 = vmatpush3.bf16.msra.mxu0 %v391_v16  ;;  %v454_v10 = vld [vmem:[%s7688_s1 + $0x100] sm:$0xff]  ;;  %v455_v13 = vld [vmem:[%s7688_s1 + $0x108] sm:$0xff]  ;;  %v324_v25 = vld [vmem:[%s5752_s30 + $0x2f0] sm:$0xff] }
  0x3e   : > { %5078 = vmatpush3.bf16.msra.mxu1 %v407_v17  ;;  %4967 = vmatprep.subr.bf16.mxu0 %v400_v18  ;;  %v458_v11 = vld [vmem:[%s7688_s1 + $0x120] sm:$0xff]  ;;  %v459_v14 = vld [vmem:[%s7688_s1 + $0x128] sm:$0xff]  ;;  %v411_v17 = vpack.c.bf16 %v337_v7, %v336_v5  ;;  %v404_v18 = vpack.c.bf16 %v323_v9, %v322_v8  ;;  %v325_v26 = vld [vmem:[%s5752_s30 + $0x2f8] sm:$0xff] }
  0x3f   : > { %1231 = vmatmul.mubr.bf16.gmra.mrb[4].mxu0 %v4479_v22  ;;  %5079 = vmatprep.subr.bf16.mxu1 %v416_v23  ;;  %v354_v12 = vld [vmem:[%s5752_s30 + $0x3e0] sm:$0xff]  ;;  %v355_v16 = vld [vmem:[%s5752_s30 + $0x3e8] sm:$0xff]  ;;  %v4495_v22 = vcombine.low %v5911_v42, %v5918_v45  ;;  %v356_v29 = vld [vmem:[%s5752_s30 + $0x3f0] sm:$0xff] }
  0x40   : > { %1392 = vmatmul.mubr.bf16.gmra.mrb[4].mxu1 %v4481_v27  ;;  %1238 = vmatprep.mubr.bf16.mxu0 %v4488_v28  ;;  %v306_v19 = vld [vmem:[%s5752_s30 + $0x260] sm:$0xff]  ;;  %v307_v20 = vld [vmem:[%s5752_s30 + $0x268] sm:$0xff]  ;;  %v420_v23 = vpack.c.bf16 %v355_v16, %v354_v12  ;;  %v4497_v27 = vcombine.low %v5923_v46, %v5928_v47  ;;  %v4504_v28 = vcombine.high %v454_v10, %v458_v11  ;;  %v357_v30 = vld [vmem:[%s5752_s30 + $0x3f8] sm:$0xff] }
  0x41   : > { %1399 = vmatprep.mubr.bf16.mxu1 %v4490_v31  ;;  %4968 = vmatpush3.bf16.msra.mxu0 %v392_v32  ;;  %v338_v21 = vld [vmem:[%s5752_s30 + $0x360] sm:$0xff]  ;;  %v339_v24 = vld [vmem:[%s5752_s30 + $0x368] sm:$0xff]  ;;  %v4506_v31 = vcombine.high %v455_v13, %v459_v14  ;;  %v396_v32 = vpack.c.bf16 %v307_v20, %v306_v19  ;;  %v308_v35 = vld [vmem:[%s5752_s30 + $0x270] sm:$0xff]  ;;  %v421_v37 = vpack.c.bf16 %v357_v30, %v356_v29 }
  0x42   : > { %5080 = vmatpush3.bf16.msra.mxu1 %v408_v33  ;;  %4969 = vmatprep.subr.bf16.mxu0 %v401_v34  ;;  %v412_v33 = vpack.c.bf16 %v339_v24, %v338_v21  ;;  %v405_v34 = vpack.c.bf16 %v325_v26, %v324_v25  ;;  %v309_v36 = vld [vmem:[%s5752_s30 + $0x278] sm:$0xff]  ;;  %v462_v40 = vld [vmem:[%s7688_s1 + $0x140] sm:$0xff]  ;;  %v463_v43 = vld [vmem:[%s7688_s1 + $0x148] sm:$0xff]  ;;  %v4503_v46 = vcombine.low %v454_v10, %v458_v11 }
  0x43   : > { %5081 = vmatprep.subr.bf16.mxu1 %v417_v38  ;;  %v340_v38 = vld [vmem:[%s5752_s30 + $0x370] sm:$0xff]  ;;  %v341_v39 = vld [vmem:[%s5752_s30 + $0x378] sm:$0xff]  ;;  %v466_v41 = vld [vmem:[%s7688_s1 + $0x160] sm:$0xff]  ;;  %v397_v42 = vpack.c.bf16 %v309_v36, %v308_v35  ;;  %v4505_v47 = vcombine.low %v455_v13, %v459_v14 }
  0x44   : > { %v467_v44 = vld [vmem:[%s7688_s1 + $0x168] sm:$0xff]  ;;  %v413_v45 = vpack.c.bf16 %v341_v39, %v340_v38  ;;  %v474_v51 = vld [vmem:[%s7688_s1 + $0x1a0] sm:$0xff] }
  0x45   : > { %4970 = vmatpush3.bf16.msra.mxu0 %v393_v48  ;;  %v4512_v48 = vcombine.high %v462_v40, %v466_v41  ;;  %v471_v52 = vld [vmem:[%s7688_s1 + $0x188] sm:$0xff]  ;;  %v478_v58 = vld [vmem:[%s7688_s1 + $0x1c0] sm:$0xff] }
  0x46   : > { %5082 = vmatpush3.bf16.msra.mxu1 %v409_v49  ;;  %4971 = vmatprep.subr.bf16.mxu0 %v402_v50  ;;  %v4514_v49 = vcombine.high %v463_v43, %v467_v44  ;;  %v470_v50 = vld [vmem:[%s7688_s1 + $0x180] sm:$0xff]  ;;  %v475_v53 = vld [vmem:[%s7688_s1 + $0x1a8] sm:$0xff] }
  0x47   : > { %1239 = vmatmul.mubr.bf16.gmra.mrb[8].mxu0 %v4487_v54  ;;  %5083 = vmatprep.subr.bf16.mxu1 %v418_v55  ;;  %v4511_v54 = vcombine.low %v462_v40, %v466_v41  ;;  %v4513_v55 = vcombine.low %v463_v43, %v467_v44  ;;  %v4520_v56 = vcombine.high %v470_v50, %v474_v51  ;;  %v483_v61 = vld [vmem:[%s7688_s1 + $0x1e8] sm:$0xff]  ;;  %v490_v2 = vld [vmem:[%s7688_s1 + $0x220] sm:$0xff] }
  0x48   : > { %1400 = vmatmul.mubr.bf16.gmra.mrb[8].mxu1 %v4489_v59  ;;  %1246 = vmatprep.mubr.bf16.mxu0 %v4496_v60  ;;  %v4522_v57 = vcombine.high %v471_v52, %v475_v53  ;;  %v482_v59 = vld [vmem:[%s7688_s1 + $0x1e0] sm:$0xff]  ;;  %v479_v60 = vld [vmem:[%s7688_s1 + $0x1c8] sm:$0xff]  ;;  %v4519_v62 = vcombine.low %v470_v50, %v474_v51 }
  0x49   : > { %1407 = vmatprep.mubr.bf16.mxu1 %v4498_v0  ;;  %4972 = vmatpush3.bf16.msra.mxu0 %v394_v1  ;;  %v4521_v0 = vcombine.low %v471_v52, %v475_v53  ;;  %v4528_v1 = vcombine.high %v478_v58, %v482_v59  ;;  %v487_v4 = vld [vmem:[%s7688_s1 + $0x208] sm:$0xff]  ;;  %v4529_v7 = vcombine.low %v479_v60, %v483_v61  ;;  %v494_v10 = vld [vmem:[%s7688_s1 + $0x240] sm:$0xff] }
  0x4a   : > { %5084 = vmatpush3.bf16.msra.mxu1 %v410_v63  ;;  %4973 = vmatprep.subr.bf16.mxu0 %v403_v3  ;;  %v4530_v63 = vcombine.high %v479_v60, %v483_v61  ;;  %v486_v3 = vld [vmem:[%s7688_s1 + $0x200] sm:$0xff]  ;;  %v491_v5 = vld [vmem:[%s7688_s1 + $0x228] sm:$0xff] }
  0x4b   : > { %5085 = vmatprep.subr.bf16.mxu1 %v419_v6  ;;  %v4527_v6 = vcombine.low %v478_v58, %v482_v59  ;;  %v4536_v8 = vcombine.high %v486_v3, %v490_v2  ;;  %v4538_v9 = vcombine.high %v487_v4, %v491_v5  ;;  %v498_v11 = vld [vmem:[%s7688_s1 + $0x260] sm:$0xff]  ;;  %v495_v12 = vld [vmem:[%s7688_s1 + $0x248] sm:$0xff]  ;;  %v4535_v14 = vcombine.low %v486_v3, %v490_v2  ;;  %v424_v3 = vld [vmem:[%s7688_s1 + $0x10] sm:$0xff] }
  0x4c   : > { %v499_v13 = vld [vmem:[%s7688_s1 + $0x268] sm:$0xff]  ;;  %v4544_v16 = vcombine.high %v494_v10, %v498_v11  ;;  %v506_v19 = vld [vmem:[%s7688_s1 + $0x2a0] sm:$0xff]  ;;  %v428_v2 = vld [vmem:[%s7688_s1 + $0x30] sm:$0xff] }
  0x4d   : > { %4974 = vmatpush3.bf16.msra.mxu0 %v395_v15  ;;  %v4537_v15 = vcombine.low %v487_v4, %v491_v5  ;;  %v503_v20 = vld [vmem:[%s7688_s1 + $0x288] sm:$0xff]  ;;  %v510_v26 = vld [vmem:[%s7688_s1 + $0x2c0] sm:$0xff]  ;;  %v425_v4 = vld [vmem:[%s7688_s1 + $0x18] sm:$0xff] }
  0x4e   : > { %5086 = vmatpush3.bf16.msra.mxu1 %v411_v17  ;;  %4975 = vmatprep.subr.bf16.mxu0 %v404_v18  ;;  %v4546_v17 = vcombine.high %v495_v12, %v499_v13  ;;  %v502_v18 = vld [vmem:[%s7688_s1 + $0x280] sm:$0xff]  ;;  %v507_v21 = vld [vmem:[%s7688_s1 + $0x2a8] sm:$0xff]  ;;  %v429_v5 = vld [vmem:[%s7688_s1 + $0x38] sm:$0xff] }
  0x4f   : > { %1247 = vmatmul.mubr.bf16.gmra.mrb[12].mxu0 %v4495_v22  ;;  %5087 = vmatprep.subr.bf16.mxu1 %v420_v23  ;;  %v4543_v22 = vcombine.low %v494_v10, %v498_v11  ;;  %v4545_v23 = vcombine.low %v495_v12, %v499_v13  ;;  %v4552_v24 = vcombine.high %v502_v18, %v506_v19  ;;  %v515_v29 = vld [vmem:[%s7688_s1 + $0x2e8] sm:$0xff]  ;;  %v522_v35 = vld [vmem:[%s7688_s1 + $0x320] sm:$0xff]  ;;  %v432_v10 = vld [vmem:[%s7688_s1 + $0x50] sm:$0xff] }
  0x50   : > { %1408 = vmatmul.mubr.bf16.gmra.mrb[12].mxu1 %v4497_v27  ;;  %1254 = vmatprep.mubr.bf16.mxu0 %v4504_v28  ;;  %v4554_v25 = vcombine.high %v503_v20, %v507_v21  ;;  %v514_v27 = vld [vmem:[%s7688_s1 + $0x2e0] sm:$0xff]  ;;  %v511_v28 = vld [vmem:[%s7688_s1 + $0x2c8] sm:$0xff]  ;;  %v4551_v30 = vcombine.low %v502_v18, %v506_v19  ;;  %v436_v11 = vld [vmem:[%s7688_s1 + $0x70] sm:$0xff] }
  0x51   : > { %1415 = vmatprep.mubr.bf16.mxu1 %v4506_v31  ;;  %4976 = vmatpush3.bf16.msra.mxu0 %v396_v32  ;;  %v4553_v31 = vcombine.low %v503_v20, %v507_v21  ;;  %v4560_v32 = vcombine.high %v510_v26, %v514_v27  ;;  %v519_v36 = vld [vmem:[%s7688_s1 + $0x308] sm:$0xff]  ;;  %v4559_v38 = vcombine.low %v510_v26, %v514_v27  ;;  %v530_v43 = vld [vmem:[%s7688_s1 + $0x360] sm:$0xff]  ;;  %v433_v12 = vld [vmem:[%s7688_s1 + $0x58] sm:$0xff] }
  0x52   : > { %5088 = vmatpush3.bf16.msra.mxu1 %v412_v33  ;;  %4977 = vmatprep.subr.bf16.mxu0 %v405_v34  ;;  %v4562_v33 = vcombine.high %v511_v28, %v515_v29  ;;  %v518_v34 = vld [vmem:[%s7688_s1 + $0x300] sm:$0xff]  ;;  %v4561_v39 = vcombine.low %v511_v28, %v515_v29  ;;  %v527_v44 = vld [vmem:[%s7688_s1 + $0x348] sm:$0xff]  ;;  %v437_v13 = vld [vmem:[%s7688_s1 + $0x78] sm:$0xff] }
  0x53   : > { %5089 = vmatprep.subr.bf16.mxu1 %v421_v37  ;;  %v523_v37 = vld [vmem:[%s7688_s1 + $0x328] sm:$0xff]  ;;  %v4568_v40 = vcombine.high %v518_v34, %v522_v35  ;;  %v534_v50 = vld [vmem:[%s7688_s1 + $0x380] sm:$0xff]  ;;  %v440_v18 = vld [vmem:[%s7688_s1 + $0x90] sm:$0xff] }
  0x54   : > { %v4570_v41 = vcombine.high %v519_v36, %v523_v37  ;;  %v538_v51 = vld [vmem:[%s7688_s1 + $0x3a0] sm:$0xff]  ;;  %v535_v52 = vld [vmem:[%s7688_s1 + $0x388] sm:$0xff]  ;;  %v444_v19 = vld [vmem:[%s7688_s1 + $0xb0] sm:$0xff] }
  0x55   : > { %4978 = vmatpush3.bf16.msra.mxu0 %v397_v42  ;;  %v526_v42 = vld [vmem:[%s7688_s1 + $0x340] sm:$0xff]  ;;  %v539_v53 = vld [vmem:[%s7688_s1 + $0x3a8] sm:$0xff]  ;;  %v441_v20 = vld [vmem:[%s7688_s1 + $0x98] sm:$0xff] }
  0x56   : > { %5090 = vmatpush3.bf16.msra.mxu1 %v413_v45  ;;  %v531_v45 = vld [vmem:[%s7688_s1 + $0x368] sm:$0xff]  ;;  %v542_v58 = vld [vmem:[%s7688_s1 + $0x3c0] sm:$0xff]  ;;  %v445_v21 = vld [vmem:[%s7688_s1 + $0xb8] sm:$0xff] }
  0x57   : > { %1255 = vmatmul.mubr.bf16.gmra.mrb[16].mxu0 %v4503_v46  ;;  %v4567_v46 = vcombine.low %v518_v34, %v522_v35  ;;  %v546_v59 = vld [vmem:[%s7688_s1 + $0x3e0] sm:$0xff]  ;;  %v543_v60 = vld [vmem:[%s7688_s1 + $0x3c8] sm:$0xff]  ;;  %v448_v26 = vld [vmem:[%s7688_s1 + $0xd0] sm:$0xff] }
  0x58   : > { %1416 = vmatmul.mubr.bf16.gmra.mrb[16].mxu1 %v4505_v47  ;;  %1262 = vmatprep.mubr.bf16.mxu0 %v4512_v48  ;;  %v4569_v47 = vcombine.low %v519_v36, %v523_v37  ;;  %v4576_v48 = vcombine.high %v526_v42, %v530_v43  ;;  %v547_v61 = vld [vmem:[%s7688_s1 + $0x3e8] sm:$0xff]  ;;  %v452_v27 = vld [vmem:[%s7688_s1 + $0xf0] sm:$0xff]  ;;  %v449_v28 = vld [vmem:[%s7688_s1 + $0xd8] sm:$0xff] }
  0x59   : > { %1423 = vmatprep.mubr.bf16.mxu1 %v4514_v49  ;;  %v4578_v49 = vcombine.high %v527_v44, %v531_v45  ;;  %v453_v29 = vld [vmem:[%s7688_s1 + $0xf8] sm:$0xff]  ;;  %v456_v34 = vld [vmem:[%s7688_s1 + $0x110] sm:$0xff] }
  0x5a   : > { %v460_v35 = vld [vmem:[%s7688_s1 + $0x130] sm:$0xff]  ;;  %v457_v36 = vld [vmem:[%s7688_s1 + $0x118] sm:$0xff] }
  0x5b   : > { %v461_v37 = vld [vmem:[%s7688_s1 + $0x138] sm:$0xff] }
  0x5f   : > { %1263 = vmatmul.mubr.bf16.gmra.mrb[20].mxu0 %v4511_v54  ;;  %v4575_v54 = vcombine.low %v526_v42, %v530_v43  ;;  %v464_v42 = vld [vmem:[%s7688_s1 + $0x150] sm:$0xff] }
  0x60   : > { %1424 = vmatmul.mubr.bf16.gmra.mrb[20].mxu1 %v4513_v55  ;;  %1270 = vmatprep.mubr.bf16.mxu0 %v4520_v56  ;;  %v4577_v55 = vcombine.low %v527_v44, %v531_v45  ;;  %v4584_v56 = vcombine.high %v534_v50, %v538_v51  ;;  %v468_v43 = vld [vmem:[%s7688_s1 + $0x170] sm:$0xff]  ;;  %v465_v44 = vld [vmem:[%s7688_s1 + $0x158] sm:$0xff] }
  0x61   : > { %1431 = vmatprep.mubr.bf16.mxu1 %v4522_v57  ;;  %v4586_v57 = vcombine.high %v535_v52, %v539_v53  ;;  %v469_v45 = vld [vmem:[%s7688_s1 + $0x178] sm:$0xff] }
  0x67   : > { %1271 = vmatmul.mubr.bf16.gmra.mrb[24].mxu0 %v4519_v62  ;;  %v4583_v62 = vcombine.low %v534_v50, %v538_v51  ;;  %v472_v50 = vld [vmem:[%s7688_s1 + $0x190] sm:$0xff] }
  0x68   : > { %1432 = vmatmul.mubr.bf16.gmra.mrb[24].mxu1 %v4521_v0  ;;  %1278 = vmatprep.mubr.bf16.mxu0 %v4528_v1  ;;  %v4585_v0 = vcombine.low %v535_v52, %v539_v53  ;;  %v4592_v1 = vcombine.high %v542_v58, %v546_v59  ;;  %v476_v51 = vld [vmem:[%s7688_s1 + $0x1b0] sm:$0xff]  ;;  %v473_v52 = vld [vmem:[%s7688_s1 + $0x198] sm:$0xff] }
  0x69   : > { %1439 = vmatprep.mubr.bf16.mxu1 %v4530_v63  ;;  %v4594_v63 = vcombine.high %v543_v60, %v547_v61  ;;  %v477_v53 = vld [vmem:[%s7688_s1 + $0x1b8] sm:$0xff] }
  0x6f   : > { %1279 = vmatmul.mubr.bf16.gmra.mrb[28].mxu0 %v4527_v6  ;;  %v4591_v6 = vcombine.low %v542_v58, %v546_v59  ;;  %v480_v58 = vld [vmem:[%s7688_s1 + $0x1d0] sm:$0xff] }
  0x70   : > { %1440 = vmatmul.mubr.bf16.gmra.mrb[28].mxu1 %v4529_v7  ;;  %1286 = vmatprep.mubr.bf16.mxu0 %v4536_v8  ;;  %v4593_v7 = vcombine.low %v543_v60, %v547_v61  ;;  %v4476_v8 = vcombine.high %v424_v3, %v428_v2  ;;  %v484_v59 = vld [vmem:[%s7688_s1 + $0x1f0] sm:$0xff]  ;;  %v481_v60 = vld [vmem:[%s7688_s1 + $0x1d8] sm:$0xff] }
  0x71   : > { %1447 = vmatprep.mubr.bf16.mxu1 %v4538_v9  ;;  %v4478_v9 = vcombine.high %v425_v4, %v429_v5  ;;  %v485_v61 = vld [vmem:[%s7688_s1 + $0x1f8] sm:$0xff] }
  0x77   : > { %1287 = vmatmul.mubr.bf16.gmra.mrb[32].mxu0 %v4535_v14  ;;  %v4475_v14 = vcombine.low %v424_v3, %v428_v2  ;;  %v488_v3 = vld [vmem:[%s7688_s1 + $0x210] sm:$0xff] }
  0x78   : > { %1448 = vmatmul.mubr.bf16.gmra.mrb[32].mxu1 %v4537_v15  ;;  %1294 = vmatprep.mubr.bf16.mxu0 %v4544_v16  ;;  %v4477_v15 = vcombine.low %v425_v4, %v429_v5  ;;  %v4484_v16 = vcombine.high %v432_v10, %v436_v11  ;;  %v492_v2 = vld [vmem:[%s7688_s1 + $0x230] sm:$0xff]  ;;  %v489_v4 = vld [vmem:[%s7688_s1 + $0x218] sm:$0xff] }
  0x79   : > { %1455 = vmatprep.mubr.bf16.mxu1 %v4546_v17  ;;  %v4486_v17 = vcombine.high %v433_v12, %v437_v13  ;;  %v493_v5 = vld [vmem:[%s7688_s1 + $0x238] sm:$0xff] }
  0x7f   : > { %1295 = vmatmul.mubr.bf16.gmra.mrb[36].mxu0 %v4543_v22  ;;  %v4483_v22 = vcombine.low %v432_v10, %v436_v11  ;;  %v496_v10 = vld [vmem:[%s7688_s1 + $0x250] sm:$0xff] }
  0x80   : > { %1456 = vmatmul.mubr.bf16.gmra.mrb[36].mxu1 %v4545_v23  ;;  %1302 = vmatprep.mubr.bf16.mxu0 %v4552_v24  ;;  %v4485_v23 = vcombine.low %v433_v12, %v437_v13  ;;  %v4492_v24 = vcombine.high %v440_v18, %v444_v19  ;;  %v500_v11 = vld [vmem:[%s7688_s1 + $0x270] sm:$0xff]  ;;  %v497_v12 = vld [vmem:[%s7688_s1 + $0x258] sm:$0xff] }
  0x81   : > { %1463 = vmatprep.mubr.bf16.mxu1 %v4554_v25  ;;  %v4494_v25 = vcombine.high %v441_v20, %v445_v21  ;;  %v501_v13 = vld [vmem:[%s7688_s1 + $0x278] sm:$0xff] }
  0x87   : > { %1303 = vmatmul.mubr.bf16.gmra.mrb[40].mxu0 %v4551_v30  ;;  %v4491_v30 = vcombine.low %v440_v18, %v444_v19  ;;  %v504_v18 = vld [vmem:[%s7688_s1 + $0x290] sm:$0xff] }
  0x88   : > { %1464 = vmatmul.mubr.bf16.gmra.mrb[40].mxu1 %v4553_v31  ;;  %1310 = vmatprep.mubr.bf16.mxu0 %v4560_v32  ;;  %v4493_v31 = vcombine.low %v441_v20, %v445_v21  ;;  %v4500_v32 = vcombine.high %v448_v26, %v452_v27  ;;  %v508_v19 = vld [vmem:[%s7688_s1 + $0x2b0] sm:$0xff]  ;;  %v505_v20 = vld [vmem:[%s7688_s1 + $0x298] sm:$0xff] }
  0x89   : > { %1471 = vmatprep.mubr.bf16.mxu1 %v4562_v33  ;;  %v4502_v33 = vcombine.high %v449_v28, %v453_v29  ;;  %v509_v21 = vld [vmem:[%s7688_s1 + $0x2b8] sm:$0xff] }
  0x8f   : > { %1311 = vmatmul.mubr.bf16.gmra.mrb[44].mxu0 %v4559_v38  ;;  %v4499_v38 = vcombine.low %v448_v26, %v452_v27  ;;  %v512_v26 = vld [vmem:[%s7688_s1 + $0x2d0] sm:$0xff] }
  0x90   : > { %1472 = vmatmul.mubr.bf16.gmra.mrb[44].mxu1 %v4561_v39  ;;  %1318 = vmatprep.mubr.bf16.mxu0 %v4568_v40  ;;  %v4501_v39 = vcombine.low %v449_v28, %v453_v29  ;;  %v4508_v40 = vcombine.high %v456_v34, %v460_v35  ;;  %v516_v27 = vld [vmem:[%s7688_s1 + $0x2f0] sm:$0xff]  ;;  %v513_v28 = vld [vmem:[%s7688_s1 + $0x2d8] sm:$0xff] }
  0x91   : > { %1479 = vmatprep.mubr.bf16.mxu1 %v4570_v41  ;;  %v4510_v41 = vcombine.high %v457_v36, %v461_v37  ;;  %v517_v29 = vld [vmem:[%s7688_s1 + $0x2f8] sm:$0xff] }
  0x97   : > { %1319 = vmatmul.mubr.bf16.gmra.mrb[48].mxu0 %v4567_v46  ;;  %v4507_v46 = vcombine.low %v456_v34, %v460_v35  ;;  %v520_v34 = vld [vmem:[%s7688_s1 + $0x310] sm:$0xff] }
  0x98   : > { %1480 = vmatmul.mubr.bf16.gmra.mrb[48].mxu1 %v4569_v47  ;;  %1326 = vmatprep.mubr.bf16.mxu0 %v4576_v48  ;;  %v4509_v47 = vcombine.low %v457_v36, %v461_v37  ;;  %v4516_v48 = vcombine.high %v464_v42, %v468_v43  ;;  %v524_v35 = vld [vmem:[%s7688_s1 + $0x330] sm:$0xff]  ;;  %v521_v37 = vld [vmem:[%s7688_s1 + $0x318] sm:$0xff] }
  0x99   : > { %1487 = vmatprep.mubr.bf16.mxu1 %v4578_v49  ;;  %v4518_v49 = vcombine.high %v465_v44, %v469_v45 }
  0x9f   : > { %1327 = vmatmul.mubr.bf16.gmra.mrb[52].mxu0 %v4575_v54  ;;  %v4515_v54 = vcombine.low %v464_v42, %v468_v43 }
  0xa0   : > { %1488 = vmatmul.mubr.bf16.gmra.mrb[52].mxu1 %v4577_v55  ;;  %1334 = vmatprep.mubr.bf16.mxu0 %v4584_v56  ;;  %v4517_v55 = vcombine.low %v465_v44, %v469_v45  ;;  %v4524_v56 = vcombine.high %v472_v50, %v476_v51  ;;  %v4565_v45 = vcombine.low %v513_v28, %v517_v29 }
  0xa1   : > { %1495 = vmatprep.mubr.bf16.mxu1 %v4586_v57  ;;  %v4526_v57 = vcombine.high %v473_v52, %v477_v53 }
  0xa7   : > { %1335 = vmatmul.mubr.bf16.gmra.mrb[56].mxu0 %v4583_v62  ;;  %v4523_v62 = vcombine.low %v472_v50, %v476_v51 }
  0xa8   : > { %1496 = vmatmul.mubr.bf16.gmra.mrb[56].mxu1 %v4585_v0  ;;  %1342 = vmatprep.mubr.bf16.mxu0 %v4592_v1  ;;  %v4525_v0 = vcombine.low %v473_v52, %v477_v53  ;;  %v4532_v1 = vcombine.high %v480_v58, %v484_v59 }
  0xa9   : > { %1503 = vmatprep.mubr.bf16.mxu1 %v4594_v63  ;;  %v4534_v63 = vcombine.high %v481_v60, %v485_v61 }
  0xaf   : > { %1343 = vmatmul.mubr.bf16.gmra.mrb[60].mxu0 %v4591_v6  ;;  %v4531_v6 = vcombine.low %v480_v58, %v484_v59  ;;  %v529_v59 = vld [vmem:[%s7688_s1 + $0x358] sm:$0xff] }
  0xb0   : > { %1504 = vmatmul.mubr.bf16.gmra.mrb[60].mxu1 %v4593_v7  ;;  %1544 = vmatprep.mubr.bf16.mxu0 %v4476_v8  ;;  %v4533_v7 = vcombine.low %v481_v60, %v485_v61  ;;  %v4540_v8 = vcombine.high %v488_v3, %v492_v2  ;;  %v533_v60 = vld [vmem:[%s7688_s1 + $0x378] sm:$0xff] }
  0xb1   : > { %1705 = vmatprep.mubr.bf16.mxu1 %v4478_v9  ;;  %v4542_v9 = vcombine.high %v489_v4, %v493_v5 }
  0xb7   : > { %1545 = vmatmul.mubr.bf16.vlgmr.msra.gmra.mrb[64].mxu0 %v4475_v14  ;;  %v4539_v14 = vcombine.low %v488_v3, %v492_v2 }
  0xb8   : > { %1706 = vmatmul.mubr.bf16.vlgmr.msra.gmra.mrb[64].mxu1 %v4477_v15  ;;  %1552 = vmatprep.mubr.bf16.mxu0 %v4484_v16  ;;  %v4541_v15 = vcombine.low %v489_v4, %v493_v5  ;;  %v4548_v16 = vcombine.high %v496_v10, %v500_v11 }
  0xb9   : > { %1713 = vmatprep.mubr.bf16.mxu1 %v4486_v17  ;;  %v4550_v17 = vcombine.high %v497_v12, %v501_v13 }
  0xbf   : > { %1553 = vmatmul.mubr.bf16.gmra.mrb[68].mxu0 %v4483_v22  ;;  %v4547_v22 = vcombine.low %v496_v10, %v500_v11 }
  0xc0   : > { %1714 = vmatmul.mubr.bf16.gmra.mrb[68].mxu1 %v4485_v23  ;;  %1560 = vmatprep.mubr.bf16.mxu0 %v4492_v24  ;;  %v4549_v23 = vcombine.low %v497_v12, %v501_v13  ;;  %v4556_v24 = vcombine.high %v504_v18, %v508_v19 }
  0xc1   : > { %1721 = vmatprep.mubr.bf16.mxu1 %v4494_v25  ;;  %v4558_v25 = vcombine.high %v505_v20, %v509_v21 }
  0xc7   : > { %1561 = vmatmul.mubr.bf16.gmra.mrb[72].mxu0 %v4491_v30  ;;  %v4555_v30 = vcombine.low %v504_v18, %v508_v19  ;;  %v537_v18 = vld [vmem:[%s7688_s1 + $0x398] sm:$0xff] }
  0xc8   : > { %1722 = vmatmul.mubr.bf16.gmra.mrb[72].mxu1 %v4493_v31  ;;  %1568 = vmatprep.mubr.bf16.mxu0 %v4500_v32  ;;  %v4557_v31 = vcombine.low %v505_v20, %v509_v21  ;;  %v4564_v32 = vcombine.high %v512_v26, %v516_v27  ;;  %v541_v19 = vld [vmem:[%s7688_s1 + $0x3b8] sm:$0xff] }
  0xc9   : > { %1729 = vmatprep.mubr.bf16.mxu1 %v4502_v33  ;;  %v4566_v33 = vcombine.high %v513_v28, %v517_v29 }
  0xcf   : > { %1569 = vmatmul.mubr.bf16.gmra.mrb[76].mxu0 %v4499_v38  ;;  %v525_v38 = vld [vmem:[%s7688_s1 + $0x338] sm:$0xff] }
  0xd0   : > { %1730 = vmatmul.mubr.bf16.gmra.mrb[76].mxu1 %v4501_v39  ;;  %1576 = vmatprep.mubr.bf16.mxu0 %v4508_v40  ;;  %v4574_v50 = vcombine.high %v521_v37, %v525_v38  ;;  %v4573_v2 = vcombine.low %v521_v37, %v525_v38  ;;  %v544_v37 = vld [vmem:[%s7688_s1 + $0x3d0] sm:$0xff] }
  0xd1   : > { %1737 = vmatprep.mubr.bf16.mxu1 %v4510_v41  ;;  %v4563_v41 = vcombine.low %v512_v26, %v516_v27  ;;  %v4581_v26 = vcombine.low %v529_v59, %v533_v60  ;;  %v548_v38 = vld [vmem:[%s7688_s1 + $0x3f0] sm:$0xff] }
  0xd7   : > { %1577 = vmatmul.mubr.bf16.gmra.mrb[80].mxu0 %v4507_v46  ;;  %v4572_v46 = vcombine.high %v520_v34, %v524_v35 }
  0xd8   : > { %1738 = vmatmul.mubr.bf16.gmra.mrb[80].mxu1 %v4509_v47  ;;  %1584 = vmatprep.mubr.bf16.mxu0 %v4516_v48 }
  0xd9   : > { %1745 = vmatprep.mubr.bf16.mxu1 %v4518_v49 }
  0xdf   : > { %1585 = vmatmul.mubr.bf16.gmra.mrb[84].mxu0 %v4515_v54 }
  0xe0   : > { %1746 = vmatmul.mubr.bf16.gmra.mrb[84].mxu1 %v4517_v55  ;;  %1592 = vmatprep.mubr.bf16.mxu0 %v4524_v56  ;;  %v528_v56 = vld [vmem:[%s7688_s1 + $0x350] sm:$0xff] }
  0xe1   : > { %1753 = vmatprep.mubr.bf16.mxu1 %v4526_v57  ;;  %v532_v57 = vld [vmem:[%s7688_s1 + $0x370] sm:$0xff] }
  0xe2   : > { %v4580_v4 = vcombine.high %v528_v56, %v532_v57 }
  0xe7   : > { %1593 = vmatmul.mubr.bf16.gmra.mrb[88].mxu0 %v4523_v62 }
  0xe8   : > { %1754 = vmatmul.mubr.bf16.gmra.mrb[88].mxu1 %v4525_v0  ;;  %1600 = vmatprep.mubr.bf16.mxu0 %v4532_v1  ;;  %v4571_v0 = vcombine.low %v520_v34, %v524_v35 }
  0xe9   : > { %1761 = vmatprep.mubr.bf16.mxu1 %v4534_v63 }
  0xef   : > { %1601 = vmatmul.mubr.bf16.gmra.mrb[92].mxu0 %v4531_v6 }
  0xf0   : > { %1762 = vmatmul.mubr.bf16.gmra.mrb[92].mxu1 %v4533_v7  ;;  %1608 = vmatprep.mubr.bf16.mxu0 %v4540_v8  ;;  %v4582_v8 = vcombine.high %v529_v59, %v533_v60 }
  0xf1   : > { %1769 = vmatprep.mubr.bf16.mxu1 %v4542_v9 }
  0xf7   : > { %1609 = vmatmul.mubr.bf16.gmra.mrb[96].mxu0 %v4539_v14  ;;  %v536_v14 = vld [vmem:[%s7688_s1 + $0x390] sm:$0xff] }
  0xf8   : > { %1770 = vmatmul.mubr.bf16.gmra.mrb[96].mxu1 %v4541_v15  ;;  %1616 = vmatprep.mubr.bf16.mxu0 %v4548_v16  ;;  %v540_v15 = vld [vmem:[%s7688_s1 + $0x3b0] sm:$0xff]  ;;  %v5678_v16 = vmov 0  }
  0xf9   : > { %1777 = vmatprep.mubr.bf16.mxu1 %v4550_v17  ;;  %2650 = vmatprep.subr.bf16.mxu0 %v5678_v16  ;;  %v4588_v27 = vcombine.high %v536_v14, %v540_v15 }
  0xfa   : > { %5275 = vmatprep.subr.bf16.mxu1 %v5678_v16 }
  0xff   : > { %1617 = vmatmul.mubr.bf16.gmra.mrb[100].mxu0 %v4547_v22  ;;  %v4579_v22 = vcombine.low %v528_v56, %v532_v57 }
 0x100   : > { %1778 = vmatmul.mubr.bf16.gmra.mrb[100].mxu1 %v4549_v23  ;;  %1624 = vmatprep.mubr.bf16.mxu0 %v4556_v24 }
 0x101   : > { %1785 = vmatprep.mubr.bf16.mxu1 %v4558_v25 }
 0x107   : > { %1625 = vmatmul.mubr.bf16.gmra.mrb[104].mxu0 %v4555_v30 }
 0x108   : > { %1786 = vmatmul.mubr.bf16.gmra.mrb[104].mxu1 %v4557_v31  ;;  %1632 = vmatprep.mubr.bf16.mxu0 %v4564_v32  ;;  %v4590_v31 = vcombine.high %v537_v18, %v541_v19 }
 0x109   : > { %1793 = vmatprep.mubr.bf16.mxu1 %v4566_v33 }
 0x10a   : > { %v4755_v36 = vpop.f32.mrb[0].mxu0 }
 0x10b   : > { %v4867_v39 = vpop.f32.mrb[0].mxu1  ;;  %v4756_v40 = vpop.f32.mrb[1].mxu0 }
 0x10c   : > { %v4757_v42 = vadd.f32 %v4756_v40, %v4755_v36  ;;  %v4868_v43 = vpop.f32.mrb[1].mxu1  ;;  %v4758_v44 = vpop.f32.mrb[2].mxu0  ;;  %v545_v40 = vld [vmem:[%s7688_s1 + $0x3d8] sm:$0xff] }
 0x10d   : > { %v4869_v47 = vadd.f32 %v4868_v43, %v4867_v39  ;;  %v4870_v48 = vpop.f32.mrb[2].mxu1  ;;  %v4759_v49 = vpop.f32.mrb[3].mxu0 }
 0x10e   : > { %v4760_v51 = vadd.f32 %v4759_v49, %v4758_v44  ;;  %v4871_v52 = vpop.f32.mrb[3].mxu1  ;;  %v4587_v44 = vcombine.low %v536_v14, %v540_v15  ;;  %v4596_v49 = vcombine.high %v544_v37, %v548_v38 }
 0x10f   : > { %v6270_v53 = vadd.f32 %v4869_v47, %v4757_v42  ;;  %v4872_v54 = vadd.f32 %v4871_v52, %v4870_v48  ;;  %1633 = vmatmul.mubr.bf16.gmra.mrb[108].mxu0 %v4563_v41  ;;  %v549_v41 = vld [vmem:[%s7688_s1 + $0x3f8] sm:$0xff]  ;;  %v4589_v48 = vcombine.low %v537_v18, %v541_v19 }
 0x110   : > { %1794 = vmatmul.mubr.bf16.gmra.mrb[108].mxu1 %v4565_v45  ;;  %1640 = vmatprep.mubr.bf16.mxu0 %v4572_v46 }
 0x111   : > { %v6272_v55 = vadd.f32 %v4872_v54, %v4760_v51  ;;  %1801 = vmatprep.mubr.bf16.mxu1 %v4574_v50  ;;  %v4598_v54 = vcombine.high %v545_v40, %v549_v41 }
 0x112   : > { %v4761_v58 = vpop.f32.mrb[4].mxu0 }
 0x113   : > { %v4873_v61 = vpop.f32.mrb[4].mxu1  ;;  %v4762_v62 = vpop.f32.mrb[5].mxu0 }
 0x114   : > { %v4763_v1 = vadd.f32 %v4762_v62, %v4761_v58  ;;  %v4874_v63 = vpop.f32.mrb[5].mxu1  ;;  %v4764_v3 = vpop.f32.mrb[6].mxu0 }
 0x115   : > { %v4875_v5 = vadd.f32 %v4874_v63, %v4873_v61  ;;  %v4876_v6 = vpop.f32.mrb[6].mxu1  ;;  %v4765_v7 = vpop.f32.mrb[7].mxu0 }
 0x116   : > { %v4766_v9 = vadd.f32 %v4765_v7, %v4764_v3  ;;  %v4877_v10 = vpop.f32.mrb[7].mxu1 }
 0x117   : > { %v6286_v11 = vadd.f32 %v4875_v5, %v4763_v1  ;;  %v4878_v12 = vadd.f32 %v4877_v10, %v4876_v6  ;;  %1641 = vmatmul.mubr.bf16.gmra.mrb[112].mxu0 %v4571_v0  ;;  %v4595_v1 = vcombine.low %v544_v37, %v548_v38 }
 0x118   : > { %1802 = vmatmul.mubr.bf16.gmra.mrb[112].mxu1 %v4573_v2  ;;  %1648 = vmatprep.mubr.bf16.mxu0 %v4580_v4  ;;  %v4597_v4 = vcombine.low %v545_v40, %v549_v41 }
 0x119   : > { %v6288_v13 = vadd.f32 %v4878_v12, %v4766_v9  ;;  %1809 = vmatprep.mubr.bf16.mxu1 %v4582_v8 }
 0x11a   : > { %v4767_v17 = vpop.f32.mrb[8].mxu0 }
 0x11b   : > { %v4879_v20 = vpop.f32.mrb[8].mxu1  ;;  %v4768_v21 = vpop.f32.mrb[9].mxu0 }
 0x11c   : > { %v4769_v23 = vadd.f32 %v4768_v21, %v4767_v17  ;;  %v4880_v24 = vpop.f32.mrb[9].mxu1  ;;  %v4770_v25 = vpop.f32.mrb[10].mxu0 }
 0x11d   : > { %v4881_v28 = vadd.f32 %v4880_v24, %v4879_v20  ;;  %v4882_v29 = vpop.f32.mrb[10].mxu1  ;;  %v4771_v30 = vpop.f32.mrb[11].mxu0 }
 0x11e   : > { %v4772_v32 = vadd.f32 %v4771_v30, %v4770_v25  ;;  %v4883_v33 = vpop.f32.mrb[11].mxu1 }
 0x11f   : > { %v6304_v34 = vadd.f32 %v4881_v28, %v4769_v23  ;;  %v4884_v35 = vadd.f32 %v4883_v33, %v4882_v29  ;;  %1649 = vmatmul.mubr.bf16.gmra.mrb[116].mxu0 %v4579_v22 }
 0x120   : > { %1810 = vmatmul.mubr.bf16.gmra.mrb[116].mxu1 %v4581_v26  ;;  %1656 = vmatprep.mubr.bf16.mxu0 %v4588_v27 }
 0x121   : > { %v6306_v36 = vadd.f32 %v4884_v35, %v4772_v32  ;;  %1817 = vmatprep.mubr.bf16.mxu1 %v4590_v31 }
 0x122   : > { %v4773_v39 = vpop.f32.mrb[12].mxu0 }
 0x123   : > { %v4885_v42 = vpop.f32.mrb[12].mxu1  ;;  %v4774_v43 = vpop.f32.mrb[13].mxu0 }
 0x124   : > { %v4775_v45 = vadd.f32 %v4774_v43, %v4773_v39  ;;  %v4886_v46 = vpop.f32.mrb[13].mxu1  ;;  %v4776_v47 = vpop.f32.mrb[14].mxu0 }
 0x125   : > { %v4887_v50 = vadd.f32 %v4886_v46, %v4885_v42  ;;  %v4888_v51 = vpop.f32.mrb[14].mxu1  ;;  %v4777_v52 = vpop.f32.mrb[15].mxu0 }
 0x126   : > { %v4778_v56 = vadd.f32 %v4777_v52, %v4776_v47  ;;  %v4889_v57 = vpop.f32.mrb[15].mxu1 }
 0x127   : > { %v6320_v58 = vadd.f32 %v4887_v50, %v4775_v45  ;;  %v4890_v59 = vadd.f32 %v4889_v57, %v4888_v51  ;;  %1657 = vmatmul.mubr.bf16.gmra.mrb[120].mxu0 %v4587_v44 }
 0x128   : > { %1818 = vmatmul.mubr.bf16.gmra.mrb[120].mxu1 %v4589_v48  ;;  %1664 = vmatprep.mubr.bf16.mxu0 %v4596_v49 }
 0x129   : > { %v6322_v60 = vadd.f32 %v4890_v59, %v4778_v56  ;;  %1825 = vmatprep.mubr.bf16.mxu1 %v4598_v54 }
 0x12a   : > { %v4779_v61 = vpop.f32.mrb[16].mxu0 }
 0x12b   : > { %v4891_v62 = vpop.f32.mrb[16].mxu1  ;;  %v4780_v0 = vpop.f32.mrb[17].mxu0 }
 0x12c   : > { %v4781_v63 = vadd.f32 %v4780_v0, %v4779_v61  ;;  %v4892_v3 = vpop.f32.mrb[17].mxu1  ;;  %v4782_v2 = vpop.f32.mrb[18].mxu0 }
 0x12d   : > { %v4893_v5 = vadd.f32 %v4892_v3, %v4891_v62  ;;  %v4894_v6 = vpop.f32.mrb[18].mxu1  ;;  %v4783_v7 = vpop.f32.mrb[19].mxu0 }
 0x12e   : > { %v4784_v8 = vadd.f32 %v4783_v7, %v4782_v2  ;;  %v4895_v9 = vpop.f32.mrb[19].mxu1 }
 0x12f   : > { %v6324_v10 = vadd.f32 %v4893_v5, %v4781_v63  ;;  %v4896_v12 = vadd.f32 %v4895_v9, %v4894_v6  ;;  %1665 = vmatmul.mubr.bf16.gmra.mrb[124].mxu0 %v4595_v1 }
 0x130   : > { %1826 = vmatmul.mubr.bf16.gmra.mrb[124].mxu1 %v4597_v4 }
 0x131   : > { %v6326_v14 = vadd.f32 %v4896_v12, %v4784_v8 }
 0x132   : > { %v4785_v15 = vpop.f32.mrb[20].mxu0 }
 0x133   : > { %v4897_v17 = vpop.f32.mrb[20].mxu1  ;;  %v4786_v18 = vpop.f32.mrb[21].mxu0 }
 0x134   : > { %v4787_v19 = vadd.f32 %v4786_v18, %v4785_v15  ;;  %v4898_v20 = vpop.f32.mrb[21].mxu1  ;;  %v4788_v21 = vpop.f32.mrb[22].mxu0 }
 0x135   : > { %v4899_v22 = vadd.f32 %v4898_v20, %v4897_v17  ;;  %v4900_v23 = vpop.f32.mrb[22].mxu1  ;;  %v4789_v24 = vpop.f32.mrb[23].mxu0 }
 0x136   : > { %v4790_v25 = vadd.f32 %v4789_v24, %v4788_v21  ;;  %v4901_v26 = vpop.f32.mrb[23].mxu1 }
 0x137   : > { %v6328_v27 = vadd.f32 %v4899_v22, %v4787_v19  ;;  %v4902_v28 = vadd.f32 %v4901_v26, %v4900_v23 }
 0x139   : > { %v6330_v29 = vadd.f32 %v4902_v28, %v4790_v25 }
 0x13a   : > { %v4791_v30 = vpop.f32.mrb[24].mxu0 }
 0x13b   : > { %v4903_v31 = vpop.f32.mrb[24].mxu1  ;;  %v4792_v32 = vpop.f32.mrb[25].mxu0 }
 0x13c   : > { %v4793_v33 = vadd.f32 %v4792_v32, %v4791_v30  ;;  %v4904_v35 = vpop.f32.mrb[25].mxu1  ;;  %v4794_v37 = vpop.f32.mrb[26].mxu0 }
 0x13d   : > { %v4905_v38 = vadd.f32 %v4904_v35, %v4903_v31  ;;  %v4906_v39 = vpop.f32.mrb[26].mxu1  ;;  %v4795_v40 = vpop.f32.mrb[27].mxu0 }
 0x13e   : > { %v4796_v41 = vadd.f32 %v4795_v40, %v4794_v37  ;;  %v4907_v42 = vpop.f32.mrb[27].mxu1 }
 0x13f   : > { %v6332_v43 = vadd.f32 %v4905_v38, %v4793_v33  ;;  %v4908_v44 = vadd.f32 %v4907_v42, %v4906_v39 }
 0x141   : > { %v6334_v45 = vadd.f32 %v4908_v44, %v4796_v41 }
 0x142   : > { %v4797_v46 = vpop.f32.mrb[28].mxu0 }
 0x143   : > { %v4909_v47 = vpop.f32.mrb[28].mxu1  ;;  %v4798_v48 = vpop.f32.mrb[29].mxu0 }
 0x144   : > { %v4799_v49 = vadd.f32 %v4798_v48, %v4797_v46  ;;  %v4910_v50 = vpop.f32.mrb[29].mxu1  ;;  %v4800_v51 = vpop.f32.mrb[30].mxu0 }
 0x145   : > { %v4911_v52 = vadd.f32 %v4910_v50, %v4909_v47  ;;  %v4912_v54 = vpop.f32.mrb[30].mxu1  ;;  %v4801_v56 = vpop.f32.mrb[31].mxu0 }
 0x146   : > { %v4802_v57 = vadd.f32 %v4801_v56, %v4800_v51  ;;  %v4913_v59 = vpop.f32.mrb[31].mxu1 }
 0x147   : > { %v6336_v61 = vadd.f32 %v4911_v52, %v4799_v49  ;;  %v4914_v62 = vadd.f32 %v4913_v59, %v4912_v54 }
 0x149   : > { %v6338_v0 = vadd.f32 %v4914_v62, %v4802_v57 }
 0x14a   : > { %v4803_v1 = vpop.f32.mrb[32].mxu0 }
 0x14b   : > { %v4915_v63 = vpop.f32.mrb[32].mxu1  ;;  %v4804_v3 = vpop.f32.mrb[33].mxu0 }
 0x14c   : > { %v4805_v2 = vadd.f32 %v4804_v3, %v4803_v1  ;;  %v4916_v4 = vpop.f32.mrb[33].mxu1  ;;  %v4806_v5 = vpop.f32.mrb[34].mxu0 }
 0x14d   : > { %v4917_v6 = vadd.f32 %v4916_v4, %v4915_v63  ;;  %v4918_v7 = vpop.f32.mrb[34].mxu1  ;;  %v4807_v8 = vpop.f32.mrb[35].mxu0 }
 0x14e   : > { %v4808_v9 = vadd.f32 %v4807_v8, %v4806_v5  ;;  %v4919_v12 = vpop.f32.mrb[35].mxu1 }
 0x14f   : > { %v6340_v15 = vadd.f32 %v4917_v6, %v4805_v2  ;;  %v4920_v17 = vadd.f32 %v4919_v12, %v4918_v7 }
 0x151   : > { %v6342_v18 = vadd.f32 %v4920_v17, %v4808_v9 }
 0x152   : > { %v4809_v19 = vpop.f32.mrb[36].mxu0 }
 0x153   : > { %v4921_v20 = vpop.f32.mrb[36].mxu1  ;;  %v4810_v21 = vpop.f32.mrb[37].mxu0 }
 0x154   : > { %v4811_v22 = vadd.f32 %v4810_v21, %v4809_v19  ;;  %v4922_v23 = vpop.f32.mrb[37].mxu1  ;;  %v4812_v24 = vpop.f32.mrb[38].mxu0 }
 0x155   : > { %v4923_v25 = vadd.f32 %v4922_v23, %v4921_v20  ;;  %v4924_v26 = vpop.f32.mrb[38].mxu1  ;;  %v4813_v28 = vpop.f32.mrb[39].mxu0 }
 0x156   : > { %v4814_v30 = vadd.f32 %v4813_v28, %v4812_v24  ;;  %v4925_v31 = vpop.f32.mrb[39].mxu1 }
 0x157   : > { %v6344_v32 = vadd.f32 %v4923_v25, %v4811_v22  ;;  %v4926_v33 = vadd.f32 %v4925_v31, %v4924_v26 }
 0x159   : > { %v6346_v35 = vadd.f32 %v4926_v33, %v4814_v30 }
 0x15a   : > { %v4815_v37 = vpop.f32.mrb[40].mxu0 }
 0x15b   : > { %v4927_v38 = vpop.f32.mrb[40].mxu1  ;;  %v4816_v39 = vpop.f32.mrb[41].mxu0 }
 0x15c   : > { %v4817_v40 = vadd.f32 %v4816_v39, %v4815_v37  ;;  %v4928_v41 = vpop.f32.mrb[41].mxu1  ;;  %v4818_v42 = vpop.f32.mrb[42].mxu0 }
 0x15d   : > { %v4929_v44 = vadd.f32 %v4928_v41, %v4927_v38  ;;  %v4930_v46 = vpop.f32.mrb[42].mxu1  ;;  %v4819_v47 = vpop.f32.mrb[43].mxu0 }
 0x15e   : > { %v4820_v48 = vadd.f32 %v4819_v47, %v4818_v42  ;;  %v4931_v49 = vpop.f32.mrb[43].mxu1 }
 0x15f   : > { %v6348_v50 = vadd.f32 %v4929_v44, %v4817_v40  ;;  %v4932_v51 = vadd.f32 %v4931_v49, %v4930_v46 }
 0x161   : > { %v6350_v52 = vadd.f32 %v4932_v51, %v4820_v48 }
 0x162   : > { %v4821_v54 = vpop.f32.mrb[44].mxu0 }
 0x163   : > { %v4933_v56 = vpop.f32.mrb[44].mxu1  ;;  %v4822_v57 = vpop.f32.mrb[45].mxu0 }
 0x164   : > { %v4823_v59 = vadd.f32 %v4822_v57, %v4821_v54  ;;  %v4934_v62 = vpop.f32.mrb[45].mxu1  ;;  %v4824_v1 = vpop.f32.mrb[46].mxu0 }
 0x165   : > { %v4935_v63 = vadd.f32 %v4934_v62, %v4933_v56  ;;  %v4936_v3 = vpop.f32.mrb[46].mxu1  ;;  %v4825_v2 = vpop.f32.mrb[47].mxu0 }
 0x166   : > { %v4826_v4 = vadd.f32 %v4825_v2, %v4824_v1  ;;  %v4937_v5 = vpop.f32.mrb[47].mxu1 }
 0x167   : > { %v6352_v6 = vadd.f32 %v4935_v63, %v4823_v59  ;;  %v4938_v7 = vadd.f32 %v4937_v5, %v4936_v3 }
 0x169   : > { %v6354_v8 = vadd.f32 %v4938_v7, %v4826_v4 }
 0x16a   : > { %v4827_v9 = vpop.f32.mrb[48].mxu0 }
 0x16b   : > { %v4939_v12 = vpop.f32.mrb[48].mxu1  ;;  %v4828_v17 = vpop.f32.mrb[49].mxu0 }
 0x16c   : > { %v4829_v19 = vadd.f32 %v4828_v17, %v4827_v9  ;;  %v4940_v20 = vpop.f32.mrb[49].mxu1  ;;  %v4830_v21 = vpop.f32.mrb[50].mxu0 }
 0x16d   : > { %v4941_v22 = vadd.f32 %v4940_v20, %v4939_v12  ;;  %v4942_v23 = vpop.f32.mrb[50].mxu1  ;;  %v4831_v24 = vpop.f32.mrb[51].mxu0 }
 0x16e   : > { %v4832_v25 = vadd.f32 %v4831_v24, %v4830_v21  ;;  %v4943_v26 = vpop.f32.mrb[51].mxu1 }
 0x16f   : > { %v6356_v28 = vadd.f32 %v4941_v22, %v4829_v19  ;;  %v4944_v30 = vadd.f32 %v4943_v26, %v4942_v23 }
 0x171   : > { %v6358_v31 = vadd.f32 %v4944_v30, %v4832_v25 }
 0x172   : > { %v4833_v33 = vpop.f32.mrb[52].mxu0 }
 0x173   : > { %v4945_v37 = vpop.f32.mrb[52].mxu1  ;;  %v4834_v38 = vpop.f32.mrb[53].mxu0 }
 0x174   : > { %v4835_v39 = vadd.f32 %v4834_v38, %v4833_v33  ;;  %v4946_v40 = vpop.f32.mrb[53].mxu1  ;;  %v4836_v41 = vpop.f32.mrb[54].mxu0 }
 0x175   : > { %v4947_v42 = vadd.f32 %v4946_v40, %v4945_v37  ;;  %v4948_v44 = vpop.f32.mrb[54].mxu1  ;;  %v4837_v46 = vpop.f32.mrb[55].mxu0 }
 0x176   : > { %v4838_v47 = vadd.f32 %v4837_v46, %v4836_v41  ;;  %v4949_v48 = vpop.f32.mrb[55].mxu1 }
 0x177   : > { %v6360_v49 = vadd.f32 %v4947_v42, %v4835_v39  ;;  %v4950_v51 = vadd.f32 %v4949_v48, %v4948_v44 }
 0x179   : > { %v6362_v54 = vadd.f32 %v4950_v51, %v4838_v47 }
 0x17a   : > { %v4839_v56 = vpop.f32.mrb[56].mxu0 }
 0x17b   : > { %v4951_v57 = vpop.f32.mrb[56].mxu1  ;;  %v4840_v59 = vpop.f32.mrb[57].mxu0 }
 0x17c   : > { %v4841_v62 = vadd.f32 %v4840_v59, %v4839_v56  ;;  %v4952_v1 = vpop.f32.mrb[57].mxu1  ;;  %v4842_v63 = vpop.f32.mrb[58].mxu0 }
 0x17d   : > { %v4953_v3 = vadd.f32 %v4952_v1, %v4951_v57  ;;  %v4954_v2 = vpop.f32.mrb[58].mxu1  ;;  %v4843_v4 = vpop.f32.mrb[59].mxu0 }
 0x17e   : > { %v4844_v5 = vadd.f32 %v4843_v4, %v4842_v63  ;;  %v4955_v7 = vpop.f32.mrb[59].mxu1  ;;  %v5334_v4 = vld [vmem:[%s7689_s2 + $0x4] ss:$8 sps:$4 sm:$0xff]  }
 0x17f   : > { %v6364_v9 = vadd.f32 %v4953_v3, %v4841_v62  ;;  %v4956_v12 = vadd.f32 %v4955_v7, %v4954_v2  ;;  %2682 = vmatprep.mubr.bf16.mxu0 %v5334_v4 }
 0x181   : > { %v6366_v17 = vadd.f32 %v4956_v12, %v4844_v5 }
 0x182   : > { %v4845_v19 = vpop.f32.mrb[60].mxu0 }
 0x183   : > { %v4957_v20 = vpop.f32.mrb[60].mxu1  ;;  %v4846_v21 = vpop.f32.mrb[61].mxu0 }
 0x184   : > { %v4847_v22 = vadd.f32 %v4846_v21, %v4845_v19  ;;  %v4958_v23 = vpop.f32.mrb[61].mxu1  ;;  %v4848_v24 = vpop.f32.mrb[62].mxu0 }
 0x185   : > { %v4959_v25 = vadd.f32 %v4958_v23, %v4957_v20  ;;  %v4960_v26 = vpop.f32.mrb[62].mxu1  ;;  %v4849_v30 = vpop.f32.mrb[63].mxu0 }
 0x186   : > { %v4850_v33 = vadd.f32 %v4849_v30, %v4848_v24  ;;  %v4961_v37 = vpop.f32.mrb[63].mxu1 }
 0x187   : > { %v6368_v38 = vadd.f32 %v4959_v25, %v4847_v22  ;;  %v4962_v39 = vadd.f32 %v4961_v37, %v4960_v26 }
 0x189   : > { %v6370_v40 = vadd.f32 %v4962_v39, %v4850_v33 }
 0x18a   : > { %v4979_v41 = vpop.f32.mrb[64].mxu0 }
 0x18b   : > { %v5091_v42 = vpop.f32.mrb[64].mxu1  ;;  %v4980_v44 = vpop.f32.mrb[65].mxu0 }
 0x18c   : > { %v4981_v46 = vadd.f32 %v4980_v44, %v4979_v41  ;;  %v5092_v47 = vpop.f32.mrb[65].mxu1  ;;  %v4982_v48 = vpop.f32.mrb[66].mxu0 }
 0x18d   : > { %v5093_v51 = vadd.f32 %v5092_v47, %v5091_v42  ;;  %v5094_v56 = vpop.f32.mrb[66].mxu1  ;;  %v4983_v57 = vpop.f32.mrb[67].mxu0 }
 0x18e   : > { %v1547_v59 = vadd.f32 %v4981_v46, %v6270_v53  ;;  %v4984_v62 = vadd.f32 %v4983_v57, %v4982_v48  ;;  %v5095_v1 = vpop.f32.mrb[67].mxu1 }
 0x18f   : > { %v5096_v63 = vadd.f32 %v5095_v1, %v5094_v56 }
 0x190   : > { %v1708_v3 = vadd.f32 %v5093_v51, %v1547_v59  ;;  %v1550_v2 = vadd.f32 %v4984_v62, %v6272_v55 }
 0x192   : > { %v1711_v5 = vadd.f32 %v5096_v63, %v1550_v2  ;;  %v4985_v7 = vpop.f32.mrb[68].mxu0  ;;  %v1834_v20 = vmax.f32 %v1708_v3, 0.0 }
 0x193   : > { %v5097_v12 = vpop.f32.mrb[68].mxu1  ;;  %v4986_v19 = vpop.f32.mrb[69].mxu0 }
 0x194   : > { %v1835_v21 = vmax.f32 %v1711_v5, 0.0  ;;  %v4987_v22 = vadd.f32 %v4986_v19, %v4985_v7  ;;  %v5098_v23 = vpop.f32.mrb[69].mxu1  ;;  %v4988_v53 = vpop.f32.mrb[70].mxu0 }
 0x195   : > { %v5099_v24 = vadd.f32 %v5098_v23, %v5097_v12  ;;  %v5100_v25 = vpop.f32.mrb[70].mxu1  ;;  %v4989_v26 = vpop.f32.mrb[71].mxu0 }
 0x196   : > { %v1866_v30 = vpack.c.bf16 %v1835_v21, %v1834_v20  ;;  %v1555_v55 = vadd.f32 %v4987_v22, %v6286_v11  ;;  %v4990_v33 = vadd.f32 %v4989_v26, %v4988_v53  ;;  %v5101_v37 = vpop.f32.mrb[71].mxu1 }
 0x197   : > { %v5102_v39 = vadd.f32 %v5101_v37, %v5100_v25 }
 0x198   : > { %v1716_v41 = vadd.f32 %v5099_v24, %v1555_v55  ;;  %v1558_v42 = vadd.f32 %v4990_v33, %v6288_v13  ;;  %2651 = vmatpush1.bf16.msra.mxu0 %v1866_v30  ;;  %5291 = vmatpush1.bf16.msra.mxu1 %v1866_v30 }
 0x199   : > { %2652 = vmatprep.subr.bf16.mxu0 %v5678_v16  ;;  %5276 = vmatprep.subr.bf16.mxu1 %v5678_v16 }
 0x19a   : > { %v1719_v44 = vadd.f32 %v5102_v39, %v1558_v42  ;;  %v4991_v46 = vpop.f32.mrb[72].mxu0  ;;  %v1836_v51 = vmax.f32 %v1716_v41, 0.0 }
 0x19b   : > { %v5103_v47 = vpop.f32.mrb[72].mxu1  ;;  %v4992_v48 = vpop.f32.mrb[73].mxu0 }
 0x19c   : > { %v1837_v56 = vmax.f32 %v1719_v44, 0.0  ;;  %v4993_v57 = vadd.f32 %v4992_v48, %v4991_v46  ;;  %v5104_v11 = vpop.f32.mrb[73].mxu1  ;;  %v4994_v59 = vpop.f32.mrb[74].mxu0 }
 0x19d   : > { %v5105_v62 = vadd.f32 %v5104_v11, %v5103_v47  ;;  %v5106_v1 = vpop.f32.mrb[74].mxu1  ;;  %v4995_v63 = vpop.f32.mrb[75].mxu0 }
 0x19e   : > { %v1867_v3 = vpack.c.bf16 %v1837_v56, %v1836_v51  ;;  %v1563_v13 = vadd.f32 %v4993_v57, %v6304_v34  ;;  %v4996_v2 = vadd.f32 %v4995_v63, %v4994_v59  ;;  %v5107_v4 = vpop.f32.mrb[75].mxu1 }
 0x19f   : > { %v5108_v5 = vadd.f32 %v5107_v4, %v5106_v1 }
 0x1a0   : > { %v1724_v7 = vadd.f32 %v5105_v62, %v1563_v13  ;;  %v1566_v12 = vadd.f32 %v4996_v2, %v6306_v36  ;;  %2653 = vmatpush1.bf16.msra.mxu0 %v1867_v3  ;;  %5292 = vmatpush1.bf16.msra.mxu1 %v1867_v3 }
 0x1a1   : > { %2654 = vmatprep.subr.bf16.mxu0 %v5678_v16  ;;  %5277 = vmatprep.subr.bf16.mxu1 %v5678_v16 }
 0x1a2   : > { %v1727_v19 = vadd.f32 %v5108_v5, %v1566_v12  ;;  %v4997_v20 = vpop.f32.mrb[76].mxu0  ;;  %v1838_v23 = vmax.f32 %v1724_v7, 0.0 }
 0x1a3   : > { %v5109_v21 = vpop.f32.mrb[76].mxu1  ;;  %v4998_v22 = vpop.f32.mrb[77].mxu0 }
 0x1a4   : > { %v1839_v53 = vmax.f32 %v1727_v19, 0.0  ;;  %v4999_v24 = vadd.f32 %v4998_v22, %v4997_v20  ;;  %v5110_v34 = vpop.f32.mrb[77].mxu1  ;;  %v5000_v25 = vpop.f32.mrb[78].mxu0 }
 0x1a5   : > { %v5111_v26 = vadd.f32 %v5110_v34, %v5109_v21  ;;  %v5112_v30 = vpop.f32.mrb[78].mxu1  ;;  %v5001_v55 = vpop.f32.mrb[79].mxu0 }
 0x1a6   : > { %v1868_v33 = vpack.c.bf16 %v1839_v53, %v1838_v23  ;;  %v1571_v36 = vadd.f32 %v4999_v24, %v6320_v58  ;;  %v5002_v37 = vadd.f32 %v5001_v55, %v5000_v25  ;;  %v5113_v39 = vpop.f32.mrb[79].mxu1 }
 0x1a7   : > { %v5114_v41 = vadd.f32 %v5113_v39, %v5112_v30 }
 0x1a8   : > { %v1732_v42 = vadd.f32 %v5111_v26, %v1571_v36  ;;  %v1574_v44 = vadd.f32 %v5002_v37, %v6322_v60  ;;  %2655 = vmatpush1.bf16.msra.mxu0 %v1868_v33  ;;  %5293 = vmatpush1.bf16.msra.mxu1 %v1868_v33 }
 0x1a9   : > { %2656 = vmatprep.subr.bf16.mxu0 %v5678_v16  ;;  %5278 = vmatprep.subr.bf16.mxu1 %v5678_v16 }
 0x1aa   : > { %v1735_v46 = vadd.f32 %v5114_v41, %v1574_v44  ;;  %v5003_v47 = vpop.f32.mrb[80].mxu0  ;;  %v1840_v56 = vmax.f32 %v1732_v42, 0.0 }
 0x1ab   : > { %v5115_v48 = vpop.f32.mrb[80].mxu1  ;;  %v5004_v51 = vpop.f32.mrb[81].mxu0 }
 0x1ac   : > { %v1841_v57 = vmax.f32 %v1735_v46, 0.0  ;;  %v5005_v11 = vadd.f32 %v5004_v51, %v5003_v47  ;;  %v5116_v58 = vpop.f32.mrb[81].mxu1  ;;  %v5006_v59 = vpop.f32.mrb[82].mxu0 }
 0x1ad   : > { %v5117_v62 = vadd.f32 %v5116_v58, %v5115_v48  ;;  %v5118_v1 = vpop.f32.mrb[82].mxu1  ;;  %v5007_v63 = vpop.f32.mrb[83].mxu0 }
 0x1ae   : > { %v1869_v3 = vpack.c.bf16 %v1841_v57, %v1840_v56  ;;  %v1579_v60 = vadd.f32 %v5005_v11, %v6324_v10  ;;  %v5008_v13 = vadd.f32 %v5007_v63, %v5006_v59  ;;  %v5119_v2 = vpop.f32.mrb[83].mxu1 }
 0x1af   : > { %v5120_v4 = vadd.f32 %v5119_v2, %v5118_v1 }
 0x1b0   : > { %v1740_v5 = vadd.f32 %v5117_v62, %v1579_v60  ;;  %v1582_v7 = vadd.f32 %v5008_v13, %v6326_v14  ;;  %2657 = vmatpush1.bf16.msra.mxu0 %v1869_v3  ;;  %5294 = vmatpush1.bf16.msra.mxu1 %v1869_v3 }
 0x1b1   : > { %2658 = vmatprep.subr.bf16.mxu0 %v5678_v16  ;;  %5279 = vmatprep.subr.bf16.mxu1 %v5678_v16 }
 0x1b2   : > { %v1743_v12 = vadd.f32 %v5120_v4, %v1582_v7  ;;  %v5009_v19 = vpop.f32.mrb[84].mxu0  ;;  %v1842_v22 = vmax.f32 %v1740_v5, 0.0 }
 0x1b3   : > { %v5121_v20 = vpop.f32.mrb[84].mxu1  ;;  %v5010_v21 = vpop.f32.mrb[85].mxu0 }
 0x1b4   : > { %v1843_v23 = vmax.f32 %v1743_v12, 0.0  ;;  %v5011_v53 = vadd.f32 %v5010_v21, %v5009_v19  ;;  %v5122_v10 = vpop.f32.mrb[85].mxu1  ;;  %v5012_v24 = vpop.f32.mrb[86].mxu0 }
 0x1b5   : > { %v5123_v34 = vadd.f32 %v5122_v10, %v5121_v20  ;;  %v5124_v25 = vpop.f32.mrb[86].mxu1  ;;  %v5013_v26 = vpop.f32.mrb[87].mxu0 }
 0x1b6   : > { %v1870_v30 = vpack.c.bf16 %v1843_v23, %v1842_v22  ;;  %v1587_v14 = vadd.f32 %v5011_v53, %v6328_v27  ;;  %v5014_v55 = vadd.f32 %v5013_v26, %v5012_v24  ;;  %v5125_v33 = vpop.f32.mrb[87].mxu1 }
 0x1b7   : > { %v5126_v36 = vadd.f32 %v5125_v33, %v5124_v25 }
 0x1b8   : > { %v1748_v37 = vadd.f32 %v5123_v34, %v1587_v14  ;;  %v1590_v39 = vadd.f32 %v5014_v55, %v6330_v29  ;;  %2659 = vmatpush1.bf16.msra.mxu0 %v1870_v30  ;;  %5295 = vmatpush1.bf16.msra.mxu1 %v1870_v30 }
 0x1b9   : > { %2660 = vmatprep.subr.bf16.mxu0 %v5678_v16  ;;  %5280 = vmatprep.subr.bf16.mxu1 %v5678_v16 }
 0x1ba   : > { %v1751_v41 = vadd.f32 %v5126_v36, %v1590_v39  ;;  %v5015_v42 = vpop.f32.mrb[88].mxu0  ;;  %v1844_v47 = vmax.f32 %v1748_v37, 0.0 }
 0x1bb   : > { %v5127_v44 = vpop.f32.mrb[88].mxu1  ;;  %v5016_v46 = vpop.f32.mrb[89].mxu0 }
 0x1bc   : > { %v1845_v48 = vmax.f32 %v1751_v41, 0.0  ;;  %v5017_v51 = vadd.f32 %v5016_v46, %v5015_v42  ;;  %v5128_v27 = vpop.f32.mrb[89].mxu1  ;;  %v5018_v56 = vpop.f32.mrb[90].mxu0 }
 0x1bd   : > { %v5129_v57 = vadd.f32 %v5128_v27, %v5127_v44  ;;  %v5130_v11 = vpop.f32.mrb[90].mxu1  ;;  %v5019_v58 = vpop.f32.mrb[91].mxu0 }
 0x1be   : > { %v1871_v59 = vpack.c.bf16 %v1845_v48, %v1844_v47  ;;  %v1595_v29 = vadd.f32 %v5017_v51, %v6332_v43  ;;  %v5020_v62 = vadd.f32 %v5019_v58, %v5018_v56  ;;  %v5131_v1 = vpop.f32.mrb[91].mxu1 }
 0x1bf   : > { %v5132_v63 = vadd.f32 %v5131_v1, %v5130_v11 }
 0x1c0   : > { %v1756_v3 = vadd.f32 %v5129_v57, %v1595_v29  ;;  %v1598_v60 = vadd.f32 %v5020_v62, %v6334_v45  ;;  %2661 = vmatpush1.bf16.msra.mxu0 %v1871_v59  ;;  %5296 = vmatpush1.bf16.msra.mxu1 %v1871_v59 }
 0x1c1   : > { %2662 = vmatprep.subr.bf16.mxu0 %v5678_v16  ;;  %5281 = vmatprep.subr.bf16.mxu1 %v5678_v16 }
 0x1c2   : > { %v1759_v13 = vadd.f32 %v5132_v63, %v1598_v60  ;;  %v5021_v2 = vpop.f32.mrb[92].mxu0  ;;  %v1846_v7 = vmax.f32 %v1756_v3, 0.0 }
 0x1c3   : > { %v5133_v4 = vpop.f32.mrb[92].mxu1  ;;  %v5022_v5 = vpop.f32.mrb[93].mxu0 }
 0x1c4   : > { %v1847_v12 = vmax.f32 %v1759_v13, 0.0  ;;  %v5023_v19 = vadd.f32 %v5022_v5, %v5021_v2  ;;  %v5134_v43 = vpop.f32.mrb[93].mxu1  ;;  %v5024_v20 = vpop.f32.mrb[94].mxu0 }
 0x1c5   : > { %v5135_v21 = vadd.f32 %v5134_v43, %v5133_v4  ;;  %v5136_v22 = vpop.f32.mrb[94].mxu1  ;;  %v5025_v23 = vpop.f32.mrb[95].mxu0 }
 0x1c6   : > { %v1872_v53 = vpack.c.bf16 %v1847_v12, %v1846_v7  ;;  %v1603_v45 = vadd.f32 %v5023_v19, %v6336_v61  ;;  %v5026_v10 = vadd.f32 %v5025_v23, %v5024_v20  ;;  %v5137_v24 = vpop.f32.mrb[95].mxu1 }
 0x1c7   : > { %v5138_v34 = vadd.f32 %v5137_v24, %v5136_v22 }
 0x1c8   : > { %v1764_v25 = vadd.f32 %v5135_v21, %v1603_v45  ;;  %v1606_v26 = vadd.f32 %v5026_v10, %v6338_v0  ;;  %2663 = vmatpush1.bf16.msra.mxu0 %v1872_v53  ;;  %5297 = vmatpush1.bf16.msra.mxu1 %v1872_v53 }
 0x1c9   : > { %2664 = vmatprep.subr.bf16.mxu0 %v5678_v16  ;;  %5282 = vmatprep.subr.bf16.mxu1 %v5678_v16 }
 0x1ca   : > { %v1767_v30 = vadd.f32 %v5138_v34, %v1606_v26  ;;  %v5027_v14 = vpop.f32.mrb[96].mxu0  ;;  %v1848_v36 = vmax.f32 %v1764_v25, 0.0 }
 0x1cb   : > { %v5139_v55 = vpop.f32.mrb[96].mxu1  ;;  %v5028_v33 = vpop.f32.mrb[97].mxu0 }
 0x1cc   : > { %v1849_v37 = vmax.f32 %v1767_v30, 0.0  ;;  %v5029_v39 = vadd.f32 %v5028_v33, %v5027_v14  ;;  %v5140_v61 = vpop.f32.mrb[97].mxu1  ;;  %v5030_v41 = vpop.f32.mrb[98].mxu0 }
 0x1cd   : > { %v5141_v42 = vadd.f32 %v5140_v61, %v5139_v55  ;;  %v5142_v44 = vpop.f32.mrb[98].mxu1  ;;  %v5031_v46 = vpop.f32.mrb[99].mxu0 }
 0x1ce   : > { %v1873_v47 = vpack.c.bf16 %v1849_v37, %v1848_v36  ;;  %v1611_v0 = vadd.f32 %v5029_v39, %v6340_v15  ;;  %v5032_v48 = vadd.f32 %v5031_v46, %v5030_v41  ;;  %v5143_v51 = vpop.f32.mrb[99].mxu1 }
 0x1cf   : > { %v5144_v27 = vadd.f32 %v5143_v51, %v5142_v44 }
 0x1d0   : > { %v1772_v56 = vadd.f32 %v5141_v42, %v1611_v0  ;;  %v1614_v57 = vadd.f32 %v5032_v48, %v6342_v18  ;;  %2665 = vmatpush1.bf16.msra.mxu0 %v1873_v47  ;;  %5298 = vmatpush1.bf16.msra.mxu1 %v1873_v47 }
 0x1d1   : > { %2666 = vmatprep.subr.bf16.mxu0 %v5678_v16  ;;  %5283 = vmatprep.subr.bf16.mxu1 %v5678_v16 }
 0x1d2   : > { %v1775_v11 = vadd.f32 %v5144_v27, %v1614_v57  ;;  %v5033_v58 = vpop.f32.mrb[100].mxu0  ;;  %v1850_v62 = vmax.f32 %v1772_v56, 0.0 }
 0x1d3   : > { %v5145_v59 = vpop.f32.mrb[100].mxu1  ;;  %v5034_v29 = vpop.f32.mrb[101].mxu0 }
 0x1d4   : > { %v1851_v1 = vmax.f32 %v1775_v11, 0.0  ;;  %v5035_v63 = vadd.f32 %v5034_v29, %v5033_v58  ;;  %v5146_v15 = vpop.f32.mrb[101].mxu1  ;;  %v5036_v3 = vpop.f32.mrb[102].mxu0 }
 0x1d5   : > { %v5147_v60 = vadd.f32 %v5146_v15, %v5145_v59  ;;  %v5148_v13 = vpop.f32.mrb[102].mxu1  ;;  %v5037_v2 = vpop.f32.mrb[103].mxu0 }
 0x1d6   : > { %v1874_v4 = vpack.c.bf16 %v1851_v1, %v1850_v62  ;;  %v1619_v18 = vadd.f32 %v5035_v63, %v6344_v32  ;;  %v5038_v5 = vadd.f32 %v5037_v2, %v5036_v3  ;;  %v5149_v7 = vpop.f32.mrb[103].mxu1 }
 0x1d7   : > { %v5150_v12 = vadd.f32 %v5149_v7, %v5148_v13 }
 0x1d8   : > { %v1780_v19 = vadd.f32 %v5147_v60, %v1619_v18  ;;  %v1622_v43 = vadd.f32 %v5038_v5, %v6346_v35  ;;  %2667 = vmatpush1.bf16.msra.mxu0 %v1874_v4  ;;  %5299 = vmatpush1.bf16.msra.mxu1 %v1874_v4 }
 0x1d9   : > { %2668 = vmatprep.subr.bf16.mxu0 %v5678_v16  ;;  %5284 = vmatprep.subr.bf16.mxu1 %v5678_v16 }
 0x1da   : > { %v1783_v20 = vadd.f32 %v5150_v12, %v1622_v43  ;;  %v5039_v21 = vpop.f32.mrb[104].mxu0  ;;  %v1852_v53 = vmax.f32 %v1780_v19, 0.0 }
 0x1db   : > { %v5151_v22 = vpop.f32.mrb[104].mxu1  ;;  %v5040_v23 = vpop.f32.mrb[105].mxu0 }
 0x1dc   : > { %v1853_v45 = vmax.f32 %v1783_v20, 0.0  ;;  %v5041_v10 = vadd.f32 %v5040_v23, %v5039_v21  ;;  %v5152_v32 = vpop.f32.mrb[105].mxu1  ;;  %v5042_v24 = vpop.f32.mrb[106].mxu0 }
 0x1dd   : > { %v5153_v34 = vadd.f32 %v5152_v32, %v5151_v22  ;;  %v5154_v25 = vpop.f32.mrb[106].mxu1  ;;  %v5043_v26 = vpop.f32.mrb[107].mxu0 }
 0x1de   : > { %v1875_v30 = vpack.c.bf16 %v1853_v45, %v1852_v53  ;;  %v1627_v35 = vadd.f32 %v5041_v10, %v6348_v50  ;;  %v5044_v14 = vadd.f32 %v5043_v26, %v5042_v24  ;;  %v5155_v55 = vpop.f32.mrb[107].mxu1 }
 0x1df   : > { %v5156_v33 = vadd.f32 %v5155_v55, %v5154_v25 }
 0x1e0   : > { %v1788_v36 = vadd.f32 %v5153_v34, %v1627_v35  ;;  %v1630_v37 = vadd.f32 %v5044_v14, %v6350_v52  ;;  %2669 = vmatpush1.bf16.msra.mxu0 %v1875_v30  ;;  %5300 = vmatpush1.bf16.msra.mxu1 %v1875_v30 }
 0x1e1   : > { %2670 = vmatprep.subr.bf16.mxu0 %v5678_v16  ;;  %5285 = vmatprep.subr.bf16.mxu1 %v5678_v16 }
 0x1e2   : > { %v1791_v39 = vadd.f32 %v5156_v33, %v1630_v37  ;;  %v5045_v61 = vpop.f32.mrb[108].mxu0  ;;  %v1854_v44 = vmax.f32 %v1788_v36, 0.0 }
 0x1e3   : > { %v5157_v41 = vpop.f32.mrb[108].mxu1  ;;  %v5046_v42 = vpop.f32.mrb[109].mxu0 }
 0x1e4   : > { %v1855_v46 = vmax.f32 %v1791_v39, 0.0  ;;  %v5047_v47 = vadd.f32 %v5046_v42, %v5045_v61  ;;  %v5158_v50 = vpop.f32.mrb[109].mxu1  ;;  %v5048_v0 = vpop.f32.mrb[110].mxu0 }
 0x1e5   : > { %v5159_v48 = vadd.f32 %v5158_v50, %v5157_v41  ;;  %v5160_v51 = vpop.f32.mrb[110].mxu1  ;;  %v5049_v27 = vpop.f32.mrb[111].mxu0 }
 0x1e6   : > { %v1876_v56 = vpack.c.bf16 %v1855_v46, %v1854_v44  ;;  %v1635_v52 = vadd.f32 %v5047_v47, %v6352_v6  ;;  %v5050_v57 = vadd.f32 %v5049_v27, %v5048_v0  ;;  %v5161_v11 = vpop.f32.mrb[111].mxu1 }
 0x1e7   : > { %v5162_v58 = vadd.f32 %v5161_v11, %v5160_v51 }
 0x1e8   : > { %v1796_v59 = vadd.f32 %v5159_v48, %v1635_v52  ;;  %v1638_v29 = vadd.f32 %v5050_v57, %v6354_v8  ;;  %2671 = vmatpush1.bf16.msra.mxu0 %v1876_v56  ;;  %5301 = vmatpush1.bf16.msra.mxu1 %v1876_v56 }
 0x1e9   : > { %2672 = vmatprep.subr.bf16.mxu0 %v5678_v16  ;;  %5286 = vmatprep.subr.bf16.mxu1 %v5678_v16 }
 0x1ea   : > { %v1799_v62 = vadd.f32 %v5162_v58, %v1638_v29  ;;  %v5051_v1 = vpop.f32.mrb[112].mxu0  ;;  %v1856_v3 = vmax.f32 %v1796_v59, 0.0 }
 0x1eb   : > { %v5163_v63 = vpop.f32.mrb[112].mxu1  ;;  %v5052_v15 = vpop.f32.mrb[113].mxu0 }
 0x1ec   : > { %v1857_v60 = vmax.f32 %v1799_v62, 0.0  ;;  %v5053_v13 = vadd.f32 %v5052_v15, %v5051_v1  ;;  %v5164_v6 = vpop.f32.mrb[113].mxu1  ;;  %v5054_v2 = vpop.f32.mrb[114].mxu0 }
 0x1ed   : > { %v5165_v4 = vadd.f32 %v5164_v6, %v5163_v63  ;;  %v5166_v18 = vpop.f32.mrb[114].mxu1  ;;  %v5055_v5 = vpop.f32.mrb[115].mxu0 }
 0x1ee   : > { %v1877_v7 = vpack.c.bf16 %v1857_v60, %v1856_v3  ;;  %v1643_v8 = vadd.f32 %v5053_v13, %v6356_v28  ;;  %v5056_v12 = vadd.f32 %v5055_v5, %v5054_v2  ;;  %v5167_v19 = vpop.f32.mrb[115].mxu1 }
 0x1ef   : > { %v5168_v43 = vadd.f32 %v5167_v19, %v5166_v18 }
 0x1f0   : > { %v1804_v20 = vadd.f32 %v5165_v4, %v1643_v8  ;;  %v1646_v21 = vadd.f32 %v5056_v12, %v6358_v31  ;;  %2673 = vmatpush1.bf16.msra.mxu0 %v1877_v7  ;;  %5302 = vmatpush1.bf16.msra.mxu1 %v1877_v7 }
 0x1f1   : > { %2674 = vmatprep.subr.bf16.mxu0 %v5678_v16  ;;  %5287 = vmatprep.subr.bf16.mxu1 %v5678_v16 }
 0x1f2   : > { %v1807_v22 = vadd.f32 %v5168_v43, %v1646_v21  ;;  %v5057_v23 = vpop.f32.mrb[116].mxu0  ;;  %v1858_v10 = vmax.f32 %v1804_v20, 0.0 }
 0x1f3   : > { %v5169_v53 = vpop.f32.mrb[116].mxu1  ;;  %v5058_v45 = vpop.f32.mrb[117].mxu0 }
 0x1f4   : > { %v1859_v32 = vmax.f32 %v1807_v22, 0.0  ;;  %v5059_v24 = vadd.f32 %v5058_v45, %v5057_v23  ;;  %v5170_v28 = vpop.f32.mrb[117].mxu1  ;;  %v5060_v34 = vpop.f32.mrb[118].mxu0  ;;  %v5338_v22 = vld [vmem:[%s7689_s2 + $0x24] ss:$8 sps:$4 sm:$0xff]  }
 0x1f5   : > { %v5171_v25 = vadd.f32 %v5170_v28, %v5169_v53  ;;  %v5172_v26 = vpop.f32.mrb[118].mxu1  ;;  %v5061_v30 = vpop.f32.mrb[119].mxu0  ;;  %v5340_v23 = vld [vmem:[%s7689_s2 + $0x20] ss:$8 sps:$4 sm:$0xff]   ;;  %v5341_v53 = vld [vmem:[%s7689_s2 + $0x34] ss:$8 sps:$4 sm:$0xff]  }
 0x1f6   : > { %v1878_v35 = vpack.c.bf16 %v1859_v32, %v1858_v10  ;;  %v1651_v31 = vadd.f32 %v5059_v24, %v6360_v49  ;;  %v5062_v14 = vadd.f32 %v5061_v30, %v5060_v34  ;;  %v5173_v55 = vpop.f32.mrb[119].mxu1  ;;  %v5391_v45 = vld [vmem:[%s7689_s2 + $0x274] ss:$8 sps:$4 sm:$0xff]   ;;  %v5389_v10 = vld [vmem:[%s7689_s2 + $0x270] ss:$8 sps:$4 sm:$0xff]  }
 0x1f7   : > { %v5174_v33 = vadd.f32 %v5173_v55, %v5172_v26  ;;  %2994 = vmatprep.mubr.bf16.mxu1 %v5391_v45  ;;  %v5343_v32 = vld [vmem:[%s7689_s2 + $0x30] ss:$8 sps:$4 sm:$0xff]   ;;  %v5344_v24 = vld [vmem:[%s7689_s2 + $0x44] ss:$8 sps:$4 sm:$0xff]   ;;  %v5397_v34 = vld [vmem:[%s7689_s2 + $0x280] ss:$8 sps:$4 sm:$0xff]  }
 0x1f8   : > { %v1812_v36 = vadd.f32 %v5171_v25, %v1651_v31  ;;  %v1654_v37 = vadd.f32 %v5062_v14, %v6362_v54  ;;  %2675 = vmatpush1.bf16.msra.mxu0 %v1878_v35  ;;  %5303 = vmatpush1.bf16.msra.mxu1 %v1878_v35  ;;  %v5395_v28 = vld [vmem:[%s7689_s2 + $0x284] ss:$8 sps:$4 sm:$0xff]   ;;  %v5346_v25 = vld [vmem:[%s7689_s2 + $0x40] ss:$8 sps:$4 sm:$0xff]   ;;  %v5347_v26 = vld [vmem:[%s7689_s2 + $0x54] ss:$8 sps:$4 sm:$0xff]  }
 0x1f9   : > { %2676 = vmatprep.subr.bf16.mxu0 %v5678_v16  ;;  %5288 = vmatprep.subr.bf16.mxu1 %v5678_v16  ;;  %v5401_v30 = vld [vmem:[%s7689_s2 + $0x294] ss:$8 sps:$4 sm:$0xff]   ;;  %v5403_v35 = vld [vmem:[%s7689_s2 + $0x290] ss:$8 sps:$4 sm:$0xff]   ;;  %v5350_v14 = vld [vmem:[%s7689_s2 + $0x64] ss:$8 sps:$4 sm:$0xff]  }
 0x1fa   : > { %v1815_v39 = vadd.f32 %v5174_v33, %v1654_v37  ;;  %v5063_v61 = vpop.f32.mrb[120].mxu0  ;;  %v1860_v44 = vmax.f32 %v1812_v36, 0.0  ;;  %v5349_v31 = vld [vmem:[%s7689_s2 + $0x50] ss:$8 sps:$4 sm:$0xff]   ;;  %v5407_v55 = vld [vmem:[%s7689_s2 + $0x2a4] ss:$8 sps:$4 sm:$0xff]  }
 0x1fb   : > { %v5175_v41 = vpop.f32.mrb[120].mxu1  ;;  %v5064_v42 = vpop.f32.mrb[121].mxu0  ;;  %v5409_v33 = vld [vmem:[%s7689_s2 + $0x2a0] ss:$8 sps:$4 sm:$0xff]   ;;  %v5353_v37 = vld [vmem:[%s7689_s2 + $0x74] ss:$8 sps:$4 sm:$0xff]  }
 0x1fc   : > { %v1861_v46 = vmax.f32 %v1815_v39, 0.0  ;;  %v5065_v47 = vadd.f32 %v5064_v42, %v5063_v61  ;;  %v5176_v49 = vpop.f32.mrb[121].mxu1  ;;  %v5066_v50 = vpop.f32.mrb[122].mxu0  ;;  %v5352_v36 = vld [vmem:[%s7689_s2 + $0x60] ss:$8 sps:$4 sm:$0xff]  }
 0x1fd   : > { %v5177_v0 = vadd.f32 %v5176_v49, %v5175_v41  ;;  %v5178_v48 = vpop.f32.mrb[122].mxu1  ;;  %v5067_v51 = vpop.f32.mrb[123].mxu0  ;;  %v5413_v39 = vld [vmem:[%s7689_s2 + $0x2b4] ss:$8 sps:$4 sm:$0xff]   ;;  %v5415_v61 = vld [vmem:[%s7689_s2 + $0x2b0] ss:$8 sps:$4 sm:$0xff]  }
 0x1fe   : > { %v1879_v27 = vpack.c.bf16 %v1861_v46, %v1860_v44  ;;  %v1659_v54 = vadd.f32 %v5065_v47, %v6364_v9  ;;  %v5068_v56 = vadd.f32 %v5067_v51, %v5066_v50  ;;  %v5179_v52 = vpop.f32.mrb[123].mxu1  ;;  %v5355_v41 = vld [vmem:[%s7689_s2 + $0x70] ss:$8 sps:$4 sm:$0xff]   ;;  %v5356_v42 = vld [vmem:[%s7689_s2 + $0x84] ss:$8 sps:$4 sm:$0xff]  }
 0x1ff   : > { %v5180_v57 = vadd.f32 %v5179_v52, %v5178_v48  ;;  %v5419_v44 = vld [vmem:[%s7689_s2 + $0x2c4] ss:$8 sps:$4 sm:$0xff]   ;;  %v5421_v46 = vld [vmem:[%s7689_s2 + $0x2c0] ss:$8 sps:$4 sm:$0xff]   ;;  %v5359_v49 = vld [vmem:[%s7689_s2 + $0x94] ss:$8 sps:$4 sm:$0xff]  }
 0x200   : > { %v1820_v11 = vadd.f32 %v5177_v0, %v1659_v54  ;;  %v1662_v58 = vadd.f32 %v5068_v56, %v6366_v17  ;;  %2677 = vmatpush1.bf16.msra.mxu0 %v1879_v27  ;;  %5304 = vmatpush1.bf16.msra.mxu1 %v1879_v27  ;;  %v5358_v47 = vld [vmem:[%s7689_s2 + $0x80] ss:$8 sps:$4 sm:$0xff]   ;;  %v5425_v50 = vld [vmem:[%s7689_s2 + $0x2d4] ss:$8 sps:$4 sm:$0xff]   ;;  %v5427_v0 = vld [vmem:[%s7689_s2 + $0x2d0] ss:$8 sps:$4 sm:$0xff]  }
 0x201   : > { %2678 = vmatprep.subr.bf16.mxu0 %v5678_v16  ;;  %5289 = vmatprep.subr.bf16.mxu1 %v5678_v16  ;;  %v5361_v48 = vld [vmem:[%s7689_s2 + $0x90] ss:$8 sps:$4 sm:$0xff]   ;;  %v5362_v51 = vld [vmem:[%s7689_s2 + $0xa4] ss:$8 sps:$4 sm:$0xff]   ;;  %v5433_v54 = vld [vmem:[%s7689_s2 + $0x2e0] ss:$8 sps:$4 sm:$0xff]  }
 0x202   : > { %v1823_v59 = vadd.f32 %v5180_v57, %v1662_v58  ;;  %v5069_v29 = vpop.f32.mrb[124].mxu0  ;;  %v1862_v63 = vmax.f32 %v1820_v11, 0.0  ;;  %v5431_v27 = vld [vmem:[%s7689_s2 + $0x2e4] ss:$8 sps:$4 sm:$0xff]   ;;  %v5364_v56 = vld [vmem:[%s7689_s2 + $0xa0] ss:$8 sps:$4 sm:$0xff]  }
 0x203   : > { %v5181_v62 = vpop.f32.mrb[124].mxu1  ;;  %v5070_v1 = vpop.f32.mrb[125].mxu0  ;;  %v5365_v52 = vld [vmem:[%s7689_s2 + $0xb4] ss:$8 sps:$4 sm:$0xff]   ;;  %v5439_v11 = vld [vmem:[%s7689_s2 + $0x2f0] ss:$8 sps:$4 sm:$0xff]  }
 0x204   : > { %v1863_v15 = vmax.f32 %v1823_v59, 0.0  ;;  %v5071_v3 = vadd.f32 %v5070_v1, %v5069_v29  ;;  %v5182_v9 = vpop.f32.mrb[125].mxu1  ;;  %v5072_v60 = vpop.f32.mrb[126].mxu0  ;;  %v5437_v57 = vld [vmem:[%s7689_s2 + $0x2f4] ss:$8 sps:$4 sm:$0xff]  }
 0x205   : > { %v5183_v13 = vadd.f32 %v5182_v9, %v5181_v62  ;;  %v5184_v6 = vpop.f32.mrb[126].mxu1  ;;  %v5073_v2 = vpop.f32.mrb[127].mxu0  ;;  %v5367_v58 = vld [vmem:[%s7689_s2 + $0xb0] ss:$8 sps:$4 sm:$0xff]   ;;  %v5368_v59 = vld [vmem:[%s7689_s2 + $0xc4] ss:$8 sps:$4 sm:$0xff]  }
 0x206   : > { %v1880_v4 = vpack.c.bf16 %v1863_v15, %v1862_v63  ;;  %v1667_v17 = vadd.f32 %v5071_v3, %v6368_v38  ;;  %v5074_v18 = vadd.f32 %v5073_v2, %v5072_v60  ;;  %v5185_v5 = vpop.f32.mrb[127].mxu1  ;;  %v5332_v38 = vld [vmem:[%s7689_s2] ss:$8 sps:$4 sm:$0xff]   ;;  %v5443_v29 = vld [vmem:[%s7689_s2 + $0x304] ss:$8 sps:$4 sm:$0xff]  }
 0x207   : > { %v5186_v7 = vadd.f32 %v5185_v5, %v5184_v6  ;;  %v5445_v62 = vld [vmem:[%s7689_s2 + $0x300] ss:$8 sps:$4 sm:$0xff]   ;;  %v5371_v63 = vld [vmem:[%s7689_s2 + $0xd4] ss:$8 sps:$4 sm:$0xff]   ;;  %v5451_v3 = vld [vmem:[%s7689_s2 + $0x310] ss:$8 sps:$4 sm:$0xff]  }
 0x208   : > { %v1828_v8 = vadd.f32 %v5183_v13, %v1667_v17  ;;  %v1670_v12 = vadd.f32 %v5074_v18, %v6370_v40  ;;  %2679 = vmatpush1.bf16.msra.mxu0 %v1880_v4  ;;  %5305 = vmatpush1.bf16.msra.mxu1 %v1880_v4  ;;  %v5335_v40 = vld [vmem:[%s7689_s2 + $0x14] ss:$8 sps:$4 sm:$0xff]   ;;  %v5370_v1 = vld [vmem:[%s7689_s2 + $0xc0] ss:$8 sps:$4 sm:$0xff]   ;;  %v5373_v9 = vld [vmem:[%s7689_s2 + $0xd0] ss:$8 sps:$4 sm:$0xff]  }
 0x209   : > { %2680 = vmatprep.subr.bf16.mxu0 %v5678_v16  ;;  %5290 = vmatprep.subr.bf16.mxu1 %v5678_v16  ;;  %v5337_v16 = vld [vmem:[%s7689_s2 + $0x10] ss:$8 sps:$4 sm:$0xff]   ;;  %v5449_v15 = vld [vmem:[%s7689_s2 + $0x314] ss:$8 sps:$4 sm:$0xff]   ;;  %v5374_v60 = vld [vmem:[%s7689_s2 + $0xe4] ss:$8 sps:$4 sm:$0xff]  }
 0x20a   : > { %v1831_v19 = vadd.f32 %v5186_v7, %v1670_v12  ;;  %v1864_v43 = vmax.f32 %v1828_v8, 0.0  ;;  %v5455_v13 = vld [vmem:[%s7689_s2 + $0x324] ss:$8 sps:$4 sm:$0xff]   ;;  %v5457_v6 = vld [vmem:[%s7689_s2 + $0x320] ss:$8 sps:$4 sm:$0xff]  }
 0x20b   : > { %v5376_v2 = vld [vmem:[%s7689_s2 + $0xe0] ss:$8 sps:$4 sm:$0xff]   ;;  %v5377_v4 = vld [vmem:[%s7689_s2 + $0xf4] ss:$8 sps:$4 sm:$0xff]   ;;  %v5463_v18 = vld [vmem:[%s7689_s2 + $0x330] ss:$8 sps:$4 sm:$0xff]  }
 0x20c   : > { %v1865_v20 = vmax.f32 %v1831_v19, 0.0  ;;  %v5461_v17 = vld [vmem:[%s7689_s2 + $0x334] ss:$8 sps:$4 sm:$0xff]   ;;  %v5379_v5 = vld [vmem:[%s7689_s2 + $0xf0] ss:$8 sps:$4 sm:$0xff]  }
 0x20d   : > { %v5380_v7 = vld [vmem:[%s7689_s2 + $0x104] ss:$8 sps:$4 sm:$0xff]   ;;  %v5469_v12 = vld [vmem:[%s7689_s2 + $0x340] ss:$8 sps:$4 sm:$0xff]   ;;  %v5485_v45 = vld [vmem:[%s7689_s2 + $0x374] ss:$8 sps:$4 sm:$0xff]  }
 0x20e   : > { %v1881_v21 = vpack.c.bf16 %v1865_v20, %v1864_v43  ;;  %v5467_v8 = vld [vmem:[%s7689_s2 + $0x344] ss:$8 sps:$4 sm:$0xff]   ;;  %v5382_v19 = vld [vmem:[%s7689_s2 + $0x100] ss:$8 sps:$4 sm:$0xff]   ;;  %v5383_v43 = vld [vmem:[%s7689_s2 + $0x114] ss:$8 sps:$4 sm:$0xff]  }
 0x20f   : > { %v5473_v20 = vld [vmem:[%s7689_s2 + $0x354] ss:$8 sps:$4 sm:$0xff]  }
 0x210   : > { %2681 = vmatpush1.bf16.msra.mxu0 %v1881_v21  ;;  %5306 = vmatpush1.bf16.msra.mxu1 %v1881_v21  ;;  %v5475_v21 = vld [vmem:[%s7689_s2 + $0x350] ss:$8 sps:$4 sm:$0xff]  }
 0x213   : > { %2683 = vmatmul.mubr.bf16.vlgmr.msra.gmra.mrb[128].mxu0 %v5332_v38  ;;  %2995 = vmatmul.mubr.bf16.vlgmr.msra.gmra.mrb[128].mxu1 %v5389_v10  ;;  %v5385_v38 = vld [vmem:[%s7689_s2 + $0x110] ss:$8 sps:$4 sm:$0xff]  }
 0x214   : > { %2690 = vmatprep.mubr.bf16.mxu0 %v5335_v40  ;;  %3002 = vmatprep.mubr.bf16.mxu1 %v5395_v28  ;;  %v5386_v40 = vld [vmem:[%s7689_s2 + $0x124] ss:$8 sps:$4 sm:$0xff]   ;;  %v5487_v10 = vld [vmem:[%s7689_s2 + $0x370] ss:$8 sps:$4 sm:$0xff]  }
 0x215   : > { %v5491_v28 = vld [vmem:[%s7689_s2 + $0x384] ss:$8 sps:$4 sm:$0xff]  }
 0x21b   : > { %2691 = vmatmul.mubr.bf16.gmra.mrb[132].mxu0 %v5337_v16  ;;  %3003 = vmatmul.mubr.bf16.gmra.mrb[132].mxu1 %v5397_v34  ;;  %v5479_v16 = vld [vmem:[%s7689_s2 + $0x364] ss:$8 sps:$4 sm:$0xff]   ;;  %v5493_v34 = vld [vmem:[%s7689_s2 + $0x380] ss:$8 sps:$4 sm:$0xff]  }
 0x21c   : > { %2698 = vmatprep.mubr.bf16.mxu0 %v5338_v22  ;;  %3010 = vmatprep.mubr.bf16.mxu1 %v5401_v30  ;;  %v5481_v22 = vld [vmem:[%s7689_s2 + $0x360] ss:$8 sps:$4 sm:$0xff]   ;;  %v5497_v30 = vld [vmem:[%s7689_s2 + $0x394] ss:$8 sps:$4 sm:$0xff]  }
 0x223   : > { %2699 = vmatmul.mubr.bf16.gmra.mrb[136].mxu0 %v5340_v23  ;;  %3011 = vmatmul.mubr.bf16.gmra.mrb[136].mxu1 %v5403_v35  ;;  %v5388_v23 = vld [vmem:[%s7689_s2 + $0x120] ss:$8 sps:$4 sm:$0xff]   ;;  %v5499_v35 = vld [vmem:[%s7689_s2 + $0x390] ss:$8 sps:$4 sm:$0xff]  }
 0x224   : > { %2706 = vmatprep.mubr.bf16.mxu0 %v5341_v53  ;;  %3018 = vmatprep.mubr.bf16.mxu1 %v5407_v55  ;;  %v5392_v53 = vld [vmem:[%s7689_s2 + $0x134] ss:$8 sps:$4 sm:$0xff]   ;;  %v5503_v55 = vld [vmem:[%s7689_s2 + $0x3a4] ss:$8 sps:$4 sm:$0xff]  }
 0x22b   : > { %2707 = vmatmul.mubr.bf16.gmra.mrb[140].mxu0 %v5343_v32  ;;  %3019 = vmatmul.mubr.bf16.gmra.mrb[140].mxu1 %v5409_v33  ;;  %v5394_v32 = vld [vmem:[%s7689_s2 + $0x130] ss:$8 sps:$4 sm:$0xff]   ;;  %v5505_v33 = vld [vmem:[%s7689_s2 + $0x3a0] ss:$8 sps:$4 sm:$0xff]  }
 0x22c   : > { %2714 = vmatprep.mubr.bf16.mxu0 %v5344_v24  ;;  %3026 = vmatprep.mubr.bf16.mxu1 %v5413_v39  ;;  %v5398_v24 = vld [vmem:[%s7689_s2 + $0x144] ss:$8 sps:$4 sm:$0xff]   ;;  %v5509_v39 = vld [vmem:[%s7689_s2 + $0x3b4] ss:$8 sps:$4 sm:$0xff]  }
 0x233   : > { %2715 = vmatmul.mubr.bf16.gmra.mrb[144].mxu0 %v5346_v25  ;;  %3027 = vmatmul.mubr.bf16.gmra.mrb[144].mxu1 %v5415_v61  ;;  %v5400_v25 = vld [vmem:[%s7689_s2 + $0x140] ss:$8 sps:$4 sm:$0xff]   ;;  %v5511_v61 = vld [vmem:[%s7689_s2 + $0x3b0] ss:$8 sps:$4 sm:$0xff]  }
 0x234   : > { %2722 = vmatprep.mubr.bf16.mxu0 %v5347_v26  ;;  %3034 = vmatprep.mubr.bf16.mxu1 %v5419_v44  ;;  %v5404_v26 = vld [vmem:[%s7689_s2 + $0x154] ss:$8 sps:$4 sm:$0xff]   ;;  %v5512_v44 = vld [vmem:[%s7689_s2 + $0x3c4] ss:$8 sps:$4 sm:$0xff]  }
 0x23b   : > { %2723 = vmatmul.mubr.bf16.gmra.mrb[148].mxu0 %v5349_v31  ;;  %3035 = vmatmul.mubr.bf16.gmra.mrb[148].mxu1 %v5421_v46  ;;  %v5406_v31 = vld [vmem:[%s7689_s2 + $0x150] ss:$8 sps:$4 sm:$0xff]   ;;  %v5514_v46 = vld [vmem:[%s7689_s2 + $0x3c0] ss:$8 sps:$4 sm:$0xff]  }
 0x23c   : > { %2730 = vmatprep.mubr.bf16.mxu0 %v5350_v14  ;;  %3042 = vmatprep.mubr.bf16.mxu1 %v5425_v50  ;;  %v5410_v14 = vld [vmem:[%s7689_s2 + $0x164] ss:$8 sps:$4 sm:$0xff]   ;;  %v5515_v50 = vld [vmem:[%s7689_s2 + $0x3d4] ss:$8 sps:$4 sm:$0xff]  }
 0x243   : > { %2731 = vmatmul.mubr.bf16.gmra.mrb[152].mxu0 %v5352_v36  ;;  %3043 = vmatmul.mubr.bf16.gmra.mrb[152].mxu1 %v5427_v0  ;;  %v5412_v36 = vld [vmem:[%s7689_s2 + $0x160] ss:$8 sps:$4 sm:$0xff]   ;;  %v5517_v0 = vld [vmem:[%s7689_s2 + $0x3d0] ss:$8 sps:$4 sm:$0xff]  }
 0x244   : > { %2738 = vmatprep.mubr.bf16.mxu0 %v5353_v37  ;;  %3050 = vmatprep.mubr.bf16.mxu1 %v5431_v27  ;;  %v5416_v37 = vld [vmem:[%s7689_s2 + $0x174] ss:$8 sps:$4 sm:$0xff]   ;;  %v5518_v27 = vld [vmem:[%s7689_s2 + $0x3e4] ss:$8 sps:$4 sm:$0xff]  }
 0x24b   : > { %2739 = vmatmul.mubr.bf16.gmra.mrb[156].mxu0 %v5355_v41  ;;  %3051 = vmatmul.mubr.bf16.gmra.mrb[156].mxu1 %v5433_v54  ;;  %v5418_v41 = vld [vmem:[%s7689_s2 + $0x170] ss:$8 sps:$4 sm:$0xff]   ;;  %v5520_v54 = vld [vmem:[%s7689_s2 + $0x3e0] ss:$8 sps:$4 sm:$0xff]  }
 0x24c   : > { %2746 = vmatprep.mubr.bf16.mxu0 %v5356_v42  ;;  %3058 = vmatprep.mubr.bf16.mxu1 %v5437_v57  ;;  %v5422_v42 = vld [vmem:[%s7689_s2 + $0x184] ss:$8 sps:$4 sm:$0xff]   ;;  %v5521_v57 = vld [vmem:[%s7689_s2 + $0x3f4] ss:$8 sps:$4 sm:$0xff]  }
 0x253   : > { %2747 = vmatmul.mubr.bf16.gmra.mrb[160].mxu0 %v5358_v47  ;;  %3059 = vmatmul.mubr.bf16.gmra.mrb[160].mxu1 %v5439_v11  ;;  %v5424_v47 = vld [vmem:[%s7689_s2 + $0x180] ss:$8 sps:$4 sm:$0xff]   ;;  %v5523_v11 = vld [vmem:[%s7689_s2 + $0x3f0] ss:$8 sps:$4 sm:$0xff]  }
 0x254   : > { %2754 = vmatprep.mubr.bf16.mxu0 %v5359_v49  ;;  %3066 = vmatprep.mubr.bf16.mxu1 %v5443_v29  ;;  %v5428_v49 = vld [vmem:[%s7689_s2 + $0x194] ss:$8 sps:$4 sm:$0xff]  }
 0x25b   : > { %2755 = vmatmul.mubr.bf16.gmra.mrb[164].mxu0 %v5361_v48  ;;  %3067 = vmatmul.mubr.bf16.gmra.mrb[164].mxu1 %v5445_v62  ;;  %v5430_v48 = vld [vmem:[%s7689_s2 + $0x190] ss:$8 sps:$4 sm:$0xff]  }
 0x25c   : > { %2762 = vmatprep.mubr.bf16.mxu0 %v5362_v51  ;;  %3074 = vmatprep.mubr.bf16.mxu1 %v5449_v15  ;;  %v5434_v51 = vld [vmem:[%s7689_s2 + $0x1a4] ss:$8 sps:$4 sm:$0xff]  }
 0x263   : > { %2763 = vmatmul.mubr.bf16.gmra.mrb[168].mxu0 %v5364_v56  ;;  %3075 = vmatmul.mubr.bf16.gmra.mrb[168].mxu1 %v5451_v3  ;;  %v5436_v56 = vld [vmem:[%s7689_s2 + $0x1a0] ss:$8 sps:$4 sm:$0xff]   ;;  %v5446_v3 = vld [vmem:[%s7689_s2 + $0x1c4] ss:$8 sps:$4 sm:$0xff]  }
 0x264   : > { %2770 = vmatprep.mubr.bf16.mxu0 %v5365_v52  ;;  %3082 = vmatprep.mubr.bf16.mxu1 %v5455_v13  ;;  %v5440_v52 = vld [vmem:[%s7689_s2 + $0x1b4] ss:$8 sps:$4 sm:$0xff]  }
 0x26b   : > { %2771 = vmatmul.mubr.bf16.gmra.mrb[172].mxu0 %v5367_v58  ;;  %3083 = vmatmul.mubr.bf16.gmra.mrb[172].mxu1 %v5457_v6 }
 0x26c   : > { %2778 = vmatprep.mubr.bf16.mxu0 %v5368_v59  ;;  %3090 = vmatprep.mubr.bf16.mxu1 %v5461_v17  ;;  %v5526_v59 = vld [vmem:[%s5752_s30] sm:$0xff] }
 0x26d   : > { %v3451_v29 = vmul.f32 0.5, %v5526_v59 }
 0x273   : > { %2779 = vmatmul.mubr.bf16.gmra.mrb[176].mxu0 %v5370_v1  ;;  %3091 = vmatmul.mubr.bf16.gmra.mrb[176].mxu1 %v5463_v18 }
 0x274   : > { %2786 = vmatprep.mubr.bf16.mxu0 %v5371_v63  ;;  %3098 = vmatprep.mubr.bf16.mxu1 %v5467_v8  ;;  %v5442_v63 = vld [vmem:[%s7689_s2 + $0x1b0] ss:$8 sps:$4 sm:$0xff]  }
 0x27b   : > { %2787 = vmatmul.mubr.bf16.gmra.mrb[180].mxu0 %v5373_v9  ;;  %3099 = vmatmul.mubr.bf16.gmra.mrb[180].mxu1 %v5469_v12  ;;  %v5527_v9 = vld [vmem:[%s5752_s30 + $0x8] sm:$0xff] }
 0x27c   : > { %2794 = vmatprep.mubr.bf16.mxu0 %v5374_v60  ;;  %3106 = vmatprep.mubr.bf16.mxu1 %v5473_v20  ;;  %v3452_v60 = vmul.f32 0.5, %v5527_v9  ;;  %v5533_v9 = vld [vmem:[%s5752_s30 + $0x30] sm:$0xff] }
 0x283   : > { %2795 = vmatmul.mubr.bf16.gmra.mrb[184].mxu0 %v5376_v2  ;;  %3107 = vmatmul.mubr.bf16.gmra.mrb[184].mxu1 %v5475_v21 }
 0x284   : > { %2802 = vmatprep.mubr.bf16.mxu0 %v5377_v4  ;;  %3114 = vmatprep.mubr.bf16.mxu1 %v5479_v16  ;;  %v5529_v16 = vld [vmem:[%s5752_s30 + $0x18] sm:$0xff] }
 0x28b   : > { %2803 = vmatmul.mubr.bf16.gmra.mrb[188].mxu0 %v5379_v5  ;;  %3115 = vmatmul.mubr.bf16.gmra.mrb[188].mxu1 %v5481_v22  ;;  %v3454_v22 = vmul.f32 0.5, %v5529_v16 }
 0x28c   : > { %2810 = vmatprep.mubr.bf16.mxu0 %v5380_v7  ;;  %3122 = vmatprep.mubr.bf16.mxu1 %v5485_v45 }
 0x293   : > { %2811 = vmatmul.mubr.bf16.gmra.mrb[192].mxu0 %v5382_v19  ;;  %3123 = vmatmul.mubr.bf16.gmra.mrb[192].mxu1 %v5487_v10 }
 0x294   : > { %2818 = vmatprep.mubr.bf16.mxu0 %v5383_v43  ;;  %3130 = vmatprep.mubr.bf16.mxu1 %v5491_v28  ;;  %v5528_v43 = vld [vmem:[%s5752_s30 + $0x10] sm:$0xff] }
 0x295   : > { %v3453_v20 = vmul.f32 0.5, %v5528_v43  ;;  %v5460_v43 = vld [vmem:[%s7689_s2 + $0x1e0] ss:$8 sps:$4 sm:$0xff]  }
 0x29b   : > { %2819 = vmatmul.mubr.bf16.gmra.mrb[196].mxu0 %v5385_v38  ;;  %3131 = vmatmul.mubr.bf16.gmra.mrb[196].mxu1 %v5493_v34  ;;  %v5448_v38 = vld [vmem:[%s7689_s2 + $0x1c0] ss:$8 sps:$4 sm:$0xff]  }
 0x29c   : > { %2826 = vmatprep.mubr.bf16.mxu0 %v5386_v40  ;;  %3138 = vmatprep.mubr.bf16.mxu1 %v5497_v30 }
 0x2a3   : > { %2827 = vmatmul.mubr.bf16.gmra.mrb[200].mxu0 %v5388_v23  ;;  %3139 = vmatmul.mubr.bf16.gmra.mrb[200].mxu1 %v5499_v35  ;;  %v5452_v23 = vld [vmem:[%s7689_s2 + $0x1d4] ss:$8 sps:$4 sm:$0xff]  }
 0x2a4   : > { %2834 = vmatprep.mubr.bf16.mxu0 %v5392_v53  ;;  %3146 = vmatprep.mubr.bf16.mxu1 %v5503_v55 }
 0x2ab   : > { %2835 = vmatmul.mubr.bf16.gmra.mrb[204].mxu0 %v5394_v32  ;;  %3147 = vmatmul.mubr.bf16.gmra.mrb[204].mxu1 %v5505_v33 }
 0x2ac   : > { %2842 = vmatprep.mubr.bf16.mxu0 %v5398_v24  ;;  %3154 = vmatprep.mubr.bf16.mxu1 %v5509_v39 }
 0x2b3   : > { %2843 = vmatmul.mubr.bf16.gmra.mrb[208].mxu0 %v5400_v25  ;;  %3155 = vmatmul.mubr.bf16.gmra.mrb[208].mxu1 %v5511_v61  ;;  %v5454_v61 = vld [vmem:[%s7689_s2 + $0x1d0] ss:$8 sps:$4 sm:$0xff]  }
 0x2b4   : > { %2850 = vmatprep.mubr.bf16.mxu0 %v5404_v26  ;;  %3162 = vmatprep.mubr.bf16.mxu1 %v5512_v44 }
 0x2bb   : > { %2851 = vmatmul.mubr.bf16.gmra.mrb[212].mxu0 %v5406_v31  ;;  %3163 = vmatmul.mubr.bf16.gmra.mrb[212].mxu1 %v5514_v46  ;;  %v5530_v31 = vld [vmem:[%s5752_s30 + $0x20] sm:$0xff] }
 0x2bc   : > { %2858 = vmatprep.mubr.bf16.mxu0 %v5410_v14  ;;  %3170 = vmatprep.mubr.bf16.mxu1 %v5515_v50  ;;  %v3455_v14 = vmul.f32 0.5, %v5530_v31  ;;  %v5458_v46 = vld [vmem:[%s7689_s2 + $0x1e4] ss:$8 sps:$4 sm:$0xff]  }
 0x2c3   : > { %2859 = vmatmul.mubr.bf16.gmra.mrb[216].mxu0 %v5412_v36  ;;  %3171 = vmatmul.mubr.bf16.gmra.mrb[216].mxu1 %v5517_v0 }
 0x2c4   : > { %2866 = vmatprep.mubr.bf16.mxu0 %v5416_v37  ;;  %3178 = vmatprep.mubr.bf16.mxu1 %v5518_v27 }
 0x2cb   : > { %2867 = vmatmul.mubr.bf16.gmra.mrb[220].mxu0 %v5418_v41  ;;  %3179 = vmatmul.mubr.bf16.gmra.mrb[220].mxu1 %v5520_v54 }
 0x2cc   : > { %2874 = vmatprep.mubr.bf16.mxu0 %v5422_v42  ;;  %3186 = vmatprep.mubr.bf16.mxu1 %v5521_v57 }
 0x2d3   : > { %2875 = vmatmul.mubr.bf16.gmra.mrb[224].mxu0 %v5424_v47  ;;  %3187 = vmatmul.mubr.bf16.gmra.mrb[224].mxu1 %v5523_v11 }
 0x2d4   : > { %2882 = vmatprep.mubr.bf16.mxu0 %v5428_v49 }
 0x2db   : > { %2883 = vmatmul.mubr.bf16.gmra.mrb[228].mxu0 %v5430_v48  ;;  %v5531_v48 = vld [vmem:[%s5752_s30 + $0x28] sm:$0xff] }
 0x2dc   : > { %2890 = vmatprep.mubr.bf16.mxu0 %v5434_v51  ;;  %v3456_v51 = vmul.f32 0.5, %v5531_v48 }
 0x2e3   : > { %2891 = vmatmul.mubr.bf16.gmra.mrb[232].mxu0 %v5436_v56 }
 0x2e4   : > { %2898 = vmatprep.mubr.bf16.mxu0 %v5440_v52 }
 0x2e6   : > { %v2684_v58 = vpop.f32.mrb[128].mxu0  ;;  %v2996_v41 = vpop.f32.mrb[128].mxu1 }
 0x2e7   : > { %v3195_v62 = vmax.f32 %v2684_v58, 0.0  ;;  %v2686_v1 = vpop.f32.mrb[129].mxu0  ;;  %v2998_v47 = vpop.f32.mrb[129].mxu1  ;;  %v3273_v58 = vmax.f32 %v2996_v41, 0.0 }
 0x2e8   : > { %v2687_v15 = vpop.f32.mrb[130].mxu0  ;;  %v2999_v54 = vpop.f32.mrb[130].mxu1  ;;  %v5537_v47 = vld [vmem:[%s5752_s30 + $0x40] sm:$0xff] }
 0x2e9   : > { %v3323_v13 = vmul.f32 0.5, %v3195_v62  ;;  %v3196_v6 = vmax.f32 %v2687_v15, 0.0  ;;  %v2689_v2 = vpop.f32.mrb[131].mxu0  ;;  %v3001_v52 = vpop.f32.mrb[131].mxu1  ;;  %v3274_v59 = vmax.f32 %v2999_v54, 0.0  ;;  %v3401_v1 = vmul.f32 0.5, %v3273_v58 }
 0x2eb   : > { %v6757_v4 = vadd.f32 %v3451_v29, %v3323_v13  ;;  %v3324_v17 = vmul.f32 0.5, %v3196_v6  ;;  %2899 = vmatmul.mubr.bf16.gmra.mrb[236].mxu0 %v5442_v63  ;;  %v5532_v63 = vld [vmem:[%s5752_s30 + $0x270] sm:$0xff]  ;;  %v3402_v13 = vmul.f32 0.5, %v3274_v59  ;;  %v5534_v6 = vld [vmem:[%s5752_s30 + $0x278] sm:$0xff] }
 0x2ec   : > { %2906 = vmatprep.mubr.bf16.mxu0 %v5446_v3  ;;  %v3529_v15 = vmul.f32 0.5, %v5532_v63  ;;  %v3530_v2 = vmul.f32 0.5, %v5534_v6  ;;  %v5539_v6 = vld [vmem:[%s5752_s30 + $0x48] sm:$0xff] }
 0x2ed   : > { %v3707_v18 = vmul.f32 %v6757_v4, %v6757_v4  ;;  %v6761_v5 = vadd.f32 %v3452_v60, %v3324_v17  ;;  %v3457_v60 = vmul.f32 0.5, %v5533_v9 }
 0x2ee   : > { %v2692_v7 = vpop.f32.mrb[132].mxu0  ;;  %v6817_v16 = vadd.f32 %v3529_v15, %v3401_v1  ;;  %v5472_v1 = vld [vmem:[%s7689_s2 + $0x204] ss:$8 sps:$4 sm:$0xff]  }
 0x2ef   : > { %v3708_v8 = vmul.f32 %v6761_v5, %v6761_v5  ;;  %v4107_v12 = vpack.c.bf16 %v6761_v5, %v6757_v4  ;;  %v3197_v19 = vmax.f32 %v2692_v7, 0.0  ;;  %v2694_v21 = vpop.f32.mrb[133].mxu0  ;;  %v3836_v53 = vsel %vm3835_vm0, %v3707_v18, 0.0  ;;  %v5561_v5 = vld [vmem:[%s5752_s30 + $0xa0] sm:$0xff] }
 0x2f0   : > { %v2695_v40 = vpop.f32.mrb[134].mxu0 }
 0x2f1   : > { %v3837_v45 = vsel %vm3835_vm0, %v3708_v8, 0.0  ;;  %v3325_v10 = vmul.f32 0.5, %v3197_v19  ;;  %v3198_v32 = vmax.f32 %v2695_v40, 0.0  ;;  %v2697_v24 = vpop.f32.mrb[135].mxu0  ;;  %v5464_v40 = vld [vmem:[%s7689_s2 + $0x1f4] ss:$8 sps:$4 sm:$0xff]  }
 0x2f2   : > { %v3838_v28 = vadd.f32 %v3837_v45, %v3836_v53 }
 0x2f3   : > { %v6777_v34 = vadd.f32 %v3453_v20, %v3325_v10  ;;  %v3326_v25 = vmul.f32 0.5, %v3198_v32  ;;  %2907 = vmatmul.mubr.bf16.gmra.mrb[240].mxu0 %v5448_v38  ;;  %v3004_v20 = vpop.f32.mrb[132].mxu1  ;;  %v5535_v32 = vld [vmem:[%s5752_s30 + $0x38] sm:$0xff] }
 0x2f4   : > { %2914 = vmatprep.mubr.bf16.mxu0 %v5452_v23  ;;  %v3006_v23 = vpop.f32.mrb[133].mxu1  ;;  %v3458_v24 = vmul.f32 0.5, %v5535_v32 }
 0x2f5   : > { %v3709_v26 = vmul.f32 %v6777_v34, %v6777_v34  ;;  %v6781_v30 = vadd.f32 %v3454_v22, %v3326_v25  ;;  %v6819_v22 = vadd.f32 %v3530_v2, %v3402_v13  ;;  %v3007_v25 = vpop.f32.mrb[134].mxu1  ;;  %v3460_v2 = vmul.f32 0.5, %v5539_v6 }
 0x2f6   : > { %v2700_v35 = vpop.f32.mrb[136].mxu0 }
 0x2f7   : > { %v3839_v55 = vsel %vm3835_vm0, %v3709_v26, 0.0  ;;  %v3710_v33 = vmul.f32 %v6781_v30, %v6781_v30  ;;  %v4108_v36 = vpack.c.bf16 %v6781_v30, %v6777_v34  ;;  %v3199_v37 = vmax.f32 %v2700_v35, 0.0  ;;  %v2702_v39 = vpop.f32.mrb[137].mxu0  ;;  %v3009_v35 = vpop.f32.mrb[135].mxu1  ;;  %v5565_v34 = vld [vmem:[%s5752_s30 + $0xb0] sm:$0xff] }
 0x2f8   : > { %v3840_v42 = vadd.f32 %v3839_v55, %v3838_v28  ;;  %v2703_v44 = vpop.f32.mrb[138].mxu0  ;;  %v3012_v58 = vpop.f32.mrb[136].mxu1  ;;  %v5542_v35 = vld [vmem:[%s5752_s30 + $0x298] sm:$0xff]  ;;  %v5557_v55 = vld [vmem:[%s5752_s30 + $0x90] sm:$0xff]  ;;  %v3473_v30 = vmul.f32 0.5, %v5565_v34 }
 0x2f9   : > { %v3841_v49 = vsel %vm3835_vm0, %v3710_v33, 0.0  ;;  %v3327_v50 = vmul.f32 0.5, %v3199_v37  ;;  %v3200_v0 = vmax.f32 %v2703_v44, 0.0  ;;  %v2705_v27 = vpop.f32.mrb[139].mxu0  ;;  %v3275_v33 = vmax.f32 %v3004_v20, 0.0 }
 0x2fa   : > { %v3842_v56 = vadd.f32 %v3841_v49, %v3840_v42  ;;  %v3276_v37 = vmax.f32 %v3007_v25, 0.0  ;;  %v5536_v42 = vld [vmem:[%s5752_s30 + $0x280] sm:$0xff]  ;;  %v3459_v49 = vmul.f32 0.5, %v5537_v47 }
 0x2fb   : > { %v6797_v57 = vadd.f32 %v3455_v14, %v3327_v50  ;;  %v3328_v11 = vmul.f32 0.5, %v3200_v0  ;;  %2915 = vmatmul.mubr.bf16.gmra.mrb[244].mxu0 %v5454_v61  ;;  %v3403_v41 = vmul.f32 0.5, %v3275_v33  ;;  %v3531_v44 = vmul.f32 0.5, %v5536_v42  ;;  %v5538_v0 = vld [vmem:[%s5752_s30 + $0x288] sm:$0xff] }
 0x2fc   : > { %2922 = vmatprep.mubr.bf16.mxu0 %v5458_v46  ;;  %v3404_v50 = vmul.f32 0.5, %v3276_v37  ;;  %v3532_v48 = vmul.f32 0.5, %v5538_v0 }
 0x2fd   : > { %v3711_v29 = vmul.f32 %v6797_v57, %v6797_v57  ;;  %v6801_v62 = vadd.f32 %v3456_v51, %v3328_v11  ;;  %v5466_v11 = vld [vmem:[%s7689_s2 + $0x1f0] ss:$8 sps:$4 sm:$0xff]   ;;  %v6845_v63 = vadd.f32 %v3531_v44, %v3403_v41  ;;  %v5470_v44 = vld [vmem:[%s7689_s2 + $0x200] ss:$8 sps:$4 sm:$0xff]  }
 0x2fe   : > { %v2708_v3 = vpop.f32.mrb[140].mxu0  ;;  %v6847_v15 = vadd.f32 %v3532_v48, %v3404_v50  ;;  %v5478_v50 = vld [vmem:[%s7689_s2 + $0x214] ss:$8 sps:$4 sm:$0xff]  }
 0x2ff   : > { %v3843_v17 = vsel %vm3835_vm0, %v3711_v29, 0.0  ;;  %v3712_v18 = vmul.f32 %v6801_v62, %v6801_v62  ;;  %v4109_v7 = vpack.c.bf16 %v6801_v62, %v6797_v57  ;;  %v3201_v8 = vmax.f32 %v2708_v3, 0.0  ;;  %v2710_v19 = vpop.f32.mrb[141].mxu0  ;;  %v3014_v3 = vpop.f32.mrb[137].mxu1  ;;  %v5570_v62 = vld [vmem:[%s5752_s30 + $0x308] sm:$0xff] }
 0x300   : > { %v3844_v21 = vadd.f32 %v3843_v17, %v3842_v56  ;;  %v2711_v38 = vpop.f32.mrb[142].mxu0 }
 0x301   : > { %v3845_v53 = vsel %vm3835_vm0, %v3712_v18, 0.0  ;;  %v3329_v45 = vmul.f32 0.5, %v3201_v8  ;;  %v3202_v10 = vmax.f32 %v2711_v38, 0.0  ;;  %v2713_v28 = vpop.f32.mrb[143].mxu0  ;;  %v3015_v18 = vpop.f32.mrb[138].mxu1 }
 0x302   : > { %v3846_v26 = vadd.f32 %v3845_v53, %v3844_v21  ;;  %v3017_v19 = vpop.f32.mrb[139].mxu1  ;;  %v3277_v21 = vmax.f32 %v3012_v58, 0.0  ;;  %v3278_v38 = vmax.f32 %v3015_v18, 0.0  ;;  %v5541_v28 = vld [vmem:[%s5752_s30 + $0x50] sm:$0xff] }
 0x303   : > { %v6823_v31 = vadd.f32 %v3457_v60, %v3329_v45  ;;  %v3330_v14 = vmul.f32 0.5, %v3202_v10  ;;  %2923 = vmatmul.mubr.bf16.gmra.mrb[248].mxu0 %v5460_v43  ;;  %v5540_v10 = vld [vmem:[%s5752_s30 + $0x290] sm:$0xff]  ;;  %v3461_v25 = vmul.f32 0.5, %v5541_v28  ;;  %v5544_v19 = vld [vmem:[%s5752_s30 + $0x2a0] sm:$0xff] }
 0x304   : > { %2930 = vmatprep.mubr.bf16.mxu0 %v5464_v40  ;;  %v3405_v45 = vmul.f32 0.5, %v3277_v21  ;;  %v3533_v32 = vmul.f32 0.5, %v5540_v10  ;;  %v5546_v10 = vld [vmem:[%s5752_s30 + $0x2a8] sm:$0xff]  ;;  %v5599_v40 = vld [vmem:[%s5752_s30 + $0x138] sm:$0xff] }
 0x305   : > { %v3713_v39 = vmul.f32 %v6823_v31, %v6823_v31  ;;  %v6829_v61 = vadd.f32 %v3458_v24, %v3330_v14  ;;  %v3534_v14 = vmul.f32 0.5, %v5542_v35 }
 0x306   : > { %v2716_v46 = vpop.f32.mrb[144].mxu0  ;;  %v6873_v0 = vadd.f32 %v3533_v32, %v3405_v45  ;;  %v3536_v32 = vmul.f32 0.5, %v5546_v10  ;;  %v5550_v10 = vld [vmem:[%s5752_s30 + $0x2b8] sm:$0xff] }
 0x307   : > { %v3847_v51 = vsel %vm3835_vm0, %v3713_v39, 0.0  ;;  %v3714_v27 = vmul.f32 %v6829_v61, %v6829_v61  ;;  %v4110_v54 = vpack.c.bf16 %v6829_v61, %v6823_v31  ;;  %v3203_v56 = vmax.f32 %v2716_v46, 0.0  ;;  %v2718_v52 = vpop.f32.mrb[145].mxu0  ;;  %v3020_v46 = vpop.f32.mrb[140].mxu1  ;;  %v5574_v31 = vld [vmem:[%s5752_s30 + $0x318] sm:$0xff] }
 0x308   : > { %v3848_v59 = vadd.f32 %v3847_v51, %v3846_v26  ;;  %v2719_v29 = vpop.f32.mrb[146].mxu0  ;;  %v3406_v26 = vmul.f32 0.5, %v3278_v38  ;;  %v3022_v51 = vpop.f32.mrb[141].mxu1  ;;  %v5545_v38 = vld [vmem:[%s5752_s30 + $0x60] sm:$0xff]  ;;  %v3550_v61 = vmul.f32 0.5, %v5574_v31 }
 0x309   : > { %v3849_v9 = vsel %vm3835_vm0, %v3714_v27, 0.0  ;;  %v3331_v60 = vmul.f32 0.5, %v3203_v56  ;;  %v3204_v13 = vmax.f32 %v2719_v29, 0.0  ;;  %v2721_v17 = vpop.f32.mrb[147].mxu0  ;;  %v3023_v29 = vpop.f32.mrb[142].mxu1 }
 0x30a   : > { %v3850_v8 = vadd.f32 %v3849_v9, %v3848_v59  ;;  %v6875_v48 = vadd.f32 %v3534_v14, %v3406_v26  ;;  %v3025_v3 = vpop.f32.mrb[143].mxu1  ;;  %v3280_v6 = vmax.f32 %v3023_v29, 0.0  ;;  %v5476_v14 = vld [vmem:[%s7689_s2 + $0x210] ss:$8 sps:$4 sm:$0xff]  }
 0x30b   : > { %v6851_v43 = vadd.f32 %v3459_v49, %v3331_v60  ;;  %v3332_v20 = vmul.f32 0.5, %v3204_v13  ;;  %2931 = vmatmul.mubr.bf16.gmra.mrb[252].mxu0 %v5466_v11  ;;  %v5543_v11 = vld [vmem:[%s5752_s30 + $0x58] sm:$0xff]  ;;  %v3279_v13 = vmax.f32 %v3020_v46, 0.0 }
 0x30c   : > { %2938 = vmatprep.mubr.bf16.mxu0 %v5472_v1  ;;  %v3462_v58 = vmul.f32 0.5, %v5543_v11  ;;  %v3408_v45 = vmul.f32 0.5, %v3280_v6 }
 0x30d   : > { %v3715_v23 = vmul.f32 %v6851_v43, %v6851_v43  ;;  %v6857_v53 = vadd.f32 %v3460_v2, %v3332_v20  ;;  %v3535_v20 = vmul.f32 0.5, %v5544_v19  ;;  %v5548_v19 = vld [vmem:[%s5752_s30 + $0x2b0] sm:$0xff] }
 0x30e   : > { %v2724_v24 = vpop.f32.mrb[148].mxu0  ;;  %v6903_v46 = vadd.f32 %v3536_v32, %v3408_v45  ;;  %v3538_v32 = vmul.f32 0.5, %v5550_v10 }
 0x30f   : > { %v3851_v33 = vsel %vm3835_vm0, %v3715_v23, 0.0  ;;  %v3716_v37 = vmul.f32 %v6857_v53, %v6857_v53  ;;  %v4111_v39 = vpack.c.bf16 %v6857_v53, %v6851_v43  ;;  %v3205_v41 = vmax.f32 %v2724_v24, 0.0  ;;  %v2726_v42 = vpop.f32.mrb[149].mxu0  ;;  %v5578_v43 = vld [vmem:[%s5752_s30 + $0x328] sm:$0xff] }
 0x310   : > { %v3852_v47 = vadd.f32 %v3851_v33, %v3850_v8  ;;  %v2727_v49 = vpop.f32.mrb[150].mxu0  ;;  %v3407_v8 = vmul.f32 0.5, %v3279_v13  ;;  %v3463_v23 = vmul.f32 0.5, %v5545_v38  ;;  %v3028_v33 = vpop.f32.mrb[144].mxu1  ;;  %v5484_v42 = vld [vmem:[%s7689_s2 + $0x224] ss:$8 sps:$4 sm:$0xff]  }
 0x311   : > { %v3853_v27 = vsel %vm3835_vm0, %v3716_v37, 0.0  ;;  %v3333_v56 = vmul.f32 0.5, %v3205_v41  ;;  %v3206_v52 = vmax.f32 %v2727_v49, 0.0  ;;  %v2729_v59 = vpop.f32.mrb[151].mxu0  ;;  %v3281_v3 = vmax.f32 %v3028_v33, 0.0  ;;  %v5549_v38 = vld [vmem:[%s5752_s30 + $0x70] sm:$0xff] }
 0x312   : > { %v3854_v1 = vadd.f32 %v3853_v27, %v3852_v47  ;;  %v3030_v47 = vpop.f32.mrb[145].mxu1  ;;  %v5547_v27 = vld [vmem:[%s5752_s30 + $0x68] sm:$0xff]  ;;  %v3552_v53 = vmul.f32 0.5, %v5578_v43 }
 0x313   : > { %v6879_v9 = vadd.f32 %v3461_v25, %v3333_v56  ;;  %v3334_v60 = vmul.f32 0.5, %v3206_v52  ;;  %2939 = vmatmul.mubr.bf16.gmra.mrb[0].mxu0 %v5470_v44  ;;  %v6901_v44 = vadd.f32 %v3535_v20, %v3407_v8  ;;  %v3464_v56 = vmul.f32 0.5, %v5547_v27  ;;  %v3031_v11 = vpop.f32.mrb[146].mxu1  ;;  %v5482_v33 = vld [vmem:[%s7689_s2 + $0x220] ss:$8 sps:$4 sm:$0xff]  }
 0x314   : > { %2946 = vmatprep.mubr.bf16.mxu0 %v5478_v50  ;;  %v3033_v59 = vpop.f32.mrb[147].mxu1  ;;  %v3409_v8 = vmul.f32 0.5, %v3281_v3  ;;  %v3537_v20 = vmul.f32 0.5, %v5548_v19  ;;  %v5490_v47 = vld [vmem:[%s7689_s2 + $0x234] ss:$8 sps:$4 sm:$0xff]  }
 0x315   : > { %v3717_v17 = vmul.f32 %v6879_v9, %v6879_v9  ;;  %v6885_v18 = vadd.f32 %v3462_v58, %v3334_v60  ;;  %v3282_v60 = vmax.f32 %v3031_v11, 0.0  ;;  %v5551_v11 = vld [vmem:[%s5752_s30 + $0x78] sm:$0xff] }
 0x316   : > { %v2732_v21 = vpop.f32.mrb[152].mxu0  ;;  %v3466_v59 = vmul.f32 0.5, %v5551_v11 }
 0x317   : > { %v3855_v24 = vsel %vm3835_vm0, %v3717_v17, 0.0  ;;  %v3718_v28 = vmul.f32 %v6885_v18, %v6885_v18  ;;  %v4112_v25 = vpack.c.bf16 %v6885_v18, %v6879_v9  ;;  %v3207_v26 = vmax.f32 %v2732_v21, 0.0  ;;  %v2734_v35 = vpop.f32.mrb[153].mxu0  ;;  %v5582_v9 = vld [vmem:[%s5752_s30 + $0x338] sm:$0xff] }
 0x318   : > { %v3856_v37 = vadd.f32 %v3855_v24, %v3854_v1  ;;  %v2735_v41 = vpop.f32.mrb[154].mxu0  ;;  %v3410_v45 = vmul.f32 0.5, %v3282_v60  ;;  %v3554_v18 = vmul.f32 0.5, %v5582_v9 }
 0x319   : > { %v3857_v49 = vsel %vm3835_vm0, %v3718_v28, 0.0  ;;  %v3335_v50 = vmul.f32 0.5, %v3207_v26  ;;  %v3208_v51 = vmax.f32 %v2735_v41, 0.0  ;;  %v2737_v52 = vpop.f32.mrb[155].mxu0 }
 0x31a   : > { %v3858_v58 = vadd.f32 %v3857_v49, %v3856_v37  ;;  %v3036_v37 = vpop.f32.mrb[148].mxu1  ;;  %v6929_v49 = vadd.f32 %v3537_v20, %v3409_v8 }
 0x31b   : > { %v6907_v29 = vadd.f32 %v3463_v23, %v3335_v50  ;;  %v3336_v1 = vmul.f32 0.5, %v3208_v51  ;;  %2947 = vmatmul.mubr.bf16.gmra.mrb[4].mxu0 %v5476_v14  ;;  %v3465_v23 = vmul.f32 0.5, %v5549_v38  ;;  %v6931_v50 = vadd.f32 %v3538_v32, %v3410_v45  ;;  %v3038_v51 = vpop.f32.mrb[149].mxu1  ;;  %v5552_v32 = vld [vmem:[%s5752_s30 + $0x2c0] sm:$0xff] }
 0x31c   : > { %2954 = vmatprep.mubr.bf16.mxu0 %v5484_v42  ;;  %v3283_v19 = vmax.f32 %v3036_v37, 0.0 }
 0x31d   : > { %v3719_v6 = vmul.f32 %v6907_v29, %v6907_v29  ;;  %v6913_v17 = vadd.f32 %v3464_v56, %v3336_v1 }
 0x31e   : > { %v2740_v21 = vpop.f32.mrb[156].mxu0  ;;  %v3411_v10 = vmul.f32 0.5, %v3283_v19  ;;  %v5555_v19 = vld [vmem:[%s5752_s30 + $0x88] sm:$0xff] }
 0x31f   : > { %v3859_v24 = vsel %vm3835_vm0, %v3719_v6, 0.0  ;;  %v3720_v28 = vmul.f32 %v6913_v17, %v6913_v17  ;;  %v4113_v26 = vpack.c.bf16 %v6913_v17, %v6907_v29  ;;  %v3209_v35 = vmax.f32 %v2740_v21, 0.0  ;;  %v2742_v14 = vpop.f32.mrb[157].mxu0  ;;  %v5586_v17 = vld [vmem:[%s5752_s30 + $0x348] sm:$0xff] }
 0x320   : > { %v3860_v41 = vadd.f32 %v3859_v24, %v3858_v58  ;;  %v2743_v42 = vpop.f32.mrb[158].mxu0  ;;  %v3039_v58 = vpop.f32.mrb[150].mxu1  ;;  %v3539_v24 = vmul.f32 0.5, %v5552_v32  ;;  %v3469_v21 = vmul.f32 0.5, %v5557_v55  ;;  %v6980_v55 = vld [vmem:[%s7690_s3 + $0x20] sm:$0xff] }
 0x321   : > { %v3861_v27 = vsel %vm3835_vm0, %v3720_v28, 0.0  ;;  %v3337_v56 = vmul.f32 0.5, %v3209_v35  ;;  %v3210_v52 = vmax.f32 %v2743_v42, 0.0  ;;  %v2745_v1 = vpop.f32.mrb[159].mxu0  ;;  %v3041_v60 = vpop.f32.mrb[151].mxu1  ;;  %v3284_v20 = vmax.f32 %v3039_v58, 0.0 }
 0x322   : > { %v3862_v3 = vadd.f32 %v3861_v27, %v3860_v41  ;;  %v5553_v28 = vld [vmem:[%s5752_s30 + $0x80] sm:$0xff]  ;;  %v6957_v58 = vadd.f32 %v3539_v24, %v3411_v10 }
 0x323   : > { %v6935_v6 = vadd.f32 %v3465_v23, %v3337_v56  ;;  %v3338_v8 = vmul.f32 0.5, %v3210_v52  ;;  %2955 = vmatmul.mubr.bf16.gmra.mrb[8].mxu0 %v5482_v33  ;;  %v3467_v23 = vmul.f32 0.5, %v5553_v28  ;;  %v3412_v14 = vmul.f32 0.5, %v3284_v20  ;;  %v5554_v33 = vld [vmem:[%s5752_s30 + $0x2c8] sm:$0xff]  ;;  %v5488_v56 = vld [vmem:[%s7689_s2 + $0x230] ss:$8 sps:$4 sm:$0xff]  }
 0x324   : > { %2962 = vmatprep.mubr.bf16.mxu0 %v5490_v47  ;;  %v3540_v37 = vmul.f32 0.5, %v5554_v33  ;;  %v3044_v52 = vpop.f32.mrb[152].mxu1  ;;  %v5496_v1 = vld [vmem:[%s7689_s2 + $0x244] ss:$8 sps:$4 sm:$0xff]   ;;  %v3468_v20 = vmul.f32 0.5, %v5555_v19  ;;  %v5556_v19 = vld [vmem:[%s5752_s30 + $0x2d0] sm:$0xff] }
 0x325   : > { %v3721_v38 = vmul.f32 %v6935_v6, %v6935_v6  ;;  %v6941_v45 = vadd.f32 %v3466_v59, %v3338_v8  ;;  %v3046_v8 = vpop.f32.mrb[153].mxu1 }
 0x326   : > { %v2748_v35 = vpop.f32.mrb[160].mxu0  ;;  %v6959_v60 = vadd.f32 %v3540_v37, %v3412_v14  ;;  %v3047_v33 = vpop.f32.mrb[154].mxu1  ;;  %v3285_v14 = vmax.f32 %v3044_v52, 0.0 }
 0x327   : > { %v3863_v41 = vsel %vm3835_vm0, %v3721_v38, 0.0  ;;  %v3722_v42 = vmul.f32 %v6941_v45, %v6941_v45  ;;  %v4114_v47 = vpack.c.bf16 %v6941_v45, %v6935_v6  ;;  %v3211_v51 = vmax.f32 %v2748_v35, 0.0  ;;  %v2750_v27 = vpop.f32.mrb[161].mxu0 }
 0x328   : > { %v3864_v11 = vadd.f32 %v3863_v41, %v3862_v3  ;;  %v2751_v59 = vpop.f32.mrb[162].mxu0  ;;  %v3049_v41 = vpop.f32.mrb[155].mxu1  ;;  %v3286_v37 = vmax.f32 %v3047_v33, 0.0  ;;  %v6975_v33 = vld [vmem:[%s7690_s3] sm:$0xff]  ;;  %v5559_v27 = vld [vmem:[%s5752_s30 + $0x98] sm:$0xff] }
 0x329   : > { %v3865_v38 = vsel %vm3835_vm0, %v3722_v42, 0.0  ;;  %v3339_v32 = vmul.f32 0.5, %v3211_v51  ;;  %v3212_v28 = vmax.f32 %v2751_v59, 0.0  ;;  %v2753_v35 = vpop.f32.mrb[163].mxu0  ;;  %v3413_v51 = vmul.f32 0.5, %v3285_v14  ;;  %v3052_v41 = vpop.f32.mrb[156].mxu1 }
 0x32a   : > { %v3866_v3 = vadd.f32 %v3865_v38, %v3864_v11  ;;  %v3541_v59 = vmul.f32 0.5, %v5556_v19  ;;  %v5494_v11 = vld [vmem:[%s7689_s2 + $0x240] ss:$8 sps:$4 sm:$0xff]   ;;  %v3414_v38 = vmul.f32 0.5, %v3286_v37  ;;  %v5502_v37 = vld [vmem:[%s7689_s2 + $0x254] ss:$8 sps:$4 sm:$0xff]  }
 0x32b   : > { %v3595_v10 = vadd.f32 %v3467_v23, %v3339_v32  ;;  %v3340_v24 = vmul.f32 0.5, %v3212_v28  ;;  %2963 = vmatmul.mubr.bf16.gmra.mrb[12].mxu0 %v5488_v56  ;;  %v5558_v23 = vld [vmem:[%s5752_s30 + $0x2d8] sm:$0xff]  ;;  %v3054_v19 = vpop.f32.mrb[157].mxu1  ;;  %v3470_v13 = vmul.f32 0.5, %v5559_v27 }
 0x32c   : > { %2970 = vmatprep.mubr.bf16.mxu0 %v5496_v1  ;;  %v3542_v32 = vmul.f32 0.5, %v5558_v23 }
 0x32d   : > { %v3723_v8 = vmul.f32 %v3595_v10, %v3595_v10  ;;  %v3596_v42 = vadd.f32 %v3468_v20, %v3340_v24 }
 0x32e   : > { %v2756_v35 = vpop.f32.mrb[164].mxu0 }
 0x32f   : > { %v3867_v56 = vsel %vm3835_vm0, %v3723_v8, 0.0  ;;  %v3724_v52 = vmul.f32 %v3596_v42, %v3596_v42  ;;  %v3213_v28 = vmax.f32 %v2756_v35, 0.0  ;;  %v2758_v1 = vpop.f32.mrb[165].mxu0  ;;  %v4115_v20 = vpack.c.bf16 %v3596_v42, %v3595_v10 }
 0x330   : > { %v3868_v24 = vadd.f32 %v3867_v56, %v3866_v3  ;;  %v2759_v14 = vpop.f32.mrb[166].mxu0  ;;  %v4728_v10 = vcombine.high %v6975_v33, %v6980_v55  ;;  %v6987_v8 = vadd.f32 %v3541_v59, %v3413_v51  ;;  %v6989_v42 = vadd.f32 %v3542_v32, %v3414_v38  ;;  %v3055_v56 = vpop.f32.mrb[158].mxu1 }
 0x331   : > { %v3869_v35 = vsel %vm3835_vm0, %v3724_v52, 0.0  ;;  %v3341_v23 = vmul.f32 0.5, %v3213_v28  ;;  %v3214_v1 = vmax.f32 %v2759_v14, 0.0  ;;  %5187 = vmatprep.subr.bf16.mxu1 %v4115_v20  ;;  %v2761_v3 = vpop.f32.mrb[167].mxu0  ;;  %v3057_v51 = vpop.f32.mrb[159].mxu1  ;;  %v3287_v32 = vmax.f32 %v3052_v41, 0.0 }
 0x332   : > { %v3870_v2 = vadd.f32 %v3869_v35, %v3868_v24  ;;  %5188 = vmatpush3.bf16.msra.mxu1 %v4107_v12  ;;  %4243 = vmatprep.mubr.bf16.mxu1 %v4728_v10  ;;  %v3288_v52 = vmax.f32 %v3055_v56, 0.0  ;;  %v5560_v14 = vld [vmem:[%s5752_s30 + $0x2e0] sm:$0xff]  ;;  %v3471_v12 = vmul.f32 0.5, %v5561_v5  ;;  %v5562_v35 = vld [vmem:[%s5752_s30 + $0x2e8] sm:$0xff]  ;;  %v3060_v3 = vpop.f32.mrb[160].mxu1 }
 0x333   : > { %v3597_v59 = vadd.f32 %v3469_v21, %v3341_v23  ;;  %v3342_v38 = vmul.f32 0.5, %v3214_v1  ;;  %2971 = vmatmul.mubr.bf16.gmra.mrb[16].mxu0 %v5494_v11  ;;  %v3415_v24 = vmul.f32 0.5, %v3287_v32  ;;  %v3543_v19 = vmul.f32 0.5, %v5560_v14 }
 0x334   : > { %2978 = vmatprep.mubr.bf16.mxu0 %v5502_v37  ;;  %v3416_v10 = vmul.f32 0.5, %v3288_v52  ;;  %v3544_v21 = vmul.f32 0.5, %v5562_v35 }
 0x335   : > { %v3725_v28 = vmul.f32 %v3597_v59, %v3597_v59  ;;  %v3598_v20 = vadd.f32 %v3470_v13, %v3342_v38  ;;  %v5500_v13 = vld [vmem:[%s7689_s2 + $0x250] ss:$8 sps:$4 sm:$0xff]   ;;  %v5508_v38 = vld [vmem:[%s7689_s2 + $0x264] ss:$8 sps:$4 sm:$0xff]   ;;  %v7008_v32 = vadd.f32 %v3543_v19, %v3415_v24 }
 0x336   : > { %v2764_v4 = vpop.f32.mrb[168].mxu0  ;;  %v7010_v52 = vadd.f32 %v3544_v21, %v3416_v10  ;;  %v3289_v21 = vmax.f32 %v3060_v3, 0.0 }
 0x337   : > { %v3871_v23 = vsel %vm3835_vm0, %v3725_v28, 0.0  ;;  %v3726_v11 = vmul.f32 %v3598_v20, %v3598_v20  ;;  %v3215_v41 = vmax.f32 %v2764_v4, 0.0  ;;  %v2766_v37 = vpop.f32.mrb[169].mxu0  ;;  %v4116_v1 = vpack.c.bf16 %v3598_v20, %v3597_v59  ;;  %v3062_v28 = vpop.f32.mrb[161].mxu1  ;;  %v5563_v20 = vld [vmem:[%s5752_s30 + $0xa8] sm:$0xff] }
 0x338   : > { %v3872_v56 = vadd.f32 %v3871_v23, %v3870_v2  ;;  %v2767_v51 = vpop.f32.mrb[170].mxu0  ;;  %v3472_v5 = vmul.f32 0.5, %v5563_v20  ;;  %v3063_v2 = vpop.f32.mrb[162].mxu1  ;;  %v5566_v20 = vld [vmem:[%s5752_s30 + $0x2f8] sm:$0xff] }
 0x339   : > { %v3873_v14 = vsel %vm3835_vm0, %v3726_v11, 0.0  ;;  %v3343_v4 = vmul.f32 0.5, %v3215_v41  ;;  %v3216_v59 = vmax.f32 %v2767_v51, 0.0  ;;  %5189 = vmatprep.subr.bf16.mxu1 %v4116_v1  ;;  %v2769_v35 = vpop.f32.mrb[171].mxu0  ;;  %v3065_v24 = vpop.f32.mrb[163].mxu1  ;;  %v3290_v11 = vmax.f32 %v3063_v2, 0.0 }
 0x33a   : > { %v3874_v23 = vadd.f32 %v3873_v14, %v3872_v56  ;;  %5190 = vmatpush3.bf16.msra.mxu1 %v4108_v36  ;;  %v3417_v51 = vmul.f32 0.5, %v3289_v21  ;;  %v5564_v56 = vld [vmem:[%s5752_s30 + $0x2f0] sm:$0xff]  ;;  %v3068_v35 = vpop.f32.mrb[164].mxu1 }
 0x33b   : > { %v3599_v19 = vadd.f32 %v3471_v12, %v3343_v4  ;;  %v3344_v10 = vmul.f32 0.5, %v3216_v59  ;;  %2979 = vmatmul.mubr.bf16.gmra.mrb[20].mxu0 %v5500_v13  ;;  %v3545_v28 = vmul.f32 0.5, %v5564_v56  ;;  %v3418_v36 = vmul.f32 0.5, %v3290_v11  ;;  %v3070_v11 = vpop.f32.mrb[165].mxu1 }
 0x33c   : > { %2986 = vmatprep.mubr.bf16.mxu0 %v5508_v38  ;;  %v3546_v12 = vmul.f32 0.5, %v5566_v20  ;;  %v5567_v20 = vld [vmem:[%s5752_s30 + $0xb8] sm:$0xff] }
 0x33d   : > { %v3727_v37 = vmul.f32 %v3599_v19, %v3599_v19  ;;  %v3600_v1 = vadd.f32 %v3472_v5, %v3344_v10  ;;  %v5506_v5 = vld [vmem:[%s7689_s2 + $0x260] ss:$8 sps:$4 sm:$0xff]   ;;  %v7026_v10 = vadd.f32 %v3545_v28, %v3417_v51 }
 0x33e   : > { %v2772_v14 = vpop.f32.mrb[172].mxu0  ;;  %v7028_v21 = vadd.f32 %v3546_v12, %v3418_v36  ;;  %v3291_v36 = vmax.f32 %v3068_v35, 0.0 }
 0x33f   : > { %v3875_v13 = vsel %vm3835_vm0, %v3727_v37, 0.0  ;;  %v3728_v3 = vmul.f32 %v3600_v1, %v3600_v1  ;;  %v3217_v4 = vmax.f32 %v2772_v14, 0.0  ;;  %v2774_v38 = vpop.f32.mrb[173].mxu0  ;;  %v4117_v59 = vpack.c.bf16 %v3600_v1, %v3599_v19  ;;  %v3071_v1 = vpop.f32.mrb[166].mxu1 }
 0x340   : > { %v3876_v2 = vadd.f32 %v3875_v13, %v3874_v23  ;;  %v2775_v24 = vpop.f32.mrb[174].mxu0  ;;  %v3474_v14 = vmul.f32 0.5, %v5567_v20  ;;  %v3073_v23 = vpop.f32.mrb[167].mxu1  ;;  %v3292_v12 = vmax.f32 %v3071_v1, 0.0  ;;  %v5571_v13 = vld [vmem:[%s5752_s30 + $0xc8] sm:$0xff] }
 0x341   : > { %v3877_v56 = vsel %vm3835_vm0, %v3728_v3, 0.0  ;;  %v3345_v34 = vmul.f32 0.5, %v3217_v4  ;;  %v3218_v37 = vmax.f32 %v2775_v24, 0.0  ;;  %5191 = vmatprep.subr.bf16.mxu1 %v4117_v59  ;;  %v2777_v19 = vpop.f32.mrb[175].mxu0  ;;  %v3419_v59 = vmul.f32 0.5, %v3291_v36  ;;  %v5568_v24 = vld [vmem:[%s5752_s30 + $0x300] sm:$0xff] }
 0x342   : > { %v3878_v38 = vadd.f32 %v3877_v56, %v3876_v2  ;;  %5192 = vmatpush3.bf16.msra.mxu1 %v4109_v7  ;;  %v3547_v11 = vmul.f32 0.5, %v5568_v24  ;;  %v5569_v56 = vld [vmem:[%s5752_s30 + $0xc0] sm:$0xff]  ;;  %v3420_v57 = vmul.f32 0.5, %v3292_v12  ;;  %v3548_v7 = vmul.f32 0.5, %v5570_v62  ;;  %v3076_v19 = vpop.f32.mrb[168].mxu1 }
 0x343   : > { %v3601_v51 = vadd.f32 %v3473_v30, %v3345_v34  ;;  %v3346_v28 = vmul.f32 0.5, %v3218_v37  ;;  %2987 = vmatmul.mubr.bf16.gmra.mrb[24].mxu0 %v5506_v5  ;;  %v3475_v20 = vmul.f32 0.5, %v5569_v56  ;;  %v3078_v36 = vpop.f32.mrb[169].mxu1  ;;  %v3476_v62 = vmul.f32 0.5, %v5571_v13 }
 0x345   : > { %v3729_v3 = vmul.f32 %v3601_v51, %v3601_v51  ;;  %v3602_v4 = vadd.f32 %v3474_v14, %v3346_v28  ;;  %v7041_v14 = vadd.f32 %v3547_v11, %v3419_v59  ;;  %v7043_v28 = vadd.f32 %v3548_v7, %v3420_v57 }
 0x346   : > { %v2780_v2 = vpop.f32.mrb[176].mxu0  ;;  %v3293_v57 = vmax.f32 %v3076_v19, 0.0 }
 0x347   : > { %v3879_v30 = vsel %vm3835_vm0, %v3729_v3, 0.0  ;;  %v3730_v5 = vmul.f32 %v3602_v4, %v3602_v4  ;;  %v3219_v35 = vmax.f32 %v2780_v2, 0.0  ;;  %v2782_v34 = vpop.f32.mrb[177].mxu0  ;;  %v4118_v37 = vpack.c.bf16 %v3602_v4, %v3601_v51  ;;  %7740 = vst [vmem:[#allocation2_spill] sm:$0xff] %v7041_v14  ;;  %7741 = vst [vmem:[#allocation3_spill] sm:$0xff] %v7043_v28  ;;  %v3079_v2 = vpop.f32.mrb[170].mxu1 }
 0x348   : > { %v3880_v1 = vadd.f32 %v3879_v30, %v3878_v38  ;;  %v2783_v23 = vpop.f32.mrb[178].mxu0  ;;  %v3081_v38 = vpop.f32.mrb[171].mxu1  ;;  %v3294_v7 = vmax.f32 %v3079_v2, 0.0  ;;  %v5620_v14 = vld [vmem:[%s5752_s30 + $0x3d0] sm:$0xff] }
 0x349   : > { %v3881_v24 = vsel %vm3835_vm0, %v3730_v5, 0.0  ;;  %v3347_v12 = vmul.f32 0.5, %v3219_v35  ;;  %v3220_v56 = vmax.f32 %v2783_v23, 0.0  ;;  %5193 = vmatprep.subr.bf16.mxu1 %v4118_v37  ;;  %v2785_v3 = vpop.f32.mrb[179].mxu0  ;;  %v3421_v5 = vmul.f32 0.5, %v3293_v57  ;;  %v5572_v35 = vld [vmem:[%s5752_s30 + $0x310] sm:$0xff] }
 0x34a   : > { %v3882_v51 = vadd.f32 %v3881_v24, %v3880_v1  ;;  %5194 = vmatpush3.bf16.msra.mxu1 %v4110_v54  ;;  %v3549_v34 = vmul.f32 0.5, %v5572_v35  ;;  %v5573_v1 = vld [vmem:[%s5752_s30 + $0xd0] sm:$0xff]  ;;  %v3422_v36 = vmul.f32 0.5, %v3294_v7  ;;  %v3084_v19 = vpop.f32.mrb[172].mxu1 }
 0x34b   : > { %v3603_v4 = vadd.f32 %v3475_v20, %v3347_v12  ;;  %v3348_v59 = vmul.f32 0.5, %v3220_v56  ;;  %v3477_v23 = vmul.f32 0.5, %v5573_v1  ;;  %v5575_v1 = vld [vmem:[%s5752_s30 + $0xd8] sm:$0xff] }
 0x34c   : > { %v7058_v38 = vadd.f32 %v3550_v61, %v3422_v36  ;;  %v3478_v31 = vmul.f32 0.5, %v5575_v1  ;;  %v3295_v36 = vmax.f32 %v3084_v19, 0.0 }
 0x34d   : > { %v3731_v30 = vmul.f32 %v3603_v4, %v3603_v4  ;;  %v3604_v13 = vadd.f32 %v3476_v62, %v3348_v59  ;;  %v7056_v62 = vadd.f32 %v3549_v34, %v3421_v5  ;;  %v3086_v59 = vpop.f32.mrb[173].mxu1 }
 0x34e   : > { %v2788_v37 = vpop.f32.mrb[180].mxu0  ;;  %7743 = vst [vmem:[#allocation5_spill] sm:$0xff] %v7058_v38 }
 0x34f   : > { %v3883_v54 = vsel %vm3835_vm0, %v3731_v30, 0.0  ;;  %v3732_v20 = vmul.f32 %v3604_v13, %v3604_v13  ;;  %v3221_v24 = vmax.f32 %v2788_v37, 0.0  ;;  %v2790_v12 = vpop.f32.mrb[181].mxu0  ;;  %v4119_v56 = vpack.c.bf16 %v3604_v13, %v3603_v4  ;;  %7742 = vst [vmem:[#allocation4_spill] sm:$0xff] %v7056_v62  ;;  %v3087_v37 = vpop.f32.mrb[174].mxu1 }
 0x350   : > { %v3884_v3 = vadd.f32 %v3883_v54, %v3882_v51  ;;  %v2791_v2 = vpop.f32.mrb[182].mxu0  ;;  %v3089_v51 = vpop.f32.mrb[175].mxu1  ;;  %v3296_v61 = vmax.f32 %v3087_v37, 0.0  ;;  %v5576_v12 = vld [vmem:[%s5752_s30 + $0x320] sm:$0xff] }
 0x351   : > { %v3885_v57 = vsel %vm3835_vm0, %v3732_v20, 0.0  ;;  %v3349_v7 = vmul.f32 0.5, %v3221_v24  ;;  %v3222_v35 = vmax.f32 %v2791_v2, 0.0  ;;  %5195 = vmatprep.subr.bf16.mxu1 %v4119_v56  ;;  %v2793_v30 = vpop.f32.mrb[183].mxu0  ;;  %v3423_v24 = vmul.f32 0.5, %v3295_v36  ;;  %v3092_v19 = vpop.f32.mrb[176].mxu1 }
 0x352   : > { %v3886_v4 = vadd.f32 %v3885_v57, %v3884_v3  ;;  %5196 = vmatpush3.bf16.msra.mxu1 %v4111_v39  ;;  %v3551_v56 = vmul.f32 0.5, %v5576_v12  ;;  %v5577_v3 = vld [vmem:[%s5752_s30 + $0xe0] sm:$0xff]  ;;  %v3424_v57 = vmul.f32 0.5, %v3296_v61 }
 0x353   : > { %v3605_v13 = vadd.f32 %v3477_v23, %v3349_v7  ;;  %v3350_v5 = vmul.f32 0.5, %v3222_v35  ;;  %v3479_v59 = vmul.f32 0.5, %v5577_v3  ;;  %v5579_v3 = vld [vmem:[%s5752_s30 + $0xe8] sm:$0xff] }
 0x354   : > { %v7073_v51 = vadd.f32 %v3552_v53, %v3424_v57  ;;  %v3480_v43 = vmul.f32 0.5, %v5579_v3  ;;  %v3297_v57 = vmax.f32 %v3092_v19, 0.0 }
 0x355   : > { %v3733_v54 = vmul.f32 %v3605_v13, %v3605_v13  ;;  %v3606_v20 = vadd.f32 %v3478_v31, %v3350_v5  ;;  %v7071_v31 = vadd.f32 %v3551_v56, %v3423_v24  ;;  %v3094_v5 = vpop.f32.mrb[177].mxu1 }
 0x356   : > { %v2796_v2 = vpop.f32.mrb[184].mxu0  ;;  %7745 = vst [vmem:[#allocation7_spill] sm:$0xff] %v7073_v51 }
 0x357   : > { %v3887_v39 = vsel %vm3835_vm0, %v3733_v54, 0.0  ;;  %v3734_v23 = vmul.f32 %v3606_v20, %v3606_v20  ;;  %v3223_v7 = vmax.f32 %v2796_v2, 0.0  ;;  %v2798_v35 = vpop.f32.mrb[185].mxu0  ;;  %v4120_v1 = vpack.c.bf16 %v3606_v20, %v3605_v13  ;;  %7744 = vst [vmem:[#allocation6_spill] sm:$0xff] %v7071_v31  ;;  %v3095_v2 = vpop.f32.mrb[178].mxu1 }
 0x358   : > { %v3888_v30 = vadd.f32 %v3887_v39, %v3886_v4  ;;  %v2799_v37 = vpop.f32.mrb[186].mxu0  ;;  %v3097_v4 = vpop.f32.mrb[179].mxu1  ;;  %v3298_v53 = vmax.f32 %v3095_v2, 0.0  ;;  %v5580_v35 = vld [vmem:[%s5752_s30 + $0x330] sm:$0xff] }
 0x359   : > { %v3889_v36 = vsel %vm3835_vm0, %v3734_v23, 0.0  ;;  %v3351_v61 = vmul.f32 0.5, %v3223_v7  ;;  %v3224_v12 = vmax.f32 %v2799_v37, 0.0  ;;  %5197 = vmatprep.subr.bf16.mxu1 %v4120_v1  ;;  %v2801_v54 = vpop.f32.mrb[187].mxu0  ;;  %v3425_v7 = vmul.f32 0.5, %v3297_v57  ;;  %v3100_v19 = vpop.f32.mrb[180].mxu1 }
 0x35a   : > { %v3890_v13 = vadd.f32 %v3889_v36, %v3888_v30  ;;  %5198 = vmatpush3.bf16.msra.mxu1 %v4112_v25  ;;  %v3553_v1 = vmul.f32 0.5, %v5580_v35  ;;  %v5581_v30 = vld [vmem:[%s5752_s30 + $0xf0] sm:$0xff]  ;;  %v3426_v36 = vmul.f32 0.5, %v3298_v53 }
 0x35b   : > { %v3607_v20 = vadd.f32 %v3479_v59, %v3351_v61  ;;  %v3352_v24 = vmul.f32 0.5, %v3224_v12  ;;  %v3481_v5 = vmul.f32 0.5, %v5581_v30  ;;  %v5583_v30 = vld [vmem:[%s5752_s30 + $0xf8] sm:$0xff] }
 0x35c   : > { %v7088_v4 = vadd.f32 %v3554_v18, %v3426_v36  ;;  %v3482_v9 = vmul.f32 0.5, %v5583_v30  ;;  %v3299_v36 = vmax.f32 %v3100_v19, 0.0 }
 0x35d   : > { %v3735_v39 = vmul.f32 %v3607_v20, %v3607_v20  ;;  %v3608_v23 = vadd.f32 %v3480_v43, %v3352_v24  ;;  %v7086_v43 = vadd.f32 %v3553_v1, %v3425_v7  ;;  %v3102_v24 = vpop.f32.mrb[181].mxu1 }
 0x35e   : > { %v2804_v37 = vpop.f32.mrb[188].mxu0  ;;  %7747 = vst [vmem:[#allocation9_spill] sm:$0xff] %v7088_v4  ;;  %v5611_v4 = vld [vmem:[%s5752_s30 + $0x168] sm:$0xff] }
 0x35f   : > { %v3891_v25 = vsel %vm3835_vm0, %v3735_v39, 0.0  ;;  %v3736_v59 = vmul.f32 %v3608_v23, %v3608_v23  ;;  %v3225_v61 = vmax.f32 %v2804_v37, 0.0  ;;  %v2806_v12 = vpop.f32.mrb[189].mxu0  ;;  %v4121_v3 = vpack.c.bf16 %v3608_v23, %v3607_v20  ;;  %7746 = vst [vmem:[#allocation8_spill] sm:$0xff] %v7086_v43  ;;  %v3103_v37 = vpop.f32.mrb[182].mxu1 }
 0x360   : > { %v3892_v54 = vadd.f32 %v3891_v25, %v3890_v13  ;;  %v2807_v2 = vpop.f32.mrb[190].mxu0  ;;  %v3105_v13 = vpop.f32.mrb[183].mxu1  ;;  %v3300_v18 = vmax.f32 %v3103_v37, 0.0  ;;  %v5584_v12 = vld [vmem:[%s5752_s30 + $0x340] sm:$0xff]  ;;  %v3496_v31 = vmul.f32 0.5, %v5611_v4 }
 0x361   : > { %v3893_v57 = vsel %vm3835_vm0, %v3736_v59, 0.0  ;;  %v3353_v53 = vmul.f32 0.5, %v3225_v61  ;;  %v3226_v35 = vmax.f32 %v2807_v2, 0.0  ;;  %5199 = vmatprep.subr.bf16.mxu1 %v4121_v3  ;;  %v2809_v39 = vpop.f32.mrb[191].mxu0  ;;  %v3427_v61 = vmul.f32 0.5, %v3299_v36  ;;  %v3108_v19 = vpop.f32.mrb[184].mxu1 }
 0x362   : > { %v3894_v20 = vadd.f32 %v3893_v57, %v3892_v54  ;;  %5200 = vmatpush3.bf16.msra.mxu1 %v4113_v26  ;;  %v3555_v3 = vmul.f32 0.5, %v5584_v12  ;;  %v5585_v54 = vld [vmem:[%s5752_s30 + $0x100] sm:$0xff]  ;;  %v3428_v29 = vmul.f32 0.5, %v3300_v18  ;;  %v3556_v26 = vmul.f32 0.5, %v5586_v17  ;;  %v5587_v39 = vld [vmem:[%s5752_s30 + $0x108] sm:$0xff]  ;;  %v3110_v12 = vpop.f32.mrb[185].mxu1 }
 0x363   : > { %v3609_v23 = vadd.f32 %v3481_v5, %v3353_v53  ;;  %v3354_v7 = vmul.f32 0.5, %v3226_v35  ;;  %v3483_v2 = vmul.f32 0.5, %v5585_v54  ;;  %v3484_v37 = vmul.f32 0.5, %v5587_v39 }
 0x364   : > { %v7104_v36 = vadd.f32 %v3556_v26, %v3428_v29 }
 0x365   : > { %v3737_v25 = vmul.f32 %v3609_v23, %v3609_v23  ;;  %v3610_v59 = vadd.f32 %v3482_v9, %v3354_v7  ;;  %v7102_v7 = vadd.f32 %v3555_v3, %v3427_v61  ;;  %v7120_v61 = vld [vmem:[%s7690_s3 + $0x28] sm:$0xff] }
 0x366   : > { %v2812_v24 = vpop.f32.mrb[192].mxu0  ;;  %7749 = vst [vmem:[#allocation11_spill] sm:$0xff] %v7104_v36 }
 0x367   : > { %v3895_v5 = vsel %vm3835_vm0, %v3737_v25, 0.0  ;;  %v3738_v57 = vmul.f32 %v3610_v59, %v3610_v59  ;;  %v3227_v53 = vmax.f32 %v2812_v24, 0.0  ;;  %v2814_v35 = vpop.f32.mrb[193].mxu0  ;;  %v4122_v30 = vpack.c.bf16 %v3610_v59, %v3609_v23  ;;  %7748 = vst [vmem:[#allocation10_spill] sm:$0xff] %v7102_v7  ;;  %v3111_v23 = vpop.f32.mrb[186].mxu1 }
 0x368   : > { %v3896_v9 = vadd.f32 %v3895_v5, %v3894_v20  ;;  %v2815_v13 = vpop.f32.mrb[194].mxu0  ;;  %v4727_v24 = vcombine.low %v6975_v33, %v6980_v55  ;;  %v7115_v20 = vld [vmem:[%s7690_s3 + $0x8] sm:$0xff]  ;;  %v3113_v3 = vpop.f32.mrb[187].mxu1  ;;  %v3301_v5 = vmax.f32 %v3108_v19, 0.0  ;;  %v5589_v35 = vld [vmem:[%s5752_s30 + $0x350] sm:$0xff]  ;;  %v3302_v39 = vmax.f32 %v3111_v23, 0.0 }
 0x369   : > { %v3897_v18 = vsel %vm3835_vm0, %v3738_v57, 0.0  ;;  %v3355_v54 = vmul.f32 0.5, %v3227_v53  ;;  %v3228_v17 = vmax.f32 %v2815_v13, 0.0  ;;  %5201 = vmatprep.subr.bf16.mxu1 %v4122_v30  ;;  %v2817_v25 = vpop.f32.mrb[195].mxu0  ;;  %v4730_v6 = vcombine.high %v7115_v20, %v7120_v61  ;;  %v5588_v57 = vld [vmem:[%s5752_s30 + $0x110] sm:$0xff] }
 0x36a   : > { %v3898_v59 = vadd.f32 %v3897_v18, %v3896_v9  ;;  %5202 = vmatpush3.bf16.msra.mxu1 %v4114_v47  ;;  %v3485_v53 = vmul.f32 0.5, %v5588_v57  ;;  %v3557_v30 = vmul.f32 0.5, %v5589_v35  ;;  %v5590_v9 = vld [vmem:[%s5752_s30 + $0x358] sm:$0xff]  ;;  %v3429_v3 = vmul.f32 0.5, %v3301_v5 }
 0x36b   : > { %v7122_v33 = vadd.f32 %v3483_v2, %v3355_v54  ;;  %v3356_v55 = vmul.f32 0.5, %v3228_v17  ;;  %v3558_v13 = vmul.f32 0.5, %v5590_v9  ;;  %v3116_v17 = vpop.f32.mrb[188].mxu1  ;;  %v5591_v9 = vld [vmem:[%s5752_s30 + $0x118] sm:$0xff] }
 0x36c   : > { %v7144_v34 = vadd.f32 %v3557_v30, %v3429_v3  ;;  %v5592_v30 = vld [vmem:[%s5752_s30 + $0x360] sm:$0xff] }
 0x36d   : > { %v3739_v29 = vmul.f32 %v7122_v33, %v7122_v33  ;;  %v7132_v26 = vadd.f32 %v3484_v37, %v3356_v55  ;;  %4244 = vmatmul.mubr.bf16.vlgmr.msra.gmra.mrb[228].mxu1 %v4727_v24  ;;  %v3430_v55 = vmul.f32 0.5, %v3302_v39  ;;  %v5593_v3 = vld [vmem:[%s5752_s30 + $0x120] sm:$0xff] }
 0x36e   : > { %v2820_v2 = vpop.f32.mrb[196].mxu0  ;;  %4284 = vmatprep.mubr.bf16.mxu1 %v4730_v6  ;;  %v3118_v6 = vpop.f32.mrb[189].mxu1  ;;  %7750 = vst [vmem:[#allocation12_spill] sm:$0xff] %v7144_v34 }
 0x36f   : > { %v3899_v12 = vsel %vm3835_vm0, %v3739_v29, 0.0  ;;  %v3740_v18 = vmul.f32 %v7132_v26, %v7132_v26  ;;  %v3229_v54 = vmax.f32 %v2820_v2, 0.0  ;;  %v2822_v19 = vpop.f32.mrb[197].mxu0  ;;  %v3486_v29 = vmul.f32 0.5, %v5591_v9  ;;  %v3119_v1 = vpop.f32.mrb[190].mxu1 }
 0x370   : > { %v3900_v25 = vadd.f32 %v3899_v12, %v3898_v59  ;;  %v2823_v24 = vpop.f32.mrb[198].mxu0  ;;  %v7146_v2 = vadd.f32 %v3558_v13, %v3430_v55  ;;  %v3121_v59 = vpop.f32.mrb[191].mxu1  ;;  %v3303_v12 = vmax.f32 %v3116_v17, 0.0  ;;  %v3487_v55 = vmul.f32 0.5, %v5593_v3 }
 0x371   : > { %v3901_v23 = vsel %vm3835_vm0, %v3740_v18, 0.0  ;;  %v3357_v57 = vmul.f32 0.5, %v3229_v54  ;;  %v3230_v35 = vmax.f32 %v2823_v24, 0.0  ;;  %v2825_v45 = vpop.f32.mrb[199].mxu0  ;;  %v3304_v18 = vmax.f32 %v3119_v1, 0.0  ;;  %v5595_v54 = vld [vmem:[%s5752_s30 + $0x128] sm:$0xff] }
 0x372   : > { %v3902_v56 = vadd.f32 %v3901_v23, %v3900_v25  ;;  %7751 = vst [vmem:[#allocation13_spill] sm:$0xff] %v7146_v2  ;;  %v3431_v25 = vmul.f32 0.5, %v3303_v12  ;;  %v3559_v24 = vmul.f32 0.5, %v5592_v30  ;;  %v3488_v11 = vmul.f32 0.5, %v5595_v54  ;;  %v5607_v2 = vld [vmem:[%s5752_s30 + $0x158] sm:$0xff] }
 0x373   : > { %v7148_v5 = vadd.f32 %v3485_v53, %v3357_v57  ;;  %v3358_v39 = vmul.f32 0.5, %v3230_v35  ;;  %v3432_v6 = vmul.f32 0.5, %v3304_v18  ;;  %v5594_v53 = vld [vmem:[%s5752_s30 + $0x368] sm:$0xff]  ;;  %v3490_v57 = vmul.f32 0.5, %v5599_v40 }
 0x374   : > { %v3560_v23 = vmul.f32 0.5, %v5594_v53  ;;  %v7164_v12 = vadd.f32 %v3559_v24, %v3431_v25  ;;  %v3494_v7 = vmul.f32 0.5, %v5607_v2 }
 0x375   : > { %v3741_v45 = vmul.f32 %v7148_v5, %v7148_v5  ;;  %v7154_v19 = vadd.f32 %v3486_v29, %v3358_v39  ;;  %v3124_v29 = vpop.f32.mrb[192].mxu1 }
 0x376   : > { %v2828_v13 = vpop.f32.mrb[200].mxu0  ;;  %7752 = vst [vmem:[#allocation14_spill] sm:$0xff] %v7164_v12  ;;  %v7166_v30 = vadd.f32 %v3560_v23, %v3432_v6  ;;  %v3126_v18 = vpop.f32.mrb[193].mxu1  ;;  %v3305_v6 = vmax.f32 %v3124_v29, 0.0 }
 0x377   : > { %v3903_v1 = vsel %vm3835_vm0, %v3741_v45, 0.0  ;;  %v3742_v17 = vmul.f32 %v7154_v19, %v7154_v19  ;;  %v3231_v35 = vmax.f32 %v2828_v13, 0.0  ;;  %v2830_v9 = vpop.f32.mrb[201].mxu0  ;;  %v3127_v27 = vpop.f32.mrb[194].mxu1 }
 0x378   : > { %v3904_v59 = vadd.f32 %v3903_v1, %v3902_v56  ;;  %v2831_v39 = vpop.f32.mrb[202].mxu0  ;;  %7753 = vst [vmem:[#allocation15_spill] sm:$0xff] %v7166_v30  ;;  %v3129_v9 = vpop.f32.mrb[195].mxu1  ;;  %v3306_v23 = vmax.f32 %v3127_v27, 0.0  ;;  %v3433_v54 = vmul.f32 0.5, %v3305_v6 }
 0x379   : > { %v3905_v3 = vsel %vm3835_vm0, %v3742_v17, 0.0  ;;  %v3359_v53 = vmul.f32 0.5, %v3231_v35  ;;  %v3232_v45 = vmax.f32 %v2831_v39, 0.0  ;;  %v2833_v41 = vpop.f32.mrb[203].mxu0  ;;  %v5596_v35 = vld [vmem:[%s5752_s30 + $0x370] sm:$0xff] }
 0x37a   : > { %v3906_v13 = vadd.f32 %v3905_v3, %v3904_v59  ;;  %v3561_v41 = vmul.f32 0.5, %v5596_v35  ;;  %v5597_v59 = vld [vmem:[%s5752_s30 + $0x130] sm:$0xff]  ;;  %v3434_v3 = vmul.f32 0.5, %v3306_v23 }
 0x37b   : > { %v7170_v56 = vadd.f32 %v3487_v55, %v3359_v53  ;;  %v3360_v25 = vmul.f32 0.5, %v3232_v45  ;;  %v3489_v18 = vmul.f32 0.5, %v5597_v59  ;;  %v5598_v55 = vld [vmem:[%s5752_s30 + $0x378] sm:$0xff] }
 0x37c   : > { %v3562_v53 = vmul.f32 0.5, %v5598_v55  ;;  %v7186_v24 = vadd.f32 %v3561_v41, %v3433_v54 }
 0x37d   : > { %v3743_v1 = vmul.f32 %v7170_v56, %v7170_v56  ;;  %v7176_v17 = vadd.f32 %v3488_v11, %v3360_v25  ;;  %v3132_v25 = vpop.f32.mrb[196].mxu1 }
 0x37e   : > { %v2836_v39 = vpop.f32.mrb[204].mxu0  ;;  %7754 = vst [vmem:[#allocation16_spill] sm:$0xff] %v7186_v24  ;;  %v7188_v59 = vadd.f32 %v3562_v53, %v3434_v3  ;;  %v3134_v23 = vpop.f32.mrb[197].mxu1  ;;  %v3307_v3 = vmax.f32 %v3132_v25, 0.0 }
 0x37f   : > { %v3907_v45 = vsel %vm3835_vm0, %v3743_v1, 0.0  ;;  %v3744_v27 = vmul.f32 %v7176_v17, %v7176_v17  ;;  %v3233_v11 = vmax.f32 %v2836_v39, 0.0  ;;  %v2838_v9 = vpop.f32.mrb[205].mxu0  ;;  %v3135_v29 = vpop.f32.mrb[198].mxu1 }
 0x380   : > { %v3908_v6 = vadd.f32 %v3907_v45, %v3906_v13  ;;  %v2839_v35 = vpop.f32.mrb[206].mxu0  ;;  %7755 = vst [vmem:[#allocation17_spill] sm:$0xff] %v7188_v59  ;;  %v3137_v9 = vpop.f32.mrb[199].mxu1  ;;  %v3308_v53 = vmax.f32 %v3135_v29, 0.0  ;;  %v3435_v40 = vmul.f32 0.5, %v3307_v3  ;;  %v5603_v59 = vld [vmem:[%s5752_s30 + $0x148] sm:$0xff] }
 0x381   : > { %v3909_v55 = vsel %vm3835_vm0, %v3744_v27, 0.0  ;;  %v3361_v47 = vmul.f32 0.5, %v3233_v11  ;;  %v3234_v1 = vmax.f32 %v2839_v35, 0.0  ;;  %v2841_v37 = vpop.f32.mrb[207].mxu0  ;;  %v5600_v11 = vld [vmem:[%s5752_s30 + $0x380] sm:$0xff]  ;;  %v3492_v12 = vmul.f32 0.5, %v5603_v59 }
 0x382   : > { %v3910_v39 = vadd.f32 %v3909_v55, %v3908_v6  ;;  %v3563_v37 = vmul.f32 0.5, %v5600_v11  ;;  %v5601_v6 = vld [vmem:[%s5752_s30 + $0x140] sm:$0xff]  ;;  %v3436_v55 = vmul.f32 0.5, %v3308_v53 }
 0x383   : > { %v7192_v13 = vadd.f32 %v3489_v18, %v3361_v47  ;;  %v3362_v54 = vmul.f32 0.5, %v3234_v1  ;;  %v3491_v23 = vmul.f32 0.5, %v5601_v6  ;;  %v5602_v47 = vld [vmem:[%s5752_s30 + $0x388] sm:$0xff] }
 0x384   : > { %v3564_v18 = vmul.f32 0.5, %v5602_v47  ;;  %v7208_v41 = vadd.f32 %v3563_v37, %v3435_v40 }
 0x385   : > { %v3745_v45 = vmul.f32 %v7192_v13, %v7192_v13  ;;  %v7198_v27 = vadd.f32 %v3490_v57, %v3362_v54  ;;  %v3140_v54 = vpop.f32.mrb[200].mxu1 }
 0x386   : > { %v2844_v35 = vpop.f32.mrb[208].mxu0  ;;  %7756 = vst [vmem:[#allocation18_spill] sm:$0xff] %v7208_v41  ;;  %v7210_v6 = vadd.f32 %v3564_v18, %v3436_v55  ;;  %v3142_v53 = vpop.f32.mrb[201].mxu1  ;;  %v3309_v37 = vmax.f32 %v3140_v54, 0.0  ;;  %v5622_v41 = vld [vmem:[%s5752_s30 + $0x3d8] sm:$0xff] }
 0x387   : > { %v3911_v1 = vsel %vm3835_vm0, %v3745_v45, 0.0  ;;  %v3746_v29 = vmul.f32 %v7198_v27, %v7198_v27  ;;  %v3235_v57 = vmax.f32 %v2844_v35, 0.0  ;;  %v2846_v9 = vpop.f32.mrb[209].mxu0  ;;  %v3143_v25 = vpop.f32.mrb[202].mxu1 }
 0x388   : > { %v3912_v3 = vadd.f32 %v3911_v1, %v3910_v39  ;;  %v2847_v11 = vpop.f32.mrb[210].mxu0  ;;  %v3145_v9 = vpop.f32.mrb[203].mxu1  ;;  %v3310_v55 = vmax.f32 %v3143_v25, 0.0  ;;  %v3437_v59 = vmul.f32 0.5, %v3309_v37 }
 0x389   : > { %v3913_v47 = vsel %vm3835_vm0, %v3746_v29, 0.0  ;;  %v3363_v24 = vmul.f32 0.5, %v3235_v57  ;;  %v3236_v45 = vmax.f32 %v2847_v11, 0.0  ;;  %v2849_v30 = vpop.f32.mrb[211].mxu0  ;;  %v5604_v57 = vld [vmem:[%s5752_s30 + $0x390] sm:$0xff] }
 0x38a   : > { %v3914_v35 = vadd.f32 %v3913_v47, %v3912_v3  ;;  %v3565_v30 = vmul.f32 0.5, %v5604_v57  ;;  %v5605_v3 = vld [vmem:[%s5752_s30 + $0x150] sm:$0xff]  ;;  %v3438_v47 = vmul.f32 0.5, %v3310_v55 }
 0x38b   : > { %v7214_v39 = vadd.f32 %v3491_v23, %v3363_v24  ;;  %v3364_v40 = vmul.f32 0.5, %v3236_v45  ;;  %v3493_v53 = vmul.f32 0.5, %v5605_v3  ;;  %v5606_v24 = vld [vmem:[%s5752_s30 + $0x398] sm:$0xff] }
 0x38c   : > { %v3566_v23 = vmul.f32 0.5, %v5606_v24  ;;  %v7230_v18 = vadd.f32 %v3565_v30, %v3437_v59 }
 0x38d   : > { %v3747_v1 = vmul.f32 %v7214_v39, %v7214_v39  ;;  %v7220_v29 = vadd.f32 %v3492_v12, %v3364_v40  ;;  %v3148_v40 = vpop.f32.mrb[204].mxu1 }
 0x38e   : > { %v2852_v11 = vpop.f32.mrb[212].mxu0  ;;  %7757 = vst [vmem:[#allocation19_spill] sm:$0xff] %v7230_v18  ;;  %v7232_v3 = vadd.f32 %v3566_v23, %v3438_v47  ;;  %v3150_v55 = vpop.f32.mrb[205].mxu1  ;;  %v3311_v30 = vmax.f32 %v3148_v40, 0.0 }
 0x38f   : > { %v3915_v25 = vsel %vm3835_vm0, %v3747_v1, 0.0  ;;  %v3748_v54 = vmul.f32 %v7220_v29, %v7220_v29  ;;  %v3237_v12 = vmax.f32 %v2852_v11, 0.0  ;;  %v2854_v9 = vpop.f32.mrb[213].mxu0  ;;  %v3151_v45 = vpop.f32.mrb[206].mxu1 }
 0x390   : > { %v3916_v37 = vadd.f32 %v3915_v25, %v3914_v35  ;;  %v2855_v57 = vpop.f32.mrb[214].mxu0  ;;  %7758 = vst [vmem:[#allocation20_spill] sm:$0xff] %v7232_v3  ;;  %v3153_v9 = vpop.f32.mrb[207].mxu1  ;;  %v3312_v47 = vmax.f32 %v3151_v45, 0.0  ;;  %v3439_v2 = vmul.f32 0.5, %v3311_v30 }
 0x391   : > { %v3917_v24 = vsel %vm3835_vm0, %v3748_v54, 0.0  ;;  %v3365_v34 = vmul.f32 0.5, %v3237_v12  ;;  %v3238_v1 = vmax.f32 %v2855_v57, 0.0  ;;  %v2857_v36 = vpop.f32.mrb[215].mxu0  ;;  %v5608_v12 = vld [vmem:[%s5752_s30 + $0x3a0] sm:$0xff] }
 0x392   : > { %v3918_v11 = vadd.f32 %v3917_v24, %v3916_v37  ;;  %v3567_v36 = vmul.f32 0.5, %v5608_v12  ;;  %v5609_v37 = vld [vmem:[%s5752_s30 + $0x160] sm:$0xff]  ;;  %v3440_v24 = vmul.f32 0.5, %v3312_v47 }
 0x393   : > { %v7236_v35 = vadd.f32 %v3493_v53, %v3365_v34  ;;  %v3366_v59 = vmul.f32 0.5, %v3238_v1  ;;  %v3495_v55 = vmul.f32 0.5, %v5609_v37  ;;  %v5610_v34 = vld [vmem:[%s5752_s30 + $0x3a8] sm:$0xff] }
 0x394   : > { %v3568_v53 = vmul.f32 0.5, %v5610_v34  ;;  %v7252_v23 = vadd.f32 %v3567_v36, %v3439_v2 }
 0x395   : > { %v3749_v25 = vmul.f32 %v7236_v35, %v7236_v35  ;;  %v7242_v54 = vadd.f32 %v3494_v7, %v3366_v59  ;;  %v3156_v59 = vpop.f32.mrb[208].mxu1 }
 0x396   : > { %v2860_v57 = vpop.f32.mrb[216].mxu0  ;;  %7759 = vst [vmem:[#allocation21_spill] sm:$0xff] %v7252_v23  ;;  %v7254_v37 = vadd.f32 %v3568_v53, %v3440_v24  ;;  %v3158_v47 = vpop.f32.mrb[209].mxu1  ;;  %v3313_v36 = vmax.f32 %v3156_v59, 0.0 }
 0x397   : > { %v3919_v45 = vsel %vm3835_vm0, %v3749_v25, 0.0  ;;  %v3750_v40 = vmul.f32 %v7242_v54, %v7242_v54  ;;  %v3239_v7 = vmax.f32 %v2860_v57, 0.0  ;;  %v2862_v9 = vpop.f32.mrb[217].mxu0  ;;  %v3159_v1 = vpop.f32.mrb[210].mxu1 }
 0x398   : > { %v3920_v30 = vadd.f32 %v3919_v45, %v3918_v11  ;;  %v2863_v12 = vpop.f32.mrb[218].mxu0  ;;  %7760 = vst [vmem:[#allocation22_spill] sm:$0xff] %v7254_v37  ;;  %v3161_v9 = vpop.f32.mrb[211].mxu1  ;;  %v3314_v24 = vmax.f32 %v3159_v1, 0.0  ;;  %v3441_v4 = vmul.f32 0.5, %v3313_v36  ;;  %v5615_v37 = vld [vmem:[%s5752_s30 + $0x178] sm:$0xff] }
 0x399   : > { %v3921_v34 = vsel %vm3835_vm0, %v3750_v40, 0.0  ;;  %v3367_v43 = vmul.f32 0.5, %v3239_v7  ;;  %v3240_v25 = vmax.f32 %v2863_v12, 0.0  ;;  %v2865_v51 = vpop.f32.mrb[219].mxu0  ;;  %v5612_v7 = vld [vmem:[%s5752_s30 + $0x3b0] sm:$0xff]  ;;  %v3498_v62 = vmul.f32 0.5, %v5615_v37 }
 0x39a   : > { %v3922_v57 = vadd.f32 %v3921_v34, %v3920_v30  ;;  %v3569_v51 = vmul.f32 0.5, %v5612_v7  ;;  %v5613_v30 = vld [vmem:[%s5752_s30 + $0x170] sm:$0xff]  ;;  %v3442_v34 = vmul.f32 0.5, %v3314_v24  ;;  %v5616_v37 = vld [vmem:[%s5752_s30 + $0x3c0] sm:$0xff] }
 0x39b   : > { %v7258_v11 = vadd.f32 %v3495_v55, %v3367_v43  ;;  %v3368_v2 = vmul.f32 0.5, %v3240_v25  ;;  %v3497_v47 = vmul.f32 0.5, %v5613_v30  ;;  %v5614_v43 = vld [vmem:[%s5752_s30 + $0x3b8] sm:$0xff] }
 0x39c   : > { %v3570_v55 = vmul.f32 0.5, %v5614_v43  ;;  %v7274_v53 = vadd.f32 %v3569_v51, %v3441_v4 }
 0x39d   : > { %v3751_v45 = vmul.f32 %v7258_v11, %v7258_v11  ;;  %v7264_v40 = vadd.f32 %v3496_v31, %v3368_v2  ;;  %v3164_v2 = vpop.f32.mrb[212].mxu1 }
 0x39e   : > { %v2868_v12 = vpop.f32.mrb[220].mxu0  ;;  %7761 = vst [vmem:[#allocation23_spill] sm:$0xff] %v7274_v53  ;;  %v7276_v30 = vadd.f32 %v3570_v55, %v3442_v34  ;;  %v3166_v24 = vpop.f32.mrb[213].mxu1  ;;  %v3315_v34 = vmax.f32 %v3164_v2, 0.0  ;;  %v5619_v53 = vld [vmem:[%s5752_s30 + $0x188] sm:$0xff] }
 0x39f   : > { %v3923_v1 = vsel %vm3835_vm0, %v3751_v45, 0.0  ;;  %v3752_v59 = vmul.f32 %v7264_v40, %v7264_v40  ;;  %v3241_v31 = vmax.f32 %v2868_v12, 0.0  ;;  %v2870_v9 = vpop.f32.mrb[221].mxu0  ;;  %v3167_v25 = vpop.f32.mrb[214].mxu1 }
 0x3a0   : > { %v3924_v36 = vadd.f32 %v3923_v1, %v3922_v57  ;;  %v2871_v7 = vpop.f32.mrb[222].mxu0  ;;  %7762 = vst [vmem:[#allocation24_spill] sm:$0xff] %v7276_v30  ;;  %v3169_v9 = vpop.f32.mrb[215].mxu1  ;;  %v3316_v55 = vmax.f32 %v3167_v25, 0.0 }
 0x3a1   : > { %v3925_v43 = vsel %vm3835_vm0, %v3752_v59, 0.0  ;;  %v3369_v23 = vmul.f32 0.5, %v3241_v31  ;;  %v3242_v45 = vmax.f32 %v2871_v7, 0.0  ;;  %v2873_v38 = vpop.f32.mrb[223].mxu0  ;;  %v3443_v31 = vmul.f32 0.5, %v3315_v34  ;;  %v5617_v7 = vld [vmem:[%s5752_s30 + $0x180] sm:$0xff] }
 0x3a2   : > { %v3926_v12 = vadd.f32 %v3925_v43, %v3924_v36  ;;  %v3571_v38 = vmul.f32 0.5, %v5616_v37  ;;  %v3499_v36 = vmul.f32 0.5, %v5617_v7  ;;  %v3444_v43 = vmul.f32 0.5, %v3316_v55  ;;  %v5618_v9 = vld [vmem:[%s5752_s30 + $0x3c8] sm:$0xff] }
 0x3a3   : > { %v7282_v4 = vadd.f32 %v3497_v47, %v3369_v23  ;;  %v3370_v51 = vmul.f32 0.5, %v3242_v45  ;;  %v3572_v57 = vmul.f32 0.5, %v5618_v9  ;;  %v3172_v45 = vpop.f32.mrb[216].mxu1  ;;  %v3500_v9 = vmul.f32 0.5, %v5619_v53 }
 0x3a4   : > { %v7296_v37 = vadd.f32 %v3571_v38, %v3443_v31  ;;  %v3174_v55 = vpop.f32.mrb[217].mxu1  ;;  %v3317_v38 = vmax.f32 %v3172_v45, 0.0 }
 0x3a5   : > { %v3753_v1 = vmul.f32 %v7282_v4, %v7282_v4  ;;  %v7286_v59 = vadd.f32 %v3498_v62, %v3370_v51  ;;  %v7298_v7 = vadd.f32 %v3572_v57, %v3444_v43  ;;  %v3175_v25 = vpop.f32.mrb[218].mxu1 }
 0x3a6   : > { %v2876_v24 = vpop.f32.mrb[224].mxu0  ;;  %7763 = vst [vmem:[#allocation25_spill] sm:$0xff] %v7296_v37  ;;  %v3318_v43 = vmax.f32 %v3175_v25, 0.0  ;;  %v3445_v55 = vmul.f32 0.5, %v3317_v38  ;;  %v5623_v37 = vld [vmem:[%s5752_s30 + $0x198] sm:$0xff] }
 0x3a7   : > { %v3927_v23 = vsel %vm3835_vm0, %v3753_v1, 0.0  ;;  %v3754_v47 = vmul.f32 %v7286_v59, %v7286_v59  ;;  %v3243_v62 = vmax.f32 %v2876_v24, 0.0  ;;  %v2878_v2 = vpop.f32.mrb[225].mxu0 }
 0x3a8   : > { %v3928_v51 = vadd.f32 %v3927_v23, %v3926_v12  ;;  %v2879_v34 = vpop.f32.mrb[226].mxu0  ;;  %v3177_v2 = vpop.f32.mrb[219].mxu1 }
 0x3a9   : > { %v3929_v1 = vsel %vm3835_vm0, %v3754_v47, 0.0  ;;  %v3371_v30 = vmul.f32 0.5, %v3243_v62  ;;  %v3244_v18 = vmax.f32 %v2879_v34, 0.0  ;;  %v2881_v3 = vpop.f32.mrb[227].mxu0  ;;  %v3573_v47 = vmul.f32 0.5, %v5620_v14  ;;  %v5621_v34 = vld [vmem:[%s5752_s30 + $0x190] sm:$0xff] }
 0x3aa   : > { %v3930_v24 = vadd.f32 %v3929_v1, %v3928_v51  ;;  %v3501_v28 = vmul.f32 0.5, %v5621_v34  ;;  %v3446_v3 = vmul.f32 0.5, %v3318_v43  ;;  %v3574_v51 = vmul.f32 0.5, %v5622_v41 }
 0x3ab   : > { %v3627_v31 = vadd.f32 %v3499_v36, %v3371_v30  ;;  %v3372_v57 = vmul.f32 0.5, %v3244_v18  ;;  %v3180_v36 = vpop.f32.mrb[220].mxu1  ;;  %v3502_v41 = vmul.f32 0.5, %v5623_v37 }
 0x3ac   : > { %v3182_v14 = vpop.f32.mrb[221].mxu1 }
 0x3ad   : > { %v3755_v23 = vmul.f32 %v3627_v31, %v3627_v31  ;;  %v3628_v53 = vadd.f32 %v3500_v9, %v3372_v57  ;;  %v7308_v9 = vadd.f32 %v3573_v47, %v3445_v55  ;;  %v7310_v57 = vadd.f32 %v3574_v51, %v3446_v3  ;;  %v5627_v55 = vld [vmem:[%s5752_s30 + $0x1a8] sm:$0xff] }
 0x3ae   : > { %v2884_v62 = vpop.f32.mrb[228].mxu0  ;;  %v3319_v3 = vmax.f32 %v3180_v36, 0.0 }
 0x3af   : > { %v3931_v1 = vsel %vm3835_vm0, %v3755_v23, 0.0  ;;  %v3756_v2 = vmul.f32 %v3628_v53, %v3628_v53  ;;  %v3245_v12 = vmax.f32 %v2884_v62, 0.0  ;;  %v2886_v30 = vpop.f32.mrb[229].mxu0  ;;  %v4131_v18 = vpack.c.bf16 %v3628_v53, %v3627_v31  ;;  %v3183_v62 = vpop.f32.mrb[222].mxu1 }
 0x3b0   : > { %v3932_v25 = vadd.f32 %v3931_v1, %v3930_v24  ;;  %v2887_v45 = vpop.f32.mrb[230].mxu0  ;;  %v7764_v24 = vpack.c.bf16 %v7132_v26, %v7122_v33  ;;  %v3185_v53 = vpop.f32.mrb[223].mxu1  ;;  %v3320_v51 = vmax.f32 %v3183_v62, 0.0  ;;  %v5624_v30 = vld [vmem:[%s5752_s30 + $0x3e0] sm:$0xff]  ;;  %v5626_v33 = vld [vmem:[%s5752_s30 + $0x3e8] sm:$0xff] }
 0x3b1   : > { %v3933_v38 = vsel %vm3835_vm0, %v3756_v2, 0.0  ;;  %v3373_v43 = vmul.f32 0.5, %v3245_v12  ;;  %v3246_v34 = vmax.f32 %v2887_v45, 0.0  ;;  %5209 = vmatprep.subr.bf16.mxu1 %v4131_v18  ;;  %v2889_v23 = vpop.f32.mrb[231].mxu0  ;;  %v3447_v2 = vmul.f32 0.5, %v3319_v3  ;;  %v3188_v36 = vpop.f32.mrb[224].mxu1 }
 0x3b2   : > { %v3934_v31 = vadd.f32 %v3933_v38, %v3932_v25  ;;  %5210 = vmatpush3.bf16.msra.mxu1 %v7764_v24  ;;  %v3575_v18 = vmul.f32 0.5, %v5624_v30  ;;  %v5625_v25 = vld [vmem:[%s5752_s30 + $0x1a0] sm:$0xff]  ;;  %v3448_v38 = vmul.f32 0.5, %v3320_v51  ;;  %v3576_v26 = vmul.f32 0.5, %v5626_v33  ;;  %v3190_v3 = vpop.f32.mrb[225].mxu1 }
 0x3b3   : > { %v3629_v47 = vadd.f32 %v3501_v28, %v3373_v43  ;;  %v3374_v12 = vmul.f32 0.5, %v3246_v34  ;;  %v3503_v14 = vmul.f32 0.5, %v5625_v25  ;;  %v3504_v33 = vmul.f32 0.5, %v5627_v55 }
 0x3b5   : > { %v3757_v1 = vmul.f32 %v3629_v47, %v3629_v47  ;;  %v3630_v37 = vadd.f32 %v3502_v41, %v3374_v12  ;;  %v7323_v41 = vadd.f32 %v3575_v18, %v3447_v2  ;;  %v7325_v12 = vadd.f32 %v3576_v26, %v3448_v38 }
 0x3b6   : > { %v2892_v45 = vpop.f32.mrb[232].mxu0  ;;  %v3321_v26 = vmax.f32 %v3188_v36, 0.0 }
 0x3b7   : > { %v3935_v23 = vsel %vm3835_vm0, %v3757_v1, 0.0  ;;  %v3758_v24 = vmul.f32 %v3630_v37, %v3630_v37  ;;  %v3247_v53 = vmax.f32 %v2892_v45, 0.0  ;;  %v2894_v28 = vpop.f32.mrb[233].mxu0  ;;  %v4132_v43 = vpack.c.bf16 %v3630_v37, %v3629_v47  ;;  %v3191_v45 = vpop.f32.mrb[226].mxu1 }
 0x3b8   : > { %v3936_v34 = vadd.f32 %v3935_v23, %v3934_v31  ;;  %v2895_v62 = vpop.f32.mrb[234].mxu0  ;;  %v7765_v31 = vpack.c.bf16 %v7154_v19, %v7148_v5  ;;  %v4169_v37 = vpack.c.bf16 %v7325_v12, %v7323_v41  ;;  %v3193_v2 = vpop.f32.mrb[227].mxu1  ;;  %v3322_v23 = vmax.f32 %v3191_v45, 0.0  ;;  %v5628_v28 = vld [vmem:[%s5752_s30 + $0x3f0] sm:$0xff]  ;;  %v5630_v19 = vld [vmem:[%s5752_s30 + $0x3f8] sm:$0xff] }
 0x3b9   : > { %v3937_v30 = vsel %vm3835_vm0, %v3758_v24, 0.0  ;;  %v3375_v51 = vmul.f32 0.5, %v3247_v53  ;;  %v3248_v25 = vmax.f32 %v2895_v62, 0.0  ;;  %5211 = vmatprep.subr.bf16.mxu1 %v4132_v43  ;;  %v2897_v1 = vpop.f32.mrb[235].mxu0  ;;  %v3449_v53 = vmul.f32 0.5, %v3321_v26 }
 0x3ba   : > { %v3938_v47 = vadd.f32 %v3937_v30, %v3936_v34  ;;  %5212 = vmatpush3.bf16.msra.mxu1 %v7765_v31  ;;  %v3577_v43 = vmul.f32 0.5, %v5628_v28  ;;  %v5629_v34 = vld [vmem:[%s5752_s30 + $0x1b0] sm:$0xff]  ;;  %v3450_v5 = vmul.f32 0.5, %v3322_v23  ;;  %v3578_v30 = vmul.f32 0.5, %v5630_v19  ;;  %v5631_v23 = vld [vmem:[%s5752_s30 + $0x1b8] sm:$0xff] }
 0x3bb   : > { %v3631_v18 = vadd.f32 %v3503_v14, %v3375_v51  ;;  %v3376_v38 = vmul.f32 0.5, %v3248_v25  ;;  %v3505_v3 = vmul.f32 0.5, %v5629_v34  ;;  %v3506_v34 = vmul.f32 0.5, %v5631_v23 }
 0x3bc   : > { %v7338_v45 = vadd.f32 %v3577_v43, %v3449_v53 }
 0x3bd   : > { %v3759_v24 = vmul.f32 %v3631_v18, %v3631_v18  ;;  %v3632_v55 = vadd.f32 %v3504_v33, %v3376_v38  ;;  %v7340_v33 = vadd.f32 %v3578_v30, %v3450_v5  ;;  %v5632_v30 = vld [vmem:[%s5752_s30 + $0x1c0] sm:$0xff] }
 0x3be   : > { %v2900_v62 = vpop.f32.mrb[236].mxu0 }
 0x3bf   : > { %v3939_v1 = vsel %vm3835_vm0, %v3759_v24, 0.0  ;;  %v3760_v31 = vmul.f32 %v3632_v55, %v3632_v55  ;;  %v3249_v2 = vmax.f32 %v2900_v62, 0.0  ;;  %v2902_v14 = vpop.f32.mrb[237].mxu0  ;;  %v4133_v51 = vpack.c.bf16 %v3632_v55, %v3631_v18 }
 0x3c0   : > { %v3940_v36 = vadd.f32 %v3939_v1, %v3938_v47  ;;  %v2903_v25 = vpop.f32.mrb[238].mxu0  ;;  %v7766_v62 = vpack.c.bf16 %v7176_v17, %v7170_v56  ;;  %v4170_v47 = vpack.c.bf16 %v7340_v33, %v7338_v45  ;;  %v3507_v1 = vmul.f32 0.5, %v5632_v30 }
 0x3c1   : > { %v3941_v38 = vsel %vm3835_vm0, %v3760_v31, 0.0  ;;  %v3377_v26 = vmul.f32 0.5, %v3249_v2  ;;  %v3250_v28 = vmax.f32 %v2903_v25, 0.0  ;;  %5213 = vmatprep.subr.bf16.mxu1 %v4133_v51  ;;  %v2905_v19 = vpop.f32.mrb[239].mxu0 }
 0x3c2   : > { %v3942_v24 = vadd.f32 %v3941_v38, %v3940_v36  ;;  %5214 = vmatpush3.bf16.msra.mxu1 %v7766_v62  ;;  %v7767_v19 = vpack.c.bf16 %v7198_v27, %v7192_v13 }
 0x3c3   : > { %v3633_v18 = vadd.f32 %v3505_v3, %v3377_v26  ;;  %v3378_v55 = vmul.f32 0.5, %v3250_v28  ;;  %v5633_v26 = vld [vmem:[%s5752_s30 + $0x1c8] sm:$0xff] }
 0x3c4   : > { %v3508_v28 = vmul.f32 0.5, %v5633_v26  ;;  %v7768_v26 = vpack.c.bf16 %v7220_v29, %v7214_v39 }
 0x3c5   : > { %v3761_v53 = vmul.f32 %v3633_v18, %v3633_v18  ;;  %v3634_v43 = vadd.f32 %v3506_v34, %v3378_v55 }
 0x3c6   : > { %v2908_v5 = vpop.f32.mrb[240].mxu0 }
 0x3c7   : > { %v3943_v31 = vsel %vm3835_vm0, %v3761_v53, 0.0  ;;  %v3762_v2 = vmul.f32 %v3634_v43, %v3634_v43  ;;  %v3251_v14 = vmax.f32 %v2908_v5, 0.0  ;;  %v2910_v51 = vpop.f32.mrb[241].mxu0  ;;  %v4134_v36 = vpack.c.bf16 %v3634_v43, %v3633_v18  ;;  %v5634_v43 = vld [vmem:[%s5752_s30 + $0x1d0] sm:$0xff] }
 0x3c8   : > { %v3944_v25 = vadd.f32 %v3943_v31, %v3942_v24  ;;  %v2911_v56 = vpop.f32.mrb[242].mxu0  ;;  %v3509_v5 = vmul.f32 0.5, %v5634_v43 }
 0x3c9   : > { %v3945_v17 = vsel %vm3835_vm0, %v3762_v2, 0.0  ;;  %v3379_v38 = vmul.f32 0.5, %v3251_v14  ;;  %v3252_v3 = vmax.f32 %v2911_v56, 0.0  ;;  %5215 = vmatprep.subr.bf16.mxu1 %v4134_v36  ;;  %v2913_v23 = vpop.f32.mrb[243].mxu0  ;;  %v5635_v56 = vld [vmem:[%s5752_s30 + $0x1d8] sm:$0xff] }
 0x3ca   : > { %v3946_v34 = vadd.f32 %v3945_v17, %v3944_v25  ;;  %5216 = vmatpush3.bf16.msra.mxu1 %v7767_v19  ;;  %v3510_v17 = vmul.f32 0.5, %v5635_v56 }
 0x3cb   : > { %v3635_v62 = vadd.f32 %v3507_v1, %v3379_v38  ;;  %v3380_v55 = vmul.f32 0.5, %v3252_v3 }
 0x3cd   : > { %v3763_v18 = vmul.f32 %v3635_v62, %v3635_v62  ;;  %v3636_v24 = vadd.f32 %v3508_v28, %v3380_v55  ;;  %v5636_v55 = vld [vmem:[%s5752_s30 + $0x1e0] sm:$0xff] }
 0x3ce   : > { %v2916_v53 = vpop.f32.mrb[244].mxu0 }
 0x3cf   : > { %v3947_v30 = vsel %vm3835_vm0, %v3763_v18, 0.0  ;;  %v3764_v31 = vmul.f32 %v3636_v24, %v3636_v24  ;;  %v3253_v2 = vmax.f32 %v2916_v53, 0.0  ;;  %v2918_v14 = vpop.f32.mrb[245].mxu0  ;;  %v4135_v51 = vpack.c.bf16 %v3636_v24, %v3635_v62 }
 0x3d0   : > { %v3948_v36 = vadd.f32 %v3947_v30, %v3946_v34  ;;  %v2919_v25 = vpop.f32.mrb[246].mxu0  ;;  %v3511_v18 = vmul.f32 0.5, %v5636_v55 }
 0x3d1   : > { %v3949_v13 = vsel %vm3835_vm0, %v3764_v31, 0.0  ;;  %v3381_v27 = vmul.f32 0.5, %v3253_v2  ;;  %v3254_v1 = vmax.f32 %v2919_v25, 0.0  ;;  %5217 = vmatprep.subr.bf16.mxu1 %v4135_v51  ;;  %v2921_v38 = vpop.f32.mrb[247].mxu0  ;;  %v5637_v51 = vld [vmem:[%s5752_s30 + $0x1e8] sm:$0xff] }
 0x3d2   : > { %v3950_v3 = vadd.f32 %v3949_v13, %v3948_v36  ;;  %5218 = vmatpush3.bf16.msra.mxu1 %v7768_v26  ;;  %v3512_v36 = vmul.f32 0.5, %v5637_v51  ;;  %v5638_v26 = vld [vmem:[%s5752_s30 + $0x1f0] sm:$0xff] }
 0x3d3   : > { %v3637_v28 = vadd.f32 %v3509_v5, %v3381_v27  ;;  %v3382_v23 = vmul.f32 0.5, %v3254_v1  ;;  %v7769_v27 = vpack.c.bf16 %v7242_v54, %v7236_v35 }
 0x3d5   : > { %v3765_v19 = vmul.f32 %v3637_v28, %v3637_v28  ;;  %v3638_v34 = vadd.f32 %v3510_v17, %v3382_v23 }
 0x3d6   : > { %v2924_v62 = vpop.f32.mrb[248].mxu0 }
 0x3d7   : > { %v3951_v24 = vsel %vm3835_vm0, %v3765_v19, 0.0  ;;  %v3766_v53 = vmul.f32 %v3638_v34, %v3638_v34  ;;  %v3255_v43 = vmax.f32 %v2924_v62, 0.0  ;;  %v2926_v30 = vpop.f32.mrb[249].mxu0  ;;  %v4136_v31 = vpack.c.bf16 %v3638_v34, %v3637_v28 }
 0x3d8   : > { %v3952_v2 = vadd.f32 %v3951_v24, %v3950_v3  ;;  %v2927_v14 = vpop.f32.mrb[250].mxu0  ;;  %v3513_v28 = vmul.f32 0.5, %v5638_v26 }
 0x3d9   : > { %v3953_v39 = vsel %vm3835_vm0, %v3766_v53, 0.0  ;;  %v3383_v29 = vmul.f32 0.5, %v3255_v43  ;;  %v3256_v5 = vmax.f32 %v2927_v14, 0.0  ;;  %5219 = vmatprep.subr.bf16.mxu1 %v4136_v31  ;;  %v2929_v25 = vpop.f32.mrb[251].mxu0  ;;  %v5639_v43 = vld [vmem:[%s5752_s30 + $0x1f8] sm:$0xff]  ;;  %v7770_v14 = vpack.c.bf16 %v7264_v40, %v7258_v11  ;;  %v7387_v11 = vld [vmem:[%s7690_s3 + $0x30] sm:$0xff] }
 0x3da   : > { %v3954_v13 = vadd.f32 %v3953_v39, %v3952_v2  ;;  %5220 = vmatpush3.bf16.msra.mxu1 %v7769_v27  ;;  %v3514_v30 = vmul.f32 0.5, %v5639_v43  ;;  %v5640_v25 = vld [vmem:[%s5752_s30 + $0x200] sm:$0xff]  ;;  %v7772_v43 = vpack.c.bf16 %v6847_v15, %v6845_v63 }
 0x3db   : > { %v3639_v1 = vadd.f32 %v3511_v18, %v3383_v29  ;;  %v3384_v56 = vmul.f32 0.5, %v3256_v5 }
 0x3dd   : > { %v3767_v17 = vmul.f32 %v3639_v1, %v3639_v1  ;;  %v3640_v38 = vadd.f32 %v3512_v36, %v3384_v56 }
 0x3de   : > { %v2932_v3 = vpop.f32.mrb[252].mxu0 }
 0x3df   : > { %v3955_v23 = vsel %vm3835_vm0, %v3767_v17, 0.0  ;;  %v3768_v19 = vmul.f32 %v3640_v38, %v3640_v38  ;;  %v3257_v34 = vmax.f32 %v2932_v3, 0.0  ;;  %v2934_v62 = vpop.f32.mrb[253].mxu0  ;;  %v4137_v55 = vpack.c.bf16 %v3640_v38, %v3639_v1  ;;  %v7382_v3 = vld [vmem:[%s7690_s3 + $0x10] sm:$0xff] }
 0x3e0   : > { %v3956_v24 = vadd.f32 %v3955_v23, %v3954_v13  ;;  %v2935_v53 = vpop.f32.mrb[254].mxu0  ;;  %v3515_v13 = vmul.f32 0.5, %v5640_v25 }
 0x3e1   : > { %v3957_v35 = vsel %vm3835_vm0, %v3768_v19, 0.0  ;;  %v3385_v54 = vmul.f32 0.5, %v3257_v34  ;;  %v3258_v18 = vmax.f32 %v2935_v53, 0.0  ;;  %5221 = vmatprep.subr.bf16.mxu1 %v4137_v55  ;;  %v2937_v31 = vpop.f32.mrb[255].mxu0  ;;  %v5641_v34 = vld [vmem:[%s5752_s30 + $0x208] sm:$0xff]  ;;  %v7771_v53 = vpack.c.bf16 %v7286_v59, %v7282_v4 }
 0x3e2   : > { %v3958_v2 = vadd.f32 %v3957_v35, %v3956_v24  ;;  %5222 = vmatpush3.bf16.msra.mxu1 %v7770_v14  ;;  %v3516_v62 = vmul.f32 0.5, %v5641_v34  ;;  %v4732_v35 = vcombine.high %v7382_v3, %v7387_v11 }
 0x3e3   : > { %v3641_v39 = vadd.f32 %v3513_v28, %v3385_v54  ;;  %v3386_v29 = vmul.f32 0.5, %v3258_v18 }
 0x3e5   : > { %v3769_v5 = vmul.f32 %v3641_v39, %v3641_v39  ;;  %v3642_v51 = vadd.f32 %v3514_v30, %v3386_v29 }
 0x3e6   : > { %v2940_v36 = vpop.f32.mrb[0].mxu0 }
 0x3e7   : > { %v3959_v27 = vsel %vm3835_vm0, %v3769_v5, 0.0  ;;  %v3770_v1 = vmul.f32 %v3642_v51, %v3642_v51  ;;  %v3259_v56 = vmax.f32 %v2940_v36, 0.0  ;;  %v2942_v17 = vpop.f32.mrb[1].mxu0  ;;  %v4138_v38 = vpack.c.bf16 %v3642_v51, %v3641_v39  ;;  %v5642_v39 = vld [vmem:[%s5752_s30 + $0x210] sm:$0xff] }
 0x3e8   : > { %v3960_v40 = vadd.f32 %v3959_v27, %v3958_v2  ;;  %v2943_v26 = vpop.f32.mrb[2].mxu0  ;;  %v7773_v2 = vcombine.low %v7115_v20, %v7120_v61  ;;  %v3517_v4 = vmul.f32 0.5, %v5642_v39  ;;  %v5643_v20 = vld [vmem:[%s5752_s30 + $0x218] sm:$0xff]  ;;  %v5645_v39 = vld [vmem:[%s5752_s30 + $0x228] sm:$0xff] }
 0x3e9   : > { %v3961_v28 = vsel %vm3835_vm0, %v3770_v1, 0.0  ;;  %v3387_v23 = vmul.f32 0.5, %v3259_v56  ;;  %v3260_v19 = vmax.f32 %v2943_v26, 0.0  ;;  %5223 = vmatprep.subr.bf16.mxu1 %v4138_v38  ;;  %v2945_v55 = vpop.f32.mrb[3].mxu0  ;;  %v3518_v61 = vmul.f32 0.5, %v5643_v20 }
 0x3ea   : > { %v3962_v24 = vadd.f32 %v3961_v28, %v3960_v40  ;;  %5224 = vmatpush3.bf16.msra.mxu1 %v7771_v53  ;;  %v7774_v40 = vpack.c.bf16 %v6875_v48, %v6873_v0 }
 0x3eb   : > { %v3643_v54 = vadd.f32 %v3515_v13, %v3387_v23  ;;  %v3388_v18 = vmul.f32 0.5, %v3260_v19  ;;  %5231 = vmatprep.subr.bf16.mxu1 %v7772_v43 }
 0x3ed   : > { %v3771_v30 = vmul.f32 %v3643_v54, %v3643_v54  ;;  %v3644_v31 = vadd.f32 %v3516_v62, %v3388_v18  ;;  %4285 = vmatmul.mubr.bf16.vlgmr.msra.gmra.mrb[232].mxu1 %v7773_v2  ;;  %v5644_v62 = vld [vmem:[%s5752_s30 + $0x220] sm:$0xff] }
 0x3ee   : > { %v2948_v14 = vpop.f32.mrb[4].mxu0  ;;  %4325 = vmatprep.mubr.bf16.mxu1 %v4732_v35  ;;  %v3519_v55 = vmul.f32 0.5, %v5644_v62  ;;  %v5647_v62 = vld [vmem:[%s5752_s30 + $0x238] sm:$0xff] }
 0x3ef   : > { %v3963_v59 = vsel %vm3835_vm0, %v3771_v30, 0.0  ;;  %v3772_v29 = vmul.f32 %v3644_v31, %v3644_v31  ;;  %v4139_v5 = vpack.c.bf16 %v3644_v31, %v3643_v54  ;;  %v3261_v51 = vmax.f32 %v2948_v14, 0.0  ;;  %v2950_v36 = vpop.f32.mrb[5].mxu0 }
 0x3f0   : > { %v3964_v25 = vadd.f32 %v3963_v59, %v3962_v24  ;;  %v2951_v13 = vpop.f32.mrb[6].mxu0 }
 0x3f1   : > { %v3965_v27 = vsel %vm3835_vm0, %v3772_v29, 0.0  ;;  %v3389_v1 = vmul.f32 0.5, %v3261_v51  ;;  %v3262_v56 = vmax.f32 %v2951_v13, 0.0  ;;  %5232 = vmatpush3.bf16.msra.mxu1 %v4139_v5  ;;  %v2953_v17 = vpop.f32.mrb[7].mxu0  ;;  %v7775_v5 = vpack.c.bf16 %v6903_v46, %v6901_v44 }
 0x3f2   : > { %v3966_v38 = vadd.f32 %v3965_v27, %v3964_v25  ;;  %5233 = vmatprep.subr.bf16.mxu1 %v7774_v40 }
 0x3f3   : > { %v3645_v26 = vadd.f32 %v3517_v4, %v3389_v1  ;;  %v3390_v28 = vmul.f32 0.5, %v3262_v56  ;;  %v3520_v4 = vmul.f32 0.5, %v5645_v39  ;;  %v5646_v1 = vld [vmem:[%s5752_s30 + $0x230] sm:$0xff] }
 0x3f4   : > { %v3521_v56 = vmul.f32 0.5, %v5646_v1  ;;  %v5649_v1 = vld [vmem:[%s5752_s30 + $0x248] sm:$0xff] }
 0x3f5   : > { %v3773_v23 = vmul.f32 %v3645_v26, %v3645_v26  ;;  %v3646_v19 = vadd.f32 %v3518_v61, %v3390_v28 }
 0x3f6   : > { %v2956_v34 = vpop.f32.mrb[8].mxu0 }
 0x3f7   : > { %v3967_v24 = vsel %vm3835_vm0, %v3773_v23, 0.0  ;;  %v3774_v53 = vmul.f32 %v3646_v19, %v3646_v19  ;;  %v4140_v35 = vpack.c.bf16 %v3646_v19, %v3645_v26  ;;  %v3263_v54 = vmax.f32 %v2956_v34, 0.0  ;;  %v2958_v18 = vpop.f32.mrb[9].mxu0 }
 0x3f8   : > { %v3968_v43 = vadd.f32 %v3967_v24, %v3966_v38  ;;  %v2959_v30 = vpop.f32.mrb[10].mxu0 }
 0x3f9   : > { %v3969_v31 = vsel %vm3835_vm0, %v3774_v53, 0.0  ;;  %v3391_v2 = vmul.f32 0.5, %v3263_v54  ;;  %v3264_v14 = vmax.f32 %v2959_v30, 0.0  ;;  %5234 = vmatpush3.bf16.msra.mxu1 %v4140_v35  ;;  %v2961_v59 = vpop.f32.mrb[11].mxu0  ;;  %v7776_v35 = vpack.c.bf16 %v6931_v50, %v6929_v49 }
 0x3fa   : > { %v3970_v29 = vadd.f32 %v3969_v31, %v3968_v43  ;;  %5235 = vmatprep.subr.bf16.mxu1 %v7775_v5 }
 0x3fb   : > { %v3647_v51 = vadd.f32 %v3519_v55, %v3391_v2  ;;  %v3392_v36 = vmul.f32 0.5, %v3264_v14  ;;  %v3522_v55 = vmul.f32 0.5, %v5647_v62  ;;  %v5648_v2 = vld [vmem:[%s5752_s30 + $0x240] sm:$0xff] }
 0x3fc   : > { %v3523_v14 = vmul.f32 0.5, %v5648_v2  ;;  %v5651_v2 = vld [vmem:[%s5752_s30 + $0x258] sm:$0xff] }
 0x3fd   : > { %v3775_v25 = vmul.f32 %v3647_v51, %v3647_v51  ;;  %v3648_v13 = vadd.f32 %v3520_v4, %v3392_v36 }
 0x3fe   : > { %v2964_v27 = vpop.f32.mrb[12].mxu0 }
 0x3ff   : > { %v3971_v20 = vsel %vm3835_vm0, %v3775_v25, 0.0  ;;  %v3776_v61 = vmul.f32 %v3648_v13, %v3648_v13  ;;  %v4141_v17 = vpack.c.bf16 %v3648_v13, %v3647_v51  ;;  %v3265_v38 = vmax.f32 %v2964_v27, 0.0  ;;  %v2966_v40 = vpop.f32.mrb[13].mxu0 }
 0x400   : > { %v3972_v26 = vadd.f32 %v3971_v20, %v3970_v29  ;;  %v2967_v28 = vpop.f32.mrb[14].mxu0 }
 0x401   : > { %v3973_v23 = vsel %vm3835_vm0, %v3776_v61, 0.0  ;;  %v3393_v19 = vmul.f32 0.5, %v3265_v38  ;;  %v3266_v34 = vmax.f32 %v2967_v28, 0.0  ;;  %5236 = vmatpush3.bf16.msra.mxu1 %v4141_v17  ;;  %v2969_v24 = vpop.f32.mrb[15].mxu0  ;;  %v7777_v17 = vpack.c.bf16 %v6959_v60, %v6957_v58 }
 0x402   : > { %v3974_v53 = vadd.f32 %v3973_v23, %v3972_v26  ;;  %5237 = vmatprep.subr.bf16.mxu1 %v7776_v35 }
 0x403   : > { %v3649_v54 = vadd.f32 %v3521_v56, %v3393_v19  ;;  %v3394_v18 = vmul.f32 0.5, %v3266_v34  ;;  %v3524_v56 = vmul.f32 0.5, %v5649_v1  ;;  %v5650_v19 = vld [vmem:[%s5752_s30 + $0x250] sm:$0xff] }
 0x404   : > { %v3525_v34 = vmul.f32 0.5, %v5650_v19  ;;  %v5653_v19 = vld [vmem:[%s5752_s30 + $0x268] sm:$0xff] }
 0x405   : > { %v3777_v43 = vmul.f32 %v3649_v54, %v3649_v54  ;;  %v3650_v30 = vadd.f32 %v3522_v55, %v3394_v18 }
 0x406   : > { %v2972_v31 = vpop.f32.mrb[16].mxu0 }
 0x407   : > { %v3975_v39 = vsel %vm3835_vm0, %v3777_v43, 0.0  ;;  %v3778_v4 = vmul.f32 %v3650_v30, %v3650_v30  ;;  %v4142_v59 = vpack.c.bf16 %v3650_v30, %v3649_v54  ;;  %v3267_v29 = vmax.f32 %v2972_v31, 0.0  ;;  %v2974_v5 = vpop.f32.mrb[17].mxu0 }
 0x408   : > { %v3976_v51 = vadd.f32 %v3975_v39, %v3974_v53  ;;  %v2975_v36 = vpop.f32.mrb[18].mxu0 }
 0x409   : > { %v3977_v25 = vsel %vm3835_vm0, %v3778_v4, 0.0  ;;  %v3395_v13 = vmul.f32 0.5, %v3267_v29  ;;  %v3268_v27 = vmax.f32 %v2975_v36, 0.0  ;;  %5238 = vmatpush3.bf16.msra.mxu1 %v4142_v59  ;;  %v2977_v20 = vpop.f32.mrb[19].mxu0  ;;  %v7778_v59 = vpack.c.bf16 %v6989_v42, %v6987_v8 }
 0x40a   : > { %v3978_v61 = vadd.f32 %v3977_v25, %v3976_v51  ;;  %5239 = vmatprep.subr.bf16.mxu1 %v7777_v17 }
 0x40b   : > { %v3651_v38 = vadd.f32 %v3523_v14, %v3395_v13  ;;  %v3396_v40 = vmul.f32 0.5, %v3268_v27  ;;  %v3526_v14 = vmul.f32 0.5, %v5651_v2  ;;  %v5652_v13 = vld [vmem:[%s5752_s30 + $0x260] sm:$0xff] }
 0x40c   : > { %v3527_v27 = vmul.f32 0.5, %v5652_v13 }
 0x40d   : > { %v3779_v26 = vmul.f32 %v3651_v38, %v3651_v38  ;;  %v3652_v28 = vadd.f32 %v3524_v56, %v3396_v40 }
 0x40e   : > { %v2980_v23 = vpop.f32.mrb[20].mxu0 }
 0x40f   : > { %v3979_v62 = vsel %vm3835_vm0, %v3779_v26, 0.0  ;;  %v3780_v55 = vmul.f32 %v3652_v28, %v3652_v28  ;;  %v4143_v24 = vpack.c.bf16 %v3652_v28, %v3651_v38  ;;  %v3269_v53 = vmax.f32 %v2980_v23, 0.0  ;;  %v2982_v35 = vpop.f32.mrb[21].mxu0 }
 0x410   : > { %v3980_v54 = vadd.f32 %v3979_v62, %v3978_v61  ;;  %v2983_v18 = vpop.f32.mrb[22].mxu0 }
 0x411   : > { %v3981_v43 = vsel %vm3835_vm0, %v3780_v55, 0.0  ;;  %v3397_v30 = vmul.f32 0.5, %v3269_v53  ;;  %v3270_v31 = vmax.f32 %v2983_v18, 0.0  ;;  %5240 = vmatpush3.bf16.msra.mxu1 %v4143_v24  ;;  %v2985_v39 = vpop.f32.mrb[23].mxu0  ;;  %v7779_v24 = vpack.c.bf16 %v7010_v52, %v7008_v32 }
 0x412   : > { %v3982_v4 = vadd.f32 %v3981_v43, %v3980_v54  ;;  %5241 = vmatprep.subr.bf16.mxu1 %v7778_v59  ;;  %v3785_v43 = vmul.f32 %v6817_v16, %v6817_v16  ;;  %v3786_v39 = vmul.f32 %v6819_v22, %v6819_v22 }
 0x413   : > { %v3653_v29 = vadd.f32 %v3525_v34, %v3397_v30  ;;  %v3398_v5 = vmul.f32 0.5, %v3270_v31  ;;  %v3528_v34 = vmul.f32 0.5, %v5653_v19  ;;  %v7787_v19 = vld [vmem:[#allocation20_spill] sm:$0xff] }
 0x415   : > { %v3781_v51 = vmul.f32 %v3653_v29, %v3653_v29  ;;  %v3654_v36 = vadd.f32 %v3526_v14, %v3398_v5  ;;  %v7456_v5 = vld [vmem:[%s7690_s3 + $0x18] sm:$0xff] }
 0x416   : > { %v2988_v25 = vpop.f32.mrb[24].mxu0 }
 0x417   : > { %v3983_v1 = vsel %vm3835_vm0, %v3781_v51, 0.0  ;;  %v3782_v56 = vmul.f32 %v3654_v36, %v3654_v36  ;;  %v4144_v20 = vpack.c.bf16 %v3654_v36, %v3653_v29  ;;  %v3271_v61 = vmax.f32 %v2988_v25, 0.0  ;;  %v2990_v17 = vpop.f32.mrb[25].mxu0  ;;  %v7461_v51 = vld [vmem:[%s7690_s3 + $0x38] sm:$0xff] }
 0x418   : > { %v3984_v38 = vadd.f32 %v3983_v1, %v3982_v4  ;;  %v2991_v40 = vpop.f32.mrb[26].mxu0  ;;  %v7780_v29 = vpack.c.bf16 %v7028_v21, %v7026_v10  ;;  %v3991_v36 = vsel %vm3835_vm0, %v3785_v43, 0.0  ;;  %v3787_v25 = vmul.f32 %v6845_v63, %v6845_v63 }
 0x419   : > { %v3985_v26 = vsel %vm3835_vm0, %v3782_v56, 0.0  ;;  %v3399_v28 = vmul.f32 0.5, %v3271_v61  ;;  %v3272_v23 = vmax.f32 %v2991_v40, 0.0  ;;  %5242 = vmatpush3.bf16.msra.mxu1 %v4144_v20  ;;  %v2993_v62 = vpop.f32.mrb[27].mxu0  ;;  %v3993_v1 = vsel %vm3835_vm0, %v3786_v39, 0.0 }
 0x41a   : > { %v3986_v55 = vadd.f32 %v3985_v26, %v3984_v38  ;;  %5243 = vmatprep.subr.bf16.mxu1 %v7779_v24  ;;  %v3788_v56 = vmul.f32 %v6847_v15, %v6847_v15  ;;  %v7781_v20 = vpack.c.bf16 %v6819_v22, %v6817_v16  ;;  %v4734_v61 = vcombine.high %v7456_v5, %v7461_v51  ;;  %v7782_v38 = vld [vmem:[#allocation18_spill] sm:$0xff]  ;;  %v7784_v22 = vld [vmem:[#allocation3_spill] sm:$0xff] }
 0x41b   : > { %v3655_v53 = vadd.f32 %v3527_v27, %v3399_v28  ;;  %v3400_v35 = vmul.f32 0.5, %v3272_v23  ;;  %v4731_v27 = vcombine.low %v7382_v3, %v7387_v11  ;;  %v7783_v63 = vpack.c.bf16 %v7210_v6, %v7782_v38  ;;  %v7785_v26 = vld [vmem:[#allocation2_spill] sm:$0xff] }
 0x41c   : > { %v3995_v40 = vsel %vm3835_vm0, %v3787_v25, 0.0  ;;  %v3789_v3 = vmul.f32 %v6873_v0, %v6873_v0  ;;  %v3997_v15 = vsel %vm3835_vm0, %v3788_v56, 0.0  ;;  %v3790_v16 = vmul.f32 %v6875_v48, %v6875_v48 }
 0x41d   : > { %v3783_v54 = vmul.f32 %v3655_v53, %v3655_v53  ;;  %v3656_v18 = vadd.f32 %v3528_v34, %v3400_v35  ;;  %v7786_v28 = vpack.c.bf16 %v7784_v22, %v7785_v26  ;;  %v7788_v34 = vld [vmem:[#allocation19_spill] sm:$0xff]  ;;  %v3791_v0 = vmul.f32 %v6901_v44, %v6901_v44  ;;  %v7790_v35 = vld [vmem:[#allocation5_spill] sm:$0xff] }
 0x41e   : > { %v7789_v62 = vpack.c.bf16 %v7787_v19, %v7788_v34  ;;  %v3792_v48 = vmul.f32 %v6903_v46, %v6903_v46  ;;  %v3793_v44 = vmul.f32 %v6929_v49, %v6929_v49  ;;  %v3794_v46 = vmul.f32 %v6931_v50, %v6931_v50 }
 0x41f   : > { %v3987_v30 = vsel %vm3835_vm0, %v3783_v54, 0.0  ;;  %v3784_v31 = vmul.f32 %v3656_v18, %v3656_v18  ;;  %v4145_v2 = vpack.c.bf16 %v3656_v18, %v3655_v53  ;;  %v4001_v53 = vsel %vm3835_vm0, %v3790_v16, 0.0  ;;  %v7791_v54 = vld [vmem:[#allocation4_spill] sm:$0xff] }
 0x420   : > { %v3988_v14 = vadd.f32 %v3987_v30, %v3986_v55  ;;  %v3999_v55 = vsel %vm3835_vm0, %v3789_v3, 0.0  ;;  %v7792_v18 = vpack.c.bf16 %v7790_v35, %v7791_v54  ;;  %v7793_v30 = vld [vmem:[#allocation22_spill] sm:$0xff]  ;;  %v4007_v56 = vsel %vm3835_vm0, %v3793_v44, 0.0 }
 0x421   : > { %v3989_v4 = vsel %vm3835_vm0, %v3784_v31, 0.0  ;;  %5244 = vmatpush3.bf16.msra.mxu1 %v4145_v2  ;;  %v7794_v31 = vld [vmem:[#allocation21_spill] sm:$0xff]  ;;  %v3795_v49 = vmul.f32 %v6957_v58, %v6957_v58  ;;  %v3796_v50 = vmul.f32 %v6959_v60, %v6959_v60  ;;  %v3797_v58 = vmul.f32 %v6987_v8, %v6987_v8 }
 0x422   : > { %v3990_v59 = vadd.f32 %v3989_v4, %v3988_v14  ;;  %5245 = vmatprep.subr.bf16.mxu1 %v7780_v29  ;;  %v7795_v2 = vpack.c.bf16 %v7793_v30, %v7794_v31  ;;  %v4003_v14 = vsel %vm3835_vm0, %v3791_v0, 0.0  ;;  %v4005_v4 = vsel %vm3835_vm0, %v3792_v48, 0.0  ;;  %v7797_v29 = vld [vmem:[#allocation6_spill] sm:$0xff] }
 0x423   : > { %v4011_v16 = vsel %vm3835_vm0, %v3795_v49, 0.0  ;;  %v3798_v60 = vmul.f32 %v6989_v42, %v6989_v42  ;;  %v4015_v48 = vsel %vm3835_vm0, %v3797_v58, 0.0  ;;  %v3799_v8 = vmul.f32 %v7008_v32, %v7008_v32 }
 0x424   : > { %v3992_v13 = vadd.f32 %v3991_v36, %v3990_v59  ;;  %v7796_v59 = vld [vmem:[#allocation7_spill] sm:$0xff]  ;;  %v3800_v42 = vmul.f32 %v7010_v52, %v7010_v52  ;;  %v3801_v32 = vmul.f32 %v7026_v10, %v7026_v10  ;;  %v3802_v52 = vmul.f32 %v7028_v21, %v7028_v21 }
 0x425   : > { %5246 = vmatpush3.bf16.msra.mxu1 %v7781_v20  ;;  %v7798_v36 = vpack.c.bf16 %v7796_v59, %v7797_v29 }
 0x426   : > { %v3994_v17 = vadd.f32 %v3993_v1, %v3992_v13  ;;  %5253 = vmatprep.subr.bf16.mxu1 %v7783_v63  ;;  %v7799_v13 = vld [vmem:[#allocation24_spill] sm:$0xff]  ;;  %v4025_v58 = vsel %vm3835_vm0, %v3802_v52, 0.0 }
 0x427   : > { %v7803_v63 = vld [vmem:[#allocation8_spill] sm:$0xff] }
 0x428   : > { %v3996_v11 = vadd.f32 %v3995_v40, %v3994_v17  ;;  %4326 = vmatmul.mubr.bf16.vlgmr.msra.gmra.mrb[236].mxu1 %v4731_v27  ;;  %v7800_v27 = vld [vmem:[#allocation23_spill] sm:$0xff]  ;;  %v7802_v17 = vld [vmem:[#allocation9_spill] sm:$0xff] }
 0x429   : > { %5254 = vmatpush3.bf16.msra.mxu1 %v7786_v28  ;;  %4366 = vmatprep.mubr.bf16.mxu1 %v4734_v61  ;;  %v7801_v1 = vpack.c.bf16 %v7799_v13, %v7800_v27  ;;  %v4009_v61 = vsel %vm3835_vm0, %v3794_v46, 0.0  ;;  %v7804_v40 = vpack.c.bf16 %v7802_v17, %v7803_v63 }
 0x42a   : > { %v3998_v23 = vadd.f32 %v3997_v15, %v3996_v11  ;;  %5255 = vmatprep.subr.bf16.mxu1 %v7789_v62  ;;  %v7805_v11 = vld [vmem:[#allocation25_spill] sm:$0xff]  ;;  %v7807_v62 = vld [vmem:[#allocation11_spill] sm:$0xff] }
 0x42b   : > { %v7806_v15 = vpack.c.bf16 %v7298_v7, %v7805_v11  ;;  %v3812_v52 = vmul.f32 %v7807_v62, %v7807_v62 }
 0x42c   : > { %v4000_v24 = vadd.f32 %v3999_v55, %v3998_v23  ;;  %v4013_v23 = vsel %vm3835_vm0, %v3796_v50, 0.0  ;;  %v7808_v55 = vld [vmem:[#allocation10_spill] sm:$0xff]  ;;  %v4023_v50 = vsel %vm3835_vm0, %v3801_v32, 0.0  ;;  %v3810_v32 = vmul.f32 %v7802_v17, %v7802_v17 }
 0x42d   : > { %5256 = vmatpush3.bf16.msra.mxu1 %v7792_v18  ;;  %v7809_v0 = vpack.c.bf16 %v7807_v62, %v7808_v55  ;;  %v4045_v17 = vsel %vm3835_vm0, %v3812_v52, 0.0  ;;  %v3830_v52 = vmul.f32 %v7310_v57, %v7310_v57 }
 0x42e   : > { %v4002_v43 = vadd.f32 %v4001_v53, %v4000_v24  ;;  %5257 = vmatprep.subr.bf16.mxu1 %v7795_v2  ;;  %v7810_v53 = vpack.c.bf16 %v7310_v57, %v7308_v9  ;;  %v7811_v2 = vld [vmem:[#allocation13_spill] sm:$0xff] }
 0x430   : > { %v4004_v39 = vadd.f32 %v4003_v14, %v4002_v43  ;;  %v4017_v43 = vsel %vm3835_vm0, %v3798_v60, 0.0  ;;  %v7812_v14 = vld [vmem:[#allocation12_spill] sm:$0xff] }
 0x431   : > { %5258 = vmatpush3.bf16.msra.mxu1 %v7798_v36  ;;  %v7813_v44 = vpack.c.bf16 %v7811_v2, %v7812_v14 }
 0x432   : > { %v4006_v25 = vadd.f32 %v4005_v4, %v4004_v39  ;;  %5259 = vmatprep.subr.bf16.mxu1 %v7801_v1  ;;  %v4019_v4 = vsel %vm3835_vm0, %v3799_v8, 0.0  ;;  %v7814_v1 = vld [vmem:[#allocation15_spill] sm:$0xff]  ;;  %v3807_v8 = vmul.f32 %v7797_v29, %v7797_v29 }
 0x434   : > { %v4008_v20 = vadd.f32 %v4007_v56, %v4006_v25  ;;  %v4021_v25 = vsel %vm3835_vm0, %v3800_v42, 0.0  ;;  %v7815_v56 = vld [vmem:[#allocation14_spill] sm:$0xff]  ;;  %v3808_v42 = vmul.f32 %v7796_v59, %v7796_v59  ;;  %v4041_v59 = vsel %vm3835_vm0, %v3810_v32, 0.0 }
 0x435   : > { %5260 = vmatpush3.bf16.msra.mxu1 %v7804_v40  ;;  %v7816_v49 = vpack.c.bf16 %v7814_v1, %v7815_v56  ;;  %v3803_v40 = vmul.f32 %v7785_v26, %v7785_v26  ;;  %v3805_v26 = vmul.f32 %v7791_v54, %v7791_v54  ;;  %v3827_v32 = vmul.f32 %v7805_v11, %v7805_v11 }
 0x436   : > { %v4010_v3 = vadd.f32 %v4009_v61, %v4008_v20  ;;  %5261 = vmatprep.subr.bf16.mxu1 %v7806_v15  ;;  %v4733_v15 = vcombine.low %v7456_v5, %v7461_v51  ;;  %v3806_v51 = vmul.f32 %v7790_v35, %v7790_v35  ;;  %v4037_v35 = vsel %vm3835_vm0, %v3808_v42, 0.0 }
 0x437   : > { %v3824_v42 = vmul.f32 %v7793_v30, %v7793_v30 }
 0x438   : > { %v4012_v28 = vadd.f32 %v4011_v16, %v4010_v3 }
 0x439   : > { %5262 = vmatpush3.bf16.msra.mxu1 %v7809_v0 }
 0x43a   : > { %v4014_v24 = vadd.f32 %v4013_v23, %v4012_v28  ;;  %5263 = vmatprep.subr.bf16.mxu1 %v7810_v53  ;;  %v7817_v28 = vld [vmem:[#allocation17_spill] sm:$0xff]  ;;  %v7818_v23 = vld [vmem:[#allocation16_spill] sm:$0xff] }
 0x43b   : > { %v7819_v60 = vpack.c.bf16 %v7817_v28, %v7818_v23 }
 0x43c   : > { %v4016_v18 = vadd.f32 %v4015_v48, %v4014_v24  ;;  %v4027_v24 = vsel %vm3835_vm0, %v3803_v40, 0.0  ;;  %v3815_v40 = vmul.f32 %v7815_v56, %v7815_v56 }
 0x43d   : > { %5264 = vmatpush3.bf16.msra.mxu1 %v7813_v44  ;;  %v4035_v44 = vsel %vm3835_vm0, %v3807_v8, 0.0 }
 0x43e   : > { %v4018_v39 = vadd.f32 %v4017_v43, %v4016_v18  ;;  %5265 = vmatprep.subr.bf16.mxu1 %v4169_v37  ;;  %v4033_v43 = vsel %vm3835_vm0, %v3806_v51, 0.0  ;;  %v3821_v51 = vmul.f32 %v7788_v34, %v7788_v34 }
 0x440   : > { %v4020_v46 = vadd.f32 %v4019_v4, %v4018_v39  ;;  %v5203_v36 = vpop.f32.mrb[228].mxu1  ;;  %v3809_v39 = vmul.f32 %v7803_v63, %v7803_v63 }
 0x441   : > { %5266 = vmatpush3.bf16.msra.mxu1 %v7816_v49  ;;  %v5204_v20 = vpop.f32.mrb[229].mxu1 }
 0x442   : > { %v4022_v61 = vadd.f32 %v4021_v25, %v4020_v46  ;;  %5267 = vmatprep.subr.bf16.mxu1 %v4170_v47  ;;  %v7563_v37 = vadd.f32 %v5204_v20, %v5203_v36  ;;  %v5206_v10 = vpop.f32.mrb[230].mxu1  ;;  %v3804_v47 = vmul.f32 %v7784_v22, %v7784_v22  ;;  %v4031_v22 = vsel %vm3835_vm0, %v3805_v26, 0.0 }
 0x443   : > { %v5207_v3 = vpop.f32.mrb[231].mxu1  ;;  %v4039_v29 = vsel %vm3835_vm0, %v3809_v39, 0.0  ;;  %v3811_v36 = vmul.f32 %v7808_v55, %v7808_v55  ;;  %v3813_v20 = vmul.f32 %v7812_v14, %v7812_v14  ;;  %v4051_v14 = vsel %vm3835_vm0, %v3815_v40, 0.0 }
 0x444   : > { %v4024_v21 = vadd.f32 %v4023_v50, %v4022_v61  ;;  %v7570_v16 = vadd.f32 %v5207_v3, %v5206_v10  ;;  %v4029_v5 = vsel %vm3835_vm0, %v3804_v47, 0.0  ;;  %v3814_v10 = vmul.f32 %v7811_v2, %v7811_v2 }
 0x445   : > { %5268 = vmatpush3.bf16.msra.mxu1 %v7819_v60  ;;  %v4043_v63 = vsel %vm3835_vm0, %v3811_v36, 0.0  ;;  %v4047_v55 = vsel %vm3835_vm0, %v3813_v20, 0.0  ;;  %v3818_v60 = vmul.f32 %v7817_v28, %v7817_v28 }
 0x446   : > { %v4026_v0 = vadd.f32 %v4025_v58, %v4024_v21  ;;  %v4049_v62 = vsel %vm3835_vm0, %v3814_v10, 0.0  ;;  %v3816_v21 = vmul.f32 %v7814_v1, %v7814_v1  ;;  %v3817_v58 = vmul.f32 %v7818_v23, %v7818_v23 }
 0x447   : > { %v4057_v1 = vsel %vm3835_vm0, %v3818_v60, 0.0  ;;  %v3833_v10 = vmul.f32 %v7338_v45, %v7338_v45 }
 0x448   : > { %v4028_v53 = vadd.f32 %v4027_v24, %v4026_v0  ;;  %4367 = vmatmul.mubr.bf16.vlgmr.msra.gmra.mrb[240].mxu1 %v4733_v15  ;;  %v4053_v2 = vsel %vm3835_vm0, %v3816_v21, 0.0  ;;  %v4055_v56 = vsel %vm3835_vm0, %v3817_v58, 0.0  ;;  %v3819_v24 = vmul.f32 %v7782_v38, %v7782_v38 }
 0x449   : > { %v4063_v38 = vsel %vm3835_vm0, %v3821_v51, 0.0 }
 0x44a   : > { %v4030_v48 = vadd.f32 %v4029_v5, %v4028_v53  ;;  %v3820_v53 = vmul.f32 %v7210_v6, %v7210_v6  ;;  %v4059_v23 = vsel %vm3835_vm0, %v3819_v24, 0.0 }
 0x44c   : > { %v4032_v18 = vadd.f32 %v4031_v22, %v4030_v48  ;;  %v4061_v28 = vsel %vm3835_vm0, %v3820_v53, 0.0  ;;  %v3822_v22 = vmul.f32 %v7787_v19, %v7787_v19  ;;  %v4069_v19 = vsel %vm3835_vm0, %v3824_v42, 0.0 }
 0x44e   : > { %v4034_v54 = vadd.f32 %v4033_v43, %v4032_v18  ;;  %v3823_v18 = vmul.f32 %v7794_v31, %v7794_v31  ;;  %v4065_v6 = vsel %vm3835_vm0, %v3822_v22, 0.0 }
 0x450   : > { %v4036_v4 = vadd.f32 %v4035_v44, %v4034_v54  ;;  %v4067_v34 = vsel %vm3835_vm0, %v3823_v18, 0.0  ;;  %v3825_v44 = vmul.f32 %v7800_v27, %v7800_v27  ;;  %v4075_v27 = vsel %vm3835_vm0, %v3827_v32, 0.0 }
 0x452   : > { %v4038_v46 = vadd.f32 %v4037_v35, %v4036_v4  ;;  %v3826_v4 = vmul.f32 %v7799_v13, %v7799_v13  ;;  %v4071_v31 = vsel %vm3835_vm0, %v3825_v44, 0.0 }
 0x454   : > { %v4040_v25 = vadd.f32 %v4039_v29, %v4038_v46  ;;  %v4073_v30 = vsel %vm3835_vm0, %v3826_v4, 0.0  ;;  %v3828_v29 = vmul.f32 %v7298_v7, %v7298_v7  ;;  %v4081_v7 = vsel %vm3835_vm0, %v3830_v52, 0.0 }
 0x456   : > { %v4042_v49 = vadd.f32 %v4041_v59, %v4040_v25  ;;  %v3829_v25 = vmul.f32 %v7308_v9, %v7308_v9  ;;  %v4077_v13 = vsel %vm3835_vm0, %v3828_v29, 0.0 }
 0x458   : > { %v4044_v61 = vadd.f32 %v4043_v63, %v4042_v49  ;;  %v4079_v11 = vsel %vm3835_vm0, %v3829_v25, 0.0  ;;  %v3831_v63 = vmul.f32 %v7323_v41, %v7323_v41  ;;  %v4087_v41 = vsel %vm3835_vm0, %v3833_v10, 0.0 }
 0x45a   : > { %v4046_v50 = vadd.f32 %v4045_v17, %v4044_v61  ;;  %v3832_v61 = vmul.f32 %v7325_v12, %v7325_v12  ;;  %v4083_v9 = vsel %vm3835_vm0, %v3831_v63, 0.0 }
 0x45c   : > { %v4048_v3 = vadd.f32 %v4047_v55, %v4046_v50  ;;  %v4085_v57 = vsel %vm3835_vm0, %v3832_v61, 0.0  ;;  %v3834_v55 = vmul.f32 %v7340_v33, %v7340_v33 }
 0x45e   : > { %v4050_v15 = vadd.f32 %v4049_v62, %v4048_v3  ;;  %v4089_v62 = vsel %vm3835_vm0, %v3834_v55, 0.0 }
 0x460   : > { %v4052_v47 = vadd.f32 %v4051_v14, %v4050_v15 }
 0x462   : > { %v4054_v0 = vadd.f32 %v4053_v2, %v4052_v47 }
 0x464   : > { %v4056_v26 = vadd.f32 %v4055_v56, %v4054_v0 }
 0x466   : > { %v4058_v5 = vadd.f32 %v4057_v1, %v4056_v26 }
 0x468   : > { %v4060_v48 = vadd.f32 %v4059_v23, %v4058_v5 }
 0x46a   : > { %v4062_v8 = vadd.f32 %v4061_v28, %v4060_v48 }
 0x46c   : > { %v4064_v43 = vadd.f32 %v4063_v38, %v4062_v8 }
 0x46e   : > { %v4066_v54 = vadd.f32 %v4065_v6, %v4064_v43 }
 0x470   : > { %v4068_v39 = vadd.f32 %v4067_v34, %v4066_v54 }
 0x472   : > { %v4070_v35 = vadd.f32 %v4069_v19, %v4068_v39 }
 0x474   : > { %v4072_v46 = vadd.f32 %v4071_v31, %v4070_v35 }
 0x476   : > { %v4074_v36 = vadd.f32 %v4073_v30, %v4072_v46 }
 0x478   : > { %v4076_v59 = vadd.f32 %v4075_v27, %v4074_v36 }
 0x47a   : > { %v4078_v49 = vadd.f32 %v4077_v13, %v4076_v59 }
 0x47c   : > { %v4080_v20 = vadd.f32 %v4079_v11, %v4078_v49 }
 0x47e   : > { %v4082_v17 = vadd.f32 %v4081_v7, %v4080_v20 }
 0x480   : > { %v4084_v50 = vadd.f32 %v4083_v9, %v4082_v17 }
 0x482   : > { %v4086_v40 = vadd.f32 %v4085_v57, %v4084_v50 }
 0x484   : > { %v4088_v3 = vadd.f32 %v4087_v41, %v4086_v40 }
 0x486   : > { %v4090_v21 = vadd.f32 %v4089_v62, %v4088_v3 }
 0x488   : > { %v4091_v0 = vrot.slane %v4090_v21, 4 }
 0x48a   : > { %v4092_v1 = vadd.f32 %v4091_v0, %v4090_v21 }
 0x48c   : > { %v4093_v48 = vrot.slane %v4092_v1, 2 }
 0x48e   : > { %v4094_v28 = vadd.f32 %v4093_v48, %v4092_v1 }
 0x490   : > { %v4095_v22 = vrot.slane %v4094_v28, 1 }
 0x492   : > { %v4096_v8 = vadd.f32 %v4095_v22, %v4094_v28 }
 0x494   : > { %v4097_v38 = vadd.f32 1e-24, %v4096_v8 }
 0x496   : > { %5524 = vrsqrt.f32 %v4097_v38 }
 0x4a0   : > { %v5525_v34 = vpop.eup %5524 }
 0x4c0   : > { %v5225_v12 = vpop.f32.mrb[232].mxu1 }
 0x4c1   : > { %v5226_v15 = vpop.f32.mrb[233].mxu1 }
 0x4c2   : > { %v5227_v14 = vadd.f32 %v5226_v15, %v5225_v12  ;;  %v5228_v58 = vpop.f32.mrb[234].mxu1 }
 0x4c3   : > { %v5229_v47 = vpop.f32.mrb[235].mxu1 }
 0x4c4   : > { %v4287_v45 = vadd.f32 %v5227_v14, %v7563_v37  ;;  %v5230_v2 = vadd.f32 %v5229_v47, %v5228_v58 }
 0x4c6   : > { %v4290_v60 = vadd.f32 %v5230_v2, %v7570_v16 }
 0x4fb   : > { %v5247_v56 = vpop.f32.mrb[236].mxu1 }
 0x4fc   : > { %v5248_v33 = vpop.f32.mrb[237].mxu1 }
 0x4fd   : > { %v5249_v24 = vadd.f32 %v5248_v33, %v5247_v56  ;;  %v5250_v26 = vpop.f32.mrb[238].mxu1 }
 0x4fe   : > { %v5251_v53 = vpop.f32.mrb[239].mxu1 }
 0x4ff   : > { %v4328_v5 = vadd.f32 %v5249_v24, %v4287_v45  ;;  %v5252_v23 = vadd.f32 %v5251_v53, %v5250_v26 }
 0x501   : > { %v4331_v51 = vadd.f32 %v5252_v23, %v4290_v60 }
 0x51b   : > { %v5269_v37 = vpop.f32.mrb[240].mxu1 }
 0x51c   : > { %v5270_v18 = vpop.f32.mrb[241].mxu1 }
 0x51d   : > { %v5271_v16 = vadd.f32 %v5270_v18, %v5269_v37  ;;  %v5272_v43 = vpop.f32.mrb[242].mxu1 }
 0x51e   : > { %v5273_v6 = vpop.f32.mrb[243].mxu1 }
 0x51f   : > { %v4369_v42 = vadd.f32 %v5271_v16, %v4328_v5  ;;  %v5274_v54 = vadd.f32 %v5273_v6, %v5272_v43 }
 0x521   : > { %v4375_v44 = vmul.f32 %v5525_v34, %v4369_v42  ;;  %v4372_v39 = vadd.f32 %v5274_v54, %v4331_v51 }
 0x523   : > { %4377 = vst.msk [vmem:[%s228_s27] sm:$0xff] %vm3835_vm0, %v4375_v44  ;;  %v4376_v19 = vmul.f32 %v5525_v34, %v4372_v39 }
 0x525   : > { %4378 = vst.msk [vmem:[%s228_s27 + $0x8] sm:$0xff] %vm3835_vm0, %v4376_v19 }
 0x526 PF: > { %s14_s17 = sadd.s32 1, %s5676_s17   ;;  %s7820_s15 = smov %s5672_s16 }
 0x527   : > { %p11_p5 = scmp.ge.s32.totalorder %s14_s17, 4   ;;  %s7821_s16 = smov %s7823_s18 }
 0x529   :  { %13 = sbr.rel (!%p11_p5) target bundleno = 2 (0x2), region = 66 }

// kernel: custom_clip_np_forward.2
= control target key start
LH: loop header
LB: loop body
LE: loop exit
PB: predicated region body
PF: predicated region fallthrough
CT: control target
= control target key end

     0   :  { %vm86_vm0 = vcmask 523264   ;;  %vm466_vm1 = vcmask 261120   ;;  %vm558_vm3 = vcmask 130048   ;;  %vm7688_vm4 = vcmask 392192   ;;  %s14157_s0 = inlined_call_operand.vmem [shape: f32[48,64], index: 0, kind: input, shape index: {}]   ;;  %s14158_s4 = inlined_call_operand.vmem [shape: f32[2,2,64,32], index: 4, kind: input, shape index: {}]   ;;  %s14159_s5 = inlined_call_operand.vmem [shape: f32[2,2,64,32], index: 5, kind: input, shape index: {}]   ;;  %s14160_s6 = inlined_call_operand.vmem [shape: f32[2,2,64,32], index: 6, kind: input, shape index: {}]   ;;  %s14161_s2 = inlined_call_operand.vmem [shape: f32[2,1,64], index: 2, kind: input, shape index: {}]   ;;  %s14162_s3 = inlined_call_operand.vmem [shape: f32[2,1,64], index: 3, kind: input, shape index: {}]   ;;  %s14163_s8 = inlined_call_operand.vmem [shape: f32[2,2,1,32], index: 8, kind: input, shape index: {}]   ;;  %s14164_s7 = inlined_call_operand.vmem [shape: f32[2,2,1,32], index: 7, kind: input, shape index: {}]   ;;  %s14165_s9 = inlined_call_operand.vmem [shape: f32[2,2,1,32], index: 9, kind: input, shape index: {}]   ;;  %s14166_s1 = inlined_call_operand.vmem [shape: f32[16,16], index: 1, kind: input, shape index: {}]   ;;  %s14167_s10 = inlined_call_operand.vmem [shape: f32[2,2,32,64], index: 10, kind: input, shape index: {}]   ;;  %s14168_s11 = inlined_call_operand.vmem [shape: f32[2,1,64], index: 11, kind: input, shape index: {}]   ;;  %s14169_s14 = inlined_call_operand.vmem [shape: f32[2,64,256], index: 14, kind: input, shape index: {}]   ;;  %s14170_s12 = inlined_call_operand.vmem [shape: f32[2,1,64], index: 12, kind: input, shape index: {}]   ;;  %s14171_s13 = inlined_call_operand.vmem [shape: f32[2,1,64], index: 13, kind: input, shape index: {}]   ;;  %s14172_s15 = inlined_call_operand.vmem [shape: f32[2,1,256], index: 15, kind: input, shape index: {}]   ;;  %s14173_s16 = inlined_call_operand.vmem [shape: f32[2,256,64], index: 16, kind: input, shape index: {}]   ;;  %s14174_s17 = inlined_call_operand.vmem [shape: f32[2,1,64], index: 17, kind: input, shape index: {}]   ;;  %s14175_s18 = inlined_call_operand.vmem [shape: f32[1,64], index: 18, kind: input, shape index: {}]   ;;  %s14176_s19 = inlined_call_operand.vmem [shape: f32[1,64], index: 19, kind: input, shape index: {}]   ;;  %s14177_s21 = inlined_call_operand.vmem [shape: f32[16,48], index: 21, kind: input, shape index: {}]   ;;  %s14178_s20 = inlined_call_operand.vmem [shape: f32[64,1024], index: 20, kind: input, shape index: {}]   ;;  %s14179_s22 = inlined_call_operand.<no memory space> [shape: f32[1,1], index: 22, kind: input, shape index: {}]   ;;  %s14180_s23 = inlined_call_operand.vmem [shape: bf16[16,1024], index: 23, kind: output, shape index: {}]  }
   0x1   :  { %14196 = sst [smem:[#allocation4_spill]] %s14157_s0  ;;  %vm11926_vm2 = vmpackc.low %vm466_vm1, %vm466_vm1 }
   0x2   :  { %14197 = sst [smem:[#allocation5_spill]] %s14158_s4  ;;  %s14206_s24 = sld [smem:[#allocation4_spill]] }
   0x3   :  { %14198 = sst [smem:[#allocation6_spill]] %s14159_s5  ;;  %s14207_s5 = sld [smem:[#allocation5_spill]] }
   0x4   :  { %14199 = sst [smem:[#allocation7_spill]] %s14160_s6  ;;  %s14208_s29 = sld [smem:[#allocation6_spill]] }
   0x5   :  { %14200 = sst [smem:[#allocation8_spill]] %s14161_s2  ;;  %s14209_s25 = sld [smem:[#allocation7_spill]] }
   0x6   :  { %14201 = sst [smem:[#allocation9_spill]] %s14162_s3  ;;  %s14210_s27 = sld [smem:[#allocation8_spill]] }
   0x7   :  { %14202 = sst [smem:[#allocation10_spill]] %s14163_s8  ;;  %s14211_s6 = sld [smem:[#allocation9_spill]] }
   0x8   :  { %14203 = sst [smem:[#allocation11_spill]] %s14164_s7  ;;  %v76_v0 = vld [vmem:[%s14206_s24] sm:$0xff]  ;;  %v77_v1 = vld [vmem:[%s14206_s24 + $0x8] sm:$0xff]  ;;  %s14212_s3 = sld [smem:[#allocation10_spill]] }
   0x9   :  { %14204 = sst [smem:[#allocation12_spill]] %s14179_s22  ;;  %v87_v2 = vsel %vm86_vm0, %v76_v0, 0.0  ;;  %v90_v3 = vsel %vm86_vm0, %v77_v1, 0.0  ;;  %v190_v14 = vld [vmem:[%s14207_s5] sm:$0xff]  ;;  %v191_v15 = vld [vmem:[%s14207_s5 + $0x8] sm:$0xff]  ;;  %v192_v20 = vld [vmem:[%s14207_s5 + $0x10] sm:$0xff] }
   0xa   :  { %14205 = sst [smem:[#allocation13_spill]] %s14180_s23  ;;  %88 = vadd.xlane.f32.xlu0 %v87_v2  ;;  %v11721_v16 = vpack.c.bf16 %v191_v15, %v190_v14  ;;  %v286_v17 = vld [vmem:[%s14208_s29] sm:$0xff]  ;;  %v287_v18 = vld [vmem:[%s14208_s29 + $0x8] sm:$0xff]  ;;  %v193_v21 = vld [vmem:[%s14207_s5 + $0x18] sm:$0xff]  ;;  %s14213_s8 = sld [smem:[#allocation11_spill]] }
   0xb   :  { %v11729_v19 = vpack.c.bf16 %v287_v18, %v286_v17  ;;  %v11741_v22 = vpack.c.bf16 %v193_v21, %v192_v20  ;;  %v288_v23 = vld [vmem:[%s14208_s29 + $0x10] sm:$0xff]  ;;  %v289_v24 = vld [vmem:[%s14208_s29 + $0x18] sm:$0xff]  ;;  %v194_v26 = vld [vmem:[%s14207_s5 + $0x20] sm:$0xff]  ;;  %s14222_s22 = sld [smem:[#allocation13_spill]] }
   0xc   :  { %10329 = vmatprep.subr.bf16.mxu0 %v11721_v16  ;;  %v11749_v25 = vpack.c.bf16 %v289_v24, %v288_v23  ;;  %v195_v27 = vld [vmem:[%s14207_s5 + $0x28] sm:$0xff]  ;;  %v290_v29 = vld [vmem:[%s14208_s29 + $0x20] sm:$0xff]  ;;  %v196_v32 = vld [vmem:[%s14207_s5 + $0x30] sm:$0xff] }
   0xd   :  { %10331 = vmatpush3.bf16.msra.mxu0 %v11721_v16  ;;  %10345 = vmatprep.subr.bf16.mxu1 %v11729_v19  ;;  %v11761_v28 = vpack.c.bf16 %v195_v27, %v194_v26  ;;  %v291_v30 = vld [vmem:[%s14208_s29 + $0x28] sm:$0xff]  ;;  %v197_v33 = vld [vmem:[%s14207_s5 + $0x38] sm:$0xff]  ;;  %v292_v35 = vld [vmem:[%s14208_s29 + $0x30] sm:$0xff] }
   0xe   :  { %91 = vadd.xlane.f32.xlu0 %v90_v3  ;;  %10347 = vmatpush3.bf16.msra.mxu1 %v11729_v19  ;;  %v11769_v31 = vpack.c.bf16 %v291_v30, %v290_v29  ;;  %v11781_v34 = vpack.c.bf16 %v197_v33, %v196_v32  ;;  %v293_v36 = vld [vmem:[%s14208_s29 + $0x38] sm:$0xff]  ;;  %v376_v38 = vld [vmem:[%s14209_s25] sm:$0xff]  ;;  %v377_v39 = vld [vmem:[%s14209_s25 + $0x8] sm:$0xff] }
   0xf   :  { %10333 = vmatprep.subr.bf16.mxu0 %v11741_v22  ;;  %10349 = vmatprep.subr.bf16.mxu1 %v11749_v25  ;;  %v11789_v37 = vpack.c.bf16 %v293_v36, %v292_v35  ;;  %v11801_v40 = vpack.c.bf16 %v377_v39, %v376_v38  ;;  %v11807_v48 = vld [vmem:[%s14210_s27] ss:$0 sm:$0xff]  ;;  %v378_v55 = vld [vmem:[%s14209_s25 + $0x10] sm:$0xff]  ;;  %v379_v56 = vld [vmem:[%s14209_s25 + $0x18] sm:$0xff] }
  0x10   :  { %v11813_v50 = vld [vmem:[%s14211_s6] ss:$0 sm:$0xff]  ;;  %v11834_v59 = vpack.c.bf16 %v379_v56, %v378_v55  ;;  %v381_v61 = vld [vmem:[%s14209_s25 + $0x28] sm:$0xff]  ;;  %v382_v63 = vld [vmem:[%s14209_s25 + $0x30] sm:$0xff] }
  0x11   :  { %10335 = vmatpush3.bf16.msra.mxu0 %v11741_v22  ;;  %v380_v60 = vld [vmem:[%s14209_s25 + $0x20] sm:$0xff]  ;;  %v8318_v3 = vld [vmem:[%s14208_s29 + $0x48] sm:$0xff] }
  0x12   :  { %10351 = vmatpush3.bf16.msra.mxu1 %v11749_v25  ;;  %10337 = vmatprep.subr.bf16.mxu0 %v11761_v28  ;;  %v11850_v62 = vpack.c.bf16 %v381_v61, %v380_v60  ;;  %v8317_v2 = vld [vmem:[%s14208_s29 + $0x40] sm:$0xff] }
  0x13   :  { %10353 = vmatprep.subr.bf16.mxu1 %v11769_v31  ;;  %v11914_v14 = vld [vmem:[%s14212_s3] ss:$0 sm:$0xff] }
  0x14   :  { %v11919_v15 = vld [vmem:[%s14213_s8] ss:$0 sm:$0xff] }
  0x15   :  { %10339 = vmatpush3.bf16.msra.mxu0 %v11761_v28  ;;  %v11940_v32 = vld [vmem:[%s14165_s9] ss:$0 sm:$0xff] }
  0x16   :  { %10355 = vmatpush3.bf16.msra.mxu1 %v11769_v31  ;;  %10341 = vmatprep.subr.bf16.mxu0 %v11781_v34 }
  0x17   :  { %10357 = vmatprep.subr.bf16.mxu1 %v11789_v37 }
  0x19   :  { %10343 = vmatpush3.bf16.msra.mxu0 %v11781_v34 }
  0x1a   :  { %10359 = vmatpush3.bf16.msra.mxu1 %v11789_v37  ;;  %10361 = vmatprep.subr.bf16.mxu0 %v11801_v40 }
  0x97   :  { %v89_v4 = vpop.xlane.xlu0 %88 }
  0x98   :  { %v106_v5 = vmul.f32 0.015625, %v89_v4  ;;  %v11870_v4 = vpack.c.bf16 %v8318_v3, %v8317_v2 }
  0x9a   :  { %v11705_v6 = vsub.f32 %v76_v0, %v106_v5  ;;  %v383_v0 = vld [vmem:[%s14209_s25 + $0x38] sm:$0xff]  ;;  %v8319_v5 = vld [vmem:[%s14208_s29 + $0x50] sm:$0xff] }
  0x9b   :  { %v92_v7 = vpop.xlane.xlu0 %91 }
  0x9c   :  { %v107_v8 = vmul.f32 0.015625, %v92_v7  ;;  %v118_v9 = vmul.f32 %v11705_v6, %v11705_v6 }
  0x9e   :  { %v11709_v10 = vsub.f32 %v77_v1, %v107_v8  ;;  %v124_v11 = vsel %vm86_vm0, %v118_v9, 0.0  ;;  %v11860_v1 = vpack.c.bf16 %v383_v0, %v382_v63  ;;  %v8321_v8 = vld [vmem:[%s14208_s29 + $0x60] sm:$0xff]  ;;  %v8322_v9 = vld [vmem:[%s14208_s29 + $0x68] sm:$0xff] }
  0x9f   :  { %125 = vadd.xlane.f32.xlu1 %v124_v11  ;;  %v8323_v11 = vld [vmem:[%s14208_s29 + $0x70] sm:$0xff] }
  0xa0   :  { %v119_v12 = vmul.f32 %v11709_v10, %v11709_v10 }
  0xa2   :  { %v127_v13 = vsel %vm86_vm0, %v119_v12, 0.0  ;;  %v8324_v12 = vld [vmem:[%s14208_s29 + $0x78] sm:$0xff] }
  0xa3   :  { %128 = vadd.xlane.f32.xlu1 %v127_v13  ;;  %v11904_v13 = vpack.c.bf16 %v8324_v12, %v8323_v11 }
 0x12c   :  { %v126_v41 = vpop.xlane.xlu1 %125 }
 0x12d   :  { %v142_v42 = vmul.f32 0.015625, %v126_v41  ;;  %v11947_v41 = vld [vmem:[%s14212_s3 + $0x1] ss:$0 sm:$0xff] }
 0x12f   :  { %v148_v43 = vadd.f32 1e-05, %v142_v42 }
 0x130   :  { %v129_v44 = vpop.xlane.xlu1 %128 }
 0x131   :  { %11307 = vrsqrt.f32 %v148_v43  ;;  %v143_v45 = vmul.f32 0.015625, %v129_v44 }
 0x133   :  { %v149_v46 = vadd.f32 1e-05, %v143_v45 }
 0x135   :  { %11309 = vrsqrt.f32 %v149_v46 }
 0x13b   :  { %v11308_v47 = vpop.eup %11307 }
 0x13c   :  { %v160_v49 = vmul.f32 %v11308_v47, %v11705_v6  ;;  %v8320_v6 = vld [vmem:[%s14208_s29 + $0x58] sm:$0xff] }
 0x13d   :  { %v11880_v7 = vpack.c.bf16 %v8320_v6, %v8319_v5 }
 0x13e   :  { %v172_v51 = vmul.f32 %v11807_v48, %v160_v49  ;;  %v11956_v49 = vld [vmem:[%s14166_s1 + $0x8] sm:$0xff] }
 0x13f   :  { %v11310_v52 = vpop.eup %11309 }
 0x140   :  { %v161_v53 = vmul.f32 %v11310_v52, %v11709_v10  ;;  %v11818_v54 = vadd.f32 %v11813_v50, %v172_v51  ;;  %v11894_v10 = vpack.c.bf16 %v8322_v9, %v8321_v8 }
 0x142   :  { %v173_v57 = vmul.f32 %v11807_v48, %v161_v53  ;;  %9345 = vmatprep.mubr.msk.f32.mxu0 %vm86_vm0, %v11818_v54  ;;  %9364 = vmatprep.mubr.msk.f32.mxu1 %vm86_vm0, %v11818_v54  ;;  %v11961_v53 = vld [vmem:[%s14166_s1] sm:$0xff] }
 0x144   :  { %v11832_v58 = vadd.f32 %v11813_v50, %v173_v57 }
 0x146   :  { %9346 = vmatmul.mubr.msk.f32.vlgmr.msra.gmra.mrb[0].mxu0 %vm86_vm0, %v11832_v58  ;;  %9365 = vmatmul.mubr.msk.f32.vlgmr.msra.gmra.mrb[0].mxu1 %vm86_vm0, %v11832_v58 }
 0x147   :  { %10363 = vmatpush3.bf16.msra.mxu0 %v11801_v40  ;;  %9383 = vmatprep.mubr.msk.f32.mxu0 %vm86_vm0, %v11818_v54 }
 0x148   :  { %10365 = vmatprep.subr.bf16.mxu0 %v11834_v59 }
 0x14b   :  { %10367 = vmatpush3.bf16.msra.mxu0 %v11834_v59 }
 0x14c   :  { %10369 = vmatprep.subr.bf16.mxu0 %v11850_v62 }
 0x14f   :  { %10371 = vmatpush3.bf16.msra.mxu0 %v11850_v62 }
 0x150   :  { %10373 = vmatprep.subr.bf16.mxu0 %v11860_v1 }
 0x153   :  { %10375 = vmatpush3.bf16.msra.mxu0 %v11860_v1 }
 0x154   :  { %10403 = vmatprep.subr.bf16.mxu0 %v11870_v4 }
 0x156   :  { %9384 = vmatmul.mubr.msk.f32.vlgmr.msra.gmra.mrb[2].mxu0 %vm86_vm0, %v11832_v58 }
 0x157   :  { %10405 = vmatpush3.bf16.msra.mxu0 %v11870_v4  ;;  %9435 = vmatprep.mubr.msk.f32.mxu0 %vm86_vm0, %v11818_v54 }
 0x158   :  { %10407 = vmatprep.subr.bf16.mxu0 %v11880_v7 }
 0x15b   :  { %10409 = vmatpush3.bf16.msra.mxu0 %v11880_v7 }
 0x15c   :  { %10411 = vmatprep.subr.bf16.mxu0 %v11894_v10 }
 0x15f   :  { %10413 = vmatpush3.bf16.msra.mxu0 %v11894_v10 }
 0x160   :  { %10415 = vmatprep.subr.bf16.mxu0 %v11904_v13 }
 0x163   :  { %10417 = vmatpush3.bf16.msra.mxu0 %v11904_v13 }
 0x166   :  { %9436 = vmatmul.mubr.msk.f32.vlgmr.msra.gmra.mrb[4].mxu0 %vm86_vm0, %v11832_v58 }
 0x219   :  { %v9347_v17 = vpop.f32.mrb[0].mxu0  ;;  %v9366_v18 = vpop.f32.mrb[0].mxu1 }
 0x21a   :  { %v373_v20 = vadd.f32 %v9366_v18, %v11914_v14  ;;  %v277_v21 = vpop.f32.mrb[1].mxu0  ;;  %v367_v23 = vpop.f32.mrb[1].mxu1  ;;  %v283_v30 = vadd.f32 %v9347_v17, %v11919_v15  ;;  %v8305_v17 = vld [vmem:[%s14207_s5 + $0x40] sm:$0xff]  ;;  %v8306_v18 = vld [vmem:[%s14207_s5 + $0x48] sm:$0xff] }
 0x21b   :  { %v278_v24 = vadd.f32 %v11919_v15, %v277_v21  ;;  %v368_v26 = vadd.f32 %v11914_v14, %v367_v23 }
 0x21d   :  { %v10376_v29 = vpack.c.bf16 %v373_v20, %v368_v26  ;;  %9390 = vmatprep.mubr.msk.f32.mxu1 %vm466_vm1, %v278_v24  ;;  %v11975_v20 = vpack.c.bf16 %v8306_v18, %v8305_v17  ;;  %v8307_v26 = vld [vmem:[%s14207_s5 + $0x50] sm:$0xff] }
 0x21f   :  { %10378 = vmatprep.subr.msk.bf16.mxu1 %vm11926_vm2, %v10376_v29 }
 0x220   :  { %10381 = vmatpush3.bf16.xpose.msk.msra.mxu1 %vm11926_vm2, %v10376_v29  ;;  %v8308_v29 = vld [vmem:[%s14207_s5 + $0x58] sm:$0xff] }
 0x227   :  { %9391 = vmatmul.mubr.msk.f32.vlgmr.msra.gmra.mrb[2].mxu1 %vm466_vm1, %v283_v30 }
 0x229   :  { %v9385_v33 = vpop.f32.mrb[2].mxu0 }
 0x22a   :  { %v463_v35 = vadd.f32 %v9385_v33, %v11940_v32  ;;  %v457_v36 = vpop.f32.mrb[3].mxu0 }
 0x22b   :  { %v458_v38 = vadd.f32 %v11940_v32, %v457_v36  ;;  %v11984_v36 = vpack.c.bf16 %v8308_v29, %v8307_v26 }
 0x22d   :  { %v10382_v39 = vpack.c.bf16 %v463_v35, %v458_v38  ;;  %v8309_v38 = vld [vmem:[%s14207_s5 + $0x60] sm:$0xff] }
 0x22f   :  { %10383 = vmatprep.subr.bf16.mxu1 %v10382_v39 }
 0x230   :  { %10385 = vmatpush3.bf16.msra.mxu1 %v10382_v39  ;;  %v8310_v39 = vld [vmem:[%s14207_s5 + $0x68] sm:$0xff] }
 0x231   :  { %10387 = vmatprep.subr.bf16.mxu1 %v11975_v20 }
 0x239   :  { %v9437_v42 = vpop.f32.mrb[4].mxu0 }
 0x23a   :  { %v847_v43 = vadd.f32 %v9437_v42, %v11947_v41  ;;  %v841_v44 = vpop.f32.mrb[5].mxu0  ;;  %v11998_v42 = vpack.c.bf16 %v8310_v39, %v8309_v38 }
 0x23b   :  { %v842_v45 = vadd.f32 %v11947_v41, %v841_v44  ;;  %v8312_v44 = vld [vmem:[%s14207_s5 + $0x78] sm:$0xff] }
 0x23d   :  { %v11951_v46 = vpack.c.bf16 %v847_v43, %v842_v45  ;;  %v8311_v43 = vld [vmem:[%s14207_s5 + $0x70] sm:$0xff] }
 0x23e   :  { %v12008_v45 = vpack.c.bf16 %v8312_v44, %v8311_v43 }
 0x2fa   :  { %v9392_v47 = vpop.f32.mrb[2].mxu1 }
 0x2fb   :  { %v555_v51 = vmul.f32 0.17677669, %v9392_v47  ;;  %v545_v52 = vpop.f32.mrb[3].mxu1  ;;  %v8329_v47 = vld [vmem:[%s14209_s25 + $0x40] sm:$0xff] }
 0x2fc   :  { %v554_v55 = vmul.f32 0.17677669, %v545_v52 }
 0x2fd   :  { %v557_v56 = vadd.f32 %v555_v51, %v11956_v49  ;;  %v8330_v51 = vld [vmem:[%s14209_s25 + $0x48] sm:$0xff] }
 0x2fe   :  { %v556_v57 = vadd.f32 %v554_v55, %v11961_v53  ;;  %v12018_v52 = vpack.c.bf16 %v8330_v51, %v8329_v47  ;;  %v8331_v55 = vld [vmem:[%s14209_s25 + $0x50] sm:$0xff] }
 0x2ff   :  { %v562_v60 = vsel %vm558_vm3, %v557_v56, -inf }
 0x300   :  { %563 = vmax.xlane.f32.xlu1 %v562_v60  ;;  %v559_v61 = vsel %vm558_vm3, %v556_v57, -inf  ;;  %v8333_v60 = vld [vmem:[%s14209_s25 + $0x60] sm:$0xff] }
 0x301   :  { %560 = vmax.xlane.f32.xlu0 %v559_v61  ;;  %v8334_v61 = vld [vmem:[%s14209_s25 + $0x68] sm:$0xff] }
 0x38d   :  { %v564_v63 = vpop.xlane.xlu1 %563 }
 0x38e   :  { %v566_v0 = vsub.f32 %v557_v56, %v564_v63  ;;  %v561_v2 = vpop.xlane.xlu0 %560  ;;  %v8332_v56 = vld [vmem:[%s14209_s25 + $0x58] sm:$0xff]  ;;  %v12042_v63 = vpack.c.bf16 %v8334_v61, %v8333_v60 }
 0x38f   :  { %v565_v3 = vsub.f32 %v556_v57, %v561_v2  ;;  %v12028_v57 = vpack.c.bf16 %v8332_v56, %v8331_v55  ;;  %v8336_v2 = vld [vmem:[%s14209_s25 + $0x78] sm:$0xff] }
 0x390   :  { %v569_v5 = vmul.f32 1.442695, %v566_v0  ;;  %v8335_v0 = vld [vmem:[%s14209_s25 + $0x70] sm:$0xff]  ;;  %v12101_v61 = vld [vmem:[%s14206_s24 + $0x18] sm:$0xff] }
 0x391   :  { %v567_v6 = vmul.f32 1.442695, %v565_v3  ;;  %v12052_v3 = vpack.c.bf16 %v8336_v2, %v8335_v0 }
 0x392   :  { %11311 = vpow2.f32 %v569_v5 }
 0x393   :  { %11313 = vpow2.f32 %v567_v6  ;;  %v12073_v6 = vld [vmem:[%s14213_s8 + $0x1] ss:$0 sm:$0xff] }
 0x39c   :  { %v11312_v8 = vpop.eup %11311 }
 0x39d   :  { %v11314_v9 = vpop.eup %11313  ;;  %v574_v11 = vsel %vm558_vm3, %v11312_v8, 0.0 }
 0x39e   :  { %575 = vadd.xlane.f32.xlu1 %v574_v11  ;;  %v571_v12 = vsel %vm558_vm3, %v11314_v9, 0.0 }
 0x39f   :  { %572 = vadd.xlane.f32.xlu0 %v571_v12 }
 0x42b   :  { %v576_v21 = vpop.xlane.xlu1 %575 }
 0x42c   :  { %11315 = vrcp.f32 %v576_v21  ;;  %v573_v23 = vpop.xlane.xlu0 %572 }
 0x42d   :  { %11317 = vrcp.f32 %v573_v23 }
 0x436   :  { %v11316_v24 = vpop.eup %11315 }
 0x437   :  { %v11318_v30 = vpop.eup %11317  ;;  %v580_v35 = vmul.f32 %v11316_v24, %v11312_v8 }
 0x438   :  { %v579_v33 = vmul.f32 %v11318_v30, %v11314_v9 }
 0x43a   :  { %9397 = vmatprep.mubr.msk.f32.mxu1 %vm558_vm3, %v579_v33 }
 0x43b   :  { %9398 = vmatmul.mubr.msk.f32.vlgmr.msra.gmra.mrb[4].mxu1 %vm558_vm3, %v580_v35 }
 0x43c   :  { %10389 = vmatpush3.bf16.msra.mxu1 %v11975_v20  ;;  %9416 = vmatprep.mubr.msk.f32.mxu1 %vm86_vm0, %v11818_v54 }
 0x43d   :  { %10391 = vmatprep.subr.bf16.mxu1 %v11984_v36 }
 0x440   :  { %10393 = vmatpush3.bf16.msra.mxu1 %v11984_v36 }
 0x441   :  { %10395 = vmatprep.subr.bf16.mxu1 %v11998_v42 }
 0x444   :  { %10397 = vmatpush3.bf16.msra.mxu1 %v11998_v42 }
 0x445   :  { %10399 = vmatprep.subr.bf16.mxu1 %v12008_v45 }
 0x448   :  { %10401 = vmatpush3.bf16.msra.mxu1 %v12008_v45 }
 0x449   :  { %10419 = vmatprep.subr.bf16.mxu1 %v12018_v52 }
 0x44b   :  { %9417 = vmatmul.mubr.msk.f32.vlgmr.msra.gmra.mrb[6].mxu1 %vm86_vm0, %v11832_v58 }
 0x44c   :  { %10421 = vmatpush3.bf16.msra.mxu1 %v12018_v52  ;;  %9454 = vmatprep.mubr.msk.f32.mxu1 %vm86_vm0, %v11818_v54 }
 0x44d   :  { %10423 = vmatprep.subr.bf16.mxu1 %v12028_v57 }
 0x450   :  { %10425 = vmatpush3.bf16.msra.mxu1 %v12028_v57 }
 0x451   :  { %10427 = vmatprep.subr.bf16.mxu1 %v12042_v63 }
 0x454   :  { %10429 = vmatpush3.bf16.msra.mxu1 %v12042_v63 }
 0x455   :  { %10431 = vmatprep.subr.bf16.mxu1 %v12052_v3 }
 0x458   :  { %10433 = vmatpush3.bf16.msra.mxu1 %v12052_v3 }
 0x459   :  { %10436 = vmatprep.subr.msk.bf16.mxu1 %vm11926_vm2, %v11951_v46 }
 0x45b   :  { %9455 = vmatmul.mubr.msk.f32.vlgmr.msra.gmra.mrb[8].mxu1 %vm86_vm0, %v11832_v58 }
 0x461   :  { %10439 = vmatpush3.bf16.xpose.msk.msra.mxu1 %vm11926_vm2, %v11951_v46  ;;  %v12086_v46 = vld [vmem:[%s14165_s9 + $0x1] ss:$0 sm:$0xff] }
 0x462   :  { %10461 = vmatprep.subr.bf16.mxu1 %v11721_v16 }
 0x50e   :  { %v12066_v54 = vpop.f32.mrb[4].mxu1 }
 0x50f   :  { %v12068_v5 = vpop.f32.mrb[5].mxu1 }
 0x51e   :  { %v9418_v8 = vpop.f32.mrb[6].mxu1 }
 0x51f   :  { %v749_v9 = vpop.f32.mrb[7].mxu1  ;;  %v755_v58 = vadd.f32 %v9418_v8, %v12073_v6  ;;  %v12107_v8 = vld [vmem:[%s14206_s24 + $0x10] sm:$0xff] }
 0x520   :  { %v750_v11 = vadd.f32 %v12073_v6, %v749_v9 }
 0x522   :  { %9461 = vmatprep.mubr.msk.f32.mxu1 %vm466_vm1, %v750_v11  ;;  %v96_v11 = vsel %vm86_vm0, %v12101_v61, 0.0 }
 0x523   :  { %9462 = vmatmul.mubr.msk.f32.vlgmr.msra.gmra.mrb[10].mxu1 %vm466_vm1, %v755_v58  ;;  %v93_v58 = vsel %vm86_vm0, %v12107_v8, 0.0 }
 0x524   :  { %10463 = vmatpush3.bf16.msra.mxu1 %v11721_v16 }
 0x525   :  { %10465 = vmatprep.subr.bf16.mxu1 %v11741_v22 }
 0x528   :  { %10467 = vmatpush3.bf16.msra.mxu1 %v11741_v22 }
 0x529   :  { %10469 = vmatprep.subr.bf16.mxu1 %v11761_v28 }
 0x52c   :  { %10471 = vmatpush3.bf16.msra.mxu1 %v11761_v28 }
 0x52d   :  { %10473 = vmatprep.subr.bf16.mxu1 %v11781_v34 }
 0x52e   :  { %v9456_v12 = vpop.f32.mrb[8].mxu1 }
 0x52f   :  { %v939_v17 = vadd.f32 %v9456_v12, %v12086_v46  ;;  %v933_v18 = vpop.f32.mrb[9].mxu1 }
 0x530   :  { %v934_v21 = vadd.f32 %v12086_v46, %v933_v18  ;;  %10475 = vmatpush3.bf16.msra.mxu1 %v11781_v34 }
 0x531   :  { %10493 = vmatprep.subr.bf16.mxu1 %v11801_v40 }
 0x532   :  { %v10440_v23 = vpack.c.bf16 %v939_v17, %v934_v21 }
 0x534   :  { %10441 = vmatprep.subr.bf16.mxu0 %v10440_v23 }
 0x535   :  { %10443 = vmatpush3.bf16.msra.mxu0 %v10440_v23 }
 0x5f6   :  { %v9463_v24 = vpop.f32.mrb[10].mxu1 }
 0x5f7   :  { %v1030_v26 = vmul.f32 0.17677669, %v9463_v24  ;;  %v1020_v29 = vpop.f32.mrb[11].mxu1 }
 0x5f8   :  { %v1029_v30 = vmul.f32 0.17677669, %v1020_v29 }
 0x5f9   :  { %v1032_v33 = vadd.f32 %v1030_v26, %v11956_v49 }
 0x5fa   :  { %v1031_v35 = vadd.f32 %v1029_v30, %v11961_v53 }
 0x5fb   :  { %v1036_v38 = vsel %vm558_vm3, %v1032_v33, -inf }
 0x5fc   :  { %1037 = vmax.xlane.f32.xlu1 %v1036_v38  ;;  %v1033_v39 = vsel %vm558_vm3, %v1031_v35, -inf }
 0x5fd   :  { %1034 = vmax.xlane.f32.xlu0 %v1033_v39 }
 0x689   :  { %v1038_v43 = vpop.xlane.xlu1 %1037 }
 0x68a   :  { %v1040_v44 = vsub.f32 %v1032_v33, %v1038_v43  ;;  %v1035_v47 = vpop.xlane.xlu0 %1034 }
 0x68b   :  { %v1039_v51 = vsub.f32 %v1031_v35, %v1035_v47 }
 0x68c   :  { %v1043_v55 = vmul.f32 1.442695, %v1040_v44 }
 0x68d   :  { %v1041_v56 = vmul.f32 1.442695, %v1039_v51  ;;  %v8347_v51 = vld [vmem:[%s14167_s10 + $0x20] sm:$0xff] }
 0x68e   :  { %11319 = vpow2.f32 %v1043_v55  ;;  %v8348_v55 = vld [vmem:[%s14167_s10 + $0x28] sm:$0xff] }
 0x68f   :  { %11321 = vpow2.f32 %v1041_v56  ;;  %v8349_v56 = vld [vmem:[%s14167_s10 + $0x30] sm:$0xff] }
 0x698   :  { %v11320_v60 = vpop.eup %11319 }
 0x699   :  { %v11322_v0 = vpop.eup %11321  ;;  %v1048_v2 = vsel %vm558_vm3, %v11320_v60, 0.0 }
 0x69a   :  { %1049 = vadd.xlane.f32.xlu1 %v1048_v2  ;;  %v1045_v9 = vsel %vm558_vm3, %v11322_v0, 0.0  ;;  %v12129_v2 = vpack.c.bf16 %v8348_v55, %v8347_v51 }
 0x69b   :  { %1046 = vadd.xlane.f32.xlu0 %v1045_v9  ;;  %v662_v9 = vld [vmem:[%s14167_s10] sm:$0xff] }
 0x69c   :  { %10445 = vmatprep.subr.bf16.mxu0 %v12129_v2 }
 0x69e   :  { %97 = vadd.xlane.f32.xlu1 %v96_v11  ;;  %v663_v11 = vld [vmem:[%s14167_s10 + $0x8] sm:$0xff] }
 0x69f   :  { %94 = vadd.xlane.f32.xlu0 %v93_v58  ;;  %v12146_v58 = vpack.c.bf16 %v663_v11, %v662_v9 }
 0x727   :  { %v1050_v12 = vpop.xlane.xlu1 %1049 }
 0x728   :  { %11323 = vrcp.f32 %v1050_v12  ;;  %v1047_v17 = vpop.xlane.xlu0 %1046 }
 0x729   :  { %11325 = vrcp.f32 %v1047_v17 }
 0x72b   :  { %v98_v18 = vpop.xlane.xlu1 %97 }
 0x72c   :  { %v109_v21 = vmul.f32 0.015625, %v98_v18  ;;  %v95_v23 = vpop.xlane.xlu0 %94 }
 0x72d   :  { %v108_v24 = vmul.f32 0.015625, %v95_v23 }
 0x72e   :  { %v115_v26 = vsub.f32 %v12101_v61, %v109_v21 }
 0x72f   :  { %v114_v29 = vsub.f32 %v12107_v8, %v108_v24 }
 0x730   :  { %v121_v30 = vmul.f32 %v115_v26, %v115_v26 }
 0x731   :  { %v120_v33 = vmul.f32 %v114_v29, %v114_v29 }
 0x732   :  { %v11324_v35 = vpop.eup %11323  ;;  %v133_v38 = vsel %vm86_vm0, %v121_v30, 0.0 }
 0x733   :  { %v11326_v39 = vpop.eup %11325  ;;  %134 = vadd.xlane.f32.xlu1 %v133_v38  ;;  %v130_v43 = vsel %vm86_vm0, %v120_v33, 0.0  ;;  %v1054_v47 = vmul.f32 %v11324_v35, %v11320_v60  ;;  %v8350_v60 = vld [vmem:[%s14167_s10 + $0x38] sm:$0xff] }
 0x734   :  { %131 = vadd.xlane.f32.xlu0 %v130_v43  ;;  %v1053_v44 = vmul.f32 %v11326_v39, %v11322_v0  ;;  %v12134_v0 = vpack.c.bf16 %v8350_v60, %v8349_v56 }
 0x736   :  { %9468 = vmatprep.mubr.msk.f32.mxu0 %vm558_vm3, %v1053_v44 }
 0x737   :  { %9469 = vmatmul.mubr.msk.f32.vlgmr.msra.gmra.mrb[6].mxu0 %vm558_vm3, %v1054_v47 }
 0x738   :  { %10447 = vmatpush3.bf16.msra.mxu0 %v12129_v2 }
 0x739   :  { %10449 = vmatprep.subr.bf16.mxu0 %v12134_v0 }
 0x73c   :  { %10451 = vmatpush3.bf16.msra.mxu0 %v12134_v0 }
 0x73d   :  { %10453 = vmatprep.subr.bf16.mxu0 %v12146_v58 }
 0x7c0   :  { %v135_v12 = vpop.xlane.xlu1 %134 }
 0x7c1   :  { %v145_v17 = vmul.f32 0.015625, %v135_v12  ;;  %v132_v18 = vpop.xlane.xlu0 %131 }
 0x7c2   :  { %v144_v21 = vmul.f32 0.015625, %v132_v18 }
 0x7c3   :  { %v151_v23 = vadd.f32 1e-05, %v145_v17 }
 0x7c4   :  { %v150_v24 = vadd.f32 1e-05, %v144_v21 }
 0x7c5   :  { %11327 = vrsqrt.f32 %v151_v23 }
 0x7c6   :  { %11329 = vrsqrt.f32 %v150_v24 }
 0x7cf   :  { %v11328_v30 = vpop.eup %11327 }
 0x7d0   :  { %v11330_v33 = vpop.eup %11329  ;;  %v163_v35 = vmul.f32 %v11328_v30, %v115_v26  ;;  %v664_v26 = vld [vmem:[%s14167_s10 + $0x10] sm:$0xff] }
 0x7d1   :  { %v162_v38 = vmul.f32 %v11330_v33, %v114_v29  ;;  %v665_v29 = vld [vmem:[%s14167_s10 + $0x18] sm:$0xff] }
 0x7d2   :  { %v175_v39 = vmul.f32 %v11807_v48, %v163_v35  ;;  %v12178_v56 = vpack.c.bf16 %v665_v29, %v664_v26 }
 0x7d3   :  { %v174_v43 = vmul.f32 %v11807_v48, %v162_v38 }
 0x7d4   :  { %v12155_v47 = vadd.f32 %v11813_v50, %v175_v39 }
 0x7d5   :  { %v12152_v44 = vadd.f32 %v11813_v50, %v174_v43 }
 0x7d7   :  { %9509 = vmatprep.mubr.msk.f32.mxu1 %vm86_vm0, %v12152_v44 }
 0x7d8   :  { %9510 = vmatmul.mubr.msk.f32.vlgmr.msra.gmra.mrb[12].mxu1 %vm86_vm0, %v12155_v47 }
 0x7d9   :  { %10495 = vmatpush3.bf16.msra.mxu1 %v11801_v40  ;;  %9547 = vmatprep.mubr.msk.f32.mxu1 %vm86_vm0, %v12152_v44 }
 0x7da   :  { %10497 = vmatprep.subr.bf16.mxu1 %v11834_v59 }
 0x7dd   :  { %10499 = vmatpush3.bf16.msra.mxu1 %v11834_v59 }
 0x7de   :  { %10501 = vmatprep.subr.bf16.mxu1 %v11850_v62 }
 0x7e1   :  { %10503 = vmatpush3.bf16.msra.mxu1 %v11850_v62 }
 0x7e2   :  { %10505 = vmatprep.subr.bf16.mxu1 %v11860_v1 }
 0x7e5   :  { %10507 = vmatpush3.bf16.msra.mxu1 %v11860_v1 }
 0x7e8   :  { %9548 = vmatmul.mubr.msk.f32.vlgmr.msra.gmra.mrb[14].mxu1 %vm86_vm0, %v12155_v47 }
 0x80a   :  { %v9470_v51 = vpop.f32.mrb[6].mxu0 }
 0x80b   :  { %v1127_v55 = vpop.f32.mrb[7].mxu0 }
 0x80c   :  { %9479 = vmatprep.mubr.msk.f32.mxu0 %vm466_vm1, %v1127_v55 }
 0x80d   :  { %9480 = vmatmul.mubr.msk.f32.vlgmr.msra.gmra.mrb[8].mxu0 %vm466_vm1, %v9470_v51 }
 0x80e   :  { %10455 = vmatpush3.bf16.msra.mxu0 %v12146_v58  ;;  %9490 = vmatprep.mubr.msk.f32.mxu0 %vm466_vm1, %v12068_v5 }
 0x80f   :  { %10457 = vmatprep.subr.bf16.mxu0 %v12178_v56 }
 0x812   :  { %10459 = vmatpush3.bf16.msra.mxu0 %v12178_v56 }
 0x813   :  { %10477 = vmatprep.subr.bf16.mxu0 %v11729_v19 }
 0x815   :  { %9491 = vmatmul.mubr.msk.f32.vlgmr.msra.gmra.mrb[8].mxu0 %vm466_vm1, %v12066_v54 }
 0x816   :  { %10479 = vmatpush3.bf16.msra.mxu0 %v11729_v19  ;;  %9528 = vmatprep.mubr.msk.f32.mxu0 %vm86_vm0, %v12152_v44 }
 0x817   :  { %10481 = vmatprep.subr.bf16.mxu0 %v11749_v25 }
 0x81a   :  { %10483 = vmatpush3.bf16.msra.mxu0 %v11749_v25 }
 0x81b   :  { %10485 = vmatprep.subr.bf16.mxu0 %v11769_v31 }
 0x81e   :  { %10487 = vmatpush3.bf16.msra.mxu0 %v11769_v31 }
 0x81f   :  { %10489 = vmatprep.subr.bf16.mxu0 %v11789_v37 }
 0x822   :  { %10491 = vmatpush3.bf16.msra.mxu0 %v11789_v37 }
 0x825   :  { %9529 = vmatmul.mubr.msk.f32.vlgmr.msra.gmra.mrb[10].mxu0 %vm86_vm0, %v12155_v47 }
 0x8ab   :  { %v9511_v54 = vpop.f32.mrb[12].mxu1 }
 0x8ac   :  { %v1375_v5 = vpop.f32.mrb[13].mxu1  ;;  %v1381_v39 = vadd.f32 %v9511_v54, %v11919_v15 }
 0x8ad   :  { %v1376_v60 = vadd.f32 %v11919_v15, %v1375_v5 }
 0x8af   :  { %9554 = vmatprep.mubr.msk.f32.mxu0 %vm466_vm1, %v1376_v60 }
 0x8bb   :  { %v9549_v9 = vpop.f32.mrb[14].mxu1 }
 0x8bc   :  { %v1531_v11 = vadd.f32 %v9549_v9, %v11940_v32  ;;  %v1525_v12 = vpop.f32.mrb[15].mxu1 }
 0x8bd   :  { %v1526_v17 = vadd.f32 %v11940_v32, %v1525_v12 }
 0x8bf   :  { %v10514_v18 = vpack.c.bf16 %v1531_v11, %v1526_v17 }
 0x8c1   :  { %10515 = vmatprep.subr.bf16.mxu1 %v10514_v18 }
 0x8c2   :  { %10517 = vmatpush3.bf16.msra.mxu1 %v10514_v18 }
 0x8c3   :  { %10519 = vmatprep.subr.bf16.mxu1 %v11975_v20 }
 0x8e8   :  { %v12206_v21 = vpop.f32.mrb[8].mxu0 }
 0x8e9   :  { %v12208_v23 = vpop.f32.mrb[9].mxu0 }
 0x8f8   :  { %v9530_v24 = vpop.f32.mrb[10].mxu0 }
 0x8f9   :  { %v1456_v30 = vadd.f32 %v9530_v24, %v11914_v14  ;;  %v1450_v33 = vpop.f32.mrb[11].mxu0 }
 0x8fa   :  { %v1451_v35 = vadd.f32 %v11914_v14, %v1450_v33 }
 0x8fc   :  { %v10508_v38 = vpack.c.bf16 %v1456_v30, %v1451_v35 }
 0x8fe   :  { %10510 = vmatprep.subr.msk.bf16.mxu0 %vm11926_vm2, %v10508_v38 }
 0x8ff   :  { %10513 = vmatpush3.bf16.xpose.msk.msra.mxu0 %vm11926_vm2, %v10508_v38 }
 0x900   :  { %10535 = vmatprep.subr.bf16.mxu0 %v11870_v4 }
 0x906   :  { %9555 = vmatmul.mubr.msk.f32.vlgmr.msra.gmra.mrb[12].mxu0 %vm466_vm1, %v1381_v39 }
 0x907   :  { %10537 = vmatpush3.bf16.msra.mxu0 %v11870_v4  ;;  %9599 = vmatprep.mubr.msk.f32.mxu0 %vm86_vm0, %v12152_v44 }
 0x908   :  { %10539 = vmatprep.subr.bf16.mxu0 %v11880_v7 }
 0x90b   :  { %10541 = vmatpush3.bf16.msra.mxu0 %v11880_v7 }
 0x90c   :  { %10543 = vmatprep.subr.bf16.mxu0 %v11894_v10 }
 0x90f   :  { %10545 = vmatpush3.bf16.msra.mxu0 %v11894_v10 }
 0x910   :  { %10547 = vmatprep.subr.bf16.mxu0 %v11904_v13 }
 0x913   :  { %10549 = vmatpush3.bf16.msra.mxu0 %v11904_v13 }
 0x916   :  { %9600 = vmatmul.mubr.msk.f32.vlgmr.msra.gmra.mrb[14].mxu0 %vm86_vm0, %v12155_v47 }
 0x9d9   :  { %v9556_v43 = vpop.f32.mrb[12].mxu0 }
 0x9da   :  { %v1622_v26 = vmul.f32 0.17677669, %v9556_v43  ;;  %v1612_v29 = vpop.f32.mrb[13].mxu0 }
 0x9db   :  { %v1621_v51 = vmul.f32 0.17677669, %v1612_v29 }
 0x9dc   :  { %v1624_v55 = vadd.f32 %v1622_v26, %v11956_v49 }
 0x9dd   :  { %v1623_v54 = vadd.f32 %v1621_v51, %v11961_v53 }
 0x9de   :  { %v1628_v5 = vsel %vm558_vm3, %v1624_v55, -inf }
 0x9df   :  { %1629 = vmax.xlane.f32.xlu1 %v1628_v5  ;;  %v1625_v60 = vsel %vm558_vm3, %v1623_v54, -inf }
 0x9e0   :  { %1626 = vmax.xlane.f32.xlu0 %v1625_v60 }
 0x9e9   :  { %v9601_v9 = vpop.f32.mrb[14].mxu0 }
 0x9ea   :  { %v1875_v11 = vadd.f32 %v9601_v9, %v11947_v41  ;;  %v1869_v12 = vpop.f32.mrb[15].mxu0 }
 0x9eb   :  { %v1870_v17 = vadd.f32 %v11947_v41, %v1869_v12 }
 0x9ed   :  { %v10566_v18 = vpack.c.bf16 %v1875_v11, %v1870_v17 }
 0x9ef   :  { %10568 = vmatprep.subr.msk.bf16.mxu0 %vm11926_vm2, %v10566_v18 }
 0x9f0   :  { %10571 = vmatpush3.bf16.xpose.msk.msra.mxu0 %vm11926_vm2, %v10566_v18 }
 0xa6c   :  { %v1630_v24 = vpop.xlane.xlu1 %1629 }
 0xa6d   :  { %v1632_v30 = vsub.f32 %v1624_v55, %v1630_v24  ;;  %v1627_v33 = vpop.xlane.xlu0 %1626 }
 0xa6e   :  { %v1631_v35 = vsub.f32 %v1623_v54, %v1627_v33 }
 0xa6f   :  { %v1635_v38 = vmul.f32 1.442695, %v1632_v30 }
 0xa70   :  { %v1633_v39 = vmul.f32 1.442695, %v1631_v35 }
 0xa71   :  { %11331 = vpow2.f32 %v1635_v38 }
 0xa72   :  { %11333 = vpow2.f32 %v1633_v39 }
 0xa7b   :  { %v11332_v43 = vpop.eup %11331 }
 0xa7c   :  { %v11334_v26 = vpop.eup %11333  ;;  %v1640_v29 = vsel %vm558_vm3, %v11332_v43, 0.0 }
 0xa7d   :  { %1641 = vadd.xlane.f32.xlu1 %v1640_v29  ;;  %v1637_v51 = vsel %vm558_vm3, %v11334_v26, 0.0 }
 0xa7e   :  { %1638 = vadd.xlane.f32.xlu0 %v1637_v51 }
 0xb0a   :  { %v1642_v5 = vpop.xlane.xlu1 %1641 }
 0xb0b   :  { %11335 = vrcp.f32 %v1642_v5  ;;  %v1639_v60 = vpop.xlane.xlu0 %1638 }
 0xb0c   :  { %11337 = vrcp.f32 %v1639_v60 }
 0xb15   :  { %v11336_v9 = vpop.eup %11335 }
 0xb16   :  { %v11338_v55 = vpop.eup %11337  ;;  %v1646_v54 = vmul.f32 %v11336_v9, %v11332_v43 }
 0xb17   :  { %v1645_v11 = vmul.f32 %v11338_v55, %v11334_v26 }
 0xb19   :  { %9561 = vmatprep.mubr.msk.f32.mxu1 %vm558_vm3, %v1645_v11 }
 0xb1a   :  { %9562 = vmatmul.mubr.msk.f32.vlgmr.msra.gmra.mrb[16].mxu1 %vm558_vm3, %v1646_v54 }
 0xb1b   :  { %10521 = vmatpush3.bf16.msra.mxu1 %v11975_v20  ;;  %9580 = vmatprep.mubr.msk.f32.mxu1 %vm86_vm0, %v12152_v44 }
 0xb1c   :  { %10523 = vmatprep.subr.bf16.mxu1 %v11984_v36 }
 0xb1f   :  { %10525 = vmatpush3.bf16.msra.mxu1 %v11984_v36 }
 0xb20   :  { %10527 = vmatprep.subr.bf16.mxu1 %v11998_v42 }
 0xb23   :  { %10529 = vmatpush3.bf16.msra.mxu1 %v11998_v42 }
 0xb24   :  { %10531 = vmatprep.subr.bf16.mxu1 %v12008_v45 }
 0xb27   :  { %10533 = vmatpush3.bf16.msra.mxu1 %v12008_v45 }
 0xb28   :  { %10551 = vmatprep.subr.bf16.mxu1 %v12018_v52 }
 0xb2a   :  { %9581 = vmatmul.mubr.msk.f32.vlgmr.msra.gmra.mrb[18].mxu1 %vm86_vm0, %v12155_v47 }
 0xb2b   :  { %10553 = vmatpush3.bf16.msra.mxu1 %v12018_v52  ;;  %9618 = vmatprep.mubr.msk.f32.mxu1 %vm86_vm0, %v12152_v44 }
 0xb2c   :  { %10555 = vmatprep.subr.bf16.mxu1 %v12028_v57 }
 0xb2f   :  { %10557 = vmatpush3.bf16.msra.mxu1 %v12028_v57 }
 0xb30   :  { %10559 = vmatprep.subr.bf16.mxu1 %v12042_v63 }
 0xb33   :  { %10561 = vmatpush3.bf16.msra.mxu1 %v12042_v63 }
 0xb34   :  { %10563 = vmatprep.subr.bf16.mxu1 %v12052_v3 }
 0xb37   :  { %10565 = vmatpush3.bf16.msra.mxu1 %v12052_v3 }
 0xb38   :  { %10593 = vmatprep.subr.bf16.mxu1 %v11721_v16 }
 0xb3a   :  { %9619 = vmatmul.mubr.msk.f32.vlgmr.msra.gmra.mrb[20].mxu1 %vm86_vm0, %v12155_v47 }
 0xb3b   :  { %10595 = vmatpush3.bf16.msra.mxu1 %v11721_v16 }
 0xb3c   :  { %10597 = vmatprep.subr.bf16.mxu1 %v11741_v22 }
 0xb3f   :  { %10599 = vmatpush3.bf16.msra.mxu1 %v11741_v22 }
 0xb40   :  { %10601 = vmatprep.subr.bf16.mxu1 %v11761_v28 }
 0xb43   :  { %10603 = vmatpush3.bf16.msra.mxu1 %v11761_v28 }
 0xb44   :  { %10605 = vmatprep.subr.bf16.mxu1 %v11781_v34 }
 0xb47   :  { %10607 = vmatpush3.bf16.msra.mxu1 %v11781_v34 }
 0xb48   :  { %10625 = vmatprep.subr.bf16.mxu1 %v11801_v40 }
 0xbed   :  { %v12276_v44 = vpop.f32.mrb[16].mxu1 }
 0xbee   :  { %v12278_v12 = vpop.f32.mrb[17].mxu1 }
 0xbfd   :  { %v9582_v47 = vpop.f32.mrb[18].mxu1 }
 0xbfe   :  { %v1794_v16 = vpop.f32.mrb[19].mxu1  ;;  %v1800_v22 = vadd.f32 %v9582_v47, %v12073_v6 }
 0xbff   :  { %v1795_v17 = vadd.f32 %v12073_v6, %v1794_v16  ;;  %v12294_v16 = vld [vmem:[%s14206_s24 + $0x28] sm:$0xff] }
 0xc01   :  { %9625 = vmatprep.mubr.msk.f32.mxu0 %vm466_vm1, %v1795_v17 }
 0xc02   :  { %9626 = vmatmul.mubr.msk.f32.vlgmr.msra.gmra.mrb[16].mxu0 %vm466_vm1, %v1800_v22 }
 0xc0d   :  { %v9620_v28 = vpop.f32.mrb[20].mxu1 }
 0xc0e   :  { %v1950_v18 = vadd.f32 %v9620_v28, %v12086_v46  ;;  %v1944_v34 = vpop.f32.mrb[21].mxu1  ;;  %v12300_v28 = vld [vmem:[%s14206_s24 + $0x20] sm:$0xff] }
 0xc0f   :  { %v1945_v24 = vadd.f32 %v12086_v46, %v1944_v34  ;;  %v102_v34 = vsel %vm86_vm0, %v12294_v16, 0.0 }
 0xc11   :  { %v10572_v30 = vpack.c.bf16 %v1950_v18, %v1945_v24  ;;  %v99_v24 = vsel %vm86_vm0, %v12300_v28, 0.0 }
 0xc13   :  { %10573 = vmatprep.subr.bf16.mxu0 %v10572_v30 }
 0xc14   :  { %10575 = vmatpush3.bf16.msra.mxu0 %v10572_v30 }
 0xc15   :  { %10577 = vmatprep.subr.bf16.mxu0 %v12129_v2 }
 0xcd5   :  { %v9627_v33 = vpop.f32.mrb[16].mxu0 }
 0xcd6   :  { %v2041_v35 = vmul.f32 0.17677669, %v9627_v33  ;;  %v2031_v38 = vpop.f32.mrb[17].mxu0 }
 0xcd7   :  { %v2040_v39 = vmul.f32 0.17677669, %v2031_v38 }
 0xcd8   :  { %v2043_v43 = vadd.f32 %v2041_v35, %v11956_v49 }
 0xcd9   :  { %v2042_v26 = vadd.f32 %v2040_v39, %v11961_v53 }
 0xcda   :  { %v2047_v29 = vsel %vm558_vm3, %v2043_v43, -inf }
 0xcdb   :  { %2048 = vmax.xlane.f32.xlu1 %v2047_v29  ;;  %v2044_v51 = vsel %vm558_vm3, %v2042_v26, -inf }
 0xcdc   :  { %2045 = vmax.xlane.f32.xlu0 %v2044_v51 }
 0xd68   :  { %v2049_v5 = vpop.xlane.xlu1 %2048 }
 0xd69   :  { %v2051_v60 = vsub.f32 %v2043_v43, %v2049_v5  ;;  %v2046_v9 = vpop.xlane.xlu0 %2045 }
 0xd6a   :  { %v2050_v55 = vsub.f32 %v2042_v26, %v2046_v9 }
 0xd6b   :  { %v2054_v11 = vmul.f32 1.442695, %v2051_v60 }
 0xd6c   :  { %v2052_v54 = vmul.f32 1.442695, %v2050_v55 }
 0xd6d   :  { %11339 = vpow2.f32 %v2054_v11 }
 0xd6e   :  { %11341 = vpow2.f32 %v2052_v54 }
 0xd77   :  { %v11340_v47 = vpop.eup %11339 }
 0xd78   :  { %v11342_v17 = vpop.eup %11341  ;;  %v2059_v22 = vsel %vm558_vm3, %v11340_v47, 0.0 }
 0xd79   :  { %2060 = vadd.xlane.f32.xlu1 %v2059_v22  ;;  %v2056_v18 = vsel %vm558_vm3, %v11342_v17, 0.0 }
 0xd7a   :  { %2057 = vadd.xlane.f32.xlu0 %v2056_v18 }
 0xd7d   :  { %103 = vadd.xlane.f32.xlu1 %v102_v34 }
 0xd7e   :  { %100 = vadd.xlane.f32.xlu0 %v99_v24 }
 0xe06   :  { %v2061_v30 = vpop.xlane.xlu1 %2060 }
 0xe07   :  { %11343 = vrcp.f32 %v2061_v30  ;;  %v2058_v33 = vpop.xlane.xlu0 %2057 }
 0xe08   :  { %11345 = vrcp.f32 %v2058_v33 }
 0xe0a   :  { %v104_v35 = vpop.xlane.xlu1 %103 }
 0xe0b   :  { %v111_v38 = vmul.f32 0.015625, %v104_v35  ;;  %v101_v39 = vpop.xlane.xlu0 %100 }
 0xe0c   :  { %v110_v43 = vmul.f32 0.015625, %v101_v39 }
 0xe0d   :  { %v117_v26 = vsub.f32 %v12294_v16, %v111_v38 }
 0xe0e   :  { %v116_v29 = vsub.f32 %v12300_v28, %v110_v43 }
 0xe0f   :  { %v123_v51 = vmul.f32 %v117_v26, %v117_v26 }
 0xe10   :  { %v122_v5 = vmul.f32 %v116_v29, %v116_v29 }
 0xe11   :  { %v11344_v60 = vpop.eup %11343  ;;  %v139_v9 = vsel %vm86_vm0, %v123_v51, 0.0 }
 0xe12   :  { %v11346_v55 = vpop.eup %11345  ;;  %140 = vadd.xlane.f32.xlu1 %v139_v9  ;;  %v136_v11 = vsel %vm86_vm0, %v122_v5, 0.0  ;;  %v2065_v22 = vmul.f32 %v11344_v60, %v11340_v47 }
 0xe13   :  { %137 = vadd.xlane.f32.xlu0 %v136_v11  ;;  %v2064_v54 = vmul.f32 %v11346_v55, %v11342_v17 }
 0xe15   :  { %9632 = vmatprep.mubr.msk.f32.mxu0 %vm558_vm3, %v2064_v54 }
 0xe16   :  { %9633 = vmatmul.mubr.msk.f32.vlgmr.msra.gmra.mrb[18].mxu0 %vm558_vm3, %v2065_v22 }
 0xe17   :  { %10579 = vmatpush3.bf16.msra.mxu0 %v12129_v2 }
 0xe18   :  { %10581 = vmatprep.subr.bf16.mxu0 %v12134_v0 }
 0xe1b   :  { %10583 = vmatpush3.bf16.msra.mxu0 %v12134_v0 }
 0xe1c   :  { %10585 = vmatprep.subr.bf16.mxu0 %v12146_v58 }
 0xe9f   :  { %v141_v18 = vpop.xlane.xlu1 %140 }
 0xea0   :  { %v147_v34 = vmul.f32 0.015625, %v141_v18  ;;  %v138_v24 = vpop.xlane.xlu0 %137 }
 0xea1   :  { %v146_v30 = vmul.f32 0.015625, %v138_v24 }
 0xea2   :  { %v153_v33 = vadd.f32 1e-05, %v147_v34 }
 0xea3   :  { %v152_v35 = vadd.f32 1e-05, %v146_v30 }
 0xea4   :  { %11347 = vrsqrt.f32 %v153_v33 }
 0xea5   :  { %11349 = vrsqrt.f32 %v152_v35 }
 0xeae   :  { %v11348_v47 = vpop.eup %11347 }
 0xeaf   :  { %v11350_v17 = vpop.eup %11349  ;;  %v165_v38 = vmul.f32 %v11348_v47, %v117_v26 }
 0xeb0   :  { %v164_v39 = vmul.f32 %v11350_v17, %v116_v29 }
 0xeb1   :  { %v177_v43 = vmul.f32 %v11807_v48, %v165_v38 }
 0xeb2   :  { %v176_v51 = vmul.f32 %v11807_v48, %v164_v39 }
 0xeb3   :  { %v12323_v60 = vadd.f32 %v11813_v50, %v177_v43 }
 0xeb4   :  { %v12320_v5 = vadd.f32 %v11813_v50, %v176_v51 }
 0xeb6   :  { %9673 = vmatprep.mubr.msk.f32.mxu1 %vm86_vm0, %v12320_v5 }
 0xeb7   :  { %9674 = vmatmul.mubr.msk.f32.vlgmr.msra.gmra.mrb[22].mxu1 %vm86_vm0, %v12323_v60 }
 0xeb8   :  { %10627 = vmatpush3.bf16.msra.mxu1 %v11801_v40  ;;  %9711 = vmatprep.mubr.msk.f32.mxu1 %vm86_vm0, %v12320_v5 }
 0xeb9   :  { %10629 = vmatprep.subr.bf16.mxu1 %v11834_v59 }
 0xebc   :  { %10631 = vmatpush3.bf16.msra.mxu1 %v11834_v59 }
 0xebd   :  { %10633 = vmatprep.subr.bf16.mxu1 %v11850_v62 }
 0xec0   :  { %10635 = vmatpush3.bf16.msra.mxu1 %v11850_v62 }
 0xec1   :  { %10637 = vmatprep.subr.bf16.mxu1 %v11860_v1 }
 0xec4   :  { %10639 = vmatpush3.bf16.msra.mxu1 %v11860_v1 }
 0xec7   :  { %9712 = vmatmul.mubr.msk.f32.vlgmr.msra.gmra.mrb[24].mxu1 %vm86_vm0, %v12323_v60 }
 0xee9   :  { %v9634_v48 = vpop.f32.mrb[18].mxu0 }
 0xeea   :  { %v2138_v40 = vpop.f32.mrb[19].mxu0 }
 0xeeb   :  { %9643 = vmatprep.mubr.msk.f32.mxu0 %vm466_vm1, %v2138_v40 }
 0xeec   :  { %9644 = vmatmul.mubr.msk.f32.vlgmr.msra.gmra.mrb[20].mxu0 %vm466_vm1, %v9634_v48 }
 0xeed   :  { %10587 = vmatpush3.bf16.msra.mxu0 %v12146_v58  ;;  %9654 = vmatprep.mubr.msk.f32.mxu0 %vm466_vm1, %v12278_v12 }
 0xeee   :  { %10589 = vmatprep.subr.bf16.mxu0 %v12178_v56 }
 0xef1   :  { %10591 = vmatpush3.bf16.msra.mxu0 %v12178_v56 }
 0xef2   :  { %10609 = vmatprep.subr.bf16.mxu0 %v11729_v19 }
 0xef4   :  { %9655 = vmatmul.mubr.msk.f32.vlgmr.msra.gmra.mrb[20].mxu0 %vm466_vm1, %v12276_v44 }
 0xef5   :  { %10611 = vmatpush3.bf16.msra.mxu0 %v11729_v19  ;;  %9692 = vmatprep.mubr.msk.f32.mxu0 %vm86_vm0, %v12320_v5 }
 0xef6   :  { %10613 = vmatprep.subr.bf16.mxu0 %v11749_v25 }
 0xef9   :  { %10615 = vmatpush3.bf16.msra.mxu0 %v11749_v25 }
 0xefa   :  { %10617 = vmatprep.subr.bf16.mxu0 %v11769_v31 }
 0xefd   :  { %10619 = vmatpush3.bf16.msra.mxu0 %v11769_v31 }
 0xefe   :  { %10621 = vmatprep.subr.bf16.mxu0 %v11789_v37 }
 0xf01   :  { %10623 = vmatpush3.bf16.msra.mxu0 %v11789_v37 }
 0xf04   :  { %9693 = vmatmul.mubr.msk.f32.vlgmr.msra.gmra.mrb[22].mxu0 %vm86_vm0, %v12323_v60 }
 0xf8a   :  { %v9675_v50 = vpop.f32.mrb[22].mxu1 }
 0xf8b   :  { %v2381_v19 = vpop.f32.mrb[23].mxu1 }
 0xf8c   :  { %v2382_v59 = vadd.f32 %v11919_v15, %v2381_v19 }
 0xf8e   :  { %9718 = vmatprep.mubr.msk.f32.mxu0 %vm466_vm1, %v2382_v59 }
 0xf9a   :  { %v9713_v62 = vpop.f32.mrb[24].mxu1 }
 0xf9b   :  { %v2537_v25 = vadd.f32 %v9713_v62, %v11940_v32  ;;  %v2531_v1 = vpop.f32.mrb[25].mxu1 }
 0xf9c   :  { %v2532_v44 = vadd.f32 %v11940_v32, %v2531_v1  ;;  %v2387_v32 = vadd.f32 %v9675_v50, %v11919_v15  ;;  %v12441_v1 = vld [vmem:[%s14168_s11] ss:$0 sm:$0xff] }
 0xf9e   :  { %v10646_v31 = vpack.c.bf16 %v2537_v25, %v2532_v44  ;;  %v3323_v44 = vadd.f32 %v12206_v21, %v12441_v1  ;;  %v11565_v21 = vld [vmem:[%s14206_s24 + $0x8] sm:$0xff] }
 0xfa0   :  { %10647 = vmatprep.subr.bf16.mxu1 %v10646_v31 }
 0xfa1   :  { %10649 = vmatpush3.bf16.msra.mxu1 %v10646_v31 }
 0xfa2   :  { %10651 = vmatprep.subr.bf16.mxu1 %v11975_v20 }
 0xfc7   :  { %v12366_v37 = vpop.f32.mrb[20].mxu0 }
 0xfc8   :  { %v12368_v12 = vpop.f32.mrb[21].mxu0 }
 0xfd7   :  { %v9694_v26 = vpop.f32.mrb[22].mxu0 }
 0xfd8   :  { %v2462_v29 = vadd.f32 %v9694_v26, %v11914_v14  ;;  %v2456_v9 = vpop.f32.mrb[23].mxu0 }
 0xfd9   :  { %v2457_v55 = vadd.f32 %v11914_v14, %v2456_v9  ;;  %v11563_v9 = vld [vmem:[%s14166_s1 + $0x8] sm:$0xff] }
 0xfdb   :  { %v10640_v11 = vpack.c.bf16 %v2462_v29, %v2457_v55  ;;  %v3322_v29 = vadd.f32 %v12441_v1, %v12208_v23  ;;  %v11566_v23 = vld [vmem:[%s14206_s24] sm:$0xff] }
 0xfdd   :  { %10642 = vmatprep.subr.msk.bf16.mxu0 %vm11926_vm2, %v10640_v11 }
 0xfde   :  { %10645 = vmatpush3.bf16.xpose.msk.msra.mxu0 %vm11926_vm2, %v10640_v11  ;;  %v11564_v11 = vld [vmem:[%s14166_s1] sm:$0xff] }
 0xfdf   :  { %10667 = vmatprep.subr.bf16.mxu0 %v11870_v4 }
 0xfe5   :  { %9719 = vmatmul.mubr.msk.f32.vlgmr.msra.gmra.mrb[24].mxu0 %vm466_vm1, %v2387_v32 }
 0xfe6   :  { %10669 = vmatpush3.bf16.msra.mxu0 %v11870_v4  ;;  %9763 = vmatprep.mubr.msk.f32.mxu0 %vm86_vm0, %v12320_v5 }
 0xfe7   :  { %10671 = vmatprep.subr.bf16.mxu0 %v11880_v7 }
 0xfea   :  { %10673 = vmatpush3.bf16.msra.mxu0 %v11880_v7 }
 0xfeb   :  { %10675 = vmatprep.subr.bf16.mxu0 %v11894_v10 }
 0xfee   :  { %10677 = vmatpush3.bf16.msra.mxu0 %v11894_v10 }
 0xfef   :  { %10679 = vmatprep.subr.bf16.mxu0 %v11904_v13 }
 0xff2   :  { %10681 = vmatpush3.bf16.msra.mxu0 %v11904_v13 }
 0xff5   :  { %9764 = vmatmul.mubr.msk.f32.vlgmr.msra.gmra.mrb[26].mxu0 %vm86_vm0, %v12323_v60 }
0x10b8   :  { %v9720_v14 = vpop.f32.mrb[24].mxu0 }
0x10b9   :  { %v2628_v4 = vmul.f32 0.17677669, %v9720_v14  ;;  %v2618_v15 = vpop.f32.mrb[25].mxu0  ;;  %v12456_v14 = vadd.f32 %v11565_v21, %v3323_v44 }
0x10ba   :  { %v2627_v54 = vmul.f32 0.17677669, %v2618_v15  ;;  %v12462_v15 = vadd.f32 %v11566_v23, %v3322_v29  ;;  %v3452_v23 = vld [vmem:[%s14169_s14 + $0x70] sm:$0xff] }
0x10bb   :  { %v2630_v22 = vadd.f32 %v2628_v4, %v11956_v49 }
0x10bc   :  { %v2629_v18 = vadd.f32 %v2627_v54, %v11961_v53 }
0x10bd   :  { %v2634_v7 = vsel %vm558_vm3, %v2630_v22, -inf }
0x10be   :  { %2635 = vmax.xlane.f32.xlu1 %v2634_v7  ;;  %v2631_v10 = vsel %vm558_vm3, %v2629_v18, -inf }
0x10bf   :  { %2632 = vmax.xlane.f32.xlu0 %v2631_v10 }
0x10c8   :  { %v9765_v34 = vpop.f32.mrb[26].mxu0 }
0x10c9   :  { %v2881_v13 = vadd.f32 %v9765_v34, %v11947_v41  ;;  %v2875_v24 = vpop.f32.mrb[27].mxu0 }
0x10ca   :  { %v2876_v30 = vadd.f32 %v11947_v41, %v2875_v24 }
0x10cc   :  { %v10698_v33 = vpack.c.bf16 %v2881_v13, %v2876_v30 }
0x10ce   :  { %10700 = vmatprep.subr.msk.bf16.mxu0 %vm11926_vm2, %v10698_v33 }
0x10cf   :  { %10703 = vmatpush3.bf16.xpose.msk.msra.mxu0 %vm11926_vm2, %v10698_v33 }
0x114b   :  { %v2636_v49 = vpop.xlane.xlu1 %2635 }
0x114c   :  { %v2638_v53 = vsub.f32 %v2630_v22, %v2636_v49  ;;  %v2633_v35 = vpop.xlane.xlu0 %2632  ;;  %v3339_v22 = vsel %vm86_vm0, %v12456_v14, 0.0 }
0x114d   :  { %v2637_v47 = vsub.f32 %v2629_v18, %v2633_v35  ;;  %v3336_v18 = vsel %vm86_vm0, %v12462_v15, 0.0 }
0x114e   :  { %v2641_v17 = vmul.f32 1.442695, %v2638_v53 }
0x114f   :  { %v2639_v38 = vmul.f32 1.442695, %v2637_v47 }
0x1150   :  { %11351 = vpow2.f32 %v2641_v17 }
0x1151   :  { %11353 = vpow2.f32 %v2639_v38 }
0x115a   :  { %v11352_v39 = vpop.eup %11351 }
0x115b   :  { %v11354_v43 = vpop.eup %11353  ;;  %v2646_v51 = vsel %vm558_vm3, %v11352_v39, 0.0 }
0x115c   :  { %2647 = vadd.xlane.f32.xlu1 %v2646_v51  ;;  %v2643_v41 = vsel %vm558_vm3, %v11354_v43, 0.0 }
0x115d   :  { %2644 = vadd.xlane.f32.xlu0 %v2643_v41 }
0x11e9   :  { %v2648_v48 = vpop.xlane.xlu1 %2647 }
0x11ea   :  { %11355 = vrcp.f32 %v2648_v48  ;;  %v2645_v40 = vpop.xlane.xlu0 %2644 }
0x11eb   :  { %11357 = vrcp.f32 %v2645_v40 }
0x11f4   :  { %v11356_v50 = vpop.eup %11355 }
0x11f5   :  { %v11358_v19 = vpop.eup %11357  ;;  %v2652_v62 = vmul.f32 %v11356_v50, %v11352_v39  ;;  %v3325_v39 = vadd.f32 %v12366_v37, %v12441_v1  ;;  %v3324_v50 = vadd.f32 %v12441_v1, %v12368_v12 }
0x11f6   :  { %v2651_v59 = vmul.f32 %v11358_v19, %v11354_v43 }
0x11f7   :  { %v12485_v48 = vadd.f32 %v3325_v39, %v12101_v61 }
0x11f8   :  { %9725 = vmatprep.mubr.msk.f32.mxu1 %vm558_vm3, %v2651_v59 }
0x11f9   :  { %9726 = vmatmul.mubr.msk.f32.vlgmr.msra.gmra.mrb[26].mxu1 %vm558_vm3, %v2652_v62  ;;  %v3345_v59 = vsel %vm86_vm0, %v12485_v48, 0.0  ;;  %v12497_v62 = vadd.f32 %v3324_v50, %v12107_v8  ;;  %v3438_v8 = vld [vmem:[%s14169_s14] sm:$0xff] }
0x11fa   :  { %10653 = vmatpush3.bf16.msra.mxu1 %v11975_v20  ;;  %9744 = vmatprep.mubr.msk.f32.mxu1 %vm86_vm0, %v12320_v5 }
0x11fb   :  { %10655 = vmatprep.subr.bf16.mxu1 %v11984_v36  ;;  %v3342_v12 = vsel %vm86_vm0, %v12497_v62, 0.0 }
0x11fe   :  { %10657 = vmatpush3.bf16.msra.mxu1 %v11984_v36 }
0x11ff   :  { %10659 = vmatprep.subr.bf16.mxu1 %v11998_v42 }
0x1202   :  { %10661 = vmatpush3.bf16.msra.mxu1 %v11998_v42 }
0x1203   :  { %10663 = vmatprep.subr.bf16.mxu1 %v12008_v45 }
0x1206   :  { %10665 = vmatpush3.bf16.msra.mxu1 %v12008_v45 }
0x1207   :  { %10683 = vmatprep.subr.bf16.mxu1 %v12018_v52 }
0x1209   :  { %9745 = vmatmul.mubr.msk.f32.vlgmr.msra.gmra.mrb[28].mxu1 %vm86_vm0, %v12323_v60 }
0x120a   :  { %10685 = vmatpush3.bf16.msra.mxu1 %v12018_v52  ;;  %9782 = vmatprep.mubr.msk.f32.mxu1 %vm86_vm0, %v12320_v5 }
0x120b   :  { %10687 = vmatprep.subr.bf16.mxu1 %v12028_v57 }
0x120e   :  { %10689 = vmatpush3.bf16.msra.mxu1 %v12028_v57 }
0x120f   :  { %10691 = vmatprep.subr.bf16.mxu1 %v12042_v63 }
0x1212   :  { %10693 = vmatpush3.bf16.msra.mxu1 %v12042_v63 }
0x1213   :  { %10695 = vmatprep.subr.bf16.mxu1 %v12052_v3 }
0x1216   :  { %10697 = vmatpush3.bf16.msra.mxu1 %v12052_v3 }
0x1219   :  { %9783 = vmatmul.mubr.msk.f32.vlgmr.msra.gmra.mrb[30].mxu1 %vm86_vm0, %v12323_v60 }
0x12cc   :  { %v12427_v20 = vpop.f32.mrb[26].mxu1 }
0x12cd   :  { %v12429_v36 = vpop.f32.mrb[27].mxu1 }
0x12dc   :  { %v9746_v42 = vpop.f32.mrb[28].mxu1 }
0x12dd   :  { %v2800_v45 = vpop.f32.mrb[29].mxu1  ;;  %v2806_v57 = vadd.f32 %v9746_v42, %v12073_v6  ;;  %v3439_v42 = vld [vmem:[%s14169_s14 + $0x8] sm:$0xff] }
0x12de   :  { %v2801_v52 = vadd.f32 %v12073_v6, %v2800_v45  ;;  %v3441_v45 = vld [vmem:[%s14169_s14 + $0x18] sm:$0xff] }
0x12e0   :  { %9789 = vmatprep.mubr.msk.f32.mxu0 %vm466_vm1, %v2801_v52  ;;  %v10724_v52 = vpack.c.bf16 %v3441_v45, %v3439_v42  ;;  %v3454_v42 = vld [vmem:[%s14172_s15] sm:$0x3] }
0x12e1   :  { %9790 = vmatmul.mubr.msk.f32.vlgmr.msra.gmra.mrb[28].mxu0 %vm466_vm1, %v2806_v57  ;;  %v3440_v57 = vld [vmem:[%s14169_s14 + $0x10] sm:$0xff] }
0x12e2   :  { %10725 = vmatprep.subr.bf16.mxu1 %v10724_v52 }
0x12ec   :  { %v9784_v63 = vpop.f32.mrb[30].mxu1 }
0x12ed   :  { %v2956_v3 = vadd.f32 %v9784_v63, %v12086_v46  ;;  %v2950_v5 = vpop.f32.mrb[31].mxu1  ;;  %v10726_v63 = vpack.c.bf16 %v3440_v57, %v3438_v8 }
0x12ee   :  { %v2951_v60 = vadd.f32 %v12086_v46, %v2950_v5  ;;  %v3445_v5 = vld [vmem:[%s14169_s14 + $0x38] sm:$0xff] }
0x12ef   :  { %10727 = vmatpush1.bf16.msra.mxu1 %v10726_v63 }
0x12f0   :  { %v10704_v25 = vpack.c.bf16 %v2956_v3, %v2951_v60  ;;  %v3443_v3 = vld [vmem:[%s14169_s14 + $0x28] sm:$0xff] }
0x12f1   :  { %v10728_v60 = vpack.c.bf16 %v3445_v5, %v3443_v3 }
0x12f2   :  { %10705 = vmatprep.subr.bf16.mxu0 %v10704_v25 }
0x12f3   :  { %10707 = vmatpush3.bf16.msra.mxu0 %v10704_v25  ;;  %v3442_v25 = vld [vmem:[%s14169_s14 + $0x20] sm:$0xff]  ;;  %10729 = vmatprep.subr.bf16.mxu1 %v10728_v60 }
0x12f4   :  { %10709 = vmatprep.subr.bf16.mxu0 %v12129_v2  ;;  %v3697_v60 = vld [vmem:[%s14173_s16 + $0x80] sm:$0xff] }
0x13b4   :  { %v9791_v6 = vpop.f32.mrb[28].mxu0 }
0x13b5   :  { %v3047_v31 = vmul.f32 0.17677669, %v9791_v6  ;;  %v3037_v26 = vpop.f32.mrb[29].mxu0  ;;  %v3444_v6 = vld [vmem:[%s14169_s14 + $0x30] sm:$0xff] }
0x13b6   :  { %v3046_v46 = vmul.f32 0.17677669, %v3037_v26  ;;  %v10730_v44 = vpack.c.bf16 %v3444_v6, %v3442_v25  ;;  %v3449_v26 = vld [vmem:[%s14169_s14 + $0x58] sm:$0xff]  ;;  %v3698_v25 = vld [vmem:[%s14173_s16 + $0x88] sm:$0xff] }
0x13b7   :  { %v3049_v55 = vadd.f32 %v11563_v9, %v3047_v31  ;;  %v3447_v31 = vld [vmem:[%s14169_s14 + $0x48] sm:$0xff]  ;;  %v3448_v9 = vld [vmem:[%s14169_s14 + $0x50] sm:$0xff] }
0x13b8   :  { %v3048_v32 = vadd.f32 %v11564_v11, %v3046_v46  ;;  %10731 = vmatpush1.bf16.msra.mxu1 %v10730_v44  ;;  %v10732_v29 = vpack.c.bf16 %v3449_v26, %v3447_v31  ;;  %v3446_v46 = vld [vmem:[%s14169_s14 + $0x40] sm:$0xff]  ;;  %v3451_v11 = vld [vmem:[%s14169_s14 + $0x68] sm:$0xff] }
0x13b9   :  { %v3053_v4 = vsel %vm558_vm3, %v3049_v55, -inf }
0x13ba   :  { %3054 = vmax.xlane.f32.xlu1 %v3053_v4  ;;  %v3050_v54 = vsel %vm558_vm3, %v3048_v32, -inf  ;;  %10733 = vmatprep.subr.bf16.mxu1 %v10732_v29  ;;  %v3450_v4 = vld [vmem:[%s14169_s14 + $0x60] sm:$0xff] }
0x13bb   :  { %3051 = vmax.xlane.f32.xlu0 %v3050_v54  ;;  %v10738_v54 = vpack.c.bf16 %v3452_v23, %v3450_v4 }
0x13be   :  { %3340 = vadd.xlane.f32.xlu1 %v3339_v22  ;;  %v14192_v22 = vmov 0.0  }
0x13bf   :  { %3337 = vadd.xlane.f32.xlu0 %v3336_v18  ;;  %3548 = vmatprep.mubr.f32.mxu1 %v14192_v22 }
0x1447   :  { %v3055_v7 = vpop.xlane.xlu1 %3054 }
0x1448   :  { %v3057_v10 = vsub.f32 %v3049_v55, %v3055_v7  ;;  %v3052_v34 = vpop.xlane.xlu0 %3051  ;;  %v10734_v55 = vpack.c.bf16 %v3448_v9, %v3446_v46 }
0x1449   :  { %v3056_v13 = vsub.f32 %v3048_v32, %v3052_v34  ;;  %v3453_v32 = vld [vmem:[%s14169_s14 + $0x78] sm:$0xff] }
0x144a   :  { %v3060_v24 = vmul.f32 1.442695, %v3057_v10  ;;  %10735 = vmatpush1.bf16.msra.mxu1 %v10734_v55  ;;  %v10736_v21 = vpack.c.bf16 %v3453_v32, %v3451_v11  ;;  %v10740_v55 = vpack.c.bf16 %v3698_v25, %v3697_v60  ;;  %v3681_v11 = vld [vmem:[%s14173_s16] sm:$0xff]  ;;  %v3700_v32 = vld [vmem:[%s14173_s16 + $0x98] sm:$0xff] }
0x144b   :  { %v3058_v30 = vmul.f32 1.442695, %v3056_v13  ;;  %v3341_v33 = vpop.xlane.xlu1 %3340  ;;  %v3708_v60 = vld [vmem:[%s14173_s16 + $0xd8] sm:$0xff] }
0x144c   :  { %v3355_v49 = vmul.f32 0.015625, %v3341_v33  ;;  %v3338_v53 = vpop.xlane.xlu0 %3337  ;;  %10737 = vmatprep.subr.bf16.mxu1 %v10736_v21 }
0x144d   :  { %11359 = vpow2.f32 %v3058_v30  ;;  %v3354_v35 = vmul.f32 0.015625, %v3338_v53  ;;  %v12555_v53 = vld [vmem:[%s14170_s12] ss:$0 sm:$0xff] }
0x144e   :  { %11361 = vpow2.f32 %v3060_v24  ;;  %v12470_v47 = vsub.f32 %v12456_v14, %v3355_v49  ;;  %10739 = vmatpush1.bf16.msra.mxu1 %v10738_v54 }
0x144f   :  { %v12473_v17 = vsub.f32 %v12462_v15, %v3354_v35 }
0x1450   :  { %v3367_v51 = vmul.f32 %v12470_v47, %v12470_v47 }
0x1451   :  { %v3366_v38 = vmul.f32 %v12473_v17, %v12473_v17 }
0x1452   :  { %v3375_v40 = vsel %vm86_vm0, %v3367_v51, 0.0 }
0x1453   :  { %v3372_v43 = vsel %vm86_vm0, %v3366_v38, 0.0 }
0x1454   :  { %3373 = vadd.xlane.f32.xlu1 %v3372_v43  ;;  %v12562_v43 = vld [vmem:[%s14171_s13] ss:$0 sm:$0xff] }
0x1457   :  { %v12482_v41 = vpop.eup %11359 }
0x1458   :  { %3376 = vadd.xlane.f32.xlu1 %v3375_v40  ;;  %v3062_v37 = vsel %vm558_vm3, %v12482_v41, 0.0  ;;  %v12492_v19 = vpop.eup %11361 }
0x1459   :  { %3063 = vadd.xlane.f32.xlu0 %v3062_v37  ;;  %v3065_v61 = vsel %vm558_vm3, %v12492_v19, 0.0 }
0x145c   :  { %3346 = vadd.xlane.f32.xlu1 %v3345_v59 }
0x145d   :  { %3066 = vadd.xlane.f32.xlu0 %v3065_v61 }
0x1461   :  { %3343 = vadd.xlane.f32.xlu0 %v3342_v12 }
0x14e1   :  { %v3374_v18 = vpop.xlane.xlu1 %3373 }
0x14e2   :  { %v3390_v7 = vmul.f32 0.015625, %v3374_v18 }
0x14e4   :  { %v3396_v10 = vadd.f32 1e-05, %v3390_v7 }
0x14e5   :  { %v3377_v34 = vpop.xlane.xlu1 %3376 }
0x14e6   :  { %11363 = vrsqrt.f32 %v3396_v10  ;;  %v3391_v13 = vmul.f32 0.015625, %v3377_v34  ;;  %v3064_v24 = vpop.xlane.xlu0 %3063  ;;  %v3683_v10 = vld [vmem:[%s14173_s16 + $0x10] sm:$0xff]  ;;  %v3684_v34 = vld [vmem:[%s14173_s16 + $0x18] sm:$0xff] }
0x14e7   :  { %11365 = vrcp.f32 %v3064_v24 }
0x14e8   :  { %v3397_v30 = vadd.f32 1e-05, %v3391_v13  ;;  %v3701_v13 = vld [vmem:[%s14173_s16 + $0xa0] sm:$0xff] }
0x14ea   :  { %11367 = vrsqrt.f32 %v3397_v30  ;;  %v3067_v33 = vpop.xlane.xlu0 %3066  ;;  %v10746_v30 = vpack.c.bf16 %v3684_v34, %v3683_v10 }
0x14eb   :  { %11369 = vrcp.f32 %v3067_v33 }
0x14f0   :  { %v11364_v49 = vpop.eup %11363 }
0x14f1   :  { %v11366_v35 = vpop.eup %11365  ;;  %v3408_v38 = vmul.f32 %v11364_v49, %v12473_v17  ;;  %v3685_v49 = vld [vmem:[%s14173_s16 + $0x20] sm:$0xff] }
0x14f2   :  { %v3070_v39 = vmul.f32 %v11366_v35, %v12482_v41  ;;  %v3686_v35 = vld [vmem:[%s14173_s16 + $0x28] sm:$0xff] }
0x14f3   :  { %v3420_v51 = vmul.f32 %v12555_v53, %v3408_v38  ;;  %v3703_v38 = vld [vmem:[%s14173_s16 + $0xb0] sm:$0xff] }
0x14f4   :  { %v11368_v40 = vpop.eup %11367  ;;  %9796 = vmatprep.mubr.msk.f32.mxu0 %vm558_vm3, %v3070_v39  ;;  %v10750_v39 = vpack.c.bf16 %v3686_v35, %v3685_v49 }
0x14f5   :  { %v11370_v50 = vpop.eup %11369  ;;  %v3432_v37 = vadd.f32 %v12562_v43, %v3420_v51  ;;  %v3409_v59 = vmul.f32 %v11368_v40, %v12470_v47  ;;  %v3456_v47 = vlaneseq }
0x14f6   :  { %v3071_v61 = vmul.f32 %v11370_v50, %v12492_v19  ;;  %v3687_v50 = vld [vmem:[%s14173_s16 + $0x30] sm:$0xff] }
0x14f7   :  { %8414 = vmatmul.mubr.msk.f32.vlgmr.msra.gmra.mrb[32].mxu1 %vm86_vm0, %v3432_v37  ;;  %v3421_v17 = vmul.f32 %v12555_v53, %v3409_v59  ;;  %v12580_v19 = vshrl.u32 %v3456_v47, 7  ;;  %v3688_v37 = vld [vmem:[%s14173_s16 + $0x38] sm:$0xff] }
0x14f8   :  { %9797 = vmatmul.mubr.msk.f32.vlgmr.msra.gmra.mrb[30].mxu0 %vm558_vm3, %v3071_v61  ;;  %3554 = vmatprep.mubr.f32.mxu1 %v14192_v22  ;;  %v3705_v61 = vld [vmem:[%s14173_s16 + $0xc0] sm:$0xff] }
0x14f9   :  { %v3433_v41 = vadd.f32 %v12562_v43, %v3421_v17  ;;  %10711 = vmatpush3.bf16.msra.mxu0 %v12129_v2  ;;  %14216 = vst [vmem:[#allocation3_spill] sm:$0xff] %v12580_v19  ;;  %v14191_v12 = vsub.s32 0, %v12580_v19  ;;  %v14190_v2 = vsub.s32 1, %v12580_v19  ;;  %v3706_v17 = vld [vmem:[%s14173_s16 + $0xc8] sm:$0xff] }
0x14fa   :  { %10713 = vmatprep.subr.bf16.mxu0 %v12134_v0 }
0x14fb   :  { %8415 = vmatmul.mubr.msk.f32.gmra.mrb[34].mxu1 %vm86_vm0, %v3433_v41  ;;  %v12589_v45 = vrot.slane %v3454_v42, %v14191_v12  ;;  %v10754_v41 = vpack.c.bf16 %v3688_v37, %v3687_v50 }
0x14fc   :  { %3560 = vmatprep.mubr.f32.mxu1 %v14192_v22 }
0x14fd   :  { %10715 = vmatpush3.bf16.msra.mxu0 %v12134_v0  ;;  %v12593_v0 = vrot.slane %v3454_v42, %v14190_v2  ;;  %v10756_v42 = vpack.c.bf16 %v3706_v17, %v3705_v61 }
0x14fe   :  { %10717 = vmatprep.subr.bf16.mxu0 %v12146_v58 }
0x15ca   :  { %v3550_v52 = vpop.f32.mrb[32].mxu1 }
0x15cb   :  { %v12596_v8 = vadd.f32 %v3550_v52, %v12589_v45  ;;  %v9798_v57 = vpop.f32.mrb[30].mxu0  ;;  %v3552_v63 = vpop.f32.mrb[33].mxu1  ;;  %v3689_v52 = vld [vmem:[%s14173_s16 + $0x40] sm:$0xff] }
0x15cc   :  { %v12599_v3 = vadd.f32 %v3552_v63, %v12593_v0  ;;  %v3144_v5 = vpop.f32.mrb[31].mxu0 }
0x15cd   :  { %9807 = vmatprep.mubr.msk.f32.mxu0 %vm466_vm1, %v3144_v5  ;;  %v8420_v6 = vmul.f32 -1.702, %v12596_v8  ;;  %v3707_v5 = vld [vmem:[%s14173_s16 + $0xd0] sm:$0xff] }
0x15ce   :  { %v8421_v44 = vmul.f32 -1.702, %v12599_v3  ;;  %9808 = vmatmul.mubr.msk.f32.vlgmr.msra.gmra.mrb[32].mxu0 %vm466_vm1, %v9798_v57  ;;  %v3556_v31 = vpop.f32.mrb[34].mxu1  ;;  %v3690_v57 = vld [vmem:[%s14173_s16 + $0x48] sm:$0xff] }
0x15cf   :  { %10719 = vmatpush3.bf16.msra.mxu0 %v12146_v58  ;;  %v12613_v26 = vadd.f32 %v3556_v31, %v12589_v45  ;;  %9818 = vmatprep.mubr.msk.f32.mxu0 %vm466_vm1, %v12429_v36  ;;  %v3558_v29 = vpop.f32.mrb[35].mxu1  ;;  %v3682_v58 = vld [vmem:[%s14173_s16 + $0x8] sm:$0xff]  ;;  %v3699_v36 = vld [vmem:[%s14173_s16 + $0x90] sm:$0xff]  ;;  %v3609_v21 = vmul.f32 1.442695, %v8420_v6  ;;  %v10758_v6 = vpack.c.bf16 %v3690_v57, %v3689_v52 }
0x15d0   :  { %v3611_v46 = vmul.f32 1.442695, %v8421_v44  ;;  %v12618_v9 = vadd.f32 %v3558_v29, %v12593_v0  ;;  %10721 = vmatprep.subr.bf16.mxu0 %v12178_v56  ;;  %v10742_v54 = vpack.c.bf16 %v3682_v58, %v3681_v11  ;;  %v10744_v7 = vpack.c.bf16 %v3700_v32, %v3699_v36  ;;  %v3709_v11 = vld [vmem:[%s14173_s16 + $0xe0] sm:$0xff]  ;;  %v3710_v58 = vld [vmem:[%s14173_s16 + $0xe8] sm:$0xff] }
0x15d1   :  { %v8422_v4 = vmul.f32 -1.702, %v12613_v26  ;;  %v10760_v29 = vpack.c.bf16 %v3708_v60, %v3707_v5 }
0x15d2   :  { %11371 = vpow2.f32 %v3611_v46  ;;  %v8423_v23 = vmul.f32 -1.702, %v12618_v9  ;;  %v3691_v46 = vld [vmem:[%s14173_s16 + $0x50] sm:$0xff] }
0x15d3   :  { %10723 = vmatpush3.bf16.msra.mxu0 %v12178_v56  ;;  %v3702_v56 = vld [vmem:[%s14173_s16 + $0xa8] sm:$0xff]  ;;  %11373 = vpow2.f32 %v3609_v21  ;;  %v3613_v24 = vmul.f32 1.442695, %v8422_v4  ;;  %v10764_v21 = vpack.c.bf16 %v3710_v58, %v3709_v11  ;;  %v3693_v4 = vld [vmem:[%s14173_s16 + $0x60] sm:$0xff] }
0x15d4   :  { %v3615_v18 = vmul.f32 1.442695, %v8423_v23  ;;  %10741 = vmatprep.subr.bf16.mxu0 %v10740_v55  ;;  %v10748_v33 = vpack.c.bf16 %v3702_v56, %v3701_v13  ;;  %v3692_v55 = vld [vmem:[%s14173_s16 + $0x58] sm:$0xff]  ;;  %v3694_v23 = vld [vmem:[%s14173_s16 + $0x68] sm:$0xff]  ;;  %v3695_v56 = vld [vmem:[%s14173_s16 + $0x70] sm:$0xff] }
0x15d5   :  { %v10762_v32 = vpack.c.bf16 %v3692_v55, %v3691_v46  ;;  %v10766_v34 = vpack.c.bf16 %v3694_v23, %v3693_v4 }
0x15d6   :  { %9819 = vmatmul.mubr.msk.f32.vlgmr.msra.gmra.mrb[32].mxu0 %vm466_vm1, %v12427_v20  ;;  %11375 = vpow2.f32 %v3615_v18  ;;  %v3704_v20 = vld [vmem:[%s14173_s16 + $0xb8] sm:$0xff]  ;;  %v3711_v18 = vld [vmem:[%s14173_s16 + $0xf0] sm:$0xff] }
0x15d7   :  { %10743 = vmatpush3.bf16.msra.mxu0 %v10742_v54  ;;  %11377 = vpow2.f32 %v3613_v24  ;;  %v10752_v40 = vpack.c.bf16 %v3704_v20, %v3703_v38  ;;  %v3696_v24 = vld [vmem:[%s14173_s16 + $0x78] sm:$0xff] }
0x15d8   :  { %10745 = vmatprep.subr.bf16.mxu0 %v10744_v7  ;;  %v3712_v7 = vld [vmem:[%s14173_s16 + $0xf8] sm:$0xff] }
0x15d9   :  { %v10768_v13 = vpack.c.bf16 %v3712_v7, %v3711_v18 }
0x15db   :  { %10747 = vmatpush3.bf16.msra.mxu0 %v10746_v30  ;;  %v10770_v30 = vpack.c.bf16 %v3696_v24, %v3695_v56 }
0x15dc   :  { %v11372_v51 = vpop.eup %11371  ;;  %10749 = vmatprep.subr.bf16.mxu0 %v10748_v33 }
0x15dd   :  { %v3634_v59 = vadd.f32 1.0, %v11372_v51  ;;  %v11374_v47 = vpop.eup %11373 }
0x15de   :  { %v3633_v25 = vadd.f32 1.0, %v11374_v47 }
0x15df   :  { %11379 = vrcp.f32 %v3634_v59  ;;  %10751 = vmatpush3.bf16.msra.mxu0 %v10750_v39 }
0x15e0   :  { %10753 = vmatprep.subr.bf16.mxu0 %v10752_v40  ;;  %v11376_v63 = vpop.eup %11375  ;;  %11381 = vrcp.f32 %v3633_v25 }
0x15e1   :  { %v11378_v44 = vpop.eup %11377  ;;  %v3636_v31 = vadd.f32 1.0, %v11376_v63 }
0x15e2   :  { %v3635_v36 = vadd.f32 1.0, %v11378_v44 }
0x15e3   :  { %10755 = vmatpush3.bf16.msra.mxu0 %v10754_v41  ;;  %11383 = vrcp.f32 %v3636_v31  ;;  %v3347_v41 = vpop.xlane.xlu1 %3346 }
0x15e4   :  { %10757 = vmatprep.subr.bf16.mxu0 %v10756_v42  ;;  %11385 = vrcp.f32 %v3635_v36 }
0x15e7   :  { %10759 = vmatpush3.bf16.msra.mxu0 %v10758_v6 }
0x15e8   :  { %10761 = vmatprep.subr.bf16.mxu0 %v10760_v29 }
0x15e9   :  { %v11380_v54 = vpop.eup %11379 }
0x15ea   :  { %v3670_v10 = vmul.f32 %v11380_v54, %v12599_v3  ;;  %v11382_v33 = vpop.eup %11381 }
0x15eb   :  { %10763 = vmatpush3.bf16.msra.mxu0 %v10762_v32  ;;  %v3669_v3 = vmul.f32 %v11382_v33, %v12596_v8 }
0x15ec   :  { %3777 = vmatprep.mubr.f32.mxu0 %v3670_v10  ;;  %10765 = vmatprep.subr.bf16.mxu0 %v10764_v21 }
0x15ed   :  { %v11384_v49 = vpop.eup %11383 }
0x15ee   :  { %v11386_v35 = vpop.eup %11385  ;;  %v3672_v38 = vmul.f32 %v11384_v49, %v12618_v9  ;;  %v3344_v9 = vpop.xlane.xlu0 %3343 }
0x15ef   :  { %10767 = vmatpush3.bf16.msra.mxu0 %v10766_v34  ;;  %v3671_v20 = vmul.f32 %v11386_v35, %v12613_v26  ;;  %v3356_v61 = vmul.f32 0.015625, %v3344_v9 }
0x15f0   :  { %10769 = vmatprep.subr.bf16.mxu0 %v10768_v13 }
0x15f1   :  { %v3362_v42 = vsub.f32 %v12497_v62, %v3356_v61 }
0x15f3   :  { %10771 = vmatpush3.bf16.msra.mxu0 %v10770_v30  ;;  %v3368_v31 = vmul.f32 %v3362_v42, %v3362_v42 }
0x15f5   :  { %v3378_v46 = vsel %vm86_vm0, %v3368_v31, 0.0  ;;  %v8443_v31 = vld [vmem:[%s14207_s5 + $0xb0] sm:$0xff] }
0x15f6   :  { %3778 = vmatmul.mubr.f32.vlgmr.msra.gmra.mrb[34].mxu0 %v3669_v3 }
0x15f7   :  { %3782 = vmatprep.mubr.f32.mxu0 %v3672_v38 }
0x15fa   :  { %3783 = vmatmul.mubr.f32.gmra.mrb[36].mxu0 %v3671_v20 }
0x16a9   :  { %v9820_v39 = vpop.f32.mrb[32].mxu0 }
0x16aa   :  { %v3327_v51 = vadd.f32 %v9820_v39, %v12441_v1  ;;  %v3306_v40 = vpop.f32.mrb[33].mxu0 }
0x16ab   :  { %v3326_v50 = vadd.f32 %v12441_v1, %v3306_v40 }
0x16ac   :  { %v12723_v37 = vadd.f32 %v3327_v51, %v12294_v16  ;;  %v12735_v16 = vld [vmem:[%s14174_s17] ss:$0 sm:$0xff] }
0x16ad   :  { %v12726_v59 = vadd.f32 %v3326_v50, %v12300_v28  ;;  %v3357_v28 = vmul.f32 0.015625, %v3347_v41 }
0x16ae   :  { %v3351_v8 = vsel %vm86_vm0, %v12723_v37, 0.0 }
0x16af   :  { %3352 = vadd.xlane.f32.xlu1 %v3351_v8  ;;  %v3348_v26 = vsel %vm86_vm0, %v12726_v59, 0.0  ;;  %v3363_v25 = vsub.f32 %v12485_v48, %v3357_v28  ;;  %v8438_v28 = vld [vmem:[%s14207_s5 + $0x88] sm:$0xff] }
0x16b0   :  { %3349 = vadd.xlane.f32.xlu0 %v3348_v26 }
0x16b1   :  { %v3369_v55 = vmul.f32 %v3363_v25, %v3363_v25 }
0x16b3   :  { %v3381_v11 = vsel %vm86_vm0, %v3369_v55, 0.0  ;;  %v8449_v55 = vld [vmem:[%s14208_s29 + $0x80] sm:$0xff] }
0x16c9   :  { %v8989_v17 = vpop.f32.mrb[34].mxu0 }
0x16ca   :  { %v8990_v47 = vpop.f32.mrb[35].mxu0 }
0x16cb   :  { %v8991_v1 = vadd.f32 %v8990_v47, %v8989_v17 }
0x16cd   :  { %v3808_v52 = vadd.f32 %v8991_v1, %v12462_v15  ;;  %v8992_v57 = vpop.f32.mrb[36].mxu0  ;;  %v8437_v1 = vld [vmem:[%s14207_s5 + $0x80] sm:$0xff] }
0x16ce   :  { %v8993_v63 = vpop.f32.mrb[37].mxu0 }
0x16cf   :  { %v12740_v5 = vadd.f32 %v12735_v16, %v3808_v52  ;;  %v8994_v60 = vadd.f32 %v8993_v63, %v8992_v57  ;;  %v12789_v52 = vpack.c.bf16 %v8438_v28, %v8437_v1  ;;  %v8439_v57 = vld [vmem:[%s14207_s5 + $0x90] sm:$0xff]  ;;  %v8440_v63 = vld [vmem:[%s14207_s5 + $0x98] sm:$0xff]  ;;  %v8454_v1 = vld [vmem:[%s14208_s29 + $0xa8] sm:$0xff] }
0x16d1   :  { %v3809_v6 = vadd.f32 %v8994_v60, %v12456_v14  ;;  %v3831_v44 = vsel %vm86_vm0, %v12740_v5, 0.0  ;;  %10773 = vmatprep.subr.bf16.mxu1 %v12789_v52  ;;  %v12801_v60 = vpack.c.bf16 %v8440_v63, %v8439_v57  ;;  %v8456_v57 = vld [vmem:[%s14208_s29 + $0xb8] sm:$0xff] }
0x16d2   :  { %3832 = vadd.xlane.f32.xlu0 %v3831_v44  ;;  %10775 = vmatpush3.bf16.msra.mxu1 %v12789_v52 }
0x16d3   :  { %v12747_v29 = vadd.f32 %v12735_v16, %v3809_v6  ;;  %10777 = vmatprep.subr.bf16.mxu1 %v12801_v60  ;;  %v8442_v6 = vld [vmem:[%s14207_s5 + $0xa8] sm:$0xff] }
0x16d5   :  { %v3834_v15 = vsel %vm86_vm0, %v12747_v29, 0.0 }
0x16d6   :  { %3835 = vadd.xlane.f32.xlu1 %v3834_v15  ;;  %3379 = vadd.xlane.f32.xlu0 %v3378_v46  ;;  %v8444_v15 = vld [vmem:[%s14207_s5 + $0xb8] sm:$0xff] }
0x16d7   :  { %10779 = vmatpush3.bf16.msra.mxu1 %v12801_v60  ;;  %v12821_v46 = vpack.c.bf16 %v8444_v15, %v8443_v31 }
0x16da   :  { %3382 = vadd.xlane.f32.xlu1 %v3381_v11  ;;  %v8450_v11 = vld [vmem:[%s14208_s29 + $0x88] sm:$0xff] }
0x173c   :  { %v3353_v14 = vpop.xlane.xlu1 %3352 }
0x173d   :  { %v3359_v58 = vmul.f32 0.015625, %v3353_v14  ;;  %v3350_v36 = vpop.xlane.xlu0 %3349  ;;  %v12831_v14 = vpack.c.bf16 %v8450_v11, %v8449_v55 }
0x173e   :  { %v3358_v32 = vmul.f32 0.015625, %v3350_v36 }
0x173f   :  { %v12754_v21 = vsub.f32 %v12723_v37, %v3359_v58 }
0x1740   :  { %v12757_v4 = vsub.f32 %v12726_v59, %v3358_v32 }
0x1741   :  { %v3371_v23 = vmul.f32 %v12754_v21, %v12754_v21 }
0x1742   :  { %v3370_v54 = vmul.f32 %v12757_v4, %v12757_v4 }
0x1743   :  { %v3387_v18 = vsel %vm86_vm0, %v3371_v23, 0.0 }
0x1744   :  { %3388 = vadd.xlane.f32.xlu1 %v3387_v18  ;;  %v3384_v7 = vsel %vm86_vm0, %v3370_v54, 0.0 }
0x1745   :  { %3385 = vadd.xlane.f32.xlu0 %v3384_v7 }
0x175f   :  { %v3833_v10 = vpop.xlane.xlu0 %3832 }
0x1760   :  { %v3849_v34 = vmul.f32 0.015625, %v3833_v10 }
0x1762   :  { %v12766_v13 = vsub.f32 %v12740_v5, %v3849_v34 }
0x1763   :  { %v3836_v56 = vpop.xlane.xlu1 %3835  ;;  %v3380_v24 = vpop.xlane.xlu0 %3379 }
0x1764   :  { %v3850_v30 = vmul.f32 0.015625, %v3836_v56  ;;  %v3392_v33 = vmul.f32 0.015625, %v3380_v24  ;;  %v3861_v49 = vmul.f32 %v12766_v13, %v12766_v13 }
0x1766   :  { %v12771_v3 = vsub.f32 %v12747_v29, %v3850_v30  ;;  %v3398_v35 = vadd.f32 1e-05, %v3392_v33  ;;  %v3867_v38 = vsel %vm86_vm0, %v3861_v49, 0.0 }
0x1767   :  { %v3383_v20 = vpop.xlane.xlu1 %3382  ;;  %3868 = vadd.xlane.f32.xlu0 %v3867_v38 }
0x1768   :  { %11387 = vrsqrt.f32 %v3398_v35  ;;  %v3393_v39 = vmul.f32 0.015625, %v3383_v20  ;;  %v3862_v51 = vmul.f32 %v12771_v3, %v12771_v3 }
0x176a   :  { %v3399_v40 = vadd.f32 1e-05, %v3393_v39  ;;  %v3870_v50 = vsel %vm86_vm0, %v3862_v51, 0.0 }
0x176b   :  { %3871 = vadd.xlane.f32.xlu1 %v3870_v50 }
0x176c   :  { %11389 = vrsqrt.f32 %v3399_v40 }
0x1772   :  { %v11388_v8 = vpop.eup %11387 }
0x1773   :  { %v3410_v26 = vmul.f32 %v11388_v8, %v3362_v42 }
0x1775   :  { %v3422_v9 = vmul.f32 %v12555_v53, %v3410_v26 }
0x1776   :  { %v11390_v61 = vpop.eup %11389 }
0x1777   :  { %v3434_v17 = vadd.f32 %v12562_v43, %v3422_v9  ;;  %v3411_v41 = vmul.f32 %v11390_v61, %v3363_v25  ;;  %v8441_v25 = vld [vmem:[%s14207_s5 + $0xa0] sm:$0xff]  ;;  %v8451_v61 = vld [vmem:[%s14208_s29 + $0x90] sm:$0xff] }
0x1778   :  { %v12811_v44 = vpack.c.bf16 %v8442_v6, %v8441_v25 }
0x1779   :  { %8416 = vmatmul.mubr.msk.f32.gmra.mrb[36].mxu1 %vm86_vm0, %v3434_v17  ;;  %v3423_v47 = vmul.f32 %v12555_v53, %v3411_v41 }
0x177a   :  { %3566 = vmatprep.mubr.f32.mxu1 %v14192_v22  ;;  %10781 = vmatprep.subr.bf16.mxu1 %v12811_v44 }
0x177b   :  { %v3435_v42 = vadd.f32 %v12562_v43, %v3423_v47  ;;  %10783 = vmatpush3.bf16.msra.mxu1 %v12811_v44 }
0x177c   :  { %10785 = vmatprep.subr.bf16.mxu1 %v12821_v46 }
0x177d   :  { %8417 = vmatmul.mubr.msk.f32.gmra.mrb[38].mxu1 %vm86_vm0, %v3435_v42  ;;  %v8455_v42 = vld [vmem:[%s14208_s29 + $0xb0] sm:$0xff] }
0x177e   :  { %3572 = vmatprep.mubr.f32.mxu1 %v14192_v22  ;;  %v12895_v63 = vpack.c.bf16 %v8456_v57, %v8455_v42  ;;  %v8495_v42 = vld [vmem:[%s14208_s29 + $0xc0] sm:$0xff]  ;;  %v8496_v57 = vld [vmem:[%s14208_s29 + $0xc8] sm:$0xff] }
0x177f   :  { %10787 = vmatpush3.bf16.msra.mxu1 %v12821_v46 }
0x1780   :  { %10789 = vmatprep.subr.bf16.mxu1 %v12831_v14 }
0x17d1   :  { %v3389_v58 = vpop.xlane.xlu1 %3388 }
0x17d2   :  { %v3395_v36 = vmul.f32 0.015625, %v3389_v58  ;;  %v3386_v32 = vpop.xlane.xlu0 %3385 }
0x17d3   :  { %v3394_v23 = vmul.f32 0.015625, %v3386_v32 }
0x17d4   :  { %v3401_v54 = vadd.f32 1e-05, %v3395_v36 }
0x17d5   :  { %v3400_v18 = vadd.f32 1e-05, %v3394_v23 }
0x17d6   :  { %11391 = vrsqrt.f32 %v3401_v54 }
0x17d7   :  { %11393 = vrsqrt.f32 %v3400_v18 }
0x17e0   :  { %v11392_v7 = vpop.eup %11391 }
0x17e1   :  { %v11394_v10 = vpop.eup %11393  ;;  %v3413_v56 = vmul.f32 %v11392_v7, %v12754_v21 }
0x17e2   :  { %v3412_v34 = vmul.f32 %v11394_v10, %v12757_v4 }
0x17e3   :  { %v3425_v33 = vmul.f32 %v12555_v53, %v3413_v56  ;;  %v8462_v56 = vld [vmem:[%s14209_s25 + $0x88] sm:$0xff] }
0x17e4   :  { %v3424_v24 = vmul.f32 %v12555_v53, %v3412_v34  ;;  %v12846_v53 = vld [vmem:[%s14210_s27 + $0x1] ss:$0 sm:$0xff] }
0x17e5   :  { %v3437_v49 = vadd.f32 %v12562_v43, %v3425_v33  ;;  %v8461_v34 = vld [vmem:[%s14209_s25 + $0x80] sm:$0xff] }
0x17e6   :  { %v3436_v30 = vadd.f32 %v12562_v43, %v3424_v24  ;;  %v12852_v43 = vld [vmem:[%s14211_s6 + $0x1] ss:$0 sm:$0xff] }
0x17e8   :  { %8418 = vmatmul.mubr.msk.f32.gmra.mrb[40].mxu1 %vm86_vm0, %v3436_v30  ;;  %v12912_v30 = vpack.c.bf16 %v8462_v56, %v8461_v34 }
0x17e9   :  { %3578 = vmatprep.mubr.f32.mxu1 %v14192_v22 }
0x17ea   :  { %10805 = vmatprep.subr.bf16.mxu0 %v12912_v30 }
0x17eb   :  { %10807 = vmatpush3.bf16.msra.mxu0 %v12912_v30 }
0x17ec   :  { %8419 = vmatmul.mubr.msk.f32.gmra.mrb[42].mxu1 %vm86_vm0, %v3437_v49  ;;  %v8463_v49 = vld [vmem:[%s14209_s25 + $0x90] sm:$0xff] }
0x17f4   :  { %v3869_v35 = vpop.xlane.xlu0 %3868 }
0x17f5   :  { %v3885_v38 = vmul.f32 0.015625, %v3869_v35  ;;  %v8464_v35 = vld [vmem:[%s14209_s25 + $0x98] sm:$0xff] }
0x17f7   :  { %v3891_v20 = vadd.f32 1e-05, %v3885_v38  ;;  %v12922_v38 = vpack.c.bf16 %v8464_v35, %v8463_v49 }
0x17f8   :  { %v3872_v4 = vpop.xlane.xlu1 %3871 }
0x17f9   :  { %11395 = vrsqrt.f32 %v3891_v20  ;;  %v3886_v21 = vmul.f32 0.015625, %v3872_v4  ;;  %10809 = vmatprep.subr.bf16.mxu0 %v12922_v38  ;;  %v8465_v20 = vld [vmem:[%s14209_s25 + $0xa0] sm:$0xff]  ;;  %v8466_v4 = vld [vmem:[%s14209_s25 + $0xa8] sm:$0xff] }
0x17fa   :  { %10811 = vmatpush3.bf16.msra.mxu0 %v12922_v38 }
0x17fb   :  { %v3892_v39 = vadd.f32 1e-05, %v3886_v21 }
0x17fd   :  { %11397 = vrsqrt.f32 %v3892_v39  ;;  %v12932_v39 = vpack.c.bf16 %v8466_v4, %v8465_v20 }
0x17ff   :  { %10813 = vmatprep.subr.bf16.mxu0 %v12932_v39 }
0x1800   :  { %10815 = vmatpush3.bf16.msra.mxu0 %v12932_v39 }
0x1803   :  { %v11396_v51 = vpop.eup %11395 }
0x1804   :  { %v3903_v40 = vmul.f32 %v11396_v51, %v12766_v13  ;;  %v8452_v13 = vld [vmem:[%s14208_s29 + $0x98] sm:$0xff] }
0x1805   :  { %v12871_v47 = vpack.c.bf16 %v8452_v13, %v8451_v61 }
0x1806   :  { %v3915_v50 = vmul.f32 %v12846_v53, %v3903_v40 }
0x1807   :  { %v11398_v8 = vpop.eup %11397 }
0x1808   :  { %v12856_v26 = vadd.f32 %v12852_v43, %v3915_v50  ;;  %v3904_v9 = vmul.f32 %v11398_v8, %v12771_v3  ;;  %v8453_v3 = vld [vmem:[%s14208_s29 + $0xa0] sm:$0xff]  ;;  %v8467_v8 = vld [vmem:[%s14209_s25 + $0xb0] sm:$0xff] }
0x1809   :  { %v12885_v28 = vpack.c.bf16 %v8454_v1, %v8453_v3 }
0x180a   :  { %v3916_v17 = vmul.f32 %v12846_v53, %v3904_v9  ;;  %9837 = vmatprep.mubr.msk.f32.mxu1 %vm86_vm0, %v12856_v26  ;;  %v8468_v9 = vld [vmem:[%s14209_s25 + $0xb8] sm:$0xff] }
0x180b   :  { %v12942_v13 = vpack.c.bf16 %v8468_v9, %v8467_v8 }
0x180c   :  { %v12869_v41 = vadd.f32 %v12852_v43, %v3916_v17 }
0x180d   :  { %10817 = vmatprep.subr.bf16.mxu0 %v12942_v13 }
0x180e   :  { %9838 = vmatmul.mubr.msk.f32.vlgmr.msra.gmra.mrb[44].mxu1 %vm86_vm0, %v12869_v41  ;;  %10819 = vmatpush3.bf16.msra.mxu0 %v12942_v13 }
0x180f   :  { %10791 = vmatpush3.bf16.msra.mxu1 %v12831_v14  ;;  %9856 = vmatprep.mubr.msk.f32.mxu1 %vm86_vm0, %v12856_v26 }
0x1810   :  { %10793 = vmatprep.subr.bf16.mxu1 %v12871_v47 }
0x1813   :  { %10795 = vmatpush3.bf16.msra.mxu1 %v12871_v47 }
0x1814   :  { %10797 = vmatprep.subr.bf16.mxu1 %v12885_v28 }
0x1817   :  { %10799 = vmatpush3.bf16.msra.mxu1 %v12885_v28 }
0x1818   :  { %10801 = vmatprep.subr.bf16.mxu1 %v12895_v63 }
0x181b   :  { %10803 = vmatpush3.bf16.msra.mxu1 %v12895_v63 }
0x181e   :  { %9857 = vmatmul.mubr.msk.f32.vlgmr.msra.gmra.mrb[46].mxu1 %vm86_vm0, %v12869_v41 }
0x184c   :  { %v3562_v25 = vpop.f32.mrb[36].mxu1 }
0x184d   :  { %v3563_v6 = vadd.f32 %v3562_v25, %v12589_v45  ;;  %v3564_v31 = vpop.f32.mrb[37].mxu1  ;;  %v12952_v25 = vpack.c.bf16 %v8496_v57, %v8495_v42 }
0x184e   :  { %v3565_v15 = vadd.f32 %v3564_v31, %v12593_v0 }
0x184f   :  { %v8424_v55 = vmul.f32 -1.702, %v3563_v6  ;;  %10847 = vmatprep.subr.bf16.mxu0 %v12952_v25 }
0x1850   :  { %v8425_v11 = vmul.f32 -1.702, %v3565_v15  ;;  %v3568_v58 = vpop.f32.mrb[38].mxu1 }
0x1851   :  { %v3617_v36 = vmul.f32 1.442695, %v8424_v55  ;;  %v3569_v32 = vadd.f32 %v3568_v58, %v12589_v45  ;;  %v3570_v23 = vpop.f32.mrb[39].mxu1 }
0x1852   :  { %v3619_v54 = vmul.f32 1.442695, %v8425_v11  ;;  %v3571_v18 = vadd.f32 %v3570_v23, %v12593_v0 }
0x1853   :  { %11399 = vpow2.f32 %v3617_v36  ;;  %v8426_v7 = vmul.f32 -1.702, %v3569_v32 }
0x1854   :  { %11401 = vpow2.f32 %v3619_v54  ;;  %v8427_v10 = vmul.f32 -1.702, %v3571_v18 }
0x1855   :  { %v3621_v24 = vmul.f32 1.442695, %v8426_v7 }
0x1856   :  { %v3623_v33 = vmul.f32 1.442695, %v8427_v10 }
0x1857   :  { %11403 = vpow2.f32 %v3621_v24 }
0x1858   :  { %11405 = vpow2.f32 %v3623_v33 }
0x185d   :  { %v11400_v21 = vpop.eup %11399 }
0x185e   :  { %v11402_v51 = vpop.eup %11401  ;;  %v3637_v40 = vadd.f32 1.0, %v11400_v21 }
0x185f   :  { %v3638_v50 = vadd.f32 1.0, %v11402_v51 }
0x1860   :  { %11407 = vrcp.f32 %v3637_v40 }
0x1861   :  { %v11404_v61 = vpop.eup %11403  ;;  %11409 = vrcp.f32 %v3638_v50 }
0x1862   :  { %v11406_v17 = vpop.eup %11405  ;;  %v3639_v3 = vadd.f32 1.0, %v11404_v61 }
0x1863   :  { %v3640_v1 = vadd.f32 1.0, %v11406_v17 }
0x1864   :  { %11411 = vrcp.f32 %v3639_v3 }
0x1865   :  { %11413 = vrcp.f32 %v3640_v1 }
0x186a   :  { %v11408_v31 = vpop.eup %11407 }
0x186b   :  { %v11410_v55 = vpop.eup %11409  ;;  %v3673_v58 = vmul.f32 %v11408_v31, %v3563_v6 }
0x186c   :  { %v3674_v11 = vmul.f32 %v11410_v55, %v3565_v15 }
0x186e   :  { %v11412_v36 = vpop.eup %11411  ;;  %3787 = vmatprep.mubr.f32.mxu0 %v3674_v11 }
0x186f   :  { %v11414_v23 = vpop.eup %11413  ;;  %3788 = vmatmul.mubr.f32.gmra.mrb[38].mxu0 %v3673_v58  ;;  %v3675_v7 = vmul.f32 %v11412_v36, %v3569_v32 }
0x1870   :  { %v3676_v54 = vmul.f32 %v11414_v23, %v3571_v18  ;;  %v12962_v23 = vld [vmem:[%s14213_s8 + $0x2] ss:$0 sm:$0xff] }
0x1872   :  { %3792 = vmatprep.mubr.f32.mxu0 %v3676_v54 }
0x1873   :  { %3793 = vmatmul.mubr.f32.gmra.mrb[40].mxu0 %v3675_v7  ;;  %v8497_v7 = vld [vmem:[%s14208_s29 + $0xd0] sm:$0xff] }
0x18bb   :  { %v3574_v10 = vpop.f32.mrb[40].mxu1 }
0x18bc   :  { %v3575_v34 = vadd.f32 %v3574_v10, %v12589_v45  ;;  %v3576_v56 = vpop.f32.mrb[41].mxu1  ;;  %v8498_v10 = vld [vmem:[%s14208_s29 + $0xd8] sm:$0xff] }
0x18bd   :  { %v3577_v24 = vadd.f32 %v3576_v56, %v12593_v0 }
0x18be   :  { %v8428_v33 = vmul.f32 -1.702, %v3575_v34 }
0x18bf   :  { %v8429_v49 = vmul.f32 -1.702, %v3577_v24  ;;  %v3580_v35 = vpop.f32.mrb[42].mxu1 }
0x18c0   :  { %v3625_v20 = vmul.f32 1.442695, %v8428_v33  ;;  %v3581_v6 = vadd.f32 %v3580_v35, %v12589_v45  ;;  %v3582_v15 = vpop.f32.mrb[43].mxu1  ;;  %v8499_v33 = vld [vmem:[%s14208_s29 + $0xe0] sm:$0xff] }
0x18c1   :  { %v3627_v4 = vmul.f32 1.442695, %v8429_v49  ;;  %v3583_v21 = vadd.f32 %v3582_v15, %v12593_v0  ;;  %v8500_v49 = vld [vmem:[%s14208_s29 + $0xe8] sm:$0xff] }
0x18c2   :  { %11415 = vpow2.f32 %v3625_v20  ;;  %v8430_v32 = vmul.f32 -1.702, %v3581_v6  ;;  %v12988_v35 = vpack.c.bf16 %v8500_v49, %v8499_v33  ;;  %v8501_v20 = vld [vmem:[%s14208_s29 + $0xf0] sm:$0xff] }
0x18c3   :  { %11417 = vpow2.f32 %v3627_v4  ;;  %v8431_v18 = vmul.f32 -1.702, %v3583_v21  ;;  %v13004_v4 = vld [vmem:[%s14212_s3 + $0x2] ss:$0 sm:$0xff] }
0x18c4   :  { %v3629_v51 = vmul.f32 1.442695, %v8430_v32 }
0x18c5   :  { %v3631_v40 = vmul.f32 1.442695, %v8431_v18 }
0x18c6   :  { %11419 = vpow2.f32 %v3629_v51 }
0x18c7   :  { %11421 = vpow2.f32 %v3631_v40 }
0x18cc   :  { %v11416_v50 = vpop.eup %11415 }
0x18cd   :  { %v11418_v8 = vpop.eup %11417  ;;  %v3641_v9 = vadd.f32 1.0, %v11416_v50 }
0x18ce   :  { %v3642_v61 = vadd.f32 1.0, %v11418_v8 }
0x18cf   :  { %11423 = vrcp.f32 %v3641_v9 }
0x18d0   :  { %v11420_v17 = vpop.eup %11419  ;;  %11425 = vrcp.f32 %v3642_v61 }
0x18d1   :  { %v11422_v45 = vpop.eup %11421  ;;  %v3643_v3 = vadd.f32 1.0, %v11420_v17 }
0x18d2   :  { %v3644_v1 = vadd.f32 1.0, %v11422_v45 }
0x18d3   :  { %11427 = vrcp.f32 %v3643_v3 }
0x18d4   :  { %11429 = vrcp.f32 %v3644_v1 }
0x18d9   :  { %v11424_v0 = vpop.eup %11423 }
0x18da   :  { %v11426_v42 = vpop.eup %11425  ;;  %v3677_v31 = vmul.f32 %v11424_v0, %v3575_v34 }
0x18db   :  { %v3678_v57 = vmul.f32 %v11426_v42, %v3577_v24  ;;  %v12973_v24 = vpack.c.bf16 %v8498_v10, %v8497_v7 }
0x18dd   :  { %v11428_v55 = vpop.eup %11427  ;;  %3797 = vmatprep.mubr.f32.mxu0 %v3678_v57 }
0x18de   :  { %v11430_v11 = vpop.eup %11429  ;;  %3798 = vmatmul.mubr.f32.gmra.mrb[42].mxu0 %v3677_v31  ;;  %v3679_v36 = vmul.f32 %v11428_v55, %v3581_v6  ;;  %v8502_v6 = vld [vmem:[%s14208_s29 + $0xf8] sm:$0xff] }
0x18df   :  { %v3680_v58 = vmul.f32 %v11430_v11, %v3583_v21  ;;  %v12998_v15 = vpack.c.bf16 %v8502_v6, %v8501_v20  ;;  %v13029_v11 = vld [vmem:[%s14165_s9 + $0x2] ss:$0 sm:$0xff] }
0x18e1   :  { %v9839_v54 = vpop.f32.mrb[44].mxu1  ;;  %3802 = vmatprep.mubr.f32.mxu0 %v3680_v58 }
0x18e2   :  { %v4022_v34 = vpop.f32.mrb[45].mxu1  ;;  %3803 = vmatmul.mubr.f32.gmra.mrb[44].mxu0 %v3679_v36  ;;  %v4028_v50 = vadd.f32 %v9839_v54, %v12962_v23 }
0x18e3   :  { %v4023_v56 = vadd.f32 %v12962_v23, %v4022_v34  ;;  %9875 = vmatprep.mubr.msk.f32.mxu0 %vm86_vm0, %v12856_v26  ;;  %v13036_v34 = vld [vmem:[%s14212_s3 + $0x3] ss:$0 sm:$0xff] }
0x18e5   :  { %9882 = vmatprep.mubr.msk.f32.mxu1 %vm466_vm1, %v4023_v56 }
0x18e6   :  { %9876 = vmatmul.mubr.msk.f32.vlgmr.msra.gmra.mrb[46].mxu0 %vm86_vm0, %v12869_v41 }
0x18e7   :  { %10849 = vmatpush3.bf16.msra.mxu0 %v12952_v25  ;;  %9927 = vmatprep.mubr.msk.f32.mxu0 %vm86_vm0, %v12856_v26 }
0x18e8   :  { %10851 = vmatprep.subr.bf16.mxu0 %v12973_v24 }
0x18eb   :  { %10853 = vmatpush3.bf16.msra.mxu0 %v12973_v24 }
0x18ec   :  { %10855 = vmatprep.subr.bf16.mxu0 %v12988_v35 }
0x18ef   :  { %10857 = vmatpush3.bf16.msra.mxu0 %v12988_v35 }
0x18f0   :  { %10859 = vmatprep.subr.bf16.mxu0 %v12998_v15 }
0x18f1   :  { %v9858_v21 = vpop.f32.mrb[46].mxu1 }
0x18f2   :  { %v4120_v32 = vadd.f32 %v9858_v21, %v13004_v4  ;;  %v4114_v18 = vpop.f32.mrb[47].mxu1 }
0x18f3   :  { %v4115_v51 = vadd.f32 %v13004_v4, %v4114_v18  ;;  %10861 = vmatpush3.bf16.msra.mxu0 %v12998_v15 }
0x18f5   :  { %v10820_v40 = vpack.c.bf16 %v4120_v32, %v4115_v51 }
0x18f6   :  { %9928 = vmatmul.mubr.msk.f32.vlgmr.msra.gmra.mrb[48].mxu0 %vm86_vm0, %v12869_v41 }
0x18f7   :  { %10822 = vmatprep.subr.msk.bf16.mxu1 %vm11926_vm2, %v10820_v40 }
0x18f8   :  { %10825 = vmatpush3.bf16.xpose.msk.msra.mxu1 %vm11926_vm2, %v10820_v40  ;;  %v13047_v40 = vld [vmem:[%s14166_s1 + $0x8] sm:$0xff] }
0x18ff   :  { %9883 = vmatmul.mubr.msk.f32.vlgmr.msra.gmra.mrb[48].mxu1 %vm466_vm1, %v4028_v50 }
0x1942   :  { %v8995_v8 = vpop.f32.mrb[38].mxu0 }
0x1943   :  { %v8996_v9 = vpop.f32.mrb[39].mxu0 }
0x1944   :  { %v13018_v61 = vadd.f32 %v8996_v9, %v8995_v8  ;;  %v13053_v8 = vld [vmem:[%s14166_s1] sm:$0xff] }
0x1946   :  { %v8998_v17 = vpop.f32.mrb[40].mxu0 }
0x1947   :  { %v8999_v45 = vpop.f32.mrb[41].mxu0 }
0x1948   :  { %v13020_v3 = vadd.f32 %v8999_v45, %v8998_v17 }
0x19b1   :  { %v9001_v1 = vpop.f32.mrb[42].mxu0 }
0x19b2   :  { %v9002_v0 = vpop.f32.mrb[43].mxu0 }
0x19b3   :  { %v13022_v42 = vadd.f32 %v9002_v0, %v9001_v1 }
0x19b5   :  { %v9004_v57 = vpop.f32.mrb[44].mxu0 }
0x19b6   :  { %v9005_v31 = vpop.f32.mrb[45].mxu0 }
0x19b7   :  { %v13024_v55 = vadd.f32 %v9005_v31, %v9004_v57 }
0x19b9   :  { %v9877_v58 = vpop.f32.mrb[46].mxu0 }
0x19ba   :  { %v4212_v36 = vadd.f32 %v9877_v58, %v13029_v11  ;;  %v4206_v54 = vpop.f32.mrb[47].mxu0 }
0x19bb   :  { %v4207_v7 = vadd.f32 %v13029_v11, %v4206_v54 }
0x19bd   :  { %v10826_v10 = vpack.c.bf16 %v4212_v36, %v4207_v7 }
0x19bf   :  { %10827 = vmatprep.subr.bf16.mxu1 %v10826_v10 }
0x19c0   :  { %10829 = vmatpush3.bf16.msra.mxu1 %v10826_v10 }
0x19c9   :  { %v9929_v56 = vpop.f32.mrb[48].mxu0 }
0x19ca   :  { %v4595_v33 = vadd.f32 %v9929_v56, %v13036_v34  ;;  %v4589_v49 = vpop.f32.mrb[49].mxu0 }
0x19cb   :  { %v4590_v20 = vadd.f32 %v13036_v34, %v4589_v49  ;;  %v8484_v49 = vld [vmem:[%s14207_s5 + $0xc8] sm:$0xff] }
0x19cd   :  { %v10878_v6 = vpack.c.bf16 %v4595_v33, %v4590_v20  ;;  %v8483_v33 = vld [vmem:[%s14207_s5 + $0xc0] sm:$0xff] }
0x19ce   :  { %v13066_v20 = vpack.c.bf16 %v8484_v49, %v8483_v33  ;;  %v8510_v33 = vld [vmem:[%s14209_s25 + $0xd8] sm:$0xff] }
0x19cf   :  { %10880 = vmatprep.subr.msk.bf16.mxu0 %vm11926_vm2, %v10878_v6 }
0x19d0   :  { %10883 = vmatpush3.bf16.xpose.msk.msra.mxu0 %vm11926_vm2, %v10878_v6  ;;  %10831 = vmatprep.subr.bf16.mxu1 %v13066_v20 }
0x19d2   :  { %v9884_v21 = vpop.f32.mrb[48].mxu1 }
0x19d3   :  { %v4303_v32 = vmul.f32 0.17677669, %v9884_v21  ;;  %v4293_v18 = vpop.f32.mrb[49].mxu1 }
0x19d4   :  { %v4302_v51 = vmul.f32 0.17677669, %v4293_v18  ;;  %v8485_v18 = vld [vmem:[%s14207_s5 + $0xd0] sm:$0xff] }
0x19d5   :  { %v4305_v50 = vadd.f32 %v13047_v40, %v4303_v32 }
0x19d6   :  { %v4304_v9 = vadd.f32 %v13053_v8, %v4302_v51  ;;  %v8486_v51 = vld [vmem:[%s14207_s5 + $0xd8] sm:$0xff] }
0x19d7   :  { %v4309_v17 = vsel %vm558_vm3, %v4305_v50, -inf }
0x19d8   :  { %4310 = vmax.xlane.f32.xlu1 %v4309_v17  ;;  %v4306_v45 = vsel %vm558_vm3, %v4304_v9, -inf }
0x19d9   :  { %4307 = vmax.xlane.f32.xlu0 %v4306_v45  ;;  %v13075_v45 = vpack.c.bf16 %v8486_v51, %v8485_v18  ;;  %v8513_v18 = vld [vmem:[%s14209_s25 + $0xf0] sm:$0xff]  ;;  %v8514_v51 = vld [vmem:[%s14209_s25 + $0xf8] sm:$0xff] }
0x1a65   :  { %v4311_v1 = vpop.xlane.xlu1 %4310 }
0x1a66   :  { %v4313_v0 = vsub.f32 %v4305_v50, %v4311_v1  ;;  %v4308_v57 = vpop.xlane.xlu0 %4307  ;;  %v8487_v1 = vld [vmem:[%s14207_s5 + $0xe0] sm:$0xff] }
0x1a67   :  { %v4312_v31 = vsub.f32 %v4304_v9, %v4308_v57 }
0x1a68   :  { %v4316_v58 = vmul.f32 1.442695, %v4313_v0  ;;  %v8488_v0 = vld [vmem:[%s14207_s5 + $0xe8] sm:$0xff] }
0x1a69   :  { %v4314_v36 = vmul.f32 1.442695, %v4312_v31  ;;  %v13089_v57 = vpack.c.bf16 %v8488_v0, %v8487_v1  ;;  %v8489_v31 = vld [vmem:[%s14207_s5 + $0xf0] sm:$0xff] }
0x1a6a   :  { %11431 = vpow2.f32 %v4316_v58  ;;  %v8490_v58 = vld [vmem:[%s14207_s5 + $0xf8] sm:$0xff] }
0x1a6b   :  { %11433 = vpow2.f32 %v4314_v36  ;;  %v13099_v36 = vpack.c.bf16 %v8490_v58, %v8489_v31  ;;  %v13175_v58 = vld [vmem:[%s14165_s9 + $0x3] ss:$0 sm:$0xff] }
0x1a74   :  { %v11432_v54 = vpop.eup %11431 }
0x1a75   :  { %v11434_v7 = vpop.eup %11433  ;;  %v4321_v10 = vsel %vm558_vm3, %v11432_v54, 0.0 }
0x1a76   :  { %4322 = vadd.xlane.f32.xlu1 %v4321_v10  ;;  %v4318_v56 = vsel %vm558_vm3, %v11434_v7, 0.0 }
0x1a77   :  { %4319 = vadd.xlane.f32.xlu0 %v4318_v56  ;;  %v8509_v56 = vld [vmem:[%s14209_s25 + $0xd0] sm:$0xff] }
0x1a78   :  { %v13119_v49 = vpack.c.bf16 %v8510_v33, %v8509_v56 }
0x1b03   :  { %v4323_v6 = vpop.xlane.xlu1 %4322 }
0x1b04   :  { %11435 = vrcp.f32 %v4323_v6  ;;  %v4320_v21 = vpop.xlane.xlu0 %4319  ;;  %v8511_v6 = vld [vmem:[%s14209_s25 + $0xe0] sm:$0xff] }
0x1b05   :  { %11437 = vrcp.f32 %v4320_v21  ;;  %v8512_v21 = vld [vmem:[%s14209_s25 + $0xe8] sm:$0xff] }
0x1b0e   :  { %v11436_v32 = vpop.eup %11435 }
0x1b0f   :  { %v11438_v50 = vpop.eup %11437  ;;  %v4327_v17 = vmul.f32 %v11436_v32, %v11432_v54  ;;  %v8507_v54 = vld [vmem:[%s14209_s25 + $0xc0] sm:$0xff]  ;;  %v13133_v32 = vpack.c.bf16 %v8512_v21, %v8511_v6 }
0x1b10   :  { %v4326_v9 = vmul.f32 %v11438_v50, %v11434_v7  ;;  %v8508_v7 = vld [vmem:[%s14209_s25 + $0xc8] sm:$0xff]  ;;  %v13143_v50 = vpack.c.bf16 %v8514_v51, %v8513_v18 }
0x1b11   :  { %v13109_v10 = vpack.c.bf16 %v8508_v7, %v8507_v54 }
0x1b12   :  { %9889 = vmatprep.mubr.msk.f32.mxu1 %vm558_vm3, %v4326_v9 }
0x1b13   :  { %9890 = vmatmul.mubr.msk.f32.vlgmr.msra.gmra.mrb[50].mxu1 %vm558_vm3, %v4327_v17 }
0x1b14   :  { %10833 = vmatpush3.bf16.msra.mxu1 %v13066_v20  ;;  %9908 = vmatprep.mubr.msk.f32.mxu1 %vm86_vm0, %v12856_v26 }
0x1b15   :  { %10835 = vmatprep.subr.bf16.mxu1 %v13075_v45 }
0x1b18   :  { %10837 = vmatpush3.bf16.msra.mxu1 %v13075_v45 }
0x1b19   :  { %10839 = vmatprep.subr.bf16.mxu1 %v13089_v57 }
0x1b1c   :  { %10841 = vmatpush3.bf16.msra.mxu1 %v13089_v57 }
0x1b1d   :  { %10843 = vmatprep.subr.bf16.mxu1 %v13099_v36 }
0x1b20   :  { %10845 = vmatpush3.bf16.msra.mxu1 %v13099_v36 }
0x1b21   :  { %10863 = vmatprep.subr.bf16.mxu1 %v13109_v10 }
0x1b23   :  { %9909 = vmatmul.mubr.msk.f32.vlgmr.msra.gmra.mrb[52].mxu1 %vm86_vm0, %v12869_v41 }
0x1b24   :  { %10865 = vmatpush3.bf16.msra.mxu1 %v13109_v10  ;;  %9946 = vmatprep.mubr.msk.f32.mxu1 %vm86_vm0, %v12856_v26 }
0x1b25   :  { %10867 = vmatprep.subr.bf16.mxu1 %v13119_v49 }
0x1b28   :  { %10869 = vmatpush3.bf16.msra.mxu1 %v13119_v49 }
0x1b29   :  { %10871 = vmatprep.subr.bf16.mxu1 %v13133_v32 }
0x1b2c   :  { %10873 = vmatpush3.bf16.msra.mxu1 %v13133_v32 }
0x1b2d   :  { %10875 = vmatprep.subr.bf16.mxu1 %v13143_v50 }
0x1b30   :  { %10877 = vmatpush3.bf16.msra.mxu1 %v13143_v50 }
0x1b31   :  { %10905 = vmatprep.subr.bf16.mxu1 %v12789_v52 }
0x1b33   :  { %9947 = vmatmul.mubr.msk.f32.vlgmr.msra.gmra.mrb[54].mxu1 %vm86_vm0, %v12869_v41  ;;  %v13166_v41 = vld [vmem:[%s14213_s8 + $0x3] ss:$0 sm:$0xff] }
0x1b34   :  { %10907 = vmatpush3.bf16.msra.mxu1 %v12789_v52 }
0x1b35   :  { %10909 = vmatprep.subr.bf16.mxu1 %v12801_v60 }
0x1b38   :  { %10911 = vmatpush3.bf16.msra.mxu1 %v12801_v60 }
0x1b39   :  { %10913 = vmatprep.subr.bf16.mxu1 %v12811_v44 }
0x1b3c   :  { %10915 = vmatpush3.bf16.msra.mxu1 %v12811_v44 }
0x1b3d   :  { %10917 = vmatprep.subr.bf16.mxu1 %v12821_v46 }
0x1b40   :  { %10919 = vmatpush3.bf16.msra.mxu1 %v12821_v46 }
0x1b41   :  { %10937 = vmatprep.subr.bf16.mxu1 %v12912_v30 }
0x1be6   :  { %v13159_v26 = vpop.f32.mrb[50].mxu1 }
0x1be7   :  { %v13161_v9 = vpop.f32.mrb[51].mxu1 }
0x1bf6   :  { %v9910_v17 = vpop.f32.mrb[52].mxu1 }
0x1bf7   :  { %v4497_v1 = vpop.f32.mrb[53].mxu1  ;;  %v4503_v31 = vadd.f32 %v9910_v17, %v13166_v41 }
0x1bf8   :  { %v4498_v0 = vadd.f32 %v13166_v41, %v4497_v1 }
0x1bfa   :  { %9953 = vmatprep.mubr.msk.f32.mxu0 %vm466_vm1, %v4498_v0 }
0x1bfb   :  { %9954 = vmatmul.mubr.msk.f32.vlgmr.msra.gmra.mrb[50].mxu0 %vm466_vm1, %v4503_v31 }
0x1c06   :  { %v9948_v54 = vpop.f32.mrb[54].mxu1 }
0x1c07   :  { %v4687_v7 = vadd.f32 %v9948_v54, %v13175_v58  ;;  %v4681_v56 = vpop.f32.mrb[55].mxu1 }
0x1c08   :  { %v4682_v33 = vadd.f32 %v13175_v58, %v4681_v56 }
0x1c0a   :  { %v10884_v6 = vpack.c.bf16 %v4687_v7, %v4682_v33 }
0x1c0c   :  { %10885 = vmatprep.subr.bf16.mxu0 %v10884_v6 }
0x1c0d   :  { %10887 = vmatpush3.bf16.msra.mxu0 %v10884_v6 }
0x1cce   :  { %v9955_v21 = vpop.f32.mrb[50].mxu0 }
0x1ccf   :  { %v4778_v18 = vmul.f32 0.17677669, %v9955_v21  ;;  %v4768_v51 = vpop.f32.mrb[51].mxu0  ;;  %v3811_v21 = vadd.f32 %v13020_v3, %v12485_v48 }
0x1cd0   :  { %v4777_v17 = vmul.f32 0.17677669, %v4768_v51 }
0x1cd1   :  { %v4780_v1 = vadd.f32 %v13047_v40, %v4778_v18  ;;  %v3810_v18 = vadd.f32 %v13018_v61, %v12497_v62 }
0x1cd2   :  { %v4779_v0 = vadd.f32 %v13053_v8, %v4777_v17 }
0x1cd3   :  { %v4784_v31 = vsel %vm558_vm3, %v4780_v1, -inf }
0x1cd4   :  { %4785 = vmax.xlane.f32.xlu1 %v4784_v31  ;;  %v4781_v2 = vsel %vm558_vm3, %v4779_v0, -inf  ;;  %v13188_v31 = vadd.f32 %v12735_v16, %v3811_v21 }
0x1cd5   :  { %4782 = vmax.xlane.f32.xlu0 %v4781_v2 }
0x1cd6   :  { %v3840_v48 = vsel %vm86_vm0, %v13188_v31, 0.0 }
0x1d61   :  { %v4786_v54 = vpop.xlane.xlu1 %4785 }
0x1d62   :  { %v4788_v12 = vsub.f32 %v4780_v1, %v4786_v54  ;;  %v4783_v56 = vpop.xlane.xlu0 %4782  ;;  %v13192_v1 = vadd.f32 %v12735_v16, %v3810_v18 }
0x1d63   :  { %v4787_v7 = vsub.f32 %v4779_v0, %v4783_v56 }
0x1d64   :  { %v4791_v33 = vmul.f32 1.442695, %v4788_v12  ;;  %v3837_v62 = vsel %vm86_vm0, %v13192_v1, 0.0 }
0x1d65   :  { %v4789_v6 = vmul.f32 1.442695, %v4787_v7 }
0x1d66   :  { %11439 = vpow2.f32 %v4791_v33 }
0x1d67   :  { %11441 = vpow2.f32 %v4789_v6 }
0x1d70   :  { %v11440_v51 = vpop.eup %11439 }
0x1d71   :  { %v11442_v17 = vpop.eup %11441  ;;  %v4796_v2 = vsel %vm558_vm3, %v11440_v51, 0.0 }
0x1d72   :  { %4797 = vadd.xlane.f32.xlu1 %v4796_v2  ;;  %v4793_v12 = vsel %vm558_vm3, %v11442_v17, 0.0 }
0x1d73   :  { %4794 = vadd.xlane.f32.xlu0 %v4793_v12 }
0x1d76   :  { %3841 = vadd.xlane.f32.xlu1 %v3840_v48 }
0x1d77   :  { %3838 = vadd.xlane.f32.xlu0 %v3837_v62 }
0x1dff   :  { %v4798_v61 = vpop.xlane.xlu1 %4797 }
0x1e00   :  { %11443 = vrcp.f32 %v4798_v61  ;;  %v4795_v3 = vpop.xlane.xlu0 %4794 }
0x1e01   :  { %11445 = vrcp.f32 %v4795_v3  ;;  %v8525_v3 = vld [vmem:[%s14167_s10 + $0x60] sm:$0xff] }
0x1e03   :  { %v3842_v0 = vpop.xlane.xlu1 %3841 }
0x1e04   :  { %v3852_v54 = vmul.f32 0.015625, %v3842_v0  ;;  %v3839_v16 = vpop.xlane.xlu0 %3838  ;;  %v8526_v0 = vld [vmem:[%s14167_s10 + $0x68] sm:$0xff] }
0x1e05   :  { %v3851_v56 = vmul.f32 0.015625, %v3839_v16  ;;  %v13214_v16 = vpack.c.bf16 %v8526_v0, %v8525_v3 }
0x1e06   :  { %v3858_v7 = vsub.f32 %v13188_v31, %v3852_v54  ;;  %v8527_v54 = vld [vmem:[%s14167_s10 + $0x70] sm:$0xff] }
0x1e07   :  { %v3857_v33 = vsub.f32 %v13192_v1, %v3851_v56  ;;  %10889 = vmatprep.subr.bf16.mxu0 %v13214_v16  ;;  %v8479_v56 = vld [vmem:[%s14167_s10 + $0x40] sm:$0xff] }
0x1e08   :  { %v3864_v6 = vmul.f32 %v3858_v7, %v3858_v7 }
0x1e09   :  { %v3863_v21 = vmul.f32 %v3857_v33, %v3857_v33 }
0x1e0a   :  { %v11444_v18 = vpop.eup %11443  ;;  %v3876_v2 = vsel %vm86_vm0, %v3864_v6, 0.0  ;;  %v8480_v6 = vld [vmem:[%s14167_s10 + $0x48] sm:$0xff] }
0x1e0b   :  { %v11446_v12 = vpop.eup %11445  ;;  %3877 = vadd.xlane.f32.xlu1 %v3876_v2  ;;  %v3873_v48 = vsel %vm86_vm0, %v3863_v21, 0.0  ;;  %v4802_v61 = vmul.f32 %v11444_v18, %v11440_v51  ;;  %v8528_v51 = vld [vmem:[%s14167_s10 + $0x78] sm:$0xff]  ;;  %v13231_v21 = vpack.c.bf16 %v8480_v6, %v8479_v56 }
0x1e0c   :  { %3874 = vadd.xlane.f32.xlu0 %v3873_v48  ;;  %v4801_v62 = vmul.f32 %v11446_v12, %v11442_v17  ;;  %v13219_v17 = vpack.c.bf16 %v8528_v51, %v8527_v54 }
0x1e0e   :  { %9960 = vmatprep.mubr.msk.f32.mxu0 %vm558_vm3, %v4801_v62 }
0x1e0f   :  { %9961 = vmatmul.mubr.msk.f32.vlgmr.msra.gmra.mrb[52].mxu0 %vm558_vm3, %v4802_v61 }
0x1e10   :  { %10891 = vmatpush3.bf16.msra.mxu0 %v13214_v16 }
0x1e11   :  { %10893 = vmatprep.subr.bf16.mxu0 %v13219_v17 }
0x1e14   :  { %10895 = vmatpush3.bf16.msra.mxu0 %v13219_v17 }
0x1e15   :  { %10897 = vmatprep.subr.bf16.mxu0 %v13231_v21 }
0x1e98   :  { %v3878_v18 = vpop.xlane.xlu1 %3877 }
0x1e99   :  { %v3888_v2 = vmul.f32 0.015625, %v3878_v18  ;;  %v3875_v12 = vpop.xlane.xlu0 %3874 }
0x1e9a   :  { %v3887_v48 = vmul.f32 0.015625, %v3875_v12 }
0x1e9b   :  { %v3894_v62 = vadd.f32 1e-05, %v3888_v2 }
0x1e9c   :  { %v3893_v61 = vadd.f32 1e-05, %v3887_v48 }
0x1e9d   :  { %11447 = vrsqrt.f32 %v3894_v62 }
0x1e9e   :  { %11449 = vrsqrt.f32 %v3893_v61 }
0x1ea7   :  { %v11448_v3 = vpop.eup %11447 }
0x1ea8   :  { %v11450_v0 = vpop.eup %11449  ;;  %v3906_v54 = vmul.f32 %v11448_v3, %v3858_v7 }
0x1ea9   :  { %v3905_v51 = vmul.f32 %v11450_v0, %v3857_v33 }
0x1eaa   :  { %v3918_v22 = vmul.f32 %v12846_v53, %v3906_v54 }
0x1eab   :  { %v3917_v19 = vmul.f32 %v12846_v53, %v3905_v51 }
0x1eac   :  { %v13240_v6 = vadd.f32 %v12852_v43, %v3918_v22  ;;  %v8481_v22 = vld [vmem:[%s14167_s10 + $0x50] sm:$0xff] }
0x1ead   :  { %v13237_v56 = vadd.f32 %v12852_v43, %v3917_v19  ;;  %v8482_v19 = vld [vmem:[%s14167_s10 + $0x58] sm:$0xff] }
0x1eae   :  { %v13263_v7 = vpack.c.bf16 %v8482_v19, %v8481_v22 }
0x1eaf   :  { %10001 = vmatprep.mubr.msk.f32.mxu1 %vm86_vm0, %v13237_v56 }
0x1eb0   :  { %10002 = vmatmul.mubr.msk.f32.vlgmr.msra.gmra.mrb[56].mxu1 %vm86_vm0, %v13240_v6 }
0x1eb1   :  { %10939 = vmatpush3.bf16.msra.mxu1 %v12912_v30  ;;  %10039 = vmatprep.mubr.msk.f32.mxu1 %vm86_vm0, %v13237_v56 }
0x1eb2   :  { %10941 = vmatprep.subr.bf16.mxu1 %v12922_v38 }
0x1eb5   :  { %10943 = vmatpush3.bf16.msra.mxu1 %v12922_v38 }
0x1eb6   :  { %10945 = vmatprep.subr.bf16.mxu1 %v12932_v39 }
0x1eb9   :  { %10947 = vmatpush3.bf16.msra.mxu1 %v12932_v39 }
0x1eba   :  { %10949 = vmatprep.subr.bf16.mxu1 %v12942_v13 }
0x1ebd   :  { %10951 = vmatpush3.bf16.msra.mxu1 %v12942_v13 }
0x1ec0   :  { %10040 = vmatmul.mubr.msk.f32.vlgmr.msra.gmra.mrb[58].mxu1 %vm86_vm0, %v13240_v6 }
0x1ee2   :  { %v9962_v53 = vpop.f32.mrb[52].mxu0 }
0x1ee3   :  { %v4875_v43 = vpop.f32.mrb[53].mxu0 }
0x1ee4   :  { %9971 = vmatprep.mubr.msk.f32.mxu0 %vm466_vm1, %v4875_v43 }
0x1ee5   :  { %9972 = vmatmul.mubr.msk.f32.vlgmr.msra.gmra.mrb[54].mxu0 %vm466_vm1, %v9962_v53 }
0x1ee6   :  { %10899 = vmatpush3.bf16.msra.mxu0 %v13231_v21  ;;  %9982 = vmatprep.mubr.msk.f32.mxu0 %vm466_vm1, %v13161_v9 }
0x1ee7   :  { %10901 = vmatprep.subr.bf16.mxu0 %v13263_v7 }
0x1eea   :  { %10903 = vmatpush3.bf16.msra.mxu0 %v13263_v7 }
0x1eeb   :  { %10921 = vmatprep.subr.bf16.mxu0 %v12831_v14 }
0x1eed   :  { %9983 = vmatmul.mubr.msk.f32.vlgmr.msra.gmra.mrb[54].mxu0 %vm466_vm1, %v13159_v26 }
0x1eee   :  { %10923 = vmatpush3.bf16.msra.mxu0 %v12831_v14  ;;  %10020 = vmatprep.mubr.msk.f32.mxu0 %vm86_vm0, %v13237_v56 }
0x1eef   :  { %10925 = vmatprep.subr.bf16.mxu0 %v12871_v47 }
0x1ef2   :  { %10927 = vmatpush3.bf16.msra.mxu0 %v12871_v47 }
0x1ef3   :  { %10929 = vmatprep.subr.bf16.mxu0 %v12885_v28 }
0x1ef6   :  { %10931 = vmatpush3.bf16.msra.mxu0 %v12885_v28 }
0x1ef7   :  { %10933 = vmatprep.subr.bf16.mxu0 %v12895_v63 }
0x1efa   :  { %10935 = vmatpush3.bf16.msra.mxu0 %v12895_v63 }
0x1efd   :  { %10021 = vmatmul.mubr.msk.f32.vlgmr.msra.gmra.mrb[56].mxu0 %vm86_vm0, %v13240_v6 }
0x1f83   :  { %v10003_v26 = vpop.f32.mrb[56].mxu1 }
0x1f84   :  { %v5123_v9 = vpop.f32.mrb[57].mxu1  ;;  %v5129_v53 = vadd.f32 %v10003_v26, %v12962_v23 }
0x1f85   :  { %v5124_v33 = vadd.f32 %v12962_v23, %v5123_v9 }
0x1f87   :  { %10046 = vmatprep.mubr.msk.f32.mxu0 %vm466_vm1, %v5124_v33 }
0x1f93   :  { %v10041_v18 = vpop.f32.mrb[58].mxu1 }
0x1f94   :  { %v5279_v2 = vadd.f32 %v10041_v18, %v13029_v11  ;;  %v5273_v12 = vpop.f32.mrb[59].mxu1 }
0x1f95   :  { %v5274_v48 = vadd.f32 %v13029_v11, %v5273_v12 }
0x1f97   :  { %v10958_v62 = vpack.c.bf16 %v5279_v2, %v5274_v48 }
0x1f99   :  { %10959 = vmatprep.subr.bf16.mxu1 %v10958_v62 }
0x1f9a   :  { %10961 = vmatpush3.bf16.msra.mxu1 %v10958_v62 }
0x1f9b   :  { %10963 = vmatprep.subr.bf16.mxu1 %v13066_v20 }
0x1fc0   :  { %v13291_v61 = vpop.f32.mrb[54].mxu0 }
0x1fc1   :  { %v13293_v3 = vpop.f32.mrb[55].mxu0 }
0x1fd0   :  { %v10022_v0 = vpop.f32.mrb[56].mxu0 }
0x1fd1   :  { %v5204_v54 = vadd.f32 %v10022_v0, %v13004_v4  ;;  %v5198_v51 = vpop.f32.mrb[57].mxu0 }
0x1fd2   :  { %v5199_v22 = vadd.f32 %v13004_v4, %v5198_v51 }
0x1fd4   :  { %v10952_v19 = vpack.c.bf16 %v5204_v54, %v5199_v22 }
0x1fd6   :  { %10954 = vmatprep.subr.msk.bf16.mxu0 %vm11926_vm2, %v10952_v19 }
0x1fd7   :  { %10957 = vmatpush3.bf16.xpose.msk.msra.mxu0 %vm11926_vm2, %v10952_v19 }
0x1fd8   :  { %10979 = vmatprep.subr.bf16.mxu0 %v12952_v25 }
0x1fde   :  { %10047 = vmatmul.mubr.msk.f32.vlgmr.msra.gmra.mrb[58].mxu0 %vm466_vm1, %v5129_v53 }
0x1fdf   :  { %10981 = vmatpush3.bf16.msra.mxu0 %v12952_v25  ;;  %10091 = vmatprep.mubr.msk.f32.mxu0 %vm86_vm0, %v13237_v56 }
0x1fe0   :  { %10983 = vmatprep.subr.bf16.mxu0 %v12973_v24 }
0x1fe3   :  { %10985 = vmatpush3.bf16.msra.mxu0 %v12973_v24 }
0x1fe4   :  { %10987 = vmatprep.subr.bf16.mxu0 %v12988_v35 }
0x1fe7   :  { %10989 = vmatpush3.bf16.msra.mxu0 %v12988_v35 }
0x1fe8   :  { %10991 = vmatprep.subr.bf16.mxu0 %v12998_v15 }
0x1feb   :  { %10993 = vmatpush3.bf16.msra.mxu0 %v12998_v15 }
0x1fee   :  { %10092 = vmatmul.mubr.msk.f32.vlgmr.msra.gmra.mrb[60].mxu0 %vm86_vm0, %v13240_v6 }
0x20b1   :  { %v10048_v43 = vpop.f32.mrb[58].mxu0 }
0x20b2   :  { %v5370_v26 = vmul.f32 0.17677669, %v10048_v43  ;;  %v5360_v9 = vpop.f32.mrb[59].mxu0 }
0x20b3   :  { %v5369_v33 = vmul.f32 0.17677669, %v5360_v9 }
0x20b4   :  { %v5372_v18 = vadd.f32 %v13047_v40, %v5370_v26 }
0x20b5   :  { %v5371_v2 = vadd.f32 %v13053_v8, %v5369_v33 }
0x20b6   :  { %v5376_v12 = vsel %vm558_vm3, %v5372_v18, -inf }
0x20b7   :  { %5377 = vmax.xlane.f32.xlu1 %v5376_v12  ;;  %v5373_v48 = vsel %vm558_vm3, %v5371_v2, -inf }
0x20b8   :  { %5374 = vmax.xlane.f32.xlu0 %v5373_v48 }
0x20c1   :  { %v10093_v62 = vpop.f32.mrb[60].mxu0 }
0x20c2   :  { %v5623_v0 = vadd.f32 %v10093_v62, %v13036_v34  ;;  %v5617_v54 = vpop.f32.mrb[61].mxu0 }
0x20c3   :  { %v5618_v51 = vadd.f32 %v13036_v34, %v5617_v54 }
0x20c5   :  { %v11010_v22 = vpack.c.bf16 %v5623_v0, %v5618_v51 }
0x20c7   :  { %11012 = vmatprep.subr.msk.bf16.mxu0 %vm11926_vm2, %v11010_v22 }
0x20c8   :  { %11015 = vmatpush3.bf16.xpose.msk.msra.mxu0 %vm11926_vm2, %v11010_v22 }
0x2144   :  { %v5378_v19 = vpop.xlane.xlu1 %5377 }
0x2145   :  { %v5380_v53 = vsub.f32 %v5372_v18, %v5378_v19  ;;  %v5375_v43 = vpop.xlane.xlu0 %5374 }
0x2146   :  { %v5379_v26 = vsub.f32 %v5371_v2, %v5375_v43 }
0x2147   :  { %v5383_v9 = vmul.f32 1.442695, %v5380_v53 }
0x2148   :  { %v5381_v33 = vmul.f32 1.442695, %v5379_v26 }
0x2149   :  { %11451 = vpow2.f32 %v5383_v9 }
0x214a   :  { %11453 = vpow2.f32 %v5381_v33 }
0x2153   :  { %v11452_v12 = vpop.eup %11451 }
0x2154   :  { %v11454_v48 = vpop.eup %11453  ;;  %v5388_v62 = vsel %vm558_vm3, %v11452_v12, 0.0 }
0x2155   :  { %5389 = vadd.xlane.f32.xlu1 %v5388_v62  ;;  %v5385_v0 = vsel %vm558_vm3, %v11454_v48, 0.0 }
0x2156   :  { %5386 = vadd.xlane.f32.xlu0 %v5385_v0 }
0x21e2   :  { %v5390_v54 = vpop.xlane.xlu1 %5389 }
0x21e3   :  { %11455 = vrcp.f32 %v5390_v54  ;;  %v5387_v51 = vpop.xlane.xlu0 %5386 }
0x21e4   :  { %11457 = vrcp.f32 %v5387_v51 }
0x21ed   :  { %v11456_v22 = vpop.eup %11455 }
0x21ee   :  { %v11458_v18 = vpop.eup %11457  ;;  %v5394_v2 = vmul.f32 %v11456_v22, %v11452_v12 }
0x21ef   :  { %v5393_v19 = vmul.f32 %v11458_v18, %v11454_v48 }
0x21f1   :  { %10053 = vmatprep.mubr.msk.f32.mxu1 %vm558_vm3, %v5393_v19 }
0x21f2   :  { %10054 = vmatmul.mubr.msk.f32.vlgmr.msra.gmra.mrb[60].mxu1 %vm558_vm3, %v5394_v2 }
0x21f3   :  { %10965 = vmatpush3.bf16.msra.mxu1 %v13066_v20  ;;  %10072 = vmatprep.mubr.msk.f32.mxu1 %vm86_vm0, %v13237_v56 }
0x21f4   :  { %10967 = vmatprep.subr.bf16.mxu1 %v13075_v45 }
0x21f7   :  { %10969 = vmatpush3.bf16.msra.mxu1 %v13075_v45 }
0x21f8   :  { %10971 = vmatprep.subr.bf16.mxu1 %v13089_v57 }
0x21fb   :  { %10973 = vmatpush3.bf16.msra.mxu1 %v13089_v57 }
0x21fc   :  { %10975 = vmatprep.subr.bf16.mxu1 %v13099_v36 }
0x21ff   :  { %10977 = vmatpush3.bf16.msra.mxu1 %v13099_v36 }
0x2200   :  { %10995 = vmatprep.subr.bf16.mxu1 %v13109_v10 }
0x2202   :  { %10073 = vmatmul.mubr.msk.f32.vlgmr.msra.gmra.mrb[62].mxu1 %vm86_vm0, %v13240_v6 }
0x2203   :  { %10997 = vmatpush3.bf16.msra.mxu1 %v13109_v10  ;;  %10110 = vmatprep.mubr.msk.f32.mxu1 %vm86_vm0, %v13237_v56 }
0x2204   :  { %10999 = vmatprep.subr.bf16.mxu1 %v13119_v49 }
0x2207   :  { %11001 = vmatpush3.bf16.msra.mxu1 %v13119_v49 }
0x2208   :  { %11003 = vmatprep.subr.bf16.mxu1 %v13133_v32 }
0x220b   :  { %11005 = vmatpush3.bf16.msra.mxu1 %v13133_v32 }
0x220c   :  { %11007 = vmatprep.subr.bf16.mxu1 %v13143_v50 }
0x220f   :  { %11009 = vmatpush3.bf16.msra.mxu1 %v13143_v50 }
0x2210   :  { %11037 = vmatprep.subr.bf16.mxu1 %v12789_v52 }
0x2212   :  { %10111 = vmatmul.mubr.msk.f32.vlgmr.msra.gmra.mrb[64].mxu1 %vm86_vm0, %v13240_v6 }
0x2213   :  { %11039 = vmatpush3.bf16.msra.mxu1 %v12789_v52 }
0x2214   :  { %11041 = vmatprep.subr.bf16.mxu1 %v12801_v60 }
0x2217   :  { %11043 = vmatpush3.bf16.msra.mxu1 %v12801_v60 }
0x2218   :  { %11045 = vmatprep.subr.bf16.mxu1 %v12811_v44 }
0x221b   :  { %11047 = vmatpush3.bf16.msra.mxu1 %v12811_v44 }
0x221c   :  { %11049 = vmatprep.subr.bf16.mxu1 %v12821_v46 }
0x221f   :  { %11051 = vmatpush3.bf16.msra.mxu1 %v12821_v46 }
0x2220   :  { %11069 = vmatprep.subr.bf16.mxu1 %v12912_v30 }
0x22c5   :  { %v13361_v56 = vpop.f32.mrb[60].mxu1 }
0x22c6   :  { %v13363_v53 = vpop.f32.mrb[61].mxu1 }
0x22d5   :  { %v10074_v6 = vpop.f32.mrb[62].mxu1 }
0x22d6   :  { %v5542_v52 = vpop.f32.mrb[63].mxu1  ;;  %v5548_v60 = vadd.f32 %v10074_v6, %v13166_v41 }
0x22d7   :  { %v5543_v43 = vadd.f32 %v13166_v41, %v5542_v52 }
0x22d9   :  { %10117 = vmatprep.mubr.msk.f32.mxu0 %vm466_vm1, %v5543_v43 }
0x22da   :  { %10118 = vmatmul.mubr.msk.f32.vlgmr.msra.gmra.mrb[62].mxu0 %vm466_vm1, %v5548_v60 }
0x22e5   :  { %v10112_v44 = vpop.f32.mrb[64].mxu1 }
0x22e6   :  { %v5698_v26 = vadd.f32 %v10112_v44, %v13175_v58  ;;  %v5692_v46 = vpop.f32.mrb[65].mxu1  ;;  %v3813_v44 = vadd.f32 %v13024_v55, %v12723_v37 }
0x22e7   :  { %v5693_v9 = vadd.f32 %v13175_v58, %v5692_v46 }
0x22e9   :  { %v11016_v33 = vpack.c.bf16 %v5698_v26, %v5693_v9  ;;  %v3812_v26 = vadd.f32 %v13022_v42, %v12726_v59 }
0x22eb   :  { %11017 = vmatprep.subr.bf16.mxu0 %v11016_v33 }
0x22ec   :  { %11019 = vmatpush3.bf16.msra.mxu0 %v11016_v33  ;;  %v11569_v33 = vld [vmem:[%s14174_s17] ss:$0 sm:$0xff] }
0x22ed   :  { %11021 = vmatprep.subr.bf16.mxu0 %v13214_v16 }
0x23ad   :  { %v10119_v12 = vpop.f32.mrb[62].mxu0 }
0x23ae   :  { %v5789_v48 = vmul.f32 0.17677669, %v10119_v12  ;;  %v5779_v62 = vpop.f32.mrb[63].mxu0  ;;  %v13383_v12 = vadd.f32 %v11569_v33, %v3813_v44 }
0x23af   :  { %v5788_v0 = vmul.f32 0.17677669, %v5779_v62  ;;  %v13386_v62 = vadd.f32 %v11569_v33, %v3812_v26 }
0x23b0   :  { %v5791_v54 = vadd.f32 %v13047_v40, %v5789_v48  ;;  %v3846_v37 = vsel %vm86_vm0, %v13383_v12, 0.0 }
0x23b1   :  { %v5790_v51 = vadd.f32 %v13053_v8, %v5788_v0  ;;  %v3843_v59 = vsel %vm86_vm0, %v13386_v62, 0.0 }
0x23b2   :  { %v5795_v22 = vsel %vm558_vm3, %v5791_v54, -inf }
0x23b3   :  { %5796 = vmax.xlane.f32.xlu1 %v5795_v22  ;;  %v5792_v18 = vsel %vm558_vm3, %v5790_v51, -inf }
0x23b4   :  { %5793 = vmax.xlane.f32.xlu0 %v5792_v18 }
0x2440   :  { %v5797_v19 = vpop.xlane.xlu1 %5796 }
0x2441   :  { %v5799_v2 = vsub.f32 %v5791_v54, %v5797_v19  ;;  %v5794_v6 = vpop.xlane.xlu0 %5793 }
0x2442   :  { %v5798_v52 = vsub.f32 %v5790_v51, %v5794_v6 }
0x2443   :  { %v5802_v43 = vmul.f32 1.442695, %v5799_v2 }
0x2444   :  { %v5800_v60 = vmul.f32 1.442695, %v5798_v52 }
0x2445   :  { %11459 = vpow2.f32 %v5802_v43 }
0x2446   :  { %11461 = vpow2.f32 %v5800_v60 }
0x244f   :  { %v11460_v46 = vpop.eup %11459 }
0x2450   :  { %v11462_v9 = vpop.eup %11461  ;;  %v5807_v48 = vsel %vm558_vm3, %v11460_v46, 0.0 }
0x2451   :  { %5808 = vadd.xlane.f32.xlu1 %v5807_v48  ;;  %v5804_v0 = vsel %vm558_vm3, %v11462_v9, 0.0 }
0x2452   :  { %5805 = vadd.xlane.f32.xlu0 %v5804_v0 }
0x2455   :  { %3847 = vadd.xlane.f32.xlu1 %v3846_v37 }
0x2456   :  { %3844 = vadd.xlane.f32.xlu0 %v3843_v59 }
0x24de   :  { %v5809_v42 = vpop.xlane.xlu1 %5808 }
0x24df   :  { %11463 = vrcp.f32 %v5809_v42  ;;  %v5806_v55 = vpop.xlane.xlu0 %5805 }
0x24e0   :  { %11465 = vrcp.f32 %v5806_v55 }
0x24e2   :  { %v3848_v54 = vpop.xlane.xlu1 %3847 }
0x24e3   :  { %v3854_v51 = vmul.f32 0.015625, %v3848_v54  ;;  %v3845_v22 = vpop.xlane.xlu0 %3844 }
0x24e4   :  { %v3853_v18 = vmul.f32 0.015625, %v3845_v22 }
0x24e5   :  { %v3860_v19 = vsub.f32 %v13383_v12, %v3854_v51 }
0x24e6   :  { %v3859_v2 = vsub.f32 %v13386_v62, %v3853_v18  ;;  %v11570_v18 = vld [vmem:[%s14210_s27 + $0x1] ss:$0 sm:$0xff] }
0x24e7   :  { %v3866_v6 = vmul.f32 %v3860_v19, %v3860_v19 }
0x24e8   :  { %v3865_v52 = vmul.f32 %v3859_v2, %v3859_v2 }
0x24e9   :  { %v11464_v43 = vpop.eup %11463  ;;  %v3882_v60 = vsel %vm86_vm0, %v3866_v6, 0.0 }
0x24ea   :  { %v11466_v44 = vpop.eup %11465  ;;  %3883 = vadd.xlane.f32.xlu1 %v3882_v60  ;;  %v3879_v26 = vsel %vm86_vm0, %v3865_v52, 0.0  ;;  %v5813_v48 = vmul.f32 %v11464_v43, %v11460_v46  ;;  %v11571_v43 = vld [vmem:[%s14211_s6 + $0x1] ss:$0 sm:$0xff] }
0x24eb   :  { %3880 = vadd.xlane.f32.xlu0 %v3879_v26  ;;  %v5812_v33 = vmul.f32 %v11466_v44, %v11462_v9 }
0x24ed   :  { %10124 = vmatprep.mubr.msk.f32.mxu0 %vm558_vm3, %v5812_v33 }
0x24ee   :  { %10125 = vmatmul.mubr.msk.f32.vlgmr.msra.gmra.mrb[64].mxu0 %vm558_vm3, %v5813_v48 }
0x24ef   :  { %11023 = vmatpush3.bf16.msra.mxu0 %v13214_v16 }
0x24f0   :  { %11025 = vmatprep.subr.bf16.mxu0 %v13219_v17 }
0x24f3   :  { %11027 = vmatpush3.bf16.msra.mxu0 %v13219_v17 }
0x24f4   :  { %11029 = vmatprep.subr.bf16.mxu0 %v13231_v21 }
0x2577   :  { %v3884_v0 = vpop.xlane.xlu1 %3883 }
0x2578   :  { %v3890_v37 = vmul.f32 0.015625, %v3884_v0  ;;  %v3881_v59 = vpop.xlane.xlu0 %3880 }
0x2579   :  { %v3889_v42 = vmul.f32 0.015625, %v3881_v59 }
0x257a   :  { %v3896_v55 = vadd.f32 1e-05, %v3890_v37 }
0x257b   :  { %v3895_v54 = vadd.f32 1e-05, %v3889_v42 }
0x257c   :  { %11467 = vrsqrt.f32 %v3896_v55 }
0x257d   :  { %11469 = vrsqrt.f32 %v3895_v54 }
0x2586   :  { %v11468_v46 = vpop.eup %11467 }
0x2587   :  { %v11470_v9 = vpop.eup %11469  ;;  %v3908_v51 = vmul.f32 %v11468_v46, %v3860_v19 }
0x2588   :  { %v3907_v22 = vmul.f32 %v11470_v9, %v3859_v2 }
0x2589   :  { %v3920_v6 = vmul.f32 %v11570_v18, %v3908_v51 }
0x258a   :  { %v3919_v52 = vmul.f32 %v11570_v18, %v3907_v22 }
0x258b   :  { %v13411_v44 = vadd.f32 %v11571_v43, %v3920_v6 }
0x258c   :  { %v13409_v60 = vadd.f32 %v11571_v43, %v3919_v52 }
0x258e   :  { %10165 = vmatprep.mubr.msk.f32.mxu1 %vm86_vm0, %v13409_v60 }
0x258f   :  { %10166 = vmatmul.mubr.msk.f32.vlgmr.msra.gmra.mrb[66].mxu1 %vm86_vm0, %v13411_v44 }
0x2590   :  { %11071 = vmatpush3.bf16.msra.mxu1 %v12912_v30  ;;  %10203 = vmatprep.mubr.msk.f32.mxu1 %vm86_vm0, %v13409_v60 }
0x2591   :  { %11073 = vmatprep.subr.bf16.mxu1 %v12922_v38 }
0x2594   :  { %11075 = vmatpush3.bf16.msra.mxu1 %v12922_v38 }
0x2595   :  { %11077 = vmatprep.subr.bf16.mxu1 %v12932_v39 }
0x2598   :  { %11079 = vmatpush3.bf16.msra.mxu1 %v12932_v39 }
0x2599   :  { %11081 = vmatprep.subr.bf16.mxu1 %v12942_v13 }
0x259c   :  { %11083 = vmatpush3.bf16.msra.mxu1 %v12942_v13 }
0x259f   :  { %10204 = vmatmul.mubr.msk.f32.vlgmr.msra.gmra.mrb[68].mxu1 %vm86_vm0, %v13411_v44 }
0x25c1   :  { %v10126_v19 = vpop.f32.mrb[64].mxu0 }
0x25c2   :  { %v5886_v30 = vpop.f32.mrb[65].mxu0 }
0x25c3   :  { %10135 = vmatprep.mubr.msk.f32.mxu0 %vm466_vm1, %v5886_v30 }
0x25c4   :  { %10136 = vmatmul.mubr.msk.f32.vlgmr.msra.gmra.mrb[66].mxu0 %vm466_vm1, %v10126_v19 }
0x25c5   :  { %11031 = vmatpush3.bf16.msra.mxu0 %v13231_v21  ;;  %10146 = vmatprep.mubr.msk.f32.mxu0 %vm466_vm1, %v13363_v53 }
0x25c6   :  { %11033 = vmatprep.subr.bf16.mxu0 %v13263_v7 }
0x25c9   :  { %11035 = vmatpush3.bf16.msra.mxu0 %v13263_v7 }
0x25ca   :  { %11053 = vmatprep.subr.bf16.mxu0 %v12831_v14 }
0x25cc   :  { %10147 = vmatmul.mubr.msk.f32.vlgmr.msra.gmra.mrb[66].mxu0 %vm466_vm1, %v13361_v56 }
0x25cd   :  { %11055 = vmatpush3.bf16.msra.mxu0 %v12831_v14  ;;  %10184 = vmatprep.mubr.msk.f32.mxu0 %vm86_vm0, %v13409_v60 }
0x25ce   :  { %11057 = vmatprep.subr.bf16.mxu0 %v12871_v47 }
0x25d1   :  { %11059 = vmatpush3.bf16.msra.mxu0 %v12871_v47 }
0x25d2   :  { %11061 = vmatprep.subr.bf16.mxu0 %v12885_v28 }
0x25d5   :  { %11063 = vmatpush3.bf16.msra.mxu0 %v12885_v28 }
0x25d6   :  { %11065 = vmatprep.subr.bf16.mxu0 %v12895_v63 }
0x25d9   :  { %11067 = vmatpush3.bf16.msra.mxu0 %v12895_v63 }
0x25dc   :  { %10185 = vmatmul.mubr.msk.f32.vlgmr.msra.gmra.mrb[68].mxu0 %vm86_vm0, %v13411_v44 }
0x2662   :  { %v10167_v38 = vpop.f32.mrb[66].mxu1 }
0x2663   :  { %v6129_v14 = vpop.f32.mrb[67].mxu1 }
0x2664   :  { %v6130_v39 = vadd.f32 %v12962_v23, %v6129_v14 }
0x2666   :  { %10210 = vmatprep.mubr.msk.f32.mxu0 %vm466_vm1, %v6130_v39 }
0x2672   :  { %v10205_v13 = vpop.f32.mrb[68].mxu1 }
0x2673   :  { %v6285_v47 = vadd.f32 %v10205_v13, %v13029_v11  ;;  %v6279_v56 = vpop.f32.mrb[69].mxu1 }
0x2674   :  { %v6280_v53 = vadd.f32 %v13029_v11, %v6279_v56  ;;  %v11572_v11 = vld [vmem:[%s14213_s8 + $0x2] ss:$0 sm:$0xff] }
0x2675   :  { %v6135_v37 = vadd.f32 %v11572_v11, %v10167_v38  ;;  %v11574_v11 = vld [vmem:[%s14166_s1] sm:$0xff] }
0x2676   :  { %v11090_v28 = vpack.c.bf16 %v6285_v47, %v6280_v53 }
0x2678   :  { %11091 = vmatprep.subr.bf16.mxu1 %v11090_v28 }
0x2679   :  { %11093 = vmatpush3.bf16.msra.mxu1 %v11090_v28 }
0x267a   :  { %11095 = vmatprep.subr.bf16.mxu1 %v13066_v20 }
0x269f   :  { %v13454_v63 = vpop.f32.mrb[66].mxu0 }
0x26a0   :  { %v13456_v2 = vpop.f32.mrb[67].mxu0 }
0x26af   :  { %v10186_v26 = vpop.f32.mrb[68].mxu0 }
0x26b0   :  { %v6210_v23 = vadd.f32 %v10186_v26, %v13004_v4  ;;  %v6204_v33 = vpop.f32.mrb[69].mxu0 }
0x26b1   :  { %v6205_v48 = vadd.f32 %v13004_v4, %v6204_v33 }
0x26b3   :  { %v11084_v0 = vpack.c.bf16 %v6210_v23, %v6205_v48 }
0x26b5   :  { %11086 = vmatprep.subr.msk.bf16.mxu0 %vm11926_vm2, %v11084_v0 }
0x26b6   :  { %11089 = vmatpush3.bf16.xpose.msk.msra.mxu0 %vm11926_vm2, %v11084_v0 }
0x26b7   :  { %11111 = vmatprep.subr.bf16.mxu0 %v12952_v25 }
0x26bd   :  { %10211 = vmatmul.mubr.msk.f32.vlgmr.msra.gmra.mrb[70].mxu0 %vm466_vm1, %v6135_v37 }
0x26be   :  { %11113 = vmatpush3.bf16.msra.mxu0 %v12952_v25  ;;  %10255 = vmatprep.mubr.msk.f32.mxu0 %vm86_vm0, %v13409_v60 }
0x26bf   :  { %11115 = vmatprep.subr.bf16.mxu0 %v12973_v24 }
0x26c2   :  { %11117 = vmatpush3.bf16.msra.mxu0 %v12973_v24 }
0x26c3   :  { %11119 = vmatprep.subr.bf16.mxu0 %v12988_v35 }
0x26c6   :  { %11121 = vmatpush3.bf16.msra.mxu0 %v12988_v35 }
0x26c7   :  { %11123 = vmatprep.subr.bf16.mxu0 %v12998_v15 }
0x26ca   :  { %11125 = vmatpush3.bf16.msra.mxu0 %v12998_v15 }
0x26cd   :  { %10256 = vmatmul.mubr.msk.f32.vlgmr.msra.gmra.mrb[72].mxu0 %vm86_vm0, %v13411_v44 }
0x2790   :  { %v10212_v4 = vpop.f32.mrb[70].mxu0 }
0x2791   :  { %v6376_v25 = vmul.f32 0.17677669, %v10212_v4  ;;  %v6366_v59 = vpop.f32.mrb[71].mxu0 }
0x2792   :  { %v6375_v42 = vmul.f32 0.17677669, %v6366_v59 }
0x2793   :  { %v6378_v55 = vadd.f32 %v13047_v40, %v6376_v25 }
0x2794   :  { %v6377_v54 = vadd.f32 %v13053_v8, %v6375_v42 }
0x2795   :  { %v6382_v24 = vsel %vm558_vm3, %v6378_v55, -inf }
0x2796   :  { %6383 = vmax.xlane.f32.xlu1 %v6382_v24  ;;  %v6379_v35 = vsel %vm558_vm3, %v6377_v54, -inf }
0x2797   :  { %6380 = vmax.xlane.f32.xlu0 %v6379_v35  ;;  %v8590_v35 = vld [vmem:[%s14168_s11 + $0x1] ss:$0 sm:$0xff] }
0x27a0   :  { %v10257_v46 = vpop.f32.mrb[72].mxu0 }
0x27a1   :  { %v6629_v15 = vadd.f32 %v10257_v46, %v13036_v34  ;;  %v6623_v9 = vpop.f32.mrb[73].mxu0  ;;  %v7072_v46 = vadd.f32 %v13291_v61, %v8590_v35 }
0x27a2   :  { %v6624_v51 = vadd.f32 %v13036_v34, %v6623_v9 }
0x27a4   :  { %v11142_v22 = vpack.c.bf16 %v6629_v15, %v6624_v51  ;;  %v7071_v15 = vadd.f32 %v8590_v35, %v13293_v3 }
0x27a6   :  { %11144 = vmatprep.subr.msk.bf16.mxu0 %vm11926_vm2, %v11142_v22 }
0x27a7   :  { %11147 = vmatpush3.bf16.xpose.msk.msra.mxu0 %vm11926_vm2, %v11142_v22  ;;  %v13543_v22 = vadd.f32 %v7072_v46, %v12747_v29 }
0x27a9   :  { %v7090_v29 = vsel %vm86_vm0, %v13543_v22, 0.0 }
0x2823   :  { %v6384_v40 = vpop.xlane.xlu1 %6383 }
0x2824   :  { %v6386_v8 = vsub.f32 %v6378_v55, %v6384_v40  ;;  %v6381_v18 = vpop.xlane.xlu0 %6380  ;;  %v7074_v40 = vadd.f32 %v13454_v63, %v8590_v35 }
0x2825   :  { %v6385_v6 = vsub.f32 %v6377_v54, %v6381_v18  ;;  %v13548_v18 = vadd.f32 %v7071_v15, %v12740_v5  ;;  %v8604_v15 = vld [vmem:[%s14169_s14 + $0xc8] sm:$0xff] }
0x2826   :  { %v6389_v52 = vmul.f32 1.442695, %v6386_v8  ;;  %v13553_v61 = vadd.f32 %v7074_v40, %v13188_v31  ;;  %v8603_v40 = vld [vmem:[%s14169_s14 + $0xc0] sm:$0xff] }
0x2827   :  { %v6387_v43 = vmul.f32 1.442695, %v6385_v6  ;;  %v7073_v6 = vadd.f32 %v8590_v35, %v13456_v2  ;;  %v7087_v5 = vsel %vm86_vm0, %v13548_v18, 0.0 }
0x2828   :  { %11471 = vpow2.f32 %v6389_v52  ;;  %v7096_v63 = vsel %vm86_vm0, %v13553_v61, 0.0 }
0x2829   :  { %11473 = vpow2.f32 %v6387_v43  ;;  %v13558_v3 = vadd.f32 %v7073_v6, %v13192_v1 }
0x282b   :  { %v7093_v2 = vsel %vm86_vm0, %v13558_v3, 0.0 }
0x2832   :  { %v11472_v19 = vpop.eup %11471 }
0x2833   :  { %v11474_v30 = vpop.eup %11473  ;;  %v6394_v38 = vsel %vm558_vm3, %v11472_v19, 0.0 }
0x2834   :  { %6395 = vadd.xlane.f32.xlu1 %v6394_v38  ;;  %v6391_v34 = vsel %vm558_vm3, %v11474_v30, 0.0 }
0x2835   :  { %6392 = vadd.xlane.f32.xlu0 %v6391_v34 }
0x28c1   :  { %v6396_v14 = vpop.xlane.xlu1 %6395 }
0x28c2   :  { %11475 = vrcp.f32 %v6396_v14  ;;  %v6393_v27 = vpop.xlane.xlu0 %6392 }
0x28c3   :  { %11477 = vrcp.f32 %v6393_v27 }
0x28cc   :  { %v11476_v39 = vpop.eup %11475 }
0x28cd   :  { %v11478_v13 = vpop.eup %11477  ;;  %v6400_v56 = vmul.f32 %v11476_v39, %v11472_v19 }
0x28ce   :  { %v6399_v47 = vmul.f32 %v11478_v13, %v11474_v30 }
0x28d0   :  { %10217 = vmatprep.mubr.msk.f32.mxu1 %vm558_vm3, %v6399_v47 }
0x28d1   :  { %10218 = vmatmul.mubr.msk.f32.vlgmr.msra.gmra.mrb[70].mxu1 %vm558_vm3, %v6400_v56 }
0x28d2   :  { %11097 = vmatpush3.bf16.msra.mxu1 %v13066_v20  ;;  %10236 = vmatprep.mubr.msk.f32.mxu1 %vm86_vm0, %v13409_v60  ;;  %v14217_v20 = vmov 0.0  }
0x28d3   :  { %11099 = vmatprep.subr.bf16.mxu1 %v13075_v45 }
0x28d6   :  { %11101 = vmatpush3.bf16.msra.mxu1 %v13075_v45 }
0x28d7   :  { %11103 = vmatprep.subr.bf16.mxu1 %v13089_v57 }
0x28da   :  { %11105 = vmatpush3.bf16.msra.mxu1 %v13089_v57 }
0x28db   :  { %11107 = vmatprep.subr.bf16.mxu1 %v13099_v36 }
0x28de   :  { %11109 = vmatpush3.bf16.msra.mxu1 %v13099_v36 }
0x28df   :  { %11127 = vmatprep.subr.bf16.mxu1 %v13109_v10 }
0x28e1   :  { %10237 = vmatmul.mubr.msk.f32.vlgmr.msra.gmra.mrb[72].mxu1 %vm86_vm0, %v13411_v44 }
0x28e2   :  { %11129 = vmatpush3.bf16.msra.mxu1 %v13109_v10  ;;  %10274 = vmatprep.mubr.msk.f32.mxu1 %vm86_vm0, %v13409_v60 }
0x28e3   :  { %11131 = vmatprep.subr.bf16.mxu1 %v13119_v49 }
0x28e6   :  { %11133 = vmatpush3.bf16.msra.mxu1 %v13119_v49 }
0x28e7   :  { %11135 = vmatprep.subr.bf16.mxu1 %v13133_v32 }
0x28ea   :  { %11137 = vmatpush3.bf16.msra.mxu1 %v13133_v32 }
0x28eb   :  { %11139 = vmatprep.subr.bf16.mxu1 %v13143_v50 }
0x28ee   :  { %11141 = vmatpush3.bf16.msra.mxu1 %v13143_v50 }
0x28f1   :  { %10275 = vmatmul.mubr.msk.f32.vlgmr.msra.gmra.mrb[74].mxu1 %vm86_vm0, %v13411_v44 }
0x28f2   :  { %7301 = vmatprep.mubr.f32.mxu1 %v14217_v20 }
0x29a4   :  { %v13518_v45 = vpop.f32.mrb[70].mxu1 }
0x29a5   :  { %v13520_v57 = vpop.f32.mrb[71].mxu1 }
0x29b4   :  { %v10238_v36 = vpop.f32.mrb[72].mxu1 }
0x29b5   :  { %v6548_v10 = vpop.f32.mrb[73].mxu1  ;;  %v6554_v60 = vadd.f32 %v10238_v36, %v13166_v41 }
0x29b6   :  { %v6549_v49 = vadd.f32 %v13166_v41, %v6548_v10  ;;  %v11573_v41 = vld [vmem:[%s14166_s1 + $0x8] sm:$0xff]  ;;  %s14221_s1 = sld [smem:[#allocation12_spill]] }
0x29b8   :  { %10281 = vmatprep.mubr.msk.f32.mxu0 %vm466_vm1, %v6549_v49 }
0x29b9   :  { %10282 = vmatmul.mubr.msk.f32.vlgmr.msra.gmra.mrb[74].mxu0 %vm466_vm1, %v6554_v60 }
0x29c4   :  { %v10276_v32 = vpop.f32.mrb[74].mxu1 }
0x29c5   :  { %v6704_v50 = vadd.f32 %v10276_v32, %v13175_v58  ;;  %v6698_v44 = vpop.f32.mrb[75].mxu1 }
0x29c6   :  { %v6699_v53 = vadd.f32 %v13175_v58, %v6698_v44 }
0x29c8   :  { %v11148_v28 = vpack.c.bf16 %v6704_v50, %v6699_v53 }
0x29ca   :  { %11149 = vmatprep.subr.bf16.mxu0 %v11148_v28 }
0x29cb   :  { %11151 = vmatpush3.bf16.msra.mxu0 %v11148_v28 }
0x29cc   :  { %11153 = vmatprep.subr.bf16.mxu0 %v13214_v16 }
0x2a8c   :  { %v10283_v26 = vpop.f32.mrb[74].mxu0 }
0x2a8d   :  { %v6795_v23 = vmul.f32 0.17677669, %v10283_v26  ;;  %v6785_v33 = vpop.f32.mrb[75].mxu0 }
0x2a8e   :  { %v6794_v48 = vmul.f32 0.17677669, %v6785_v33 }
0x2a8f   :  { %v6797_v0 = vadd.f32 %v11573_v41, %v6795_v23 }
0x2a90   :  { %v6796_v37 = vadd.f32 %v11574_v11, %v6794_v48  ;;  %v8596_v11 = vld [vmem:[%s14169_s14 + $0x88] sm:$0xff] }
0x2a91   :  { %v6801_v58 = vsel %vm558_vm3, %v6797_v0, -inf }
0x2a92   :  { %6802 = vmax.xlane.f32.xlu1 %v6801_v58  ;;  %v6798_v4 = vsel %vm558_vm3, %v6796_v37, -inf }
0x2a93   :  { %6799 = vmax.xlane.f32.xlu0 %v6798_v4  ;;  %v8595_v4 = vld [vmem:[%s14169_s14 + $0x80] sm:$0xff] }
0x2b1f   :  { %v6803_v25 = vpop.xlane.xlu1 %6802 }
0x2b20   :  { %v6805_v59 = vsub.f32 %v6797_v0, %v6803_v25  ;;  %v6800_v42 = vpop.xlane.xlu0 %6799  ;;  %v8597_v25 = vld [vmem:[%s14169_s14 + $0x90] sm:$0xff] }
0x2b21   :  { %v6804_v55 = vsub.f32 %v6796_v37, %v6800_v42  ;;  %v8598_v37 = vld [vmem:[%s14169_s14 + $0x98] sm:$0xff]  ;;  %v8600_v42 = vld [vmem:[%s14169_s14 + $0xa8] sm:$0xff] }
0x2b22   :  { %v6808_v54 = vmul.f32 1.442695, %v6805_v59  ;;  %v11168_v58 = vpack.c.bf16 %v8598_v37, %v8596_v11  ;;  %v11170_v59 = vpack.c.bf16 %v8597_v25, %v8595_v4 }
0x2b23   :  { %v6806_v24 = vmul.f32 1.442695, %v6804_v55  ;;  %v8602_v55 = vld [vmem:[%s14169_s14 + $0xb8] sm:$0xff] }
0x2b24   :  { %11479 = vpow2.f32 %v6808_v54  ;;  %11169 = vmatprep.subr.bf16.mxu1 %v11168_v58  ;;  %v11172_v54 = vpack.c.bf16 %v8602_v55, %v8600_v42 }
0x2b25   :  { %11481 = vpow2.f32 %v6806_v24  ;;  %11171 = vmatpush1.bf16.msra.mxu1 %v11170_v59  ;;  %v8599_v24 = vld [vmem:[%s14169_s14 + $0xa0] sm:$0xff] }
0x2b26   :  { %11173 = vmatprep.subr.bf16.mxu1 %v11172_v54  ;;  %v8647_v54 = vld [vmem:[%s14173_s16 + $0x188] sm:$0xff] }
0x2b2e   :  { %v11480_v9 = vpop.eup %11479 }
0x2b2f   :  { %v11482_v51 = vpop.eup %11481  ;;  %v6813_v8 = vsel %vm558_vm3, %v11480_v9, 0.0 }
0x2b30   :  { %6814 = vadd.xlane.f32.xlu1 %v6813_v8  ;;  %v6810_v52 = vsel %vm558_vm3, %v11482_v51, 0.0  ;;  %v8605_v8 = vld [vmem:[%s14169_s14 + $0xd0] sm:$0xff] }
0x2b31   :  { %6811 = vadd.xlane.f32.xlu0 %v6810_v52  ;;  %v11178_v6 = vpack.c.bf16 %v8605_v8, %v8603_v40  ;;  %v8608_v52 = vld [vmem:[%s14169_s14 + $0xe8] sm:$0xff]  ;;  %v8632_v8 = vld [vmem:[%s14173_s16 + $0x110] sm:$0xff] }
0x2b34   :  { %7091 = vadd.xlane.f32.xlu1 %v7090_v29  ;;  %v8610_v29 = vld [vmem:[%s14169_s14 + $0xf8] sm:$0xff] }
0x2b35   :  { %7088 = vadd.xlane.f32.xlu0 %v7087_v5  ;;  %v11180_v5 = vpack.c.bf16 %v8610_v29, %v8608_v52  ;;  %v8650_v29 = vld [vmem:[%s14173_s16 + $0x1a0] sm:$0xff] }
0x2b38   :  { %7097 = vadd.xlane.f32.xlu1 %v7096_v63  ;;  %v8607_v63 = vld [vmem:[%s14169_s14 + $0xe0] sm:$0xff] }
0x2b39   :  { %7094 = vadd.xlane.f32.xlu0 %v7093_v2  ;;  %v8609_v2 = vld [vmem:[%s14169_s14 + $0xf0] sm:$0xff] }
0x2bbd   :  { %v6815_v31 = vpop.xlane.xlu1 %6814 }
0x2bbe   :  { %11483 = vrcp.f32 %v6815_v31  ;;  %v6812_v43 = vpop.xlane.xlu0 %6811  ;;  %v11182_v31 = vpack.c.bf16 %v8609_v2, %v8607_v63  ;;  %v8634_v2 = vld [vmem:[%s14173_s16 + $0x120] sm:$0xff] }
0x2bbf   :  { %11485 = vrcp.f32 %v6812_v43 }
0x2bc8   :  { %v11484_v19 = vpop.eup %11483 }
0x2bc9   :  { %v11486_v1 = vpop.eup %11485  ;;  %v6819_v38 = vmul.f32 %v11484_v19, %v11480_v9  ;;  %v8606_v9 = vld [vmem:[%s14169_s14 + $0xd8] sm:$0xff] }
0x2bca   :  { %v6818_v30 = vmul.f32 %v11486_v1, %v11482_v51  ;;  %v11176_v51 = vpack.c.bf16 %v8606_v9, %v8604_v15  ;;  %v8648_v9 = vld [vmem:[%s14173_s16 + $0x190] sm:$0xff] }
0x2bcc   :  { %10288 = vmatprep.mubr.msk.f32.mxu0 %vm558_vm3, %v6818_v30 }
0x2bcd   :  { %10289 = vmatmul.mubr.msk.f32.vlgmr.msra.gmra.mrb[76].mxu0 %vm558_vm3, %v6819_v38 }
0x2bce   :  { %11155 = vmatpush3.bf16.msra.mxu0 %v13214_v16  ;;  %v7092_v16 = vpop.xlane.xlu1 %7091 }
0x2bcf   :  { %11157 = vmatprep.subr.bf16.mxu0 %v13219_v17  ;;  %v7106_v27 = vmul.f32 0.015625, %v7092_v16 }
0x2bd1   :  { %v13582_v36 = vsub.f32 %v13543_v22, %v7106_v27 }
0x2bd2   :  { %11159 = vmatpush3.bf16.msra.mxu0 %v13219_v17  ;;  %v7089_v17 = vpop.xlane.xlu0 %7088  ;;  %v7098_v13 = vpop.xlane.xlu1 %7097 }
0x2bd3   :  { %11161 = vmatprep.subr.bf16.mxu0 %v13231_v21  ;;  %v7105_v39 = vmul.f32 0.015625, %v7089_v17  ;;  %v7118_v53 = vmul.f32 %v13582_v36, %v13582_v36 }
0x2bd5   :  { %v13585_v49 = vsub.f32 %v13548_v18, %v7105_v39  ;;  %v7126_v26 = vsel %vm86_vm0, %v7118_v53, 0.0 }
0x2bd6   :  { %v7095_v47 = vpop.xlane.xlu0 %7094 }
0x2ca0   :  { %v10290_v34 = vpop.f32.mrb[76].mxu0 }
0x2ca1   :  { %v6892_v14 = vpop.f32.mrb[77].mxu0 }
0x2ca2   :  { %10299 = vmatprep.mubr.msk.f32.mxu0 %vm466_vm1, %v6892_v14 }
0x2ca3   :  { %10300 = vmatmul.mubr.msk.f32.vlgmr.msra.gmra.mrb[78].mxu0 %vm466_vm1, %v10290_v34 }
0x2ca4   :  { %11163 = vmatpush3.bf16.msra.mxu0 %v13231_v21  ;;  %10310 = vmatprep.mubr.msk.f32.mxu0 %vm466_vm1, %v13520_v57  ;;  %v7108_v21 = vmul.f32 0.015625, %v7098_v13 }
0x2ca5   :  { %11165 = vmatprep.subr.bf16.mxu0 %v13263_v7 }
0x2ca6   :  { %v13594_v50 = vsub.f32 %v13553_v61, %v7108_v21 }
0x2ca8   :  { %11167 = vmatpush3.bf16.msra.mxu0 %v13263_v7  ;;  %v7107_v7 = vmul.f32 0.015625, %v7095_v47  ;;  %v7120_v23 = vmul.f32 %v13594_v50, %v13594_v50 }
0x2caa   :  { %v13601_v28 = vsub.f32 %v13558_v3, %v7107_v7  ;;  %v7132_v41 = vsel %vm86_vm0, %v7120_v23, 0.0  ;;  %v13678_v23 = vld [vmem:[%s14170_s12 + $0x1] ss:$0 sm:$0xff] }
0x2cab   :  { %10311 = vmatmul.mubr.msk.f32.vlgmr.msra.gmra.mrb[78].mxu0 %vm466_vm1, %v13518_v45 }
0x2cac   :  { %v7119_v48 = vmul.f32 %v13601_v28, %v13601_v28 }
0x2cae   :  { %v7129_v0 = vsel %vm86_vm0, %v7119_v48, 0.0 }
0x2d7e   :  { %v10312_v56 = vpop.f32.mrb[78].mxu0 }
0x2d7f   :  { %v7076_v10 = vadd.f32 %v10312_v56, %v8590_v35  ;;  %v7054_v57 = vpop.f32.mrb[79].mxu0 }
0x2d80   :  { %v7075_v60 = vadd.f32 %v8590_v35, %v7054_v57  ;;  %v8601_v35 = vld [vmem:[%s14169_s14 + $0xb0] sm:$0xff] }
0x2d81   :  { %v13588_v45 = vadd.f32 %v7076_v10, %v13383_v12  ;;  %v11174_v46 = vpack.c.bf16 %v8601_v35, %v8599_v24  ;;  %v8630_v35 = vld [vmem:[%s14173_s16 + $0x100] sm:$0xff] }
0x2d82   :  { %v13591_v32 = vadd.f32 %v7075_v60, %v13386_v62  ;;  %v7117_v62 = vmul.f32 %v13585_v49, %v13585_v49 }
0x2d83   :  { %v7102_v44 = vsel %vm86_vm0, %v13588_v45, 0.0  ;;  %11175 = vmatpush1.bf16.msra.mxu1 %v11174_v46  ;;  %v8631_v46 = vld [vmem:[%s14173_s16 + $0x108] sm:$0xff] }
0x2d84   :  { %7103 = vadd.xlane.f32.xlu1 %v7102_v44  ;;  %v7099_v12 = vsel %vm86_vm0, %v13591_v32, 0.0  ;;  %v7123_v33 = vsel %vm86_vm0, %v7117_v62, 0.0  ;;  %11177 = vmatprep.subr.bf16.mxu1 %v11176_v51  ;;  %v11186_v15 = vpack.c.bf16 %v8631_v46, %v8630_v35  ;;  %v8649_v51 = vld [vmem:[%s14173_s16 + $0x198] sm:$0xff] }
0x2d85   :  { %7100 = vadd.xlane.f32.xlu0 %v7099_v12  ;;  %v11188_v40 = vpack.c.bf16 %v8649_v51, %v8648_v9 }
0x2d87   :  { %11179 = vmatpush1.bf16.msra.mxu1 %v11178_v6  ;;  %v8633_v6 = vld [vmem:[%s14173_s16 + $0x118] sm:$0xff] }
0x2d88   :  { %7127 = vadd.xlane.f32.xlu1 %v7126_v26  ;;  %11181 = vmatprep.subr.bf16.mxu1 %v11180_v5  ;;  %v11190_v52 = vpack.c.bf16 %v8633_v6, %v8632_v8  ;;  %v8651_v5 = vld [vmem:[%s14173_s16 + $0x1a8] sm:$0xff] }
0x2d89   :  { %7124 = vadd.xlane.f32.xlu0 %v7123_v33  ;;  %v11192_v63 = vpack.c.bf16 %v8651_v5, %v8650_v29  ;;  %v14218_v8 = vld [vmem:[#allocation3_spill] sm:$0xff] }
0x2d8b   :  { %11183 = vmatpush1.bf16.msra.mxu1 %v11182_v31  ;;  %v8635_v31 = vld [vmem:[%s14173_s16 + $0x128] sm:$0xff] }
0x2d8c   :  { %7133 = vadd.xlane.f32.xlu1 %v7132_v41  ;;  %v13685_v41 = vld [vmem:[%s14171_s13 + $0x1] ss:$0 sm:$0xff] }
0x2d8d   :  { %7130 = vadd.xlane.f32.xlu0 %v7129_v0 }
0x2e11   :  { %v7104_v43 = vpop.xlane.xlu1 %7103 }
0x2e12   :  { %v7110_v19 = vmul.f32 0.015625, %v7104_v43  ;;  %v7101_v1 = vpop.xlane.xlu0 %7100  ;;  %v11194_v43 = vpack.c.bf16 %v8635_v31, %v8634_v2 }
0x2e13   :  { %v7109_v30 = vmul.f32 0.015625, %v7101_v1  ;;  %v8653_v1 = vld [vmem:[%s14173_s16 + $0x1b8] sm:$0xff] }
0x2e14   :  { %v13664_v38 = vsub.f32 %v13588_v45, %v7110_v19  ;;  %v8652_v19 = vld [vmem:[%s14173_s16 + $0x1b0] sm:$0xff] }
0x2e15   :  { %v13667_v34 = vsub.f32 %v13591_v32, %v7109_v30  ;;  %v7128_v14 = vpop.xlane.xlu1 %7127  ;;  %v11196_v30 = vpack.c.bf16 %v8653_v1, %v8652_v19 }
0x2e16   :  { %v7142_v16 = vmul.f32 0.015625, %v7128_v14  ;;  %v7125_v17 = vpop.xlane.xlu0 %7124  ;;  %v7122_v27 = vmul.f32 %v13664_v38, %v13664_v38  ;;  %v8636_v14 = vld [vmem:[%s14173_s16 + $0x130] sm:$0xff] }
0x2e17   :  { %v7141_v39 = vmul.f32 0.015625, %v7125_v17  ;;  %v7121_v13 = vmul.f32 %v13667_v34, %v13667_v34 }
0x2e18   :  { %v7148_v47 = vadd.f32 1e-05, %v7142_v16  ;;  %v7138_v56 = vsel %vm86_vm0, %v7122_v27, 0.0  ;;  %v8637_v16 = vld [vmem:[%s14173_s16 + $0x138] sm:$0xff]  ;;  %v8654_v27 = vld [vmem:[%s14173_s16 + $0x1c0] sm:$0xff] }
0x2e19   :  { %v7147_v21 = vadd.f32 1e-05, %v7141_v39  ;;  %7139 = vadd.xlane.f32.xlu1 %v7138_v56  ;;  %v7134_v10 = vpop.xlane.xlu1 %7133  ;;  %v7135_v57 = vsel %vm86_vm0, %v7121_v13, 0.0  ;;  %v11198_v17 = vpack.c.bf16 %v8637_v16, %v8636_v14  ;;  %v8655_v39 = vld [vmem:[%s14173_s16 + $0x1c8] sm:$0xff] }
0x2e1a   :  { %11487 = vrsqrt.f32 %v7148_v47  ;;  %v7144_v7 = vmul.f32 0.015625, %v7134_v10  ;;  %7136 = vadd.xlane.f32.xlu0 %v7135_v57  ;;  %v7131_v60 = vpop.xlane.xlu0 %7130  ;;  %v11200_v13 = vpack.c.bf16 %v8655_v39, %v8654_v27  ;;  %v8638_v47 = vld [vmem:[%s14173_s16 + $0x140] sm:$0xff]  ;;  %v8639_v56 = vld [vmem:[%s14173_s16 + $0x148] sm:$0xff]  ;;  %v8656_v10 = vld [vmem:[%s14173_s16 + $0x1d0] sm:$0xff] }
0x2e1b   :  { %11489 = vrsqrt.f32 %v7147_v21  ;;  %v7143_v44 = vmul.f32 0.015625, %v7131_v60  ;;  %v11202_v21 = vpack.c.bf16 %v8639_v56, %v8638_v47  ;;  %v8657_v57 = vld [vmem:[%s14173_s16 + $0x1d8] sm:$0xff]  ;;  %v8640_v60 = vld [vmem:[%s14173_s16 + $0x150] sm:$0xff] }
0x2e1c   :  { %v7150_v53 = vadd.f32 1e-05, %v7144_v7  ;;  %v11204_v7 = vpack.c.bf16 %v8657_v57, %v8656_v10 }
0x2e1d   :  { %v7149_v12 = vadd.f32 1e-05, %v7143_v44  ;;  %v8641_v44 = vld [vmem:[%s14173_s16 + $0x158] sm:$0xff] }
0x2e1f   :  { %11491 = vrsqrt.f32 %v7149_v12  ;;  %v8658_v12 = vld [vmem:[%s14173_s16 + $0x1e0] sm:$0xff] }
0x2e20   :  { %11493 = vrsqrt.f32 %v7150_v53  ;;  %v11206_v53 = vpack.c.bf16 %v8641_v44, %v8640_v60 }
0x2e24   :  { %v11488_v62 = vpop.eup %11487 }
0x2e25   :  { %v11490_v26 = vpop.eup %11489  ;;  %v7160_v48 = vmul.f32 %v11488_v62, %v13582_v36  ;;  %v8659_v62 = vld [vmem:[%s14173_s16 + $0x1e8] sm:$0xff] }
0x2e26   :  { %v7159_v33 = vmul.f32 %v11490_v26, %v13585_v49  ;;  %v11208_v26 = vpack.c.bf16 %v8659_v62, %v8658_v12 }
0x2e27   :  { %v7172_v58 = vmul.f32 %v13678_v23, %v7160_v48  ;;  %v8643_v48 = vld [vmem:[%s14173_s16 + $0x168] sm:$0xff] }
0x2e28   :  { %v7171_v0 = vmul.f32 %v13678_v23, %v7159_v33  ;;  %v8642_v33 = vld [vmem:[%s14173_s16 + $0x160] sm:$0xff] }
0x2e29   :  { %v11492_v11 = vpop.eup %11491  ;;  %v7184_v36 = vadd.f32 %v13685_v41, %v7172_v58 }
0x2e2a   :  { %v7183_v37 = vadd.f32 %v13685_v41, %v7171_v0  ;;  %v7161_v4 = vmul.f32 %v11492_v11, %v13601_v28  ;;  %v11494_v25 = vpop.eup %11493  ;;  %v11210_v0 = vpack.c.bf16 %v8643_v48, %v8642_v33  ;;  %v8660_v11 = vld [vmem:[%s14173_s16 + $0x1f0] sm:$0xff] }
0x2e2b   :  { %v7162_v59 = vmul.f32 %v11494_v25, %v13594_v50  ;;  %v8646_v50 = vld [vmem:[%s14173_s16 + $0x180] sm:$0xff]  ;;  %v8645_v25 = vld [vmem:[%s14173_s16 + $0x178] sm:$0xff] }
0x2e2c   :  { %8612 = vmatmul.mubr.msk.f32.vlgmr.msra.gmra.mrb[76].mxu1 %vm86_vm0, %v7183_v37  ;;  %v7173_v49 = vmul.f32 %v13678_v23, %v7161_v4  ;;  %v11184_v24 = vpack.c.bf16 %v8647_v54, %v8646_v50  ;;  %v8661_v37 = vld [vmem:[%s14173_s16 + $0x1f8] sm:$0xff]  ;;  %v8644_v4 = vld [vmem:[%s14173_s16 + $0x170] sm:$0xff] }
0x2e2d   :  { %7307 = vmatprep.mubr.f32.mxu1 %v14217_v20  ;;  %v7174_v55 = vmul.f32 %v13678_v23, %v7162_v59  ;;  %v11212_v58 = vpack.c.bf16 %v8661_v37, %v8660_v11 }
0x2e2e   :  { %v7185_v42 = vadd.f32 %v13685_v41, %v7173_v49  ;;  %11185 = vmatprep.subr.bf16.mxu0 %v11184_v24 }
0x2e2f   :  { %v7186_v28 = vadd.f32 %v13685_v41, %v7174_v55  ;;  %11187 = vmatpush3.bf16.msra.mxu0 %v11186_v15 }
0x2e30   :  { %8613 = vmatmul.mubr.msk.f32.gmra.mrb[78].mxu1 %vm86_vm0, %v7184_v36  ;;  %11189 = vmatprep.subr.bf16.mxu0 %v11188_v40  ;;  %v11214_v36 = vpack.c.bf16 %v8645_v25, %v8644_v4 }
0x2e31   :  { %7313 = vmatprep.mubr.f32.mxu1 %v14217_v20 }
0x2e33   :  { %11191 = vmatpush3.bf16.msra.mxu0 %v11190_v52  ;;  %v14220_v52 = vsub.s32 1, %v14218_v8 }
0x2e34   :  { %8614 = vmatmul.mubr.msk.f32.gmra.mrb[80].mxu1 %vm86_vm0, %v7185_v42  ;;  %11193 = vmatprep.subr.bf16.mxu0 %v11192_v63 }
0x2e35   :  { %7319 = vmatprep.mubr.f32.mxu1 %v14217_v20 }
0x2e37   :  { %11195 = vmatpush3.bf16.msra.mxu0 %v11194_v43 }
0x2e38   :  { %8615 = vmatmul.mubr.msk.f32.gmra.mrb[82].mxu1 %vm86_vm0, %v7186_v28  ;;  %11197 = vmatprep.subr.bf16.mxu0 %v11196_v30 }
0x2e39   :  { %7325 = vmatprep.mubr.f32.mxu1 %v14217_v20 }
0x2e3b   :  { %11199 = vmatpush3.bf16.msra.mxu0 %v11198_v17 }
0x2e3c   :  { %11201 = vmatprep.subr.bf16.mxu0 %v11200_v13 }
0x2e3f   :  { %11203 = vmatpush3.bf16.msra.mxu0 %v11202_v21 }
0x2e40   :  { %11205 = vmatprep.subr.bf16.mxu0 %v11204_v7 }
0x2e43   :  { %11207 = vmatpush3.bf16.msra.mxu0 %v11206_v53 }
0x2e44   :  { %11209 = vmatprep.subr.bf16.mxu0 %v11208_v26 }
0x2e47   :  { %11211 = vmatpush3.bf16.msra.mxu0 %v11210_v0 }
0x2e48   :  { %11213 = vmatprep.subr.bf16.mxu0 %v11212_v58 }
0x2e4b   :  { %11215 = vmatpush3.bf16.msra.mxu0 %v11214_v36 }
0x2ea6   :  { %v7140_v49 = vpop.xlane.xlu1 %7139 }
0x2ea7   :  { %v7146_v59 = vmul.f32 0.015625, %v7140_v49  ;;  %v7137_v42 = vpop.xlane.xlu0 %7136 }
0x2ea8   :  { %v7145_v55 = vmul.f32 0.015625, %v7137_v42 }
0x2ea9   :  { %v7152_v28 = vadd.f32 1e-05, %v7146_v59 }
0x2eaa   :  { %v7151_v50 = vadd.f32 1e-05, %v7145_v55 }
0x2eab   :  { %11495 = vrsqrt.f32 %v7152_v28 }
0x2eac   :  { %11497 = vrsqrt.f32 %v7151_v50 }
0x2eb5   :  { %v11496_v54 = vpop.eup %11495 }
0x2eb6   :  { %v11498_v24 = vpop.eup %11497  ;;  %v7164_v46 = vmul.f32 %v11496_v54, %v13664_v38  ;;  %v14219_v38 = vsub.s32 0, %v14218_v8 }
0x2eb7   :  { %v7163_v35 = vmul.f32 %v11498_v24, %v13667_v34  ;;  %v8611_v34 = vld [vmem:[%s14172_s15 + $0x2] sm:$0x3] }
0x2eb8   :  { %v7176_v51 = vmul.f32 %v13678_v23, %v7164_v46  ;;  %v13815_v6 = vrot.slane %v8611_v34, %v14219_v38  ;;  %v13819_v29 = vrot.slane %v8611_v34, %v14220_v52 }
0x2eb9   :  { %v7175_v15 = vmul.f32 %v13678_v23, %v7163_v35 }
0x2eba   :  { %v7188_v40 = vadd.f32 %v13685_v41, %v7176_v51 }
0x2ebb   :  { %v7187_v9 = vadd.f32 %v13685_v41, %v7175_v15 }
0x2ebd   :  { %8616 = vmatmul.mubr.msk.f32.gmra.mrb[84].mxu1 %vm86_vm0, %v7187_v9 }
0x2ebe   :  { %7331 = vmatprep.mubr.f32.mxu1 %v14217_v20 }
0x2ec1   :  { %8617 = vmatmul.mubr.msk.f32.gmra.mrb[86].mxu1 %vm86_vm0, %v7188_v40 }
0x2eff   :  { %v7303_v23 = vpop.f32.mrb[76].mxu1 }
0x2f00   :  { %v13822_v5 = vadd.f32 %v7303_v23, %v13815_v6  ;;  %v7305_v63 = vpop.f32.mrb[77].mxu1 }
0x2f01   :  { %v7306_v41 = vadd.f32 %v7305_v63, %v13819_v29 }
0x2f02   :  { %v8618_v2 = vmul.f32 -1.702, %v13822_v5 }
0x2f03   :  { %v8619_v31 = vmul.f32 -1.702, %v7306_v41  ;;  %v7309_v43 = vpop.f32.mrb[78].mxu1 }
0x2f04   :  { %v7362_v19 = vmul.f32 1.442695, %v8618_v2  ;;  %v13827_v1 = vadd.f32 %v7309_v43, %v13815_v6  ;;  %v7311_v30 = vpop.f32.mrb[79].mxu1 }
0x2f05   :  { %v7364_v14 = vmul.f32 1.442695, %v8619_v31  ;;  %v7312_v16 = vadd.f32 %v7311_v30, %v13819_v29 }
0x2f06   :  { %11499 = vpow2.f32 %v7362_v19  ;;  %v8620_v17 = vmul.f32 -1.702, %v13827_v1 }
0x2f07   :  { %11501 = vpow2.f32 %v7364_v14  ;;  %v8621_v27 = vmul.f32 -1.702, %v7312_v16  ;;  %v7315_v39 = vpop.f32.mrb[80].mxu1 }
0x2f08   :  { %v7366_v13 = vmul.f32 1.442695, %v8620_v17  ;;  %v7316_v47 = vadd.f32 %v7315_v39, %v13815_v6  ;;  %v7317_v56 = vpop.f32.mrb[81].mxu1 }
0x2f09   :  { %v7368_v21 = vmul.f32 1.442695, %v8621_v27  ;;  %v7318_v10 = vadd.f32 %v7317_v56, %v13819_v29 }
0x2f0a   :  { %11503 = vpow2.f32 %v7366_v13  ;;  %v8622_v57 = vmul.f32 -1.702, %v7316_v47 }
0x2f0b   :  { %11505 = vpow2.f32 %v7368_v21  ;;  %v8623_v7 = vmul.f32 -1.702, %v7318_v10  ;;  %v7321_v60 = vpop.f32.mrb[82].mxu1 }
0x2f0c   :  { %v7370_v44 = vmul.f32 1.442695, %v8622_v57  ;;  %v7322_v53 = vadd.f32 %v7321_v60, %v13815_v6  ;;  %v7323_v12 = vpop.f32.mrb[83].mxu1 }
0x2f0d   :  { %v7372_v62 = vmul.f32 1.442695, %v8623_v7  ;;  %v7324_v26 = vadd.f32 %v7323_v12, %v13819_v29 }
0x2f0e   :  { %11507 = vpow2.f32 %v7370_v44  ;;  %v8624_v33 = vmul.f32 -1.702, %v7322_v53 }
0x2f0f   :  { %11509 = vpow2.f32 %v7372_v62  ;;  %v8625_v48 = vmul.f32 -1.702, %v7324_v26 }
0x2f10   :  { %v11500_v0 = vpop.eup %11499  ;;  %v7374_v11 = vmul.f32 1.442695, %v8624_v33 }
0x2f11   :  { %v11502_v37 = vpop.eup %11501  ;;  %v7386_v58 = vadd.f32 1.0, %v11500_v0  ;;  %v7376_v4 = vmul.f32 1.442695, %v8625_v48 }
0x2f12   :  { %v7387_v25 = vadd.f32 1.0, %v11502_v37  ;;  %11511 = vpow2.f32 %v7374_v11 }
0x2f13   :  { %11513 = vrcp.f32 %v7386_v58 }
0x2f14   :  { %v11504_v36 = vpop.eup %11503  ;;  %11515 = vrcp.f32 %v7387_v25 }
0x2f15   :  { %v11506_v49 = vpop.eup %11505  ;;  %v7388_v59 = vadd.f32 1.0, %v11504_v36  ;;  %11517 = vpow2.f32 %v7376_v4 }
0x2f16   :  { %v7389_v42 = vadd.f32 1.0, %v11506_v49 }
0x2f17   :  { %11519 = vrcp.f32 %v7388_v59 }
0x2f18   :  { %v11508_v55 = vpop.eup %11507  ;;  %11521 = vrcp.f32 %v7389_v42 }
0x2f19   :  { %v11510_v28 = vpop.eup %11509  ;;  %v7390_v50 = vadd.f32 1.0, %v11508_v55 }
0x2f1a   :  { %v7391_v54 = vadd.f32 1.0, %v11510_v28 }
0x2f1b   :  { %11523 = vrcp.f32 %v7390_v50  ;;  %v8663_v50 = vld [vmem:[%s14174_s17 + $0x1] ss:$0 sm:$0xff] }
0x2f1c   :  { %v11512_v24 = vpop.eup %11511  ;;  %11525 = vrcp.f32 %v7391_v54 }
0x2f1d   :  { %v11514_v35 = vpop.eup %11513  ;;  %v7392_v46 = vadd.f32 1.0, %v11512_v24 }
0x2f1e   :  { %v11516_v15 = vpop.eup %11515  ;;  %v7422_v40 = vmul.f32 %v11514_v35, %v13822_v5 }
0x2f1f   :  { %v11518_v9 = vpop.eup %11517  ;;  %v7423_v51 = vmul.f32 %v11516_v15, %v7306_v41  ;;  %11527 = vrcp.f32 %v7392_v46 }
0x2f20   :  { %v7393_v34 = vadd.f32 1.0, %v11518_v9 }
0x2f21   :  { %v11520_v8 = vpop.eup %11519  ;;  %7531 = vmatprep.mubr.f32.mxu0 %v7423_v51 }
0x2f22   :  { %v11522_v38 = vpop.eup %11521  ;;  %11529 = vrcp.f32 %v7393_v34  ;;  %7532 = vmatmul.mubr.f32.vlgmr.msra.gmra.mrb[80].mxu0 %v7422_v40  ;;  %v7424_v23 = vmul.f32 %v11520_v8, %v13827_v1 }
0x2f23   :  { %v7425_v52 = vmul.f32 %v11522_v38, %v7312_v16 }
0x2f25   :  { %v11524_v63 = vpop.eup %11523  ;;  %7536 = vmatprep.mubr.f32.mxu0 %v7425_v52 }
0x2f26   :  { %v11526_v2 = vpop.eup %11525  ;;  %7537 = vmatmul.mubr.f32.gmra.mrb[82].mxu0 %v7424_v23  ;;  %v7426_v43 = vmul.f32 %v11524_v63, %v7316_v47 }
0x2f27   :  { %v7427_v31 = vmul.f32 %v11526_v2, %v7318_v10 }
0x2f29   :  { %7541 = vmatprep.mubr.f32.mxu0 %v7427_v31  ;;  %v11528_v41 = vpop.eup %11527 }
0x2f2a   :  { %7542 = vmatmul.mubr.f32.gmra.mrb[84].mxu0 %v7426_v43  ;;  %v7428_v30 = vmul.f32 %v11528_v41, %v7322_v53 }
0x2f2c   :  { %v11530_v5 = vpop.eup %11529 }
0x2f2d   :  { %v7429_v19 = vmul.f32 %v11530_v5, %v7324_v26 }
0x2f2f   :  { %7546 = vmatprep.mubr.f32.mxu0 %v7429_v19 }
0x2f30   :  { %7547 = vmatmul.mubr.f32.gmra.mrb[86].mxu0 %v7428_v30 }
0x2f90   :  { %v7327_v14 = vpop.f32.mrb[84].mxu1 }
0x2f91   :  { %v7328_v17 = vadd.f32 %v7327_v14, %v13815_v6  ;;  %v7329_v16 = vpop.f32.mrb[85].mxu1 }
0x2f92   :  { %v7330_v1 = vadd.f32 %v7329_v16, %v13819_v29 }
0x2f93   :  { %v8626_v27 = vmul.f32 -1.702, %v7328_v17 }
0x2f94   :  { %v8627_v39 = vmul.f32 -1.702, %v7330_v1  ;;  %v7333_v13 = vpop.f32.mrb[86].mxu1 }
0x2f95   :  { %v7378_v56 = vmul.f32 1.442695, %v8626_v27  ;;  %v7334_v47 = vadd.f32 %v7333_v13, %v13815_v6  ;;  %v7335_v21 = vpop.f32.mrb[87].mxu1 }
0x2f96   :  { %v7380_v10 = vmul.f32 1.442695, %v8627_v39  ;;  %v7336_v57 = vadd.f32 %v7335_v21, %v13819_v29 }
0x2f97   :  { %11531 = vpow2.f32 %v7378_v56  ;;  %v8628_v7 = vmul.f32 -1.702, %v7334_v47 }
0x2f98   :  { %11533 = vpow2.f32 %v7380_v10  ;;  %v8629_v60 = vmul.f32 -1.702, %v7336_v57 }
0x2f99   :  { %v7382_v44 = vmul.f32 1.442695, %v8628_v7 }
0x2f9a   :  { %v7384_v53 = vmul.f32 1.442695, %v8629_v60 }
0x2f9b   :  { %11535 = vpow2.f32 %v7382_v44 }
0x2f9c   :  { %11537 = vpow2.f32 %v7384_v53 }
0x2fa1   :  { %v11532_v12 = vpop.eup %11531 }
0x2fa2   :  { %v11534_v62 = vpop.eup %11533  ;;  %v7394_v26 = vadd.f32 1.0, %v11532_v12 }
0x2fa3   :  { %v7395_v33 = vadd.f32 1.0, %v11534_v62 }
0x2fa4   :  { %11539 = vrcp.f32 %v7394_v26 }
0x2fa5   :  { %v11536_v48 = vpop.eup %11535  ;;  %11541 = vrcp.f32 %v7395_v33 }
0x2fa6   :  { %v11538_v6 = vpop.eup %11537  ;;  %v7396_v0 = vadd.f32 1.0, %v11536_v48 }
0x2fa7   :  { %v7397_v11 = vadd.f32 1.0, %v11538_v6 }
0x2fa8   :  { %11543 = vrcp.f32 %v7396_v0 }
0x2fa9   :  { %11545 = vrcp.f32 %v7397_v11 }
0x2fae   :  { %v11540_v29 = vpop.eup %11539 }
0x2faf   :  { %v11542_v37 = vpop.eup %11541  ;;  %v7430_v4 = vmul.f32 %v11540_v29, %v7328_v17 }
0x2fb0   :  { %v7431_v58 = vmul.f32 %v11542_v37, %v7330_v1 }
0x2fb2   :  { %v11544_v25 = vpop.eup %11543  ;;  %7551 = vmatprep.mubr.f32.mxu0 %v7431_v58 }
0x2fb3   :  { %v11546_v36 = vpop.eup %11545  ;;  %7552 = vmatmul.mubr.f32.gmra.mrb[88].mxu0 %v7430_v4  ;;  %v7432_v59 = vmul.f32 %v11544_v25, %v7334_v47 }
0x2fb4   :  { %v7433_v49 = vmul.f32 %v11546_v36, %v7336_v57 }
0x2fb6   :  { %7556 = vmatprep.mubr.f32.mxu0 %v7433_v49 }
0x2fb7   :  { %7557 = vmatmul.mubr.f32.gmra.mrb[90].mxu0 %v7432_v59 }
0x2fb8   :  { %7981 = vmatprep.mubr.f32.mxu0 %v14217_v20 }
0x2ff5   :  { %v9303_v42 = vpop.f32.mrb[80].mxu0 }
0x2ff6   :  { %v9304_v55 = vpop.f32.mrb[81].mxu0 }
0x2ff7   :  { %v9305_v28 = vadd.f32 %v9304_v55, %v9303_v42 }
0x2ff9   :  { %v7562_v54 = vadd.f32 %v9305_v28, %v13548_v18  ;;  %v9306_v24 = vpop.f32.mrb[82].mxu0 }
0x2ffa   :  { %v9307_v35 = vpop.f32.mrb[83].mxu0 }
0x2ffb   :  { %v9308_v46 = vadd.f32 %v9307_v35, %v9306_v24  ;;  %v7576_v15 = vadd.f32 %v8663_v50, %v7562_v54 }
0x2ffd   :  { %v7563_v9 = vadd.f32 %v9308_v46, %v13543_v22  ;;  %v9309_v51 = vpop.f32.mrb[84].mxu0  ;;  %v7584_v40 = vsel %vm86_vm0, %v7576_v15, 0.0 }
0x2ffe   :  { %7585 = vadd.xlane.f32.xlu0 %v7584_v40  ;;  %v9310_v34 = vpop.f32.mrb[85].mxu0 }
0x2fff   :  { %v9311_v8 = vadd.f32 %v9310_v34, %v9309_v51  ;;  %v7577_v38 = vadd.f32 %v8663_v50, %v7563_v9 }
0x3001   :  { %v7564_v52 = vadd.f32 %v9311_v8, %v13558_v3  ;;  %v7587_v23 = vsel %vm86_vm0, %v7577_v38, 0.0 }
0x3002   :  { %7588 = vadd.xlane.f32.xlu1 %v7587_v23 }
0x3003   :  { %v9312_v63 = vpop.f32.mrb[86].mxu0  ;;  %v7578_v18 = vadd.f32 %v8663_v50, %v7564_v52 }
0x3004   :  { %v9313_v2 = vpop.f32.mrb[87].mxu0 }
0x3005   :  { %v9314_v31 = vadd.f32 %v9313_v2, %v9312_v63  ;;  %v7590_v43 = vsel %vm86_vm0, %v7578_v18, 0.0 }
0x3006   :  { %7591 = vadd.xlane.f32.xlu0 %v7590_v43 }
0x3007   :  { %v7565_v22 = vadd.f32 %v9314_v31, %v13553_v61 }
0x3009   :  { %v7579_v41 = vadd.f32 %v8663_v50, %v7565_v22  ;;  %v13880_v22 = vld [vmem:[%s14176_s19] ss:$0 sm:$0xff] }
0x300b   :  { %v7593_v5 = vsel %vm86_vm0, %v7579_v41, 0.0 }
0x300c   :  { %7594 = vadd.xlane.f32.xlu1 %v7593_v5 }
0x3086   :  { %v9315_v19 = vpop.f32.mrb[88].mxu0 }
0x3087   :  { %v9316_v30 = vpop.f32.mrb[89].mxu0 }
0x3088   :  { %v9317_v14 = vadd.f32 %v9316_v30, %v9315_v19 }
0x308a   :  { %v7566_v3 = vadd.f32 %v9317_v14, %v13591_v32  ;;  %v9318_v17 = vpop.f32.mrb[90].mxu0 }
0x308b   :  { %v9319_v16 = vpop.f32.mrb[91].mxu0  ;;  %v7586_v1 = vpop.xlane.xlu0 %7585 }
0x308c   :  { %v9320_v27 = vadd.f32 %v9319_v16, %v9318_v17  ;;  %v7602_v39 = vmul.f32 0.015625, %v7586_v1  ;;  %v7580_v13 = vadd.f32 %v8663_v50, %v7566_v3 }
0x308e   :  { %v7567_v56 = vadd.f32 %v9320_v27, %v13588_v45  ;;  %v7608_v47 = vsub.f32 %v7576_v15, %v7602_v39  ;;  %v7596_v61 = vsel %vm86_vm0, %v7580_v13, 0.0 }
0x308f   :  { %v7589_v21 = vpop.xlane.xlu1 %7588  ;;  %7597 = vadd.xlane.f32.xlu0 %v7596_v61  ;;  %v7773_v61 = vld [vmem:[%s14178_s20 + $0x18] sm:$0xff] }
0x3090   :  { %v7603_v10 = vmul.f32 0.015625, %v7589_v21  ;;  %v7581_v57 = vadd.f32 %v8663_v50, %v7567_v56  ;;  %v7614_v7 = vmul.f32 %v7608_v47, %v7608_v47  ;;  %v7781_v21 = vld [vmem:[%s14178_s20 + $0x58] sm:$0xff] }
0x3092   :  { %v7609_v60 = vsub.f32 %v7577_v38, %v7603_v10  ;;  %v7599_v44 = vsel %vm86_vm0, %v7581_v57, 0.0  ;;  %v7620_v32 = vsel %vm86_vm0, %v7614_v7, 0.0  ;;  %v11244_v10 = vpack.c.bf16 %v7781_v21, %v7773_v61  ;;  %v7780_v7 = vld [vmem:[%s14178_s20 + $0x50] sm:$0xff]  ;;  %v7775_v21 = vld [vmem:[%s14178_s20 + $0x28] sm:$0xff] }
0x3093   :  { %7600 = vadd.xlane.f32.xlu1 %v7599_v44  ;;  %7621 = vadd.xlane.f32.xlu0 %v7620_v32  ;;  %v7592_v53 = vpop.xlane.xlu0 %7591  ;;  %v7789_v44 = vld [vmem:[%s14178_s20 + $0x98] sm:$0xff] }
0x3094   :  { %v7604_v12 = vmul.f32 0.015625, %v7592_v53  ;;  %v7615_v62 = vmul.f32 %v7609_v60, %v7609_v60  ;;  %v7797_v32 = vld [vmem:[%s14178_s20 + $0xd8] sm:$0xff]  ;;  %11245 = vmatprep.subr.bf16.mxu0 %v11244_v10  ;;  %v7783_v10 = vld [vmem:[%s14178_s20 + $0x68] sm:$0xff] }
0x3095   :  { %v11248_v53 = vpack.c.bf16 %v7797_v32, %v7789_v44  ;;  %v7774_v32 = vld [vmem:[%s14178_s20 + $0x20] sm:$0xff] }
0x3096   :  { %v7610_v26 = vsub.f32 %v7578_v18, %v7604_v12  ;;  %v7623_v45 = vsel %vm86_vm0, %v7615_v62, 0.0  ;;  %v13874_v18 = vld [vmem:[%s14175_s18] ss:$0 sm:$0xff]  ;;  %v7788_v12 = vld [vmem:[%s14178_s20 + $0x90] sm:$0xff] }
0x3097   :  { %7624 = vadd.xlane.f32.xlu1 %v7623_v45  ;;  %v7796_v62 = vld [vmem:[%s14178_s20 + $0xd0] sm:$0xff]  ;;  %v7805_v45 = vld [vmem:[%s14178_s20 + $0x118] sm:$0xff] }
0x3098   :  { %v7616_v33 = vmul.f32 %v7610_v26, %v7610_v26 }
0x3099   :  { %v7595_v48 = vpop.xlane.xlu1 %7594 }
0x309a   :  { %v7605_v6 = vmul.f32 0.015625, %v7595_v48  ;;  %v7626_v0 = vsel %vm86_vm0, %v7616_v33, 0.0  ;;  %v7813_v33 = vld [vmem:[%s14178_s20 + $0x158] sm:$0xff] }
0x309b   :  { %7627 = vadd.xlane.f32.xlu0 %v7626_v0  ;;  %v11252_v48 = vpack.c.bf16 %v7813_v33, %v7805_v45  ;;  %v7812_v0 = vld [vmem:[%s14178_s20 + $0x150] sm:$0xff]  ;;  %v7799_v45 = vld [vmem:[%s14178_s20 + $0xe8] sm:$0xff]  ;;  %v7793_v33 = vld [vmem:[%s14178_s20 + $0xb8] sm:$0xff] }
0x309c   :  { %v7611_v11 = vsub.f32 %v7579_v41, %v7605_v6  ;;  %v7804_v6 = vld [vmem:[%s14178_s20 + $0x110] sm:$0xff] }
0x309e   :  { %v7617_v29 = vmul.f32 %v7611_v11, %v7611_v11 }
0x30a0   :  { %v7629_v37 = vsel %vm86_vm0, %v7617_v29, 0.0  ;;  %v7821_v29 = vld [vmem:[%s14178_s20 + $0x198] sm:$0xff] }
0x30a1   :  { %7630 = vadd.xlane.f32.xlu1 %v7629_v37  ;;  %v7829_v37 = vld [vmem:[%s14178_s20 + $0x1d8] sm:$0xff] }
0x311c   :  { %v7598_v58 = vpop.xlane.xlu0 %7597 }
0x311d   :  { %v7606_v4 = vmul.f32 0.015625, %v7598_v58  ;;  %v11256_v58 = vpack.c.bf16 %v7829_v37, %v7821_v29  ;;  %v7798_v29 = vld [vmem:[%s14178_s20 + $0xe0] sm:$0xff] }
0x311f   :  { %v13861_v25 = vsub.f32 %v7580_v13, %v7606_v4  ;;  %v7820_v4 = vld [vmem:[%s14178_s20 + $0x190] sm:$0xff] }
0x3120   :  { %v7601_v36 = vpop.xlane.xlu1 %7600  ;;  %v7622_v49 = vpop.xlane.xlu0 %7621 }
0x3121   :  { %v7607_v59 = vmul.f32 0.015625, %v7601_v36  ;;  %v7638_v42 = vmul.f32 0.015625, %v7622_v49  ;;  %v7618_v55 = vmul.f32 %v13861_v25, %v13861_v25  ;;  %v7828_v36 = vld [vmem:[%s14178_s20 + $0x1d0] sm:$0xff] }
0x3122   :  { %v11258_v49 = vpack.c.bf16 %v7828_v36, %v7820_v4  ;;  %v7800_v4 = vld [vmem:[%s14178_s20 + $0xf0] sm:$0xff]  ;;  %v7807_v36 = vld [vmem:[%s14178_s20 + $0x128] sm:$0xff] }
0x3123   :  { %v13865_v28 = vsub.f32 %v7581_v57, %v7607_v59  ;;  %v7644_v50 = vadd.f32 1e-05, %v7638_v42  ;;  %v7632_v54 = vsel %vm86_vm0, %v7618_v55, 0.0  ;;  %v7772_v57 = vld [vmem:[%s14178_s20 + $0x10] sm:$0xff] }
0x3124   :  { %v7625_v24 = vpop.xlane.xlu1 %7624  ;;  %7633 = vadd.xlane.f32.xlu0 %v7632_v54 }
0x3125   :  { %11547 = vrsqrt.f32 %v7644_v50  ;;  %v7639_v35 = vmul.f32 0.015625, %v7625_v24  ;;  %v7619_v46 = vmul.f32 %v13865_v28, %v13865_v28 }
0x3127   :  { %v7645_v15 = vadd.f32 1e-05, %v7639_v35  ;;  %v7635_v9 = vsel %vm86_vm0, %v7619_v46, 0.0 }
0x3128   :  { %7636 = vadd.xlane.f32.xlu1 %v7635_v9  ;;  %v7628_v51 = vpop.xlane.xlu0 %7627 }
0x3129   :  { %11549 = vrsqrt.f32 %v7645_v15  ;;  %v7640_v40 = vmul.f32 0.015625, %v7628_v51 }
0x312b   :  { %v7646_v34 = vadd.f32 1e-05, %v7640_v40 }
0x312d   :  { %11551 = vrsqrt.f32 %v7646_v34  ;;  %v7771_v34 = vld [vmem:[%s14178_s20 + $0x8] sm:$0xff] }
0x312e   :  { %v7631_v8 = vpop.xlane.xlu1 %7630 }
0x312f   :  { %v11548_v38 = vpop.eup %11547  ;;  %v7641_v52 = vmul.f32 0.015625, %v7631_v8  ;;  %v7779_v8 = vld [vmem:[%s14178_s20 + $0x48] sm:$0xff] }
0x3130   :  { %v7656_v23 = vmul.f32 %v11548_v38, %v7608_v47  ;;  %v7686_v47 = vld [vmem:[%s14177_s21] sm:$0xff] }
0x3131   :  { %v7647_v63 = vadd.f32 1e-05, %v7641_v52  ;;  %10325 = vmatprep.mubr.msk.f32.mxu1 %vm7688_vm4, %v7686_v47  ;;  %v7826_v47 = vld [vmem:[%s14178_s20 + $0x1c0] sm:$0xff] }
0x3132   :  { %v7668_v43 = vmul.f32 %v13874_v18, %v7656_v23  ;;  %v11228_v23 = vpack.c.bf16 %v7779_v8, %v7771_v34  ;;  %v7816_v34 = vld [vmem:[%s14178_s20 + $0x170] sm:$0xff]  ;;  %v7823_v8 = vld [vmem:[%s14178_s20 + $0x1a8] sm:$0xff] }
0x3133   :  { %v11550_v2 = vpop.eup %11549  ;;  %11553 = vrsqrt.f32 %v7647_v63  ;;  %v7778_v63 = vld [vmem:[%s14178_s20 + $0x40] sm:$0xff] }
0x3134   :  { %v7657_v31 = vmul.f32 %v11550_v2, %v7609_v60  ;;  %v7680_v19 = vadd.f32 %v13880_v22, %v7668_v43  ;;  %v11246_v60 = vpack.c.bf16 %v7780_v7, %v7772_v57  ;;  %v7795_v2 = vld [vmem:[%s14178_s20 + $0xc8] sm:$0xff]  ;;  %v7777_v57 = vld [vmem:[%s14178_s20 + $0x38] sm:$0xff]  ;;  %v11260_v7 = vpack.c.bf16 %v7783_v10, %v7775_v21 }
0x3136   :  { %v7669_v41 = vmul.f32 %v13874_v18, %v7657_v31  ;;  %11247 = vmatpush1.bf16.msra.mxu0 %v11246_v60  ;;  %v7687_v31 = vld [vmem:[%s14177_s21 + $0x8] sm:$0xff]  ;;  %v7785_v60 = vld [vmem:[%s14178_s20 + $0x78] sm:$0xff] }
0x3137   :  { %v11552_v5 = vpop.eup %11551  ;;  %11249 = vmatprep.subr.bf16.mxu0 %v11248_v53  ;;  %v11276_v44 = vpack.c.bf16 %v7785_v60, %v7777_v57  ;;  %v7782_v53 = vld [vmem:[%s14178_s20 + $0x60] sm:$0xff] }
0x3138   :  { %v7681_v30 = vadd.f32 %v13880_v22, %v7669_v41  ;;  %v7658_v3 = vmul.f32 %v11552_v5, %v7610_v26  ;;  %v11250_v26 = vpack.c.bf16 %v7796_v62, %v7788_v12  ;;  %v7786_v41 = vld [vmem:[%s14178_s20 + $0x80] sm:$0xff]  ;;  %v7776_v12 = vld [vmem:[%s14178_s20 + $0x30] sm:$0xff] }
0x3139   :  { %v7794_v5 = vld [vmem:[%s14178_s20 + $0xc0] sm:$0xff]  ;;  %v7784_v62 = vld [vmem:[%s14178_s20 + $0x70] sm:$0xff] }
0x313a   :  { %v11216_v14 = vpack.c.bf16 %v7681_v30, %v7680_v19  ;;  %v7670_v1 = vmul.f32 %v13874_v18, %v7658_v3  ;;  %11251 = vmatpush1.bf16.msra.mxu0 %v11250_v26  ;;  %v7803_v19 = vld [vmem:[%s14178_s20 + $0x108] sm:$0xff] }
0x313b   :  { %11253 = vmatprep.subr.bf16.mxu0 %v11252_v48  ;;  %v7811_v30 = vld [vmem:[%s14178_s20 + $0x148] sm:$0xff]  ;;  %v7801_v48 = vld [vmem:[%s14178_s20 + $0xf8] sm:$0xff] }
0x313c   :  { %11217 = vmatprep.subr.bf16.mxu1 %v11216_v14  ;;  %v7682_v39 = vadd.f32 %v13880_v22, %v7670_v1  ;;  %v11236_v3 = vpack.c.bf16 %v7811_v30, %v7803_v19  ;;  %v7819_v1 = vld [vmem:[%s14178_s20 + $0x188] sm:$0xff]  ;;  %v11576_v19 = vmov 0   ;;  %v28_v30 = vstv %s14221_s1 }
0x313d   :  { %v11554_v17 = vpop.eup %11553  ;;  %11219 = vmatpush3.bf16.msra.mxu1 %v11216_v14  ;;  %v11234_v14 = vpack.c.bf16 %v7794_v5, %v7786_v41  ;;  %v7791_v26 = vld [vmem:[%s14178_s20 + $0xa8] sm:$0xff]  ;;  %11306 = vset.pattern.permute.xlu0 %v11576_v19  ;;  %29 = vst [vmem:[#allocation2] sm:$0x1] %v28_v30 }
0x313e   :  { %v7659_v16 = vmul.f32 %v11554_v17, %v7611_v11  ;;  %v11254_v11 = vpack.c.bf16 %v7812_v0, %v7804_v6  ;;  %v7802_v17 = vld [vmem:[%s14178_s20 + $0x100] sm:$0xff]  ;;  %v11262_v6 = vpack.c.bf16 %v7782_v53, %v7774_v32  ;;  %v11278_v0 = vpack.c.bf16 %v7784_v62, %v7776_v12 }
0x3140   :  { %v7671_v27 = vmul.f32 %v13874_v18, %v7659_v16  ;;  %11255 = vmatpush1.bf16.msra.mxu0 %v11254_v11  ;;  %v7810_v16 = vld [vmem:[%s14178_s20 + $0x140] sm:$0xff] }
0x3141   :  { %11257 = vmatprep.subr.bf16.mxu0 %v11256_v58  ;;  %v7790_v11 = vld [vmem:[%s14178_s20 + $0xa0] sm:$0xff]  ;;  %v7792_v58 = vld [vmem:[%s14178_s20 + $0xb0] sm:$0xff] }
0x3142   :  { %v7683_v13 = vadd.f32 %v13880_v22, %v7671_v27  ;;  %v7827_v27 = vld [vmem:[%s14178_s20 + $0x1c8] sm:$0xff] }
0x3144   :  { %v11220_v56 = vpack.c.bf16 %v7683_v13, %v7682_v39  ;;  %11259 = vmatpush1.bf16.msra.mxu0 %v11258_v49  ;;  %v11238_v39 = vpack.c.bf16 %v7810_v16, %v7802_v17  ;;  %v11240_v13 = vpack.c.bf16 %v7827_v27, %v7819_v1 }
0x3145   :  { %11277 = vmatprep.subr.bf16.mxu0 %v11276_v44 }
0x3146   :  { %11221 = vmatprep.subr.bf16.mxu1 %v11220_v56 }
0x3147   :  { %11223 = vmatpush3.bf16.msra.mxu1 %v11220_v56  ;;  %v7818_v56 = vld [vmem:[%s14178_s20 + $0x180] sm:$0xff] }
0x3148   :  { %v11242_v61 = vpack.c.bf16 %v7826_v47, %v7818_v56 }
0x31b1   :  { %v7634_v59 = vpop.xlane.xlu0 %7633 }
0x31b2   :  { %v7642_v42 = vmul.f32 0.015625, %v7634_v59  ;;  %v11264_v59 = vpack.c.bf16 %v7799_v45, %v7791_v26 }
0x31b4   :  { %v7648_v55 = vadd.f32 1e-05, %v7642_v42  ;;  %v11280_v42 = vpack.c.bf16 %v7801_v48, %v7793_v33 }
0x31b5   :  { %v7637_v50 = vpop.xlane.xlu1 %7636 }
0x31b6   :  { %11555 = vrsqrt.f32 %v7648_v55  ;;  %v7643_v54 = vmul.f32 0.015625, %v7637_v50  ;;  %v7815_v55 = vld [vmem:[%s14178_s20 + $0x168] sm:$0xff]  ;;  %v7809_v50 = vld [vmem:[%s14178_s20 + $0x138] sm:$0xff] }
0x31b8   :  { %v7649_v24 = vadd.f32 1e-05, %v7643_v54  ;;  %v7817_v54 = vld [vmem:[%s14178_s20 + $0x178] sm:$0xff] }
0x31ba   :  { %11557 = vrsqrt.f32 %v7649_v24  ;;  %v11266_v24 = vpack.c.bf16 %v7798_v29, %v7790_v11 }
0x31c0   :  { %v11556_v35 = vpop.eup %11555 }
0x31c1   :  { %v7660_v46 = vmul.f32 %v11556_v35, %v13861_v25  ;;  %v11282_v35 = vpack.c.bf16 %v7800_v4, %v7792_v58 }
0x31c3   :  { %v7672_v51 = vmul.f32 %v13874_v18, %v7660_v46  ;;  %v7806_v46 = vld [vmem:[%s14178_s20 + $0x120] sm:$0xff] }
0x31c4   :  { %v11558_v15 = vpop.eup %11557 }
0x31c5   :  { %v7661_v9 = vmul.f32 %v11558_v15, %v13865_v28  ;;  %v7684_v38 = vadd.f32 %v13880_v22, %v7672_v51  ;;  %v7770_v28 = vld [vmem:[%s14178_s20] sm:$0xff]  ;;  %v11284_v51 = vpack.c.bf16 %v7817_v54, %v7809_v50 }
0x31c6   :  { %v11230_v43 = vpack.c.bf16 %v7778_v63, %v7770_v28  ;;  %v7814_v15 = vld [vmem:[%s14178_s20 + $0x160] sm:$0xff] }
0x31c7   :  { %v7673_v40 = vmul.f32 %v13874_v18, %v7661_v9  ;;  %v7787_v18 = vld [vmem:[%s14178_s20 + $0x88] sm:$0xff]  ;;  %v11268_v9 = vpack.c.bf16 %v7815_v55, %v7807_v36  ;;  %v7822_v63 = vld [vmem:[%s14178_s20 + $0x1a0] sm:$0xff] }
0x31c9   :  { %v7685_v52 = vadd.f32 %v13880_v22, %v7673_v40  ;;  %v11232_v22 = vpack.c.bf16 %v7795_v2, %v7787_v18  ;;  %v7808_v40 = vld [vmem:[%s14178_s20 + $0x130] sm:$0xff] }
0x31ca   :  { %v11286_v28 = vpack.c.bf16 %v7816_v34, %v7808_v40  ;;  %v8676_v40 = vld [vmem:[#allocation2] ss:$0 sm:$0xff] }
0x31cb   :  { %v11224_v25 = vpack.c.bf16 %v7685_v52, %v7684_v38  ;;  %v7831_v38 = vld [vmem:[%s14178_s20 + $0x1e8] sm:$0xff]  ;;  %v7825_v52 = vld [vmem:[%s14178_s20 + $0x1b8] sm:$0xff] }
0x31cc   :  { %v11272_v18 = vpack.c.bf16 %v7831_v38, %v7823_v8 }
0x31cd   :  { %11225 = vmatprep.subr.bf16.mxu1 %v11224_v25 }
0x31ce   :  { %11227 = vmatpush3.bf16.msra.mxu1 %v11224_v25  ;;  %v7833_v25 = vld [vmem:[%s14178_s20 + $0x1f8] sm:$0xff] }
0x31cf   :  { %11229 = vmatprep.subr.bf16.mxu1 %v11228_v23  ;;  %v11270_v23 = vpack.c.bf16 %v7814_v15, %v7806_v46  ;;  %v11288_v2 = vpack.c.bf16 %v7833_v25, %v7825_v52 }
0x31d1   :  { %10326 = vmatmul.mubr.msk.f32.vlgmr.msra.gmra.mrb[88].mxu1 %vm7688_vm4, %v7687_v31  ;;  %v7830_v31 = vld [vmem:[%s14178_s20 + $0x1e0] sm:$0xff] }
0x31d2   :  { %11231 = vmatpush1.bf16.msra.mxu1 %v11230_v43  ;;  %7904 = vmatprep.mubr.f32.mxu1 %v14217_v20  ;;  %v7824_v43 = vld [vmem:[%s14178_s20 + $0x1b0] sm:$0xff]  ;;  %v11274_v41 = vpack.c.bf16 %v7830_v31, %v7822_v63 }
0x31d3   :  { %11233 = vmatprep.subr.bf16.mxu1 %v11232_v22  ;;  %v7832_v22 = vld [vmem:[%s14178_s20 + $0x1f0] sm:$0xff] }
0x31d4   :  { %v11290_v5 = vpack.c.bf16 %v7832_v22, %v7824_v43 }
0x31d6   :  { %11235 = vmatpush1.bf16.msra.mxu1 %v11234_v14 }
0x31d7   :  { %11237 = vmatprep.subr.bf16.mxu1 %v11236_v3 }
0x31da   :  { %11239 = vmatpush1.bf16.msra.mxu1 %v11238_v39 }
0x31db   :  { %11241 = vmatprep.subr.bf16.mxu1 %v11240_v13 }
0x31de   :  { %11243 = vmatpush1.bf16.msra.mxu1 %v11242_v61 }
0x31df   :  { %11261 = vmatprep.subr.bf16.mxu1 %v11260_v7 }
0x32a4   :  { %v10327_v37 = vpop.f32.mrb[88].mxu1 }
0x32a5   :  { %v7761_v49 = vpop.f32.mrb[89].mxu1 }
0x32a6   :  { %8668 = vmatmul.mubr.msk.f32.vlgmr.msra.gmra.mrb[90].mxu1 %vm86_vm0, %v7761_v49  ;;  %8670 = vmatmul.mubr.msk.f32.vlgmr.msra.gmra.mrb[92].mxu0 %vm86_vm0, %v7761_v49 }
0x32a7   :  { %11263 = vmatpush1.bf16.msra.mxu1 %v11262_v6  ;;  %11279 = vmatpush1.bf16.msra.mxu0 %v11278_v0 }
0x32a8   :  { %7910 = vmatprep.mubr.f32.mxu1 %v14217_v20  ;;  %7987 = vmatprep.mubr.f32.mxu0 %v14217_v20 }
0x32a9   :  { %11265 = vmatprep.subr.bf16.mxu1 %v11264_v59  ;;  %11281 = vmatprep.subr.bf16.mxu0 %v11280_v42 }
0x32aa   :  { %8669 = vmatmul.mubr.msk.f32.gmra.mrb[92].mxu1 %vm86_vm0, %v10327_v37  ;;  %8671 = vmatmul.mubr.msk.f32.gmra.mrb[94].mxu0 %vm86_vm0, %v10327_v37 }
0x32ab   :  { %11267 = vmatpush1.bf16.msra.mxu1 %v11266_v24  ;;  %11283 = vmatpush1.bf16.msra.mxu0 %v11282_v35 }
0x32ac   :  { %11269 = vmatprep.subr.bf16.mxu1 %v11268_v9  ;;  %11285 = vmatprep.subr.bf16.mxu0 %v11284_v51 }
0x32ad   :  { %8058 = vmatprep.mubr.f32.mxu1 %v14217_v20  ;;  %8135 = vmatprep.mubr.f32.mxu0 %v14217_v20 }
0x32af   :  { %11271 = vmatpush1.bf16.msra.mxu1 %v11270_v23  ;;  %11287 = vmatpush1.bf16.msra.mxu0 %v11286_v28 }
0x32b0   :  { %11273 = vmatprep.subr.bf16.mxu1 %v11272_v18  ;;  %11289 = vmatprep.subr.bf16.mxu0 %v11288_v2 }
0x32b3   :  { %11275 = vmatpush1.bf16.msra.mxu1 %v11274_v41  ;;  %11291 = vmatpush1.bf16.msra.mxu0 %v11290_v5 }
0x32b6   :  { %8672 = vmatmul.mubr.msk.f32.vlgmr.msra.gmra.mrb[94].mxu1 %vm86_vm0, %v7761_v49  ;;  %8674 = vmatmul.mubr.msk.f32.vlgmr.msra.gmra.mrb[96].mxu0 %vm86_vm0, %v7761_v49 }
0x32b7   :  { %8064 = vmatprep.mubr.f32.mxu1 %v14217_v20  ;;  %8141 = vmatprep.mubr.f32.mxu0 %v14217_v20 }
0x32ba   :  { %8673 = vmatmul.mubr.msk.f32.gmra.mrb[96].mxu1 %vm86_vm0, %v10327_v37  ;;  %8675 = vmatmul.mubr.msk.f32.gmra.mrb[98].mxu0 %vm86_vm0, %v10327_v37 }
0x3379   :  { %v7906_v14 = vpop.f32.mrb[90].mxu1  ;;  %v7983_v3 = vpop.f32.mrb[92].mxu0 }
0x337a   :  { %v8148_v17 = vmul.f32 %v7906_v14, %v7906_v14  ;;  %v7908_v16 = vpop.f32.mrb[91].mxu1  ;;  %v7985_v1 = vpop.f32.mrb[93].mxu0  ;;  %v8150_v13 = vmul.f32 %v7983_v3, %v7983_v3 }
0x337b   :  { %v8149_v27 = vmul.f32 %v7908_v16, %v7908_v16  ;;  %v8151_v57 = vmul.f32 %v7985_v1, %v7985_v1 }
0x337d   :  { %v8164_v39 = vadd.f32 %v8149_v27, %v8148_v17  ;;  %v14113_v20 = vpop.f32.mrb[92].mxu1  ;;  %v14115_v56 = vpop.f32.mrb[94].mxu0 }
0x337e   :  { %v8156_v47 = vmul.f32 %v14113_v20, %v14113_v20  ;;  %v14119_v61 = vpop.f32.mrb[93].mxu1  ;;  %v14121_v21 = vpop.f32.mrb[95].mxu0  ;;  %v8158_v44 = vmul.f32 %v14115_v56, %v14115_v56 }
0x337f   :  { %v8165_v10 = vadd.f32 %v8164_v39, %v8150_v13  ;;  %v8157_v7 = vmul.f32 %v14119_v61, %v14119_v61  ;;  %v8159_v53 = vmul.f32 %v14121_v21, %v14121_v21 }
0x3381   :  { %v8166_v60 = vadd.f32 %v8165_v10, %v8151_v57  ;;  %v8173_v32 = vadd.f32 %v8157_v7, %v8156_v47 }
0x3383   :  { %v8174_v12 = vadd.f32 %v8173_v32, %v8158_v44 }
0x3385   :  { %v8175_v62 = vadd.f32 %v8174_v12, %v8159_v53 }
0x3389   :  { %v8060_v26 = vpop.f32.mrb[94].mxu1  ;;  %v8137_v45 = vpop.f32.mrb[96].mxu0 }
0x338a   :  { %v8152_v33 = vmul.f32 %v8060_v26, %v8060_v26  ;;  %v8062_v48 = vpop.f32.mrb[95].mxu1  ;;  %v8139_v6 = vpop.f32.mrb[97].mxu0  ;;  %v8154_v58 = vmul.f32 %v8137_v45, %v8137_v45 }
0x338b   :  { %v8153_v0 = vmul.f32 %v8062_v48, %v8062_v48  ;;  %v8155_v55 = vmul.f32 %v8139_v6, %v8139_v6 }
0x338c   :  { %v8167_v11 = vadd.f32 %v8166_v60, %v8152_v33 }
0x338d   :  { %v8066_v29 = vpop.f32.mrb[96].mxu1  ;;  %v8143_v37 = vpop.f32.mrb[98].mxu0 }
0x338e   :  { %v8168_v4 = vadd.f32 %v8167_v11, %v8153_v0  ;;  %v8160_v36 = vmul.f32 %v8066_v29, %v8066_v29  ;;  %v8068_v49 = vpop.f32.mrb[97].mxu1  ;;  %v8145_v59 = vpop.f32.mrb[99].mxu0  ;;  %v8162_v35 = vmul.f32 %v8143_v37, %v8143_v37 }
0x338f   :  { %v8161_v42 = vmul.f32 %v8068_v49, %v8068_v49  ;;  %v8163_v15 = vmul.f32 %v8145_v59, %v8145_v59 }
0x3390   :  { %v8169_v50 = vadd.f32 %v8168_v4, %v8154_v58  ;;  %v8176_v54 = vadd.f32 %v8175_v62, %v8160_v36 }
0x3392   :  { %v8170_v24 = vadd.f32 %v8169_v50, %v8155_v55  ;;  %v8177_v46 = vadd.f32 %v8176_v54, %v8161_v42 }
0x3394   :  { %v8178_v9 = vadd.f32 %v8177_v46, %v8162_v35  ;;  %8171 = vadd.xlane.f32.xlu0 %v8170_v24 }
0x3396   :  { %v8179_v51 = vadd.f32 %v8178_v9, %v8163_v15 }
0x3398   :  { %8180 = vadd.xlane.f32.xlu1 %v8179_v51 }
0x33aa   :  { %8209 = vperm.xlu0 %11306, %v8676_v40  }
0x3421   :  { %v8172_v34 = vpop.xlane.xlu0 %8171 }
0x3422   :  { %v8182_v8 = vadd.f32 1e-24, %v8172_v34 }
0x3424   :  { %11559 = vrsqrt.f32 %v8182_v8 }
0x3425   :  { %v8181_v38 = vpop.xlane.xlu1 %8180 }
0x3426   :  { %v8183_v52 = vadd.f32 1e-24, %v8181_v38 }
0x3428   :  { %11561 = vrsqrt.f32 %v8183_v52 }
0x3429   :  { %v8210_v23 = vpop.permute.xlu0 %8209 }
0x342e   :  { %v11560_v25 = vpop.eup %11559 }
0x342f   :  { %v8186_v28 = vmul.f32 %v11560_v25, %v7906_v14  ;;  %v8187_v63 = vmul.f32 %v11560_v25, %v7908_v16  ;;  %v8188_v18 = vmul.f32 %v11560_v25, %v7983_v3  ;;  %v8189_v2 = vmul.f32 %v11560_v25, %v7985_v1 }
0x3430   :  { %v8190_v31 = vmul.f32 %v11560_v25, %v8060_v26  ;;  %v8191_v43 = vmul.f32 %v11560_v25, %v8062_v48  ;;  %v8192_v22 = vmul.f32 %v11560_v25, %v8137_v45  ;;  %v8193_v41 = vmul.f32 %v11560_v25, %v8139_v6 }
0x3431   :  { %v8212_v5 = vmul.f32 %v8210_v23, %v8186_v28  ;;  %v8213_v19 = vmul.f32 %v8210_v23, %v8187_v63  ;;  %v8214_v30 = vmul.f32 %v8210_v23, %v8188_v18  ;;  %v8215_v17 = vmul.f32 %v8210_v23, %v8189_v2 }
0x3432   :  { %v11562_v27 = vpop.eup %11561  ;;  %v8216_v39 = vmul.f32 %v8210_v23, %v8190_v31  ;;  %v8217_v13 = vmul.f32 %v8210_v23, %v8191_v43  ;;  %v8218_v47 = vmul.f32 %v8210_v23, %v8192_v22  ;;  %v8219_v10 = vmul.f32 %v8210_v23, %v8193_v41 }
0x3433   :  { %v8194_v57 = vmul.f32 %v11562_v27, %v14113_v20  ;;  %v8195_v14 = vmul.f32 %v11562_v27, %v14119_v61  ;;  %v8196_v3 = vmul.f32 %v11562_v27, %v14115_v56  ;;  %v8197_v16 = vmul.f32 %v11562_v27, %v14121_v21 }
0x3434   :  { %v8198_v1 = vmul.f32 %v11562_v27, %v8066_v29  ;;  %v8199_v7 = vmul.f32 %v11562_v27, %v8068_v49  ;;  %v8200_v60 = vmul.f32 %v11562_v27, %v8143_v37  ;;  %v8201_v44 = vmul.f32 %v11562_v27, %v8145_v59 }
0x3435   :  { %v8220_v32 = vmul.f32 %v8210_v23, %v8194_v57  ;;  %v8221_v53 = vmul.f32 %v8210_v23, %v8195_v14  ;;  %v8222_v12 = vmul.f32 %v8210_v23, %v8196_v3  ;;  %v8223_v62 = vmul.f32 %v8210_v23, %v8197_v16 }
0x3436   :  { %v8224_v26 = vmul.f32 %v8210_v23, %v8198_v1  ;;  %v8225_v45 = vmul.f32 %v8210_v23, %v8199_v7  ;;  %v8226_v33 = vmul.f32 %v8210_v23, %v8200_v60  ;;  %v8227_v48 = vmul.f32 %v8210_v23, %v8201_v44 }
0x3437   :  { %v8685_v6 = vpack.c.bf16 %v8213_v19, %v8212_v5  ;;  %v8686_v20 = vpack.c.bf16 %v8215_v17, %v8214_v30  ;;  %v8687_v0 = vpack.c.bf16 %v8217_v13, %v8216_v39  ;;  %v8688_v61 = vpack.c.bf16 %v8219_v10, %v8218_v47 }
0x3438   :  { %v8689_v11 = vpack.c.bf16 %v8221_v53, %v8220_v32  ;;  %v8690_v56 = vpack.c.bf16 %v8223_v62, %v8222_v12  ;;  %v8691_v58 = vpack.c.bf16 %v8225_v45, %v8224_v26  ;;  %v8692_v21 = vpack.c.bf16 %v8227_v48, %v8226_v33 }
0x3439   :  { %8276 = vst [vmem:[%s14222_s22] sm:$0xff] %v8685_v6  ;;  %8277 = vst [vmem:[%s14222_s22 + $0x8] sm:$0xff] %v8686_v20 }
0x343a   :  { %8278 = vst [vmem:[%s14222_s22 + $0x10] sm:$0xff] %v8687_v0  ;;  %8279 = vst [vmem:[%s14222_s22 + $0x18] sm:$0xff] %v8688_v61 }
0x343b   :  { %8280 = vst [vmem:[%s14222_s22 + $0x20] sm:$0xff] %v8689_v11  ;;  %8281 = vst [vmem:[%s14222_s22 + $0x28] sm:$0xff] %v8690_v56 }
0x343c   :  { %8282 = vst [vmem:[%s14222_s22 + $0x30] sm:$0xff] %v8691_v58  ;;  %8283 = vst [vmem:[%s14222_s22 + $0x38] sm:$0xff] %v8692_v21 }

</bundles_post_ra>
